<compile_context>
chip_gen: v5e
topology: v5e:2x2
jax: 0.10.0
libtpu: 0.0.40
codegen_flags: <defaults>
</compile_context>

<pallas_src>
import functools

import jax
import jax.numpy as jnp
from jax.experimental import pallas as pl
from jax.experimental.pallas import tpu as pltpu

BN_EPS = 1e-5   # PyTorch BatchNorm1d default eps
LANES = 128     # TPU lane width; fused-head / noise / output slabs are this wide


def encoder_smm_kernel(
    x_ref,
    w1_ref, g1_ref, bt1_ref,
    w2_ref, g2_ref, bt2_ref,
    w3_ref, g3_ref, bt3_ref,
    wh_ref, bh_ref,
    noise_ref,
    out_ref,
    *, r, latent_dim,
):
    L = latent_dim
    W = out_ref.shape[1]  # = LANES

    def block(h_bf16, w_ref, g_ref, bt_ref):
        # Linear -> BatchNorm1d (training-mode batch stats) -> ReLU.
        # bf16 operands on the MXU, f32 accumulation & statistics.
        # Linear bias omitted (cancels exactly against the batch-mean
        # subtraction); BN affine folded into a single FMA.
        hp = jnp.dot(h_bf16, w_ref[...], preferred_element_type=jnp.float32)
        inv_b = 1.0 / hp.shape[0]
        s1 = jnp.sum(hp, axis=0, keepdims=True)
        s2 = jnp.sum(hp * hp, axis=0, keepdims=True)
        mean = s1 * inv_b
        var = s2 * inv_b - mean * mean
        scale = g_ref[...] * jax.lax.rsqrt(var + BN_EPS)
        shift = bt_ref[...] - mean * scale
        h = jnp.maximum(hp * scale + shift, 0.0)
        return h.astype(jnp.bfloat16)

    h = block(x_ref[...], w1_ref, g1_ref, bt1_ref)
    h = block(h, w2_ref, g2_ref, bt2_ref)
    h = block(h, w3_ref, g3_ref, bt3_ref)

    # Fused heads: one lane-dense bf16 matmul (f32 accumulate) + f32 bias.
    # head lanes: [ mu (0:L) | log_sigma (L:2L) | log_v (2L) | zero pad ].
    head = jnp.dot(h, wh_ref[...], preferred_element_type=jnp.float32) + bh_ref[...]

    # Noise slab lanes: [ std_z (0:L) | e (L:2L) | zero pad ].
    noise = noise_ref[...]
    std_z = noise                                   # valid in lanes 0:L
    e = pltpu.roll(noise, shift=W - L, axis=1)      # e -> lanes 0:L

    mu_full = head                                  # mu in lanes 0:L
    ls_full = pltpu.roll(head, shift=W - L, axis=1)  # log_sigma -> lanes 0:L
    log_v = head[:, 2 * L:2 * L + 1]                # (B, 1), broadcasts over lanes

    # Reparameterization (all f32, EUP-friendly rsqrt forms; r=9 guarantees
    # v >= 9 so 4.5v-3 > 0 and z1 > 0).  Garbage lanes (>= L) are masked below.
    v = jnp.exp(log_v) + r                          # (B, 1)
    sigma = jnp.exp(ls_full * 0.5)
    t = 1.0 + e * jax.lax.rsqrt(4.5 * v - 3.0)      # e / sqrt(9v/2 - 3)
    z1 = (0.5 * v - 1.0 / 3.0) * (t * t * t)
    z2 = jnp.sqrt(v) * jax.lax.rsqrt(2.0 * z1)      # sqrt(v / (2 z1))
    z_full = mu_full + sigma * z2 * std_z           # valid in lanes 0:L
    logpz_full = ls_full - jnp.log(z1)              # valid in lanes 0:L

    # Pack [ z | mu | logpz | 0 ] via XLU rolls + VPU selects (no concat temp).
    lane = jax.lax.broadcasted_iota(jnp.int32, head.shape, 1)
    mu_at_l = pltpu.roll(head, shift=L, axis=1)             # mu -> lanes L:2L
    logpz_at_2l = pltpu.roll(logpz_full, shift=2 * L, axis=1)  # logpz -> 2L:3L
    out = jnp.where(
        lane < L, z_full,
        jnp.where(lane < 2 * L, mu_at_l,
                  jnp.where(lane < 3 * L, logpz_at_2l, 0.0)))
    out_ref[...] = out


def prepare_params(params, latent_dim):
    """One-time (per parameter update) preparation, hoisted out of the forward:
    fuse the mu/con/v head weights+biases into one lane-dense (H3, 128)/(1, 128)
    slab (v-bias folded in) and cast all matmul weights to bf16."""
    H3, L = params["wmu"].shape
    assert 2 * L + 1 <= LANES and 3 * L <= LANES, "latent_dim too large for 128-lane packing"
    head_pad = LANES - (2 * L + 1)
    w_head = jnp.concatenate(
        [params["wmu"], params["wcon"], params["wv"].T,
         jnp.zeros((H3, head_pad), jnp.float32)], axis=1)
    b_head = jnp.concatenate(
        [params["bmu"], params["bcon"], params["bv"],
         jnp.zeros((1, head_pad), jnp.float32)], axis=1)
    return dict(
        w1=params["w1"].astype(jnp.bfloat16), g1=params["g1"], bt1=params["bt1"],
        w2=params["w2"].astype(jnp.bfloat16), g2=params["g2"], bt2=params["bt2"],
        w3=params["w3"].astype(jnp.bfloat16), g3=params["g3"], bt3=params["bt3"],
        w_head=w_head.astype(jnp.bfloat16), b_head=b_head,
    )


def encoder_smm_forward(x, prep, std_z, e, *, r, latent_dim):
    """One forward pass (one BN batch) in one pallas_call."""
    B = x.shape[0]
    L = latent_dim
    x2d = x.reshape(B, -1).astype(jnp.bfloat16)

    # Lane-dense noise slab: [ std_z | e | zero pad ] -> one unmasked DMA/load.
    noise = jnp.concatenate(
        [std_z.astype(jnp.float32), e.astype(jnp.float32),
         jnp.zeros((B, LANES - 2 * L), jnp.float32)], axis=1)

    inputs = (
        x2d,
        prep["w1"], prep["g1"], prep["bt1"],
        prep["w2"], prep["g2"], prep["bt2"],
        prep["w3"], prep["g3"], prep["bt3"],
        prep["w_head"], prep["b_head"],
        noise,
    )

    vmem_spec = pl.BlockSpec(memory_space=pltpu.MemorySpace.VMEM)
    packed = pl.pallas_call(
        functools.partial(encoder_smm_kernel, r=float(r), latent_dim=L),
        out_shape=jax.ShapeDtypeStruct((B, LANES), jnp.float32),
        in_specs=[vmem_spec] * len(inputs),
        out_specs=vmem_spec,
    )(*inputs)

    z = packed[:, 0:L]
    mu = packed[:, L:2 * L]
    logpz = packed[:, 2 * L:3 * L]
    return z, mu, logpz


def init_params(key, input_dim, inter_dims, latent_dim):
    """Deterministic synthetic parameter init (shapes match Encoder_SMM.__init__)."""
    dims = [input_dim] + list(inter_dims)
    ks = jax.random.split(key, 12)
    p = {}
    for i in range(3):
        fan_in, fan_out = dims[i], dims[i + 1]
        scale = 1.0 / jnp.sqrt(fan_in)
        p[f"w{i+1}"] = jax.random.uniform(ks[2 * i], (fan_in, fan_out), jnp.float32,
                                          -scale, scale)
        p[f"b{i+1}"] = jax.random.uniform(ks[2 * i + 1], (1, fan_out), jnp.float32,
                                          -scale, scale)
        p[f"g{i+1}"] = jnp.ones((1, fan_out), jnp.float32)     # BN weight
        p[f"bt{i+1}"] = jnp.zeros((1, fan_out), jnp.float32)   # BN bias
    h3 = dims[-1]
    scale = 1.0 / jnp.sqrt(h3)
    p["wmu"] = jax.random.uniform(ks[6], (h3, latent_dim), jnp.float32, -scale, scale)
    p["bmu"] = jax.random.uniform(ks[7], (1, latent_dim), jnp.float32, -scale, scale)
    p["wcon"] = jax.random.uniform(ks[8], (h3, latent_dim), jnp.float32, -scale, scale)
    p["bcon"] = jax.random.uniform(ks[9], (1, latent_dim), jnp.float32, -scale, scale)
    # self.v.weight.data.uniform_(0.01, 0.03); stored row-major as (1, h3).
    p["wv"] = jax.random.uniform(ks[10], (1, h3), jnp.float32, 0.01, 0.03)
    p["bv"] = jax.random.uniform(ks[11], (1, 1), jnp.float32, -scale, scale)
    return p


def reference_forward(x, params, std_z, e, *, r):
    """Pure-JAX f32 reference mirroring the PyTorch forward (training-mode BN)."""
    h = x.reshape(x.shape[0], -1).astype(jnp.float32)
    for i in range(1, 4):
        h = h @ params[f"w{i}"] + params[f"b{i}"]
        mean = jnp.mean(h, axis=0, keepdims=True)
        var = jnp.mean((h - mean) ** 2, axis=0, keepdims=True)
        h = (h - mean) / jnp.sqrt(var + BN_EPS)
        h = jnp.maximum(h * params[f"g{i}"] + params[f"bt{i}"], 0.0)
    mu = h @ params["wmu"] + params["bmu"]
    log_sigma = h @ params["wcon"] + params["bcon"]
    log_v = jnp.sum(h * params["wv"], axis=1, keepdims=True) + params["bv"]
    v = jnp.exp(log_v) + r
    sigma = jnp.exp(log_sigma * 0.5)
    z1 = (v / 2 - 1.0 / 3.0) * (1.0 + e / jnp.sqrt(9.0 * v / 2.0 - 3.0)) ** 3
    z2 = jnp.sqrt(v / (2.0 * z1))
    return mu + sigma * z2 * std_z, mu, log_sigma - jnp.log(z1)


if __name__ == "__main__":
    # Shapes consistent with the module (input_dim = 1*8*8 = 64).  Batch is 256
    # so the MXU sees full rows; the whole batch must live in one call anyway
    # because BatchNorm uses full-batch statistics.
    B = 256
    input_dim = 64
    inter_dims = [128, 128, 256]
    latent_dim = 16
    r = 9

    key = jax.random.PRNGKey(0)
    k_x, k_p, k_std, k_e = jax.random.split(key, 4)

    x = jax.random.normal(k_x, (B, 1, 8, 8), jnp.float32)  # NCHW, flattened in wrapper
    params = init_params(k_p, input_dim, inter_dims, latent_dim)
    # In PyTorch these come from numpy's host RNG inside forward(); here they
    # are deterministic jax.random samples passed into the kernel as inputs.
    std_z = jax.random.normal(k_std, (B, latent_dim), jnp.float32)
    e = jax.random.uniform(k_e, (B, latent_dim), jnp.float32, -1.0, 1.0)

    # Head-slab fusion + bf16 weight cast done once, outside the forward.
    prep = prepare_params(params, latent_dim)

    fwd = jax.jit(functools.partial(encoder_smm_forward, r=r, latent_dim=latent_dim))
    z, mu, logpz = jax.block_until_ready(fwd(x, prep, std_z, e))

    # Tolerance loosened vs the all-f32 version: the matmuls now run with bf16
    # operands (f32 accumulation), compounding to ~1e-2 worst-element error.
    z_ref, mu_ref, logpz_ref = reference_forward(x, params, std_z, e, r=r)
    assert jnp.allclose(z, z_ref, atol=5e-2, rtol=5e-2)
    assert jnp.allclose(mu, mu_ref, atol=5e-2, rtol=5e-2)
    assert jnp.allclose(logpz, logpz_ref, atol=5e-2, rtol=5e-2)

    print("KERNEL_OK")
</pallas_src>

<mosaic_0001>
module attributes {stable_mosaic.version = 11 : i64} {
  func.func @encoder_smm_kernel(%arg0: memref<256x64xbf16, #tpu.memory_space<vmem>>, %arg1: memref<64x128xbf16, #tpu.memory_space<vmem>>, %arg2: memref<1x128xf32, #tpu.memory_space<vmem>>, %arg3: memref<1x128xf32, #tpu.memory_space<vmem>>, %arg4: memref<128x128xbf16, #tpu.memory_space<vmem>>, %arg5: memref<1x128xf32, #tpu.memory_space<vmem>>, %arg6: memref<1x128xf32, #tpu.memory_space<vmem>>, %arg7: memref<128x256xbf16, #tpu.memory_space<vmem>>, %arg8: memref<1x256xf32, #tpu.memory_space<vmem>>, %arg9: memref<1x256xf32, #tpu.memory_space<vmem>>, %arg10: memref<256x128xbf16, #tpu.memory_space<vmem>>, %arg11: memref<1x128xf32, #tpu.memory_space<vmem>>, %arg12: memref<256x128xf32, #tpu.memory_space<vmem>>, %arg13: memref<256x128xf32, #tpu.memory_space<vmem>>) attributes {dimension_semantics = [], scalar_prefetch = 0 : i64, scratch_operands = 0 : i64, tpu.core_type = #tpu.core_type<tc>} {
    %c0 = arith.constant 0 : index
    %c0_0 = arith.constant 0 : index
    %0 = vector.load %arg0[%c0, %c0_0] : memref<256x64xbf16, #tpu.memory_space<vmem>>, vector<256x64xbf16>
    %c0_1 = arith.constant 0 : index
    %c0_2 = arith.constant 0 : index
    %1 = vector.load %arg1[%c0_1, %c0_2] : memref<64x128xbf16, #tpu.memory_space<vmem>>, vector<64x128xbf16>
    %cst = arith.constant dense<0.000000e+00> : vector<256x128xf32>
    %2 = tpu.matmul %0, %1, %cst {dimension_numbers = #tpu.dot_dimension_numbers<[1], [0], [0], [1], [0, 0, 1, 1], [], []>} : vector<256x64xbf16>, vector<64x128xbf16>, vector<256x128xf32> -> vector<256x128xf32>
    %cst_3 = arith.constant dense<0.000000e+00> : vector<128xf32>
    %3 = vector.multi_reduction <add>, %2, %cst_3 [0] : vector<256x128xf32> to vector<128xf32>
    %4 = vector.shape_cast %3 : vector<128xf32> to vector<1x128xf32>
    %5 = arith.mulf %2, %2 : vector<256x128xf32>
    %cst_4 = arith.constant dense<0.000000e+00> : vector<128xf32>
    %6 = vector.multi_reduction <add>, %5, %cst_4 [0] : vector<256x128xf32> to vector<128xf32>
    %7 = vector.shape_cast %6 : vector<128xf32> to vector<1x128xf32>
    %cst_5 = arith.constant 3.906250e-03 : f32
    %8 = vector.broadcast %cst_5 : f32 to vector<1x128xf32>
    %9 = arith.mulf %4, %8 : vector<1x128xf32>
    %cst_6 = arith.constant 3.906250e-03 : f32
    %10 = vector.broadcast %cst_6 : f32 to vector<1x128xf32>
    %11 = arith.mulf %7, %10 : vector<1x128xf32>
    %12 = arith.mulf %9, %9 : vector<1x128xf32>
    %13 = arith.subf %11, %12 : vector<1x128xf32>
    %c0_7 = arith.constant 0 : index
    %c0_8 = arith.constant 0 : index
    %14 = vector.load %arg2[%c0_7, %c0_8] : memref<1x128xf32, #tpu.memory_space<vmem>>, vector<1x128xf32>
    %cst_9 = arith.constant 9.99999974E-6 : f32
    %15 = vector.broadcast %cst_9 : f32 to vector<1x128xf32>
    %16 = arith.addf %13, %15 : vector<1x128xf32>
    %17 = math.rsqrt %16 : vector<1x128xf32>
    %18 = arith.mulf %14, %17 : vector<1x128xf32>
    %c0_10 = arith.constant 0 : index
    %c0_11 = arith.constant 0 : index
    %19 = vector.load %arg3[%c0_10, %c0_11] : memref<1x128xf32, #tpu.memory_space<vmem>>, vector<1x128xf32>
    %20 = arith.mulf %9, %18 : vector<1x128xf32>
    %21 = arith.subf %19, %20 : vector<1x128xf32>
    %22 = vector.broadcast %18 : vector<1x128xf32> to vector<256x128xf32>
    %23 = arith.mulf %2, %22 : vector<256x128xf32>
    %24 = vector.broadcast %21 : vector<1x128xf32> to vector<256x128xf32>
    %25 = arith.addf %23, %24 : vector<256x128xf32>
    %cst_12 = arith.constant 0.000000e+00 : f32
    %26 = vector.broadcast %cst_12 : f32 to vector<256x128xf32>
    %27 = arith.maximumf %25, %26 : vector<256x128xf32>
    %28 = arith.truncf %27 : vector<256x128xf32> to vector<256x128xbf16>
    %c0_13 = arith.constant 0 : index
    %c0_14 = arith.constant 0 : index
    %29 = vector.load %arg4[%c0_13, %c0_14] : memref<128x128xbf16, #tpu.memory_space<vmem>>, vector<128x128xbf16>
    %cst_15 = arith.constant dense<0.000000e+00> : vector<256x128xf32>
    %30 = tpu.matmul %28, %29, %cst_15 {dimension_numbers = #tpu.dot_dimension_numbers<[1], [0], [0], [1], [0, 0, 1, 1], [], []>} : vector<256x128xbf16>, vector<128x128xbf16>, vector<256x128xf32> -> vector<256x128xf32>
    %cst_16 = arith.constant dense<0.000000e+00> : vector<128xf32>
    %31 = vector.multi_reduction <add>, %30, %cst_16 [0] : vector<256x128xf32> to vector<128xf32>
    %32 = vector.shape_cast %31 : vector<128xf32> to vector<1x128xf32>
    %33 = arith.mulf %30, %30 : vector<256x128xf32>
    %cst_17 = arith.constant dense<0.000000e+00> : vector<128xf32>
    %34 = vector.multi_reduction <add>, %33, %cst_17 [0] : vector<256x128xf32> to vector<128xf32>
    %35 = vector.shape_cast %34 : vector<128xf32> to vector<1x128xf32>
    %cst_18 = arith.constant 3.906250e-03 : f32
    %36 = vector.broadcast %cst_18 : f32 to vector<1x128xf32>
    %37 = arith.mulf %32, %36 : vector<1x128xf32>
    %cst_19 = arith.constant 3.906250e-03 : f32
    %38 = vector.broadcast %cst_19 : f32 to vector<1x128xf32>
    %39 = arith.mulf %35, %38 : vector<1x128xf32>
    %40 = arith.mulf %37, %37 : vector<1x128xf32>
    %41 = arith.subf %39, %40 : vector<1x128xf32>
    %c0_20 = arith.constant 0 : index
    %c0_21 = arith.constant 0 : index
    %42 = vector.load %arg5[%c0_20, %c0_21] : memref<1x128xf32, #tpu.memory_space<vmem>>, vector<1x128xf32>
    %cst_22 = arith.constant 9.99999974E-6 : f32
    %43 = vector.broadcast %cst_22 : f32 to vector<1x128xf32>
    %44 = arith.addf %41, %43 : vector<1x128xf32>
    %45 = math.rsqrt %44 : vector<1x128xf32>
    %46 = arith.mulf %42, %45 : vector<1x128xf32>
    %c0_23 = arith.constant 0 : index
    %c0_24 = arith.constant 0 : index
    %47 = vector.load %arg6[%c0_23, %c0_24] : memref<1x128xf32, #tpu.memory_space<vmem>>, vector<1x128xf32>
    %48 = arith.mulf %37, %46 : vector<1x128xf32>
    %49 = arith.subf %47, %48 : vector<1x128xf32>
    %50 = vector.broadcast %46 : vector<1x128xf32> to vector<256x128xf32>
    %51 = arith.mulf %30, %50 : vector<256x128xf32>
    %52 = vector.broadcast %49 : vector<1x128xf32> to vector<256x128xf32>
    %53 = arith.addf %51, %52 : vector<256x128xf32>
    %cst_25 = arith.constant 0.000000e+00 : f32
    %54 = vector.broadcast %cst_25 : f32 to vector<256x128xf32>
    %55 = arith.maximumf %53, %54 : vector<256x128xf32>
    %56 = arith.truncf %55 : vector<256x128xf32> to vector<256x128xbf16>
    %c0_26 = arith.constant 0 : index
    %c0_27 = arith.constant 0 : index
    %57 = vector.load %arg7[%c0_26, %c0_27] : memref<128x256xbf16, #tpu.memory_space<vmem>>, vector<128x256xbf16>
    %cst_28 = arith.constant dense<0.000000e+00> : vector<256x256xf32>
    %58 = tpu.matmul %56, %57, %cst_28 {dimension_numbers = #tpu.dot_dimension_numbers<[1], [0], [0], [1], [0, 0, 1, 1], [], []>} : vector<256x128xbf16>, vector<128x256xbf16>, vector<256x256xf32> -> vector<256x256xf32>
    %cst_29 = arith.constant dense<0.000000e+00> : vector<256xf32>
    %59 = vector.multi_reduction <add>, %58, %cst_29 [0] : vector<256x256xf32> to vector<256xf32>
    %60 = vector.shape_cast %59 : vector<256xf32> to vector<1x256xf32>
    %61 = arith.mulf %58, %58 : vector<256x256xf32>
    %cst_30 = arith.constant dense<0.000000e+00> : vector<256xf32>
    %62 = vector.multi_reduction <add>, %61, %cst_30 [0] : vector<256x256xf32> to vector<256xf32>
    %63 = vector.shape_cast %62 : vector<256xf32> to vector<1x256xf32>
    %cst_31 = arith.constant 3.906250e-03 : f32
    %64 = vector.broadcast %cst_31 : f32 to vector<1x256xf32>
    %65 = arith.mulf %60, %64 : vector<1x256xf32>
    %cst_32 = arith.constant 3.906250e-03 : f32
    %66 = vector.broadcast %cst_32 : f32 to vector<1x256xf32>
    %67 = arith.mulf %63, %66 : vector<1x256xf32>
    %68 = arith.mulf %65, %65 : vector<1x256xf32>
    %69 = arith.subf %67, %68 : vector<1x256xf32>
    %c0_33 = arith.constant 0 : index
    %c0_34 = arith.constant 0 : index
    %70 = vector.load %arg8[%c0_33, %c0_34] : memref<1x256xf32, #tpu.memory_space<vmem>>, vector<1x256xf32>
    %cst_35 = arith.constant 9.99999974E-6 : f32
    %71 = vector.broadcast %cst_35 : f32 to vector<1x256xf32>
    %72 = arith.addf %69, %71 : vector<1x256xf32>
    %73 = math.rsqrt %72 : vector<1x256xf32>
    %74 = arith.mulf %70, %73 : vector<1x256xf32>
    %c0_36 = arith.constant 0 : index
    %c0_37 = arith.constant 0 : index
    %75 = vector.load %arg9[%c0_36, %c0_37] : memref<1x256xf32, #tpu.memory_space<vmem>>, vector<1x256xf32>
    %76 = arith.mulf %65, %74 : vector<1x256xf32>
    %77 = arith.subf %75, %76 : vector<1x256xf32>
    %78 = vector.broadcast %74 : vector<1x256xf32> to vector<256x256xf32>
    %79 = arith.mulf %58, %78 : vector<256x256xf32>
    %80 = vector.broadcast %77 : vector<1x256xf32> to vector<256x256xf32>
    %81 = arith.addf %79, %80 : vector<256x256xf32>
    %cst_38 = arith.constant 0.000000e+00 : f32
    %82 = vector.broadcast %cst_38 : f32 to vector<256x256xf32>
    %83 = arith.maximumf %81, %82 : vector<256x256xf32>
    %84 = arith.truncf %83 : vector<256x256xf32> to vector<256x256xbf16>
    %c0_39 = arith.constant 0 : index
    %c0_40 = arith.constant 0 : index
    %85 = vector.load %arg10[%c0_39, %c0_40] : memref<256x128xbf16, #tpu.memory_space<vmem>>, vector<256x128xbf16>
    %cst_41 = arith.constant dense<0.000000e+00> : vector<256x128xf32>
    %86 = tpu.matmul %84, %85, %cst_41 {dimension_numbers = #tpu.dot_dimension_numbers<[1], [0], [0], [1], [0, 0, 1, 1], [], []>} : vector<256x256xbf16>, vector<256x128xbf16>, vector<256x128xf32> -> vector<256x128xf32>
    %c0_42 = arith.constant 0 : index
    %c0_43 = arith.constant 0 : index
    %87 = vector.load %arg11[%c0_42, %c0_43] : memref<1x128xf32, #tpu.memory_space<vmem>>, vector<1x128xf32>
    %88 = vector.broadcast %87 : vector<1x128xf32> to vector<256x128xf32>
    %89 = arith.addf %86, %88 : vector<256x128xf32>
    %c0_44 = arith.constant 0 : index
    %c0_45 = arith.constant 0 : index
    %90 = vector.load %arg12[%c0_44, %c0_45] : memref<256x128xf32, #tpu.memory_space<vmem>>, vector<256x128xf32>
    %c112_i32 = arith.constant 112 : i32
    %91 = tpu.dynamic_rotate %90 by %c112_i32 dim 1 : vector<256x128xf32>, i32 -> vector<256x128xf32>
    %c112_i32_46 = arith.constant 112 : i32
    %92 = tpu.dynamic_rotate %89 by %c112_i32_46 dim 1 : vector<256x128xf32>, i32 -> vector<256x128xf32>
    %93 = vector.extract_strided_slice %89 {offsets = [0, 32], sizes = [256, 1], strides = [1, 1]} : vector<256x128xf32> to vector<256x1xf32>
    %94 = math.exp %93 : vector<256x1xf32>
    %cst_47 = arith.constant 9.000000e+00 : f32
    %95 = vector.broadcast %cst_47 : f32 to vector<256x1xf32>
    %96 = arith.addf %94, %95 : vector<256x1xf32>
    %cst_48 = arith.constant 5.000000e-01 : f32
    %97 = vector.broadcast %cst_48 : f32 to vector<256x128xf32>
    %98 = arith.mulf %92, %97 : vector<256x128xf32>
    %99 = math.exp %98 : vector<256x128xf32>
    %cst_49 = arith.constant 4.500000e+00 : f32
    %100 = vector.broadcast %cst_49 : f32 to vector<256x1xf32>
    %101 = arith.mulf %100, %96 : vector<256x1xf32>
    %cst_50 = arith.constant 3.000000e+00 : f32
    %102 = vector.broadcast %cst_50 : f32 to vector<256x1xf32>
    %103 = arith.subf %101, %102 : vector<256x1xf32>
    %104 = math.rsqrt %103 : vector<256x1xf32>
    %105 = vector.broadcast %104 : vector<256x1xf32> to vector<256x128xf32>
    %106 = arith.mulf %91, %105 : vector<256x128xf32>
    %cst_51 = arith.constant 1.000000e+00 : f32
    %107 = vector.broadcast %cst_51 : f32 to vector<256x128xf32>
    %108 = arith.addf %107, %106 : vector<256x128xf32>
    %cst_52 = arith.constant 5.000000e-01 : f32
    %109 = vector.broadcast %cst_52 : f32 to vector<256x1xf32>
    %110 = arith.mulf %109, %96 : vector<256x1xf32>
    %cst_53 = arith.constant 0.333333343 : f32
    %111 = vector.broadcast %cst_53 : f32 to vector<256x1xf32>
    %112 = arith.subf %110, %111 : vector<256x1xf32>
    %113 = arith.mulf %108, %108 : vector<256x128xf32>
    %114 = arith.mulf %113, %108 : vector<256x128xf32>
    %115 = vector.broadcast %112 : vector<256x1xf32> to vector<256x128xf32>
    %116 = arith.mulf %115, %114 : vector<256x128xf32>
    %117 = math.sqrt %96 : vector<256x1xf32>
    %cst_54 = arith.constant 2.000000e+00 : f32
    %118 = vector.broadcast %cst_54 : f32 to vector<256x128xf32>
    %119 = arith.mulf %118, %116 : vector<256x128xf32>
    %120 = math.rsqrt %119 : vector<256x128xf32>
    %121 = vector.broadcast %117 : vector<256x1xf32> to vector<256x128xf32>
    %122 = arith.mulf %121, %120 : vector<256x128xf32>
    %123 = arith.mulf %99, %122 : vector<256x128xf32>
    %124 = arith.mulf %123, %90 : vector<256x128xf32>
    %125 = arith.addf %89, %124 : vector<256x128xf32>
    %126 = math.log %116 : vector<256x128xf32>
    %127 = arith.subf %92, %126 : vector<256x128xf32>
    %128 = tpu.iota {dimensions = array<i32: 1>} : vector<256x128xi32>
    %c16_i32 = arith.constant 16 : i32
    %129 = tpu.dynamic_rotate %89 by %c16_i32 dim 1 : vector<256x128xf32>, i32 -> vector<256x128xf32>
    %c32_i32 = arith.constant 32 : i32
    %130 = tpu.dynamic_rotate %127 by %c32_i32 dim 1 : vector<256x128xf32>, i32 -> vector<256x128xf32>
    %c16_i32_55 = arith.constant 16 : i32
    %131 = vector.broadcast %c16_i32_55 : i32 to vector<256x128xi32>
    %132 = arith.cmpi slt, %128, %131 : vector<256x128xi32>
    %c32_i32_56 = arith.constant 32 : i32
    %133 = vector.broadcast %c32_i32_56 : i32 to vector<256x128xi32>
    %134 = arith.cmpi slt, %128, %133 : vector<256x128xi32>
    %c48_i32 = arith.constant 48 : i32
    %135 = vector.broadcast %c48_i32 : i32 to vector<256x128xi32>
    %136 = arith.cmpi slt, %128, %135 : vector<256x128xi32>
    %cst_57 = arith.constant 0.000000e+00 : f32
    %137 = vector.broadcast %cst_57 : f32 to vector<256x128xf32>
    %138 = arith.select %136, %130, %137 : vector<256x128xi1>, vector<256x128xf32>
    %139 = arith.select %134, %129, %138 : vector<256x128xi1>, vector<256x128xf32>
    %140 = arith.select %132, %125, %139 : vector<256x128xi1>, vector<256x128xf32>
    %c0_58 = arith.constant 0 : index
    %c0_59 = arith.constant 0 : index
    %141 = vector.load %arg13[%c0_58, %c0_59] : memref<256x128xf32, #tpu.memory_space<vmem>>, vector<256x128xf32>
    tpu.vector_store %arg13[%c0_58, %c0_59], %140 {strides = array<i32>} : memref<256x128xf32, #tpu.memory_space<vmem>>, vector<256x128xf32>,
    return
  }
}

</mosaic_0001>

<bundles_post_ra>
// kernel: encoder_smm_forward.1
= control target key start
LH: loop header
LB: loop body
LE: loop exit
PB: predicated region body
PF: predicated region fallthrough
CT: control target
= control target key end

     0   :  { %vm189_vm0 = vcmask 523264   ;;  %vm1488_vm12 = vcmask 1040384   ;;  %s5538_s28 = smov 16   ;;  %s10226_s1 = inlined_call_operand.vmem [shape: bf16[64,128], index: 1, kind: input, shape index: {}]   ;;  %s10227_s0 = inlined_call_operand.vmem [shape: bf16[256,64], index: 0, kind: input, shape index: {}]   ;;  %s10228_s4 = inlined_call_operand.vmem [shape: bf16[128,128], index: 4, kind: input, shape index: {}]   ;;  %s10229_s2 = inlined_call_operand.vmem [shape: f32[1,128], index: 2, kind: input, shape index: {}]   ;;  %s10230_s3 = inlined_call_operand.vmem [shape: f32[1,128], index: 3, kind: input, shape index: {}]   ;;  %s10231_s7 = inlined_call_operand.vmem [shape: bf16[128,256], index: 7, kind: input, shape index: {}]   ;;  %s10232_s5 = inlined_call_operand.vmem [shape: f32[1,128], index: 5, kind: input, shape index: {}]   ;;  %s10233_s6 = inlined_call_operand.vmem [shape: f32[1,128], index: 6, kind: input, shape index: {}]   ;;  %s10234_s10 = inlined_call_operand.vmem [shape: bf16[256,128], index: 10, kind: input, shape index: {}]   ;;  %s10235_s8 = inlined_call_operand.vmem [shape: f32[1,256], index: 8, kind: input, shape index: {}]   ;;  %s10236_s9 = inlined_call_operand.vmem [shape: f32[1,256], index: 9, kind: input, shape index: {}]   ;;  %s10237_s11 = inlined_call_operand.vmem [shape: f32[1,128], index: 11, kind: input, shape index: {}]   ;;  %s10238_s12 = inlined_call_operand.vmem [shape: f32[256,128], index: 12, kind: input, shape index: {}]   ;;  %s10239_s13 = inlined_call_operand.vmem [shape: f32[256,128], index: 13, kind: output, shape index: {}]  }
   0x1   :  { %v5049_v0 = vld [vmem:[%s10226_s1 + $0x18] sm:$0xff]  ;;  %v5048_v1 = vld [vmem:[%s10226_s1 + $0x10] sm:$0xff]  ;;  %v5047_v2 = vld [vmem:[%s10226_s1 + $0x8] sm:$0xff] }
   0x2   :  { %242 = vmatpush.bf16.msra.mxu0 %v5049_v0  ;;  %5090 = vmatpush.bf16.msra.mxu3 %v5049_v0  ;;  %v5046_v3 = vld [vmem:[%s10226_s1] sm:$0xff]  ;;  %v5039_v5 = vld [vmem:[%s10227_s0 + $0x48] sm:$0xff]  ;;  %v5040_v7 = vld [vmem:[%s10227_s0 + $0x50] sm:$0xff]  ;;  %s5536_s1 = smov 112  }
   0x3   :  { %v5030_v4 = vld [vmem:[%s10227_s0] sm:$0xff]  ;;  %v5031_v6 = vld [vmem:[%s10227_s0 + $0x8] sm:$0xff]  ;;  %v5032_v8 = vld [vmem:[%s10227_s0 + $0x10] sm:$0xff] }
   0x4   :  { %v5041_v9 = vld [vmem:[%s10227_s0 + $0x58] sm:$0xff]  ;;  %v5042_v11 = vld [vmem:[%s10227_s0 + $0x60] sm:$0xff]  ;;  %v5043_v13 = vld [vmem:[%s10227_s0 + $0x68] sm:$0xff] }
   0x5   :  { %v5033_v10 = vld [vmem:[%s10227_s0 + $0x18] sm:$0xff]  ;;  %v5034_v12 = vld [vmem:[%s10227_s0 + $0x20] sm:$0xff]  ;;  %v5035_v14 = vld [vmem:[%s10227_s0 + $0x28] sm:$0xff] }
   0x6   :  { %243 = vmatpush.bf16.msra.mxu0 %v5048_v1  ;;  %5091 = vmatpush.bf16.msra.mxu3 %v5048_v1  ;;  %v5036_v15 = vld [vmem:[%s10227_s0 + $0x30] sm:$0xff]  ;;  %v5037_v17 = vld [vmem:[%s10227_s0 + $0x38] sm:$0xff]  ;;  %v5038_v19 = vld [vmem:[%s10227_s0 + $0x40] sm:$0xff] }
   0x7   :  { %v5044_v16 = vld [vmem:[%s10227_s0 + $0x70] sm:$0xff]  ;;  %v5045_v18 = vld [vmem:[%s10227_s0 + $0x78] sm:$0xff] }
   0xa   :  { %244 = vmatpush.bf16.msra.mxu0 %v5047_v2  ;;  %5092 = vmatpush.bf16.msra.mxu3 %v5047_v2 }
   0xe   :  { %245 = vmatpush.bf16.msra.mxu0 %v5046_v3  ;;  %5093 = vmatpush.bf16.msra.mxu3 %v5046_v3 }
  0x11   :  { %4790 = vmatmul.msk.bf16.vlgmr.msra.gmra.mxu0 %vm189_vm0, %v5030_v4  ;;  %4799 = vmatmul.msk.bf16.vlgmr.msra.gmra.mxu3 %vm189_vm0, %v5039_v5 }
  0x21   :  { %4791 = vmatmul.msk.bf16.gmra.mxu0 %vm189_vm0, %v5031_v6  ;;  %4800 = vmatmul.msk.bf16.gmra.mxu3 %vm189_vm0, %v5040_v7 }
  0x31   :  { %4792 = vmatmul.msk.bf16.gmra.mxu0 %vm189_vm0, %v5032_v8  ;;  %4801 = vmatmul.msk.bf16.gmra.mxu3 %vm189_vm0, %v5041_v9 }
  0x41   :  { %4793 = vmatmul.msk.bf16.gmra.mxu0 %vm189_vm0, %v5033_v10  ;;  %4802 = vmatmul.msk.bf16.gmra.mxu3 %vm189_vm0, %v5042_v11 }
  0x51   :  { %4794 = vmatmul.msk.bf16.gmra.mxu0 %vm189_vm0, %v5034_v12  ;;  %4803 = vmatmul.msk.bf16.gmra.mxu3 %vm189_vm0, %v5043_v13 }
  0x61   :  { %4795 = vmatmul.msk.bf16.gmra.mxu0 %vm189_vm0, %v5035_v14  ;;  %4804 = vmatmul.msk.bf16.gmra.mxu3 %vm189_vm0, %v5044_v16 }
  0x71   :  { %4796 = vmatmul.msk.bf16.gmra.mxu0 %vm189_vm0, %v5036_v15  ;;  %4805 = vmatmul.msk.bf16.gmra.mxu3 %vm189_vm0, %v5045_v18 }
  0x81   :  { %4797 = vmatmul.msk.bf16.gmra.mxu0 %vm189_vm0, %v5037_v17 }
  0x8e   :  { %v5685_v20 = vpop.f32.mrf.mxu0 }
  0x8f   :  { %v364_v43 = vmul.f32 %v5685_v20, %v5685_v20 }
  0x91   :  { %4798 = vmatmul.msk.bf16.gmra.mxu0 %vm189_vm0, %v5038_v19 }
  0x94   :  { %v5696_v25 = vpop.f32.mrf.mxu3 }
  0x96   :  { %v5688_v21 = vpop.f32.mrf.mxu0 }
  0x97   :  { %v365_v41 = vmul.f32 %v5688_v21, %v5688_v21  ;;  %v327_v44 = vadd.f32 %v5688_v21, %v5685_v20 }
  0x99   :  { %v396_v47 = vadd.f32 %v365_v41, %v364_v43 }
  0x9c   :  { %v5700_v27 = vpop.f32.mrf.mxu3 }
  0x9e   :  { %v5690_v22 = vpop.f32.mrf.mxu0 }
  0x9f   :  { %v366_v45 = vmul.f32 %v5690_v22, %v5690_v22  ;;  %v328_v46 = vadd.f32 %v327_v44, %v5690_v22 }
  0xa1   :  { %v397_v49 = vadd.f32 %v396_v47, %v366_v45 }
  0xa4   :  { %v5704_v29 = vpop.f32.mrf.mxu3 }
  0xa6   :  { %v5692_v23 = vpop.f32.mrf.mxu0 }
  0xa7   :  { %v367_v48 = vmul.f32 %v5692_v23, %v5692_v23  ;;  %v329_v50 = vadd.f32 %v328_v46, %v5692_v23 }
  0xa9   :  { %v398_v53 = vadd.f32 %v397_v49, %v367_v48 }
  0xac   :  { %v5708_v31 = vpop.f32.mrf.mxu3 }
  0xae   :  { %v5694_v24 = vpop.f32.mrf.mxu0 }
  0xaf   :  { %v368_v51 = vmul.f32 %v5694_v24, %v5694_v24  ;;  %v330_v52 = vadd.f32 %v329_v50, %v5694_v24 }
  0xb1   :  { %v399_v57 = vadd.f32 %v398_v53, %v368_v51 }
  0xb4   :  { %v5714_v34 = vpop.f32.mrf.mxu3 }
  0xb6   :  { %v5698_v26 = vpop.f32.mrf.mxu0 }
  0xb7   :  { %v369_v54 = vmul.f32 %v5698_v26, %v5698_v26  ;;  %v331_v58 = vadd.f32 %v330_v52, %v5698_v26 }
  0xb9   :  { %v400_v61 = vadd.f32 %v399_v57, %v369_v54 }
  0xbc   :  { %v5718_v36 = vpop.f32.mrf.mxu3 }
  0xbe   :  { %v5702_v28 = vpop.f32.mrf.mxu0 }
  0xbf   :  { %v370_v59 = vmul.f32 %v5702_v28, %v5702_v28  ;;  %v332_v60 = vadd.f32 %v331_v58, %v5702_v28 }
  0xc1   :  { %v401_v63 = vadd.f32 %v400_v61, %v370_v59 }
  0xc4   :  { %v5722_v38 = vpop.f32.mrf.mxu3 }
  0xc6   :  { %v5706_v30 = vpop.f32.mrf.mxu0 }
  0xc7   :  { %v371_v62 = vmul.f32 %v5706_v30, %v5706_v30  ;;  %v333_v0 = vadd.f32 %v332_v60, %v5706_v30  ;;  %v382_v60 = vmul.f32 %v5696_v25, %v5696_v25 }
  0xc9   :  { %v402_v3 = vadd.f32 %v401_v63, %v371_v62  ;;  %v383_v63 = vmul.f32 %v5700_v27, %v5700_v27 }
  0xcc   :  { %v5726_v40 = vpop.f32.mrf.mxu3 }
  0xce   :  { %v5710_v32 = vpop.f32.mrf.mxu0 }
  0xcf   :  { %v372_v1 = vmul.f32 %v5710_v32, %v5710_v32  ;;  %v334_v2 = vadd.f32 %v333_v0, %v5710_v32 }
  0xd1   :  { %v403_v6 = vadd.f32 %v402_v3, %v372_v1  ;;  %v384_v3 = vmul.f32 %v5704_v29, %v5704_v29 }
  0xd4   :  { %v5749_v56 = vpop.f32.mrf.mxu3 }
  0xd6   :  { %v5712_v33 = vpop.f32.mrf.mxu0 }
  0xd7   :  { %v373_v4 = vmul.f32 %v5712_v33, %v5712_v33  ;;  %v335_v7 = vadd.f32 %v334_v2, %v5712_v33 }
  0xd9   :  { %v404_v11 = vadd.f32 %v403_v6, %v373_v4 }
  0xdc   :  { %v5768_v9 = vpop.f32.mrf.mxu3 }
  0xde   :  { %v5716_v35 = vpop.f32.mrf.mxu0 }
  0xdf   :  { %v374_v8 = vmul.f32 %v5716_v35, %v5716_v35  ;;  %v336_v10 = vadd.f32 %v335_v7, %v5716_v35  ;;  %v385_v7 = vmul.f32 %v5708_v31, %v5708_v31 }
  0xe1   :  { %v405_v13 = vadd.f32 %v404_v11, %v374_v8  ;;  %v386_v11 = vmul.f32 %v5714_v34, %v5714_v34 }
  0xe4   :  { %v5787_v48 = vpop.f32.mrf.mxu3 }
  0xe6   :  { %v5720_v37 = vpop.f32.mrf.mxu0 }
  0xe7   :  { %v375_v12 = vmul.f32 %v5720_v37, %v5720_v37  ;;  %v337_v14 = vadd.f32 %v336_v10, %v5720_v37 }
  0xe9   :  { %v406_v17 = vadd.f32 %v405_v13, %v375_v12 }
  0xec   :  { %v5804_v2 = vpop.f32.mrf.mxu3 }
  0xee   :  { %v5724_v39 = vpop.f32.mrf.mxu0 }
  0xef   :  { %v376_v15 = vmul.f32 %v5724_v39, %v5724_v39  ;;  %v338_v16 = vadd.f32 %v337_v14, %v5724_v39  ;;  %v387_v14 = vmul.f32 %v5718_v36, %v5718_v36 }
  0xf1   :  { %v407_v41 = vadd.f32 %v406_v17, %v376_v15  ;;  %v388_v17 = vmul.f32 %v5722_v38, %v5722_v38 }
  0xf6   :  { %v5730_v42 = vpop.f32.mrf.mxu0 }
  0xf7   :  { %v377_v18 = vmul.f32 %v5730_v42, %v5730_v42  ;;  %v339_v43 = vadd.f32 %v338_v16, %v5730_v42 }
  0xf9   :  { %v408_v46 = vadd.f32 %v407_v41, %v377_v18 }
  0xfe   :  { %v5747_v55 = vpop.f32.mrf.mxu0 }
  0xff   :  { %v378_v44 = vmul.f32 %v5747_v55, %v5747_v55  ;;  %v340_v45 = vadd.f32 %v339_v43, %v5747_v55  ;;  %v5821_v43 = vpop.f32.mrf.mxu3 }
 0x101   :  { %v409_v49 = vadd.f32 %v408_v46, %v378_v44  ;;  %v389_v44 = vmul.f32 %v5726_v40, %v5726_v40 }
 0x106   :  { %v5763_v5 = vpop.f32.mrf.mxu0 }
 0x107   :  { %v379_v47 = vmul.f32 %v5763_v5, %v5763_v5  ;;  %v341_v50 = vadd.f32 %v340_v45, %v5763_v5 }
 0x109   :  { %v410_v53 = vadd.f32 %v409_v49, %v379_v47  ;;  %v390_v47 = vmul.f32 %v5749_v56, %v5749_v56 }
 0x10e   :  { %v5779_v19 = vpop.f32.mrf.mxu0 }
 0x10f   :  { %v380_v51 = vmul.f32 %v5779_v19, %v5779_v19  ;;  %v342_v52 = vadd.f32 %v341_v50, %v5779_v19 }
 0x111   :  { %v411_v57 = vadd.f32 %v410_v53, %v380_v51  ;;  %v391_v51 = vmul.f32 %v5768_v9, %v5768_v9 }
 0x116   :  { %v5793_v54 = vpop.f32.mrf.mxu0 }
 0x117   :  { %v343_v58 = vadd.f32 %v342_v52, %v5793_v54  ;;  %v381_v59 = vmul.f32 %v5793_v54, %v5793_v54 }
 0x119   :  { %v344_v61 = vadd.f32 %v343_v58, %v5696_v25  ;;  %v412_v62 = vadd.f32 %v411_v57, %v381_v59  ;;  %v392_v57 = vmul.f32 %v5787_v48, %v5787_v48 }
 0x11b   :  { %v345_v0 = vadd.f32 %v344_v61, %v5700_v27  ;;  %v413_v1 = vadd.f32 %v412_v62, %v382_v60  ;;  %v393_v60 = vmul.f32 %v5804_v2, %v5804_v2 }
 0x11d   :  { %v346_v4 = vadd.f32 %v345_v0, %v5704_v29  ;;  %v414_v6 = vadd.f32 %v413_v1, %v383_v63  ;;  %v5838_v63 = vpop.f32.mrf.mxu3  ;;  %v5057_v0 = vld [vmem:[%s10228_s4 + $0x38] sm:$0xff] }
 0x11e   :  { %635 = vmatpush.bf16.msra.mxu1 %v5057_v0  ;;  %5094 = vmatpush.bf16.msra.mxu2 %v5057_v0 }
 0x11f   :  { %v347_v8 = vadd.f32 %v346_v4, %v5708_v31  ;;  %v415_v10 = vadd.f32 %v414_v6, %v384_v3  ;;  %v394_v3 = vmul.f32 %v5821_v43, %v5821_v43 }
 0x121   :  { %v348_v12 = vadd.f32 %v347_v8, %v5714_v34  ;;  %v416_v13 = vadd.f32 %v415_v10, %v385_v7  ;;  %v395_v8 = vmul.f32 %v5838_v63, %v5838_v63  ;;  %v5056_v10 = vld [vmem:[%s10228_s4 + $0x30] sm:$0xff] }
 0x122   :  { %636 = vmatpush.bf16.msra.mxu1 %v5056_v10  ;;  %5095 = vmatpush.bf16.msra.mxu2 %v5056_v10 }
 0x123   :  { %v417_v15 = vadd.f32 %v416_v13, %v386_v11  ;;  %v349_v16 = vadd.f32 %v348_v12, %v5718_v36 }
 0x125   :  { %v350_v18 = vadd.f32 %v349_v16, %v5722_v38  ;;  %v418_v41 = vadd.f32 %v417_v15, %v387_v14  ;;  %v5055_v15 = vld [vmem:[%s10228_s4 + $0x28] sm:$0xff] }
 0x126   :  { %637 = vmatpush.bf16.msra.mxu1 %v5055_v15  ;;  %5096 = vmatpush.bf16.msra.mxu2 %v5055_v15 }
 0x127   :  { %v351_v45 = vadd.f32 %v350_v18, %v5726_v40  ;;  %v419_v46 = vadd.f32 %v418_v41, %v388_v17 }
 0x129   :  { %v352_v49 = vadd.f32 %v351_v45, %v5749_v56  ;;  %v420_v50 = vadd.f32 %v419_v46, %v389_v44  ;;  %v5054_v44 = vld [vmem:[%s10228_s4 + $0x20] sm:$0xff] }
 0x12a   :  { %638 = vmatpush.bf16.msra.mxu1 %v5054_v44  ;;  %5097 = vmatpush.bf16.msra.mxu2 %v5054_v44 }
 0x12b   :  { %v353_v52 = vadd.f32 %v352_v49, %v5768_v9  ;;  %v421_v53 = vadd.f32 %v420_v50, %v390_v47  ;;  %v5053_v50 = vld [vmem:[%s10228_s4 + $0x18] sm:$0xff] }
 0x12d   :  { %v354_v58 = vadd.f32 %v353_v52, %v5787_v48  ;;  %v422_v59 = vadd.f32 %v421_v53, %v391_v51 }
 0x12e   :  { %639 = vmatpush.bf16.msra.mxu1 %v5053_v50  ;;  %5098 = vmatpush.bf16.msra.mxu2 %v5053_v50 }
 0x12f   :  { %v355_v61 = vadd.f32 %v354_v58, %v5804_v2  ;;  %v423_v62 = vadd.f32 %v422_v59, %v392_v57  ;;  %v5052_v58 = vld [vmem:[%s10228_s4 + $0x10] sm:$0xff] }
 0x131   :  { %v356_v1 = vadd.f32 %v355_v61, %v5821_v43  ;;  %v424_v4 = vadd.f32 %v423_v62, %v393_v60  ;;  %v5051_v61 = vld [vmem:[%s10228_s4 + $0x8] sm:$0xff]  ;;  %v5050_v62 = vld [vmem:[%s10228_s4] sm:$0xff] }
 0x132   :  { %640 = vmatpush.bf16.msra.mxu1 %v5052_v58  ;;  %5099 = vmatpush.bf16.msra.mxu2 %v5052_v58 }
 0x133   :  { %v425_v6 = vadd.f32 %v424_v4, %v394_v3  ;;  %v357_v7 = vadd.f32 %v356_v1, %v5838_v63 }
 0x135   :  { %v358_v11 = vrot.slane %v357_v7, 4  ;;  %v426_v12 = vadd.f32 %v425_v6, %v395_v8 }
 0x136   :  { %641 = vmatpush.bf16.msra.mxu1 %v5051_v61  ;;  %5100 = vmatpush.bf16.msra.mxu2 %v5051_v61 }
 0x137   :  { %v359_v13 = vadd.f32 %v358_v11, %v357_v7  ;;  %v427_v14 = vrot.slane %v426_v12, 4  ;;  %v437_v7 = vld [vmem:[%s10229_s2] sm:$0x1] }
 0x139   :  { %v360_v16 = vrot.slane %v359_v13, 2  ;;  %v428_v17 = vadd.f32 %v427_v14, %v426_v12  ;;  %v450_v12 = vld [vmem:[%s10230_s3] sm:$0x1] }
 0x13a   :  { %642 = vmatpush.bf16.msra.mxu1 %v5050_v62  ;;  %5101 = vmatpush.bf16.msra.mxu2 %v5050_v62 }
 0x13b   :  { %v361_v18 = vadd.f32 %v360_v16, %v359_v13  ;;  %v429_v41 = vrot.slane %v428_v17, 2 }
 0x13d   :  { %v362_v45 = vrot.slane %v361_v18, 1  ;;  %v430_v46 = vadd.f32 %v429_v41, %v428_v17 }
 0x13f   :  { %v363_v47 = vadd.f32 %v362_v45, %v361_v18  ;;  %v431_v49 = vrot.slane %v430_v46, 1 }
 0x141   :  { %v432_v51 = vadd.f32 %v431_v49, %v430_v46  ;;  %v433_v52 = vmul.f32 0.00390625, %v363_v47 }
 0x143   :  { %v434_v53 = vmul.f32 0.00390625, %v432_v51  ;;  %v435_v57 = vmul.f32 %v433_v52, %v433_v52 }
 0x145   :  { %v436_v59 = vsub.f32 %v434_v53, %v435_v57 }
 0x147   :  { %v438_v60 = vadd.f32 1e-05, %v436_v59 }
 0x149   :  { %5110 = vrsqrt.f32 %v438_v60  ;;  %vm445_vm2 = vweird.f32 %v438_v60 }
 0x14f   :  { %v5111_v0 = vpop.eup %5110 }
 0x150   :  { %v440_v1 = vmul.f32 %v5111_v0, %v438_v60  ;;  %vm446_vm1 = vweird.f32 %v5111_v0 }
 0x151   :  { %vm447_vm3 = vmor %vm445_vm2, %vm446_vm1 }
 0x152   :  { %v441_v3 = vmul.f32 %v5111_v0, %v440_v1 }
 0x154   :  { %v442_v4 = vmul.f32 0.5, %v441_v3 }
 0x156   :  { %v443_v6 = vsub.f32 1.5, %v442_v4 }
 0x158   :  { %v444_v8 = vmul.f32 %v5111_v0, %v443_v6 }
 0x15a   :  { %v448_v10 = vsel %vm447_vm3, %v5111_v0, %v444_v8 }
 0x15b   :  { %v449_v11 = vmul.f32 %v448_v10, %v437_v7 }
 0x15d   :  { %v451_v13 = vmul.f32 %v449_v11, %v433_v52  ;;  %v5876_v15 = vperm.slane %v449_v11, 0 }
 0x15f   :  { %v452_v14 = vsub.f32 %v450_v12, %v451_v13  ;;  %v456_v17 = vmul.f32 %v5876_v15, %v5685_v20  ;;  %v457_v18 = vmul.f32 %v5876_v15, %v5688_v21  ;;  %v472_v41 = vmul.f32 %v5876_v15, %v5779_v19 }
 0x160   :  { %v473_v44 = vmul.f32 %v5876_v15, %v5793_v54  ;;  %v5894_v20 = vmul.f32 %v5876_v15, %v5838_v63  ;;  %v458_v21 = vmul.f32 %v5876_v15, %v5690_v22  ;;  %v459_v54 = vmul.f32 %v5876_v15, %v5692_v23 }
 0x161   :  { %v5878_v16 = vperm.slane %v452_v14, 0  ;;  %v464_v51 = vmul.f32 %v5876_v15, %v5710_v32  ;;  %v465_v57 = vmul.f32 %v5876_v15, %v5712_v33  ;;  %v466_v63 = vmul.f32 %v5876_v15, %v5716_v35 }
 0x162   :  { %v467_v58 = vmul.f32 %v5876_v15, %v5720_v37  ;;  %v468_v59 = vmul.f32 %v5876_v15, %v5724_v39  ;;  %v469_v23 = vmul.f32 %v5876_v15, %v5730_v42  ;;  %v474_v32 = vmul.f32 %v5876_v15, %v5696_v25 }
 0x163   :  { %v491_v45 = vadd.f32 %v5878_v16, %v456_v17  ;;  %v492_v46 = vadd.f32 %v5878_v16, %v457_v18  ;;  %v507_v47 = vadd.f32 %v5878_v16, %v472_v41  ;;  %v508_v49 = vadd.f32 %v5878_v16, %v473_v44 }
 0x164   :  { %v470_v33 = vmul.f32 %v5876_v15, %v5747_v55  ;;  %v475_v35 = vmul.f32 %v5876_v15, %v5700_v27  ;;  %v493_v37 = vadd.f32 %v5878_v16, %v458_v21  ;;  %v494_v61 = vadd.f32 %v5878_v16, %v459_v54 }
 0x165   :  { %v523_v50 = vmax.f32 %v491_v45, 0.0  ;;  %v524_v19 = vmax.f32 %v492_v46, 0.0  ;;  %v539_v52 = vmax.f32 %v507_v47, 0.0  ;;  %v540_v53 = vmax.f32 %v508_v49, 0.0 }
 0x166   :  { %v471_v39 = vmul.f32 %v5876_v15, %v5763_v5  ;;  %v480_v42 = vmul.f32 %v5876_v15, %v5722_v38  ;;  %v481_v25 = vmul.f32 %v5876_v15, %v5726_v40  ;;  %v509_v55 = vadd.f32 %v5878_v16, %v474_v32 }
 0x167   :  { %v555_v22 = vpack.c.bf16 %v524_v19, %v523_v50  ;;  %v563_v60 = vpack.c.bf16 %v540_v53, %v539_v52  ;;  %v482_v27 = vmul.f32 %v5876_v15, %v5749_v56  ;;  %v483_v62 = vmul.f32 %v5876_v15, %v5768_v9 }
 0x168   :  { %v510_v0 = vadd.f32 %v5878_v16, %v475_v35  ;;  %v499_v1 = vadd.f32 %v5878_v16, %v464_v51  ;;  %v484_v5 = vmul.f32 %v5876_v15, %v5787_v48  ;;  %v485_v38 = vmul.f32 %v5876_v15, %v5804_v2 }
 0x169   :  { %643 = vmatmul.bf16.vlgmr.msra.gmra.mxu1 %v555_v22  ;;  %683 = vmatmul.bf16.vlgmr.msra.gmra.mxu2 %v563_v60  ;;  %v486_v40 = vmul.f32 %v5876_v15, %v5821_v43  ;;  %v500_v3 = vadd.f32 %v5878_v16, %v465_v57  ;;  %v525_v4 = vmax.f32 %v493_v37, 0.0  ;;  %v526_v56 = vmax.f32 %v494_v61, 0.0 }
 0x16a   :  { %v531_v6 = vmax.f32 %v499_v1, 0.0  ;;  %v515_v9 = vadd.f32 %v5878_v16, %v480_v42  ;;  %v541_v7 = vmax.f32 %v509_v55, 0.0  ;;  %v516_v10 = vadd.f32 %v5878_v16, %v481_v25 }
 0x16b   :  { %v532_v8 = vmax.f32 %v500_v3, 0.0  ;;  %v501_v11 = vadd.f32 %v5878_v16, %v466_v63  ;;  %v542_v48 = vmax.f32 %v510_v0, 0.0  ;;  %v502_v2 = vadd.f32 %v5878_v16, %v467_v58 }
 0x16c   :  { %v547_v12 = vmax.f32 %v515_v9, 0.0  ;;  %v517_v13 = vadd.f32 %v5878_v16, %v482_v27  ;;  %v548_v14 = vmax.f32 %v516_v10, 0.0  ;;  %v518_v18 = vadd.f32 %v5878_v16, %v483_v62 }
 0x16d   :  { %v5945_v43 = vpack.c.bf16 %v532_v8, %v531_v6  ;;  %v533_v17 = vmax.f32 %v501_v11, 0.0  ;;  %v534_v41 = vmax.f32 %v502_v2, 0.0  ;;  %v503_v45 = vadd.f32 %v5878_v16, %v468_v59 }
 0x16e   :  { %v549_v44 = vmax.f32 %v517_v13, 0.0  ;;  %v504_v46 = vadd.f32 %v5878_v16, %v469_v23  ;;  %v567_v47 = vpack.c.bf16 %v548_v14, %v547_v12  ;;  %v550_v49 = vmax.f32 %v518_v18, 0.0 }
 0x16f   :  { %v519_v21 = vadd.f32 %v5878_v16, %v484_v5  ;;  %v520_v50 = vadd.f32 %v5878_v16, %v485_v38  ;;  %v560_v19 = vpack.c.bf16 %v534_v41, %v533_v17  ;;  %v535_v54 = vmax.f32 %v503_v45, 0.0 }
 0x170   :  { %v536_v51 = vmax.f32 %v504_v46, 0.0  ;;  %v505_v52 = vadd.f32 %v5878_v16, %v470_v33  ;;  %v568_v53 = vpack.c.bf16 %v550_v49, %v549_v44  ;;  %v506_v58 = vadd.f32 %v5878_v16, %v471_v39  ;;  %v4896_v49 = vld [vmem:[%s10231_s7 + $0x70] sm:$0xf] }
 0x171   :  { %v551_v57 = vmax.f32 %v519_v21, 0.0  ;;  %v552_v63 = vmax.f32 %v520_v50, 0.0  ;;  %v521_v23 = vadd.f32 %v5878_v16, %v486_v40  ;;  %v522_v32 = vadd.f32 %v5878_v16, %v5894_v20  ;;  %v5073_v21 = vld [vmem:[%s10231_s7 + $0x74] sm:$0xf0] }
 0x172   :  { %v561_v22 = vpack.c.bf16 %v536_v51, %v535_v54  ;;  %v537_v59 = vmax.f32 %v505_v52, 0.0  ;;  %v538_v35 = vmax.f32 %v506_v58, 0.0  ;;  %v556_v37 = vpack.c.bf16 %v526_v56, %v525_v4  ;;  %v5072_v52 = vld [vmem:[%s10231_s7 + $0x74] sm:$0xf]  ;;  %v5071_v58 = vld [vmem:[%s10231_s7 + $0x64] sm:$0xf0] }
 0x173   :  { %v569_v60 = vpack.c.bf16 %v552_v63, %v551_v57  ;;  %v553_v61 = vmax.f32 %v521_v23, 0.0  ;;  %v554_v42 = vmax.f32 %v522_v32, 0.0  ;;  %v564_v25 = vpack.c.bf16 %v542_v48, %v541_v7  ;;  %v4888_v63 = vld [vmem:[%s10231_s7 + $0x60] sm:$0xf]  ;;  %v5070_v32 = vld [vmem:[%s10231_s7 + $0x64] sm:$0xf] }
 0x174   :  { %v562_v55 = vpack.c.bf16 %v538_v35, %v537_v59  ;;  %v460_v39 = vmul.f32 %v5876_v15, %v5694_v24  ;;  %v461_v27 = vmul.f32 %v5876_v15, %v5698_v26  ;;  %v476_v62 = vmul.f32 %v5876_v15, %v5704_v29 }
 0x175   :  { %v570_v33 = vpack.c.bf16 %v554_v42, %v553_v61  ;;  %v477_v20 = vmul.f32 %v5876_v15, %v5708_v31  ;;  %v462_v29 = vmul.f32 %v5876_v15, %v5702_v28  ;;  %v463_v31 = vmul.f32 %v5876_v15, %v5706_v30  ;;  %v4880_v42 = vld [vmem:[%s10231_s7 + $0x50] sm:$0xf] }
 0x176   :  { %v495_v0 = vadd.f32 %v5878_v16, %v460_v39  ;;  %v496_v1 = vadd.f32 %v5878_v16, %v461_v27  ;;  %v511_v5 = vadd.f32 %v5878_v16, %v476_v62  ;;  %v478_v6 = vmul.f32 %v5876_v15, %v5714_v34 }
 0x177   :  { %v512_v38 = vadd.f32 %v5878_v16, %v477_v20  ;;  %v479_v9 = vmul.f32 %v5876_v15, %v5718_v36  ;;  %v497_v7 = vadd.f32 %v5878_v16, %v462_v29  ;;  %v498_v8 = vadd.f32 %v5878_v16, %v463_v31 }
 0x178   :  { %v527_v40 = vmax.f32 %v495_v0, 0.0  ;;  %v528_v3 = vmax.f32 %v496_v1, 0.0  ;;  %v543_v24 = vmax.f32 %v511_v5, 0.0  ;;  %v513_v10 = vadd.f32 %v5878_v16, %v478_v6 }
 0x179   :  { %648 = vmatmul.bf16.gmra.mxu1 %v556_v37  ;;  %688 = vmatmul.bf16.gmra.mxu2 %v564_v25  ;;  %v544_v4 = vmax.f32 %v512_v38, 0.0  ;;  %v514_v11 = vadd.f32 %v5878_v16, %v479_v9  ;;  %v529_v48 = vmax.f32 %v497_v7, 0.0  ;;  %v530_v12 = vmax.f32 %v498_v8, 0.0  ;;  %v5069_v25 = vld [vmem:[%s10231_s7 + $0x54] sm:$0xf0] }
 0x17a   :  { %v557_v56 = vpack.c.bf16 %v528_v3, %v527_v40  ;;  %v545_v28 = vmax.f32 %v513_v10, 0.0  ;;  %v4897_v50 = vor.u32 %v5073_v21, %v4896_v49 }
 0x17b   :  { %v565_v26 = vpack.c.bf16 %v544_v4, %v543_v24  ;;  %v546_v2 = vmax.f32 %v514_v11, 0.0  ;;  %v558_v13 = vpack.c.bf16 %v530_v12, %v529_v48 }
 0x17c   :  { %1064 = vmatpush.bf16.msrb.mxu2 %v4897_v50 }
 0x17d   :  { %v566_v30 = vpack.c.bf16 %v546_v2, %v545_v28 }
 0x189   :  { %653 = vmatmul.bf16.gmra.mxu1 %v557_v56  ;;  %693 = vmatmul.bf16.gmra.mxu2 %v565_v26 }
 0x199   :  { %658 = vmatmul.bf16.gmra.mxu1 %v558_v13  ;;  %698 = vmatmul.bf16.gmra.mxu2 %v566_v30  ;;  %v5068_v13 = vld [vmem:[%s10231_s7 + $0x54] sm:$0xf]  ;;  %v4882_v30 = vld [vmem:[%s10231_s7 + $0x58] sm:$0xf0] }
 0x19a   :  { %v4885_v49 = vor.u32 %v5068_v13, %v4882_v30 }
 0x1a9   :  { %663 = vmatmul.bf16.gmra.mxu1 %v5945_v43  ;;  %703 = vmatmul.bf16.gmra.mxu2 %v567_v47 }
 0x1b9   :  { %668 = vmatmul.bf16.gmra.mxu1 %v560_v19  ;;  %708 = vmatmul.bf16.gmra.mxu2 %v568_v53  ;;  %v4898_v53 = vld [vmem:[%s10231_s7 + $0x78] sm:$0xf0] }
 0x1ba   :  { %v4901_v57 = vor.u32 %v5072_v52, %v4898_v53 }
 0x1bc   :  { %1153 = vmatpush.bf16.msrb.mxu3 %v4901_v57 }
 0x1c9   :  { %673 = vmatmul.bf16.gmra.mxu1 %v561_v22  ;;  %713 = vmatmul.bf16.gmra.mxu2 %v569_v60  ;;  %v4889_v22 = vor.u32 %v5071_v58, %v4888_v63  ;;  %v4890_v60 = vld [vmem:[%s10231_s7 + $0x68] sm:$0xf0] }
 0x1ca   :  { %v4893_v35 = vor.u32 %v5070_v32, %v4890_v60 }
 0x1cb   :  { %1065 = vmatpush.bf16.msrb.mxu2 %v4889_v22 }
 0x1cc   :  { %1154 = vmatpush.bf16.msrb.mxu3 %v4893_v35 }
 0x1d0   :  { %1155 = vmatpush.bf16.msrb.mxu3 %v4885_v49 }
 0x1d9   :  { %678 = vmatmul.bf16.gmra.mxu1 %v562_v55  ;;  %718 = vmatmul.bf16.gmra.mxu2 %v570_v33  ;;  %v4881_v55 = vor.u32 %v5069_v25, %v4880_v42 }
 0x1db   :  { %1066 = vmatpush.bf16.msrb.mxu2 %v4881_v55 }
 0x1e6   :  { %v5982_v34 = vpop.f32.mrf.mxu1 }
 0x1e7   :  { %v761_v62 = vmul.f32 %v5982_v34, %v5982_v34 }
 0x1ec   :  { %v5984_v36 = vpop.f32.mrf.mxu2 }
 0x1ee   :  { %v5986_v15 = vpop.f32.mrf.mxu1 }
 0x1ef   :  { %v762_v27 = vmul.f32 %v5986_v15, %v5986_v15  ;;  %v724_v20 = vadd.f32 %v5986_v15, %v5982_v34 }
 0x1f1   :  { %v793_v5 = vadd.f32 %v762_v27, %v761_v62 }
 0x1f4   :  { %v5988_v16 = vpop.f32.mrf.mxu2 }
 0x1f6   :  { %v5990_v14 = vpop.f32.mrf.mxu1 }
 0x1f7   :  { %v763_v0 = vmul.f32 %v5990_v14, %v5990_v14  ;;  %v725_v1 = vadd.f32 %v724_v20, %v5990_v14 }
 0x1f9   :  { %v794_v3 = vadd.f32 %v793_v5, %v763_v0 }
 0x1fc   :  { %v5992_v17 = vpop.f32.mrf.mxu2 }
 0x1fe   :  { %v5994_v43 = vpop.f32.mrf.mxu1 }
 0x1ff   :  { %v764_v38 = vmul.f32 %v5994_v43, %v5994_v43  ;;  %v726_v24 = vadd.f32 %v725_v1, %v5994_v43 }
 0x201   :  { %v795_v26 = vadd.f32 %v794_v3, %v764_v38 }
 0x204   :  { %v5996_v18 = vpop.f32.mrf.mxu2 }
 0x205   :  { %v780_v13 = vmul.f32 %v5996_v18, %v5996_v18 }
 0x206   :  { %v5998_v41 = vpop.f32.mrf.mxu1 }
 0x207   :  { %v765_v4 = vmul.f32 %v5998_v41, %v5998_v41  ;;  %v727_v56 = vadd.f32 %v726_v24, %v5998_v41 }
 0x209   :  { %v796_v6 = vadd.f32 %v795_v26, %v765_v4 }
 0x20c   :  { %v6000_v44 = vpop.f32.mrf.mxu2 }
 0x20e   :  { %v6002_v45 = vpop.f32.mrf.mxu1 }
 0x20f   :  { %v766_v29 = vmul.f32 %v6002_v45, %v6002_v45  ;;  %v728_v9 = vadd.f32 %v727_v56, %v6002_v45 }
 0x211   :  { %v797_v10 = vadd.f32 %v796_v6, %v766_v29  ;;  %v777_v6 = vmul.f32 %v5984_v36, %v5984_v36 }
 0x214   :  { %v6006_v47 = vpop.f32.mrf.mxu2 }
 0x216   :  { %v6004_v46 = vpop.f32.mrf.mxu1 }
 0x217   :  { %v767_v7 = vmul.f32 %v6004_v46, %v6004_v46  ;;  %v729_v8 = vadd.f32 %v728_v9, %v6004_v46 }
 0x219   :  { %v798_v12 = vadd.f32 %v797_v10, %v767_v7 }
 0x21c   :  { %v6016_v54 = vpop.f32.mrf.mxu2 }
 0x21e   :  { %v6014_v19 = vpop.f32.mrf.mxu1 }
 0x21f   :  { %v768_v11 = vmul.f32 %v6014_v19, %v6014_v19  ;;  %v730_v28 = vadd.f32 %v729_v8, %v6014_v19  ;;  %v778_v8 = vmul.f32 %v5988_v16, %v5988_v16 }
 0x221   :  { %v799_v50 = vadd.f32 %v798_v12, %v768_v11  ;;  %v779_v12 = vmul.f32 %v5992_v17, %v5992_v17 }
 0x224   :  { %v6032_v59 = vpop.f32.mrf.mxu2 }
 0x226   :  { %v6018_v51 = vpop.f32.mrf.mxu1 }
 0x227   :  { %v769_v2 = vmul.f32 %v6018_v51, %v6018_v51  ;;  %v731_v21 = vadd.f32 %v730_v28, %v6018_v51 }
 0x229   :  { %v800_v53 = vadd.f32 %v799_v50, %v769_v2  ;;  %v781_v50 = vmul.f32 %v6000_v44, %v6000_v44 }
 0x22c   :  { %v6042_v37 = vpop.f32.mrf.mxu2 }
 0x22e   :  { %v6034_v23 = vpop.f32.mrf.mxu1 }
 0x22f   :  { %v770_v52 = vmul.f32 %v6034_v23, %v6034_v23  ;;  %v732_v57 = vadd.f32 %v731_v21, %v6034_v23 }
 0x231   :  { %v801_v32 = vadd.f32 %v800_v53, %v770_v52 }
 0x234   :  { %v6054_v39 = vpop.f32.mrf.mxu2 }
 0x236   :  { %v6044_v61 = vpop.f32.mrf.mxu1 }
 0x237   :  { %v771_v63 = vmul.f32 %v6044_v61, %v6044_v61  ;;  %v733_v22 = vadd.f32 %v732_v57, %v6044_v61  ;;  %v782_v57 = vmul.f32 %v6006_v47, %v6006_v47 }
 0x239   :  { %v802_v42 = vadd.f32 %v801_v32, %v771_v63  ;;  %v783_v32 = vmul.f32 %v6016_v54, %v6016_v54 }
 0x23c   :  { %v6075_v31 = vpop.f32.mrf.mxu2 }
 0x23e   :  { %v6052_v33 = vpop.f32.mrf.mxu1 }
 0x23f   :  { %v772_v60 = vmul.f32 %v6052_v33, %v6052_v33  ;;  %v734_v25 = vadd.f32 %v733_v22, %v6052_v33 }
 0x241   :  { %v803_v62 = vadd.f32 %v802_v42, %v772_v60 }
 0x244   :  { %v6100_v58 = vpop.f32.mrf.mxu2 }
 0x246   :  { %v6067_v40 = vpop.f32.mrf.mxu1 }
 0x247   :  { %v773_v55 = vmul.f32 %v6067_v40, %v6067_v40  ;;  %v735_v27 = vadd.f32 %v734_v25, %v6067_v40  ;;  %v784_v25 = vmul.f32 %v6032_v59, %v6032_v59 }
 0x249   :  { %v804_v0 = vadd.f32 %v803_v62, %v773_v55  ;;  %v785_v62 = vmul.f32 %v6042_v37, %v6042_v37 }
 0x24c   :  { %v6117_v24 = vpop.f32.mrf.mxu2 }
 0x24e   :  { %v6083_v48 = vpop.f32.mrf.mxu1 }
 0x24f   :  { %v774_v20 = vmul.f32 %v6083_v48, %v6083_v48  ;;  %v736_v1 = vadd.f32 %v735_v27, %v6083_v48 }
 0x251   :  { %v805_v3 = vadd.f32 %v804_v0, %v774_v20 }
 0x254   :  { %v6136_v21 = vpop.f32.mrf.mxu2 }
 0x256   :  { %v6105_v35 = vpop.f32.mrf.mxu1 }
 0x257   :  { %v775_v5 = vmul.f32 %v6105_v35, %v6105_v35  ;;  %v737_v38 = vadd.f32 %v736_v1, %v6105_v35 }
 0x259   :  { %v806_v56 = vadd.f32 %v805_v3, %v775_v5  ;;  %v786_v5 = vmul.f32 %v6054_v39, %v6054_v39 }
 0x25c   :  { %v6153_v1 = vpop.f32.mrf.mxu2 }
 0x25e   :  { %v6119_v4 = vpop.f32.mrf.mxu1 }
 0x25f   :  { %v738_v26 = vadd.f32 %v737_v38, %v6119_v4  ;;  %v776_v29 = vmul.f32 %v6119_v4, %v6119_v4 }
 0x261   :  { %v739_v9 = vadd.f32 %v738_v26, %v5984_v36  ;;  %v807_v7 = vadd.f32 %v806_v56, %v776_v29  ;;  %v787_v56 = vmul.f32 %v6075_v31, %v6075_v31 }
 0x263   :  { %v740_v10 = vadd.f32 %v739_v9, %v5988_v16  ;;  %v808_v11 = vadd.f32 %v807_v7, %v777_v6  ;;  %v788_v6 = vmul.f32 %v6100_v58, %v6100_v58 }
 0x265   :  { %v741_v28 = vadd.f32 %v740_v10, %v5992_v17  ;;  %v809_v2 = vadd.f32 %v808_v11, %v778_v8  ;;  %v789_v8 = vmul.f32 %v6117_v24, %v6117_v24 }
 0x267   :  { %v742_v30 = vadd.f32 %v741_v28, %v5996_v18  ;;  %v810_v49 = vadd.f32 %v809_v2, %v779_v12  ;;  %v790_v12 = vmul.f32 %v6136_v21, %v6136_v21 }
 0x269   :  { %v743_v52 = vadd.f32 %v742_v30, %v6000_v44  ;;  %v811_v53 = vadd.f32 %v810_v49, %v780_v13  ;;  %v6170_v13 = vpop.f32.mrf.mxu2  ;;  %v791_v30 = vmul.f32 %v6153_v1, %v6153_v1 }
 0x26b   :  { %v744_v63 = vadd.f32 %v743_v52, %v6006_v47  ;;  %v812_v22 = vadd.f32 %v811_v53, %v781_v50  ;;  %v792_v53 = vmul.f32 %v6170_v13, %v6170_v13 }
 0x26d   :  { %v745_v60 = vadd.f32 %v744_v63, %v6016_v54  ;;  %v813_v42 = vadd.f32 %v812_v22, %v782_v57 }
 0x26f   :  { %v814_v55 = vadd.f32 %v813_v42, %v783_v32  ;;  %v746_v27 = vadd.f32 %v745_v60, %v6032_v59 }
 0x271   :  { %v747_v20 = vadd.f32 %v746_v27, %v6042_v37  ;;  %v815_v0 = vadd.f32 %v814_v55, %v784_v25 }
 0x273   :  { %v748_v38 = vadd.f32 %v747_v20, %v6054_v39  ;;  %v816_v3 = vadd.f32 %v815_v0, %v785_v62 }
 0x275   :  { %v749_v26 = vadd.f32 %v748_v38, %v6075_v31  ;;  %v817_v29 = vadd.f32 %v816_v3, %v786_v5 }
 0x277   :  { %v750_v9 = vadd.f32 %v749_v26, %v6100_v58  ;;  %v818_v7 = vadd.f32 %v817_v29, %v787_v56 }
 0x279   :  { %v751_v10 = vadd.f32 %v750_v9, %v6117_v24  ;;  %v819_v11 = vadd.f32 %v818_v7, %v788_v6  ;;  %v4872_v6 = vld [vmem:[%s10231_s7 + $0x40] sm:$0xf]  ;;  %v5067_v9 = vld [vmem:[%s10231_s7 + $0x44] sm:$0xf0]  ;;  %v5066_v7 = vld [vmem:[%s10231_s7 + $0x44] sm:$0xf] }
 0x27b   :  { %v752_v28 = vadd.f32 %v751_v10, %v6136_v21  ;;  %v820_v2 = vadd.f32 %v819_v11, %v789_v8  ;;  %v4873_v8 = vor.u32 %v5067_v9, %v4872_v6  ;;  %v4874_v10 = vld [vmem:[%s10231_s7 + $0x48] sm:$0xf0] }
 0x27c   :  { %v4842_v6 = vld [vmem:[%s10231_s7 + $0x8] sm:$0xf0] }
 0x27d   :  { %v753_v49 = vadd.f32 %v752_v28, %v6153_v1  ;;  %v821_v50 = vadd.f32 %v820_v2, %v790_v12  ;;  %v4877_v12 = vor.u32 %v5066_v7, %v4874_v10  ;;  %1067 = vmatpush.bf16.msrb.mxu2 %v4873_v8  ;;  %v4864_v28 = vld [vmem:[%s10231_s7 + $0x30] sm:$0xf]  ;;  %v5065_v2 = vld [vmem:[%s10231_s7 + $0x34] sm:$0xf0] }
 0x27f   :  { %v754_v52 = vadd.f32 %v753_v49, %v6170_v13  ;;  %v822_v57 = vadd.f32 %v821_v50, %v791_v30  ;;  %1156 = vmatpush.bf16.msrb.mxu3 %v4877_v12  ;;  %v5064_v30 = vld [vmem:[%s10231_s7 + $0x34] sm:$0xf]  ;;  %v4865_v49 = vor.u32 %v5065_v2, %v4864_v28  ;;  %v4866_v50 = vld [vmem:[%s10231_s7 + $0x38] sm:$0xf0]  ;;  %v834_v12 = vld [vmem:[%s10232_s5] sm:$0x1] }
 0x281   :  { %v755_v63 = vrot.slane %v754_v52, 4  ;;  %v823_v22 = vadd.f32 %v822_v57, %v792_v53  ;;  %v5063_v53 = vld [vmem:[%s10231_s7 + $0x24] sm:$0xf0]  ;;  %v4869_v57 = vor.u32 %v5064_v30, %v4866_v50  ;;  %1068 = vmatpush.bf16.msrb.mxu2 %v4865_v49  ;;  %v847_v49 = vld [vmem:[%s10233_s6] sm:$0x1] }
 0x283   :  { %v756_v32 = vadd.f32 %v755_v63, %v754_v52  ;;  %v824_v60 = vrot.slane %v823_v22, 4  ;;  %v4856_v52 = vld [vmem:[%s10231_s7 + $0x20] sm:$0xf]  ;;  %v5062_v63 = vld [vmem:[%s10231_s7 + $0x24] sm:$0xf]  ;;  %1157 = vmatpush.bf16.msrb.mxu3 %v4869_v57 }
 0x285   :  { %v757_v42 = vrot.slane %v756_v32, 2  ;;  %v825_v25 = vadd.f32 %v824_v60, %v823_v22  ;;  %v4858_v22 = vld [vmem:[%s10231_s7 + $0x28] sm:$0xf0] }
 0x286   :  { %v4861_v60 = vor.u32 %v5062_v63, %v4858_v22 }
 0x287   :  { %v758_v55 = vadd.f32 %v757_v42, %v756_v32  ;;  %v826_v27 = vrot.slane %v825_v25, 2  ;;  %v4857_v32 = vor.u32 %v5063_v53, %v4856_v52  ;;  %v4848_v42 = vld [vmem:[%s10231_s7 + $0x10] sm:$0xf] }
 0x288   :  { %1158 = vmatpush.bf16.msrb.mxu3 %v4861_v60 }
 0x289   :  { %v759_v62 = vrot.slane %v758_v55, 1  ;;  %v827_v20 = vadd.f32 %v826_v27, %v825_v25  ;;  %v5061_v25 = vld [vmem:[%s10231_s7 + $0x14] sm:$0xf0]  ;;  %v4850_v27 = vld [vmem:[%s10231_s7 + $0x18] sm:$0xf0]  ;;  %1069 = vmatpush.bf16.msrb.mxu2 %v4857_v32 }
 0x28b   :  { %v760_v0 = vadd.f32 %v759_v62, %v758_v55  ;;  %v828_v5 = vrot.slane %v827_v20, 1  ;;  %v5060_v55 = vld [vmem:[%s10231_s7 + $0x14] sm:$0xf] }
 0x28d   :  { %v829_v38 = vadd.f32 %v828_v5, %v827_v20  ;;  %v830_v3 = vmul.f32 0.00390625, %v760_v0  ;;  %v4849_v0 = vor.u32 %v5061_v25, %v4848_v42  ;;  %v4853_v5 = vor.u32 %v5060_v55, %v4850_v27 }
 0x28f   :  { %v831_v56 = vmul.f32 0.00390625, %v829_v38  ;;  %v832_v26 = vmul.f32 %v830_v3, %v830_v3  ;;  %v4840_v38 = vld [vmem:[%s10231_s7] sm:$0xf]  ;;  %1070 = vmatpush.bf16.msrb.mxu2 %v4849_v0  ;;  %1159 = vmatpush.bf16.msrb.mxu3 %v4853_v5 }
 0x291   :  { %v833_v29 = vsub.f32 %v831_v56, %v832_v26  ;;  %v5059_v56 = vld [vmem:[%s10231_s7 + $0x4] sm:$0xf0] }
 0x292   :  { %v4841_v7 = vor.u32 %v5059_v56, %v4840_v38 }
 0x293   :  { %v835_v11 = vadd.f32 1e-05, %v833_v29  ;;  %v5058_v29 = vld [vmem:[%s10231_s7 + $0x4] sm:$0xf]  ;;  %s5539_s7 = smov 32  }
 0x294   :  { %v4845_v8 = vor.u32 %v5058_v29, %v4842_v6  ;;  %1071 = vmatpush.bf16.msrb.mxu2 %v4841_v7 }
 0x295   :  { %5112 = vrsqrt.f32 %v835_v11  ;;  %vm842_vm5 = vweird.f32 %v835_v11 }
 0x296   :  { %1160 = vmatpush.bf16.msrb.mxu3 %v4845_v8 }
 0x29b   :  { %v5113_v62 = vpop.eup %5112 }
 0x29c   :  { %v837_v20 = vmul.f32 %v5113_v62, %v835_v11  ;;  %vm843_vm4 = vweird.f32 %v5113_v62 }
 0x29d   :  { %vm844_vm6 = vmor %vm842_vm5, %vm843_vm4 }
 0x29e   :  { %v838_v26 = vmul.f32 %v5113_v62, %v837_v20 }
 0x2a0   :  { %v839_v9 = vmul.f32 0.5, %v838_v26 }
 0x2a2   :  { %v840_v10 = vsub.f32 1.5, %v839_v9 }
 0x2a4   :  { %v841_v28 = vmul.f32 %v5113_v62, %v840_v10 }
 0x2a6   :  { %v845_v2 = vsel %vm844_vm6, %v5113_v62, %v841_v28 }
 0x2a7   :  { %v846_v30 = vmul.f32 %v845_v2, %v834_v12 }
 0x2a9   :  { %v848_v50 = vmul.f32 %v846_v30, %v830_v3  ;;  %v6244_v53 = vperm.slane %v846_v30, 0 }
 0x2ab   :  { %v849_v52 = vsub.f32 %v847_v49, %v848_v50  ;;  %v6248_v57 = vmul.f32 %v6244_v53, %v6170_v13  ;;  %v853_v11 = vmul.f32 %v6244_v53, %v5982_v34  ;;  %v854_v22 = vmul.f32 %v6244_v53, %v5986_v15 }
 0x2ac   :  { %v861_v32 = vmul.f32 %v6244_v53, %v6018_v51  ;;  %v863_v3 = vmul.f32 %v6244_v53, %v6044_v61  ;;  %v865_v60 = vmul.f32 %v6244_v53, %v6067_v40  ;;  %v867_v13 = vmul.f32 %v6244_v53, %v6105_v35 }
 0x2ad   :  { %v6250_v63 = vperm.slane %v849_v52, 0  ;;  %v869_v42 = vmul.f32 %v6244_v53, %v5984_v36  ;;  %v871_v34 = vmul.f32 %v6244_v53, %v5992_v17  ;;  %v873_v15 = vmul.f32 %v6244_v53, %v6000_v44 }
 0x2ae   :  { %v875_v51 = vmul.f32 %v6244_v53, %v6016_v54  ;;  %v877_v61 = vmul.f32 %v6244_v53, %v6042_v37  ;;  %v879_v40 = vmul.f32 %v6244_v53, %v6075_v31  ;;  %v881_v35 = vmul.f32 %v6244_v53, %v6117_v24 }
 0x2af   :  { %v883_v36 = vmul.f32 %v6244_v53, %v6153_v1  ;;  %v888_v17 = vadd.f32 %v6250_v63, %v853_v11  ;;  %v896_v25 = vadd.f32 %v6250_v63, %v861_v32  ;;  %v898_v44 = vadd.f32 %v6250_v63, %v863_v3 }
 0x2b0   :  { %v900_v54 = vadd.f32 %v6250_v63, %v865_v60  ;;  %v902_v55 = vadd.f32 %v6250_v63, %v867_v13  ;;  %v904_v37 = vadd.f32 %v6250_v63, %v869_v42  ;;  %v906_v31 = vadd.f32 %v6250_v63, %v871_v34 }
 0x2b1   :  { %v908_v27 = vadd.f32 %v6250_v63, %v873_v15  ;;  %v6289_v24 = vadd.f32 %v6250_v63, %v875_v51  ;;  %v6292_v1 = vadd.f32 %v6250_v63, %v877_v61  ;;  %v6295_v62 = vadd.f32 %v6250_v63, %v879_v40 }
 0x2b2   :  { %v6298_v20 = vadd.f32 %v6250_v63, %v881_v35  ;;  %v6301_v0 = vadd.f32 %v6250_v63, %v883_v36  ;;  %v889_v5 = vadd.f32 %v6250_v63, %v854_v22  ;;  %v855_v38 = vmul.f32 %v6244_v53, %v5990_v14 }
 0x2b3   :  { %v856_v56 = vmul.f32 %v6244_v53, %v5994_v43  ;;  %v862_v26 = vmul.f32 %v6244_v53, %v6034_v23  ;;  %v920_v29 = vmax.f32 %v888_v17, 0.0  ;;  %v864_v6 = vmul.f32 %v6244_v53, %v6052_v33 }
 0x2b4   :  { %v866_v9 = vmul.f32 %v6244_v53, %v6083_v48  ;;  %v868_v7 = vmul.f32 %v6244_v53, %v6119_v4  ;;  %v921_v8 = vmax.f32 %v889_v5, 0.0  ;;  %v870_v14 = vmul.f32 %v6244_v53, %v5988_v16 }
 0x2b5   :  { %v872_v43 = vmul.f32 %v6244_v53, %v5996_v18  ;;  %v874_v23 = vmul.f32 %v6244_v53, %v6006_v47  ;;  %v897_v10 = vadd.f32 %v6250_v63, %v862_v26  ;;  %v876_v33 = vmul.f32 %v6244_v53, %v6032_v59 }
 0x2b6   :  { %v878_v48 = vmul.f32 %v6244_v53, %v6054_v39  ;;  %v880_v4 = vmul.f32 %v6244_v53, %v6100_v58  ;;  %v952_v12 = vpack.c.bf16 %v921_v8, %v920_v29  ;;  %v882_v16 = vmul.f32 %v6244_v53, %v6136_v21 }
 0x2b7   :  { %v928_v28 = vmax.f32 %v896_v25, 0.0  ;;  %v929_v18 = vmax.f32 %v897_v10, 0.0  ;;  %v899_v2 = vadd.f32 %v6250_v63, %v864_v6  ;;  %v890_v47 = vadd.f32 %v6250_v63, %v855_v38 }
 0x2b8   :  { %1072 = vmatmul.bf16.vlgmr.msrb.gmra.mxu2 %v952_v12  ;;  %1161 = vmatmul.bf16.vlgmr.msrb.gmra.mxu3 %v952_v12  ;;  %v891_v59 = vadd.f32 %v6250_v63, %v856_v56  ;;  %v930_v30 = vmax.f32 %v898_v44, 0.0  ;;  %v901_v39 = vadd.f32 %v6250_v63, %v866_v9  ;;  %v932_v50 = vmax.f32 %v900_v54, 0.0 }
 0x2b9   :  { %v6335_v49 = vpack.c.bf16 %v929_v18, %v928_v28  ;;  %v931_v58 = vmax.f32 %v899_v2, 0.0  ;;  %v903_v52 = vadd.f32 %v6250_v63, %v868_v7  ;;  %v934_v11 = vmax.f32 %v902_v55, 0.0 }
 0x2ba   :  { %v933_v21 = vmax.f32 %v901_v39, 0.0  ;;  %v905_v22 = vadd.f32 %v6250_v63, %v870_v14  ;;  %v936_v32 = vmax.f32 %v904_v37, 0.0  ;;  %v907_v13 = vadd.f32 %v6250_v63, %v872_v43 }
 0x2bb   :  { %v957_v3 = vpack.c.bf16 %v931_v58, %v930_v30  ;;  %v935_v60 = vmax.f32 %v903_v52, 0.0  ;;  %v938_v42 = vmax.f32 %v906_v31, 0.0  ;;  %v909_v51 = vadd.f32 %v6250_v63, %v874_v23 }
 0x2bc   :  { %v958_v34 = vpack.c.bf16 %v933_v21, %v932_v50  ;;  %v937_v15 = vmax.f32 %v905_v22, 0.0  ;;  %v940_v61 = vmax.f32 %v908_v27, 0.0  ;;  %v939_v35 = vmax.f32 %v907_v13, 0.0 }
 0x2bd   :  { %v959_v40 = vpack.c.bf16 %v935_v60, %v934_v11  ;;  %v911_v36 = vadd.f32 %v6250_v63, %v876_v33  ;;  %v942_v17 = vmax.f32 %v6289_v24, 0.0  ;;  %v941_v44 = vmax.f32 %v909_v51, 0.0 }
 0x2be   :  { %v960_v25 = vpack.c.bf16 %v937_v15, %v936_v32  ;;  %v913_v54 = vadd.f32 %v6250_v63, %v878_v48  ;;  %v944_v55 = vmax.f32 %v6292_v1, 0.0  ;;  %v961_v37 = vpack.c.bf16 %v939_v35, %v938_v42 }
 0x2bf   :  { %v943_v5 = vmax.f32 %v911_v36, 0.0  ;;  %v915_v31 = vadd.f32 %v6250_v63, %v880_v4  ;;  %v946_v38 = vmax.f32 %v6295_v62, 0.0  ;;  %v962_v56 = vpack.c.bf16 %v941_v44, %v940_v61 }
 0x2c0   :  { %v945_v27 = vmax.f32 %v913_v54, 0.0  ;;  %v917_v26 = vadd.f32 %v6250_v63, %v882_v16  ;;  %v948_v29 = vmax.f32 %v6298_v20, 0.0  ;;  %v919_v9 = vadd.f32 %v6250_v63, %v6248_v57 }
 0x2c1   :  { %v963_v6 = vpack.c.bf16 %v943_v5, %v942_v17  ;;  %v947_v24 = vmax.f32 %v915_v31, 0.0  ;;  %v950_v7 = vmax.f32 %v6301_v0, 0.0  ;;  %v922_v1 = vmax.f32 %v890_v47, 0.0 }
 0x2c2   :  { %v923_v8 = vmax.f32 %v891_v59, 0.0  ;;  %v964_v14 = vpack.c.bf16 %v945_v27, %v944_v55  ;;  %v949_v43 = vmax.f32 %v917_v26, 0.0  ;;  %v951_v62 = vmax.f32 %v919_v9, 0.0  ;;  %v5081_v27 = vld [vmem:[%s10234_s10 + $0x38] sm:$0xff] }
 0x2c3   :  { %v6352_v23 = vpack.c.bf16 %v947_v24, %v946_v38  ;;  %v857_v20 = vmul.f32 %v6244_v53, %v5998_v41  ;;  %v858_v57 = vmul.f32 %v6244_v53, %v6002_v45  ;;  %v859_v18 = vmul.f32 %v6244_v53, %v6004_v46  ;;  %1867 = vmatpush.bf16.msrb.mxu0 %v5081_v27 }
 0x2c4   :  { %v6354_v10 = vpack.c.bf16 %v949_v43, %v948_v29  ;;  %v6356_v33 = vpack.c.bf16 %v951_v62, %v950_v7  ;;  %v953_v48 = vpack.c.bf16 %v923_v8, %v922_v1  ;;  %v860_v2 = vmul.f32 %v6244_v53, %v6014_v19  ;;  %v5080_v1 = vld [vmem:[%s10234_s10 + $0x30] sm:$0xff]  ;;  %v5089_v8 = vld [vmem:[%s10234_s10 + $0x78] sm:$0xff] }
 0x2c5   :  { %v892_v0 = vadd.f32 %v6250_v63, %v857_v20  ;;  %v893_v4 = vadd.f32 %v6250_v63, %v858_v57  ;;  %v894_v41 = vadd.f32 %v6250_v63, %v859_v18  ;;  %1956 = vmatpush.bf16.msrb.mxu1 %v5089_v8 }
 0x2c6   :  { %v895_v47 = vadd.f32 %v6250_v63, %v860_v2 }
 0x2c7   :  { %v924_v12 = vmax.f32 %v892_v0, 0.0  ;;  %v925_v16 = vmax.f32 %v893_v4, 0.0  ;;  %v926_v45 = vmax.f32 %v894_v41, 0.0  ;;  %1868 = vmatpush.bf16.msrb.mxu0 %v5080_v1 }
 0x2c8   :  { %1077 = vmatmul.bf16.gmra.mxu2 %v953_v48  ;;  %1166 = vmatmul.bf16.gmra.mxu3 %v953_v48  ;;  %v927_v59 = vmax.f32 %v895_v47, 0.0 }
 0x2c9   :  { %v954_v28 = vpack.c.bf16 %v925_v16, %v924_v12  ;;  %v5087_v16 = vld [vmem:[%s10234_s10 + $0x68] sm:$0xff] }
 0x2ca   :  { %v955_v30 = vpack.c.bf16 %v927_v59, %v926_v45 }
 0x2d8   :  { %1082 = vmatmul.bf16.gmra.mxu2 %v954_v28  ;;  %1171 = vmatmul.bf16.gmra.mxu3 %v954_v28  ;;  %v5078_v28 = vld [vmem:[%s10234_s10 + $0x20] sm:$0xff] }
 0x2e8   :  { %1087 = vmatmul.bf16.gmra.mxu2 %v955_v30  ;;  %1176 = vmatmul.bf16.gmra.mxu3 %v955_v30 }
 0x2f8   :  { %1092 = vmatmul.bf16.gmra.mxu2 %v6335_v49  ;;  %1181 = vmatmul.bf16.gmra.mxu3 %v6335_v49 }
 0x308   :  { %1097 = vmatmul.bf16.gmra.mxu2 %v957_v3  ;;  %1186 = vmatmul.bf16.gmra.mxu3 %v957_v3 }
 0x318   :  { %1102 = vmatmul.bf16.gmra.mxu2 %v958_v34  ;;  %1191 = vmatmul.bf16.gmra.mxu3 %v958_v34 }
 0x328   :  { %1107 = vmatmul.bf16.gmra.mxu2 %v959_v40  ;;  %1196 = vmatmul.bf16.gmra.mxu3 %v959_v40 }
 0x338   :  { %1112 = vmatmul.bf16.gmra.mxu2 %v960_v25  ;;  %1201 = vmatmul.bf16.gmra.mxu3 %v960_v25 }
 0x33b   :  { %v6372_v46 = vpop.f32.mrf.mxu2  ;;  %v6374_v19 = vpop.f32.mrf.mxu3 }
 0x33c   :  { %v1316_v18 = vmul.f32 %v6372_v46, %v6372_v46  ;;  %v1317_v2 = vmul.f32 %v6374_v19, %v6374_v19 }
 0x343   :  { %v6376_v53 = vpop.f32.mrf.mxu2  ;;  %v6378_v63 = vpop.f32.mrf.mxu3 }
 0x344   :  { %10329 = vst [vmem:[#allocation2_spill] sm:$0xff] %v6376_v53  ;;  %v1318_v4 = vmul.f32 %v6376_v53, %v6376_v53  ;;  %v1319_v12 = vmul.f32 %v6378_v63, %v6378_v63  ;;  %v1242_v45 = vadd.f32 %v6376_v53, %v6372_v46  ;;  %v1279_v59 = vadd.f32 %v6378_v63, %v6374_v19 }
 0x346   :  { %v1380_v30 = vadd.f32 %v1318_v4, %v1316_v18  ;;  %v1417_v27 = vadd.f32 %v1319_v12, %v1317_v2 }
 0x348   :  { %1117 = vmatmul.bf16.gmra.mxu2 %v961_v37  ;;  %1206 = vmatmul.bf16.gmra.mxu3 %v961_v37 }
 0x34b   :  { %v6380_v39 = vpop.f32.mrf.mxu2  ;;  %v6382_v49 = vpop.f32.mrf.mxu3 }
 0x34c   :  { %10330 = vst [vmem:[#allocation3_spill] sm:$0xff] %v6380_v39  ;;  %v1320_v41 = vmul.f32 %v6380_v39, %v6380_v39  ;;  %v1321_v47 = vmul.f32 %v6382_v49, %v6382_v49 }
 0x34d   :  { %10331 = vst [vmem:[#allocation4_spill] sm:$0xff] %v6382_v49 }
 0x353   :  { %v6384_v58 = vpop.f32.mrf.mxu2  ;;  %v6386_v50 = vpop.f32.mrf.mxu3 }
 0x354   :  { %10332 = vst [vmem:[#allocation5_spill] sm:$0xff] %v6386_v50  ;;  %v1322_v1 = vmul.f32 %v6384_v58, %v6384_v58  ;;  %v1323_v8 = vmul.f32 %v6386_v50, %v6386_v50 }
 0x358   :  { %1122 = vmatmul.bf16.gmra.mxu2 %v962_v56  ;;  %1211 = vmatmul.bf16.gmra.mxu3 %v962_v56 }
 0x35b   :  { %v6388_v52 = vpop.f32.mrf.mxu2  ;;  %v6390_v21 = vpop.f32.mrf.mxu3 }
 0x35c   :  { %10333 = vst [vmem:[#allocation6_spill] sm:$0xff] %v6388_v52  ;;  %v1324_v53 = vmul.f32 %v6388_v52, %v6388_v52 }
 0x35d   :  { %10334 = vst [vmem:[#allocation7_spill] sm:$0xff] %v6390_v21 }
 0x363   :  { %v6392_v11 = vpop.f32.mrf.mxu2  ;;  %v6394_v22 = vpop.f32.mrf.mxu3 }
 0x364   :  { %10335 = vst [vmem:[#allocation8_spill] sm:$0xff] %v6392_v11 }
 0x365   :  { %10336 = vst [vmem:[#allocation9_spill] sm:$0xff] %v6394_v22 }
 0x368   :  { %1127 = vmatmul.bf16.gmra.mxu2 %v963_v6  ;;  %1216 = vmatmul.bf16.gmra.mxu3 %v963_v6 }
 0x36b   :  { %v6396_v32 = vpop.f32.mrf.mxu2  ;;  %v6398_v3 = vpop.f32.mrf.mxu3 }
 0x36c   :  { %10337 = vst [vmem:[#allocation10_spill] sm:$0xff] %v6396_v32 }
 0x36d   :  { %10338 = vst [vmem:[#allocation11_spill] sm:$0xff] %v6398_v3 }
 0x373   :  { %v6400_v60 = vpop.f32.mrf.mxu2  ;;  %v6402_v13 = vpop.f32.mrf.mxu3 }
 0x374   :  { %10339 = vst [vmem:[#allocation12_spill] sm:$0xff] %v6400_v60 }
 0x375   :  { %10340 = vst [vmem:[#allocation13_spill] sm:$0xff] %v6402_v13 }
 0x378   :  { %1132 = vmatmul.bf16.gmra.mxu2 %v964_v14  ;;  %1221 = vmatmul.bf16.gmra.mxu3 %v964_v14 }
 0x37b   :  { %v6404_v42 = vpop.f32.mrf.mxu2  ;;  %v6406_v34 = vpop.f32.mrf.mxu3 }
 0x383   :  { %v6408_v15 = vpop.f32.mrf.mxu2  ;;  %v6410_v51 = vpop.f32.mrf.mxu3 }
 0x388   :  { %1137 = vmatmul.bf16.gmra.mxu2 %v6352_v23  ;;  %1226 = vmatmul.bf16.gmra.mxu3 %v6352_v23 }
 0x38b   :  { %v6414_v61 = vpop.f32.mrf.mxu2  ;;  %v6416_v40 = vpop.f32.mrf.mxu3 }
 0x393   :  { %v6418_v35 = vpop.f32.mrf.mxu2  ;;  %v6420_v36 = vpop.f32.mrf.mxu3 }
 0x398   :  { %1142 = vmatmul.bf16.gmra.mxu2 %v6354_v10  ;;  %1231 = vmatmul.bf16.gmra.mxu3 %v6354_v10  ;;  %v5088_v10 = vld [vmem:[%s10234_s10 + $0x70] sm:$0xff] }
 0x399   :  { %1957 = vmatpush.bf16.msrb.mxu1 %v5088_v10  ;;  %v1243_v10 = vadd.f32 %v1242_v45, %v6380_v39  ;;  %v1328_v39 = vmul.f32 %v6396_v32, %v6396_v32 }
 0x39b   :  { %v6424_v17 = vpop.f32.mrf.mxu2  ;;  %v6426_v25 = vpop.f32.mrf.mxu3 }
 0x39d   :  { %1958 = vmatpush.bf16.msrb.mxu1 %v5087_v16  ;;  %v1325_v16 = vmul.f32 %v6390_v21, %v6390_v21 }
 0x3a3   :  { %v6428_v44 = vpop.f32.mrf.mxu2  ;;  %v6430_v54 = vpop.f32.mrf.mxu3 }
 0x3a8   :  { %1147 = vmatmul.bf16.gmra.mxu2 %v6356_v33  ;;  %1236 = vmatmul.bf16.gmra.mxu3 %v6356_v33  ;;  %v5079_v33 = vld [vmem:[%s10234_s10 + $0x28] sm:$0xff] }
 0x3a9   :  { %1869 = vmatpush.bf16.msrb.mxu0 %v5079_v33  ;;  %v1280_v33 = vadd.f32 %v1279_v59, %v6382_v49 }
 0x3ab   :  { %v6434_v55 = vpop.f32.mrf.mxu2  ;;  %v6436_v37 = vpop.f32.mrf.mxu3  ;;  %v1281_v18 = vadd.f32 %v1280_v33, %v6386_v50  ;;  %v1330_v33 = vmul.f32 %v6400_v60, %v6400_v60 }
 0x3ad   :  { %1870 = vmatpush.bf16.msrb.mxu0 %v5078_v28  ;;  %v1244_v28 = vadd.f32 %v1243_v10, %v6384_v58  ;;  %v1329_v10 = vmul.f32 %v6398_v3, %v6398_v3 }
 0x3af   :  { %v1245_v59 = vadd.f32 %v1244_v28, %v6388_v52  ;;  %v1331_v28 = vmul.f32 %v6402_v13, %v6402_v13 }
 0x3b3   :  { %v6438_v5 = vpop.f32.mrf.mxu2  ;;  %v6440_v31 = vpop.f32.mrf.mxu3 }
 0x3bb   :  { %v6442_v38 = vpop.f32.mrf.mxu2  ;;  %v6444_v56 = vpop.f32.mrf.mxu3 }
 0x3c3   :  { %v6449_v26 = vpop.f32.mrf.mxu2  ;;  %v6451_v29 = vpop.f32.mrf.mxu3 }
 0x3cb   :  { %v6453_v6 = vpop.f32.mrf.mxu2  ;;  %v6455_v24 = vpop.f32.mrf.mxu3 }
 0x3d3   :  { %v6457_v9 = vpop.f32.mrf.mxu2  ;;  %v6459_v7 = vpop.f32.mrf.mxu3 }
 0x3db   :  { %v6467_v14 = vpop.f32.mrf.mxu2  ;;  %v6469_v43 = vpop.f32.mrf.mxu3 }
 0x3dc   :  { %10341 = vst [vmem:[#allocation14_spill] sm:$0xff] %v6469_v43 }
 0x3e3   :  { %v6471_v23 = vpop.f32.mrf.mxu2  ;;  %v6473_v62 = vpop.f32.mrf.mxu3 }
 0x3eb   :  { %v6481_v48 = vpop.f32.mrf.mxu2  ;;  %v6483_v20 = vpop.f32.mrf.mxu3 }
 0x3ec   :  { %10342 = vst [vmem:[#allocation15_spill] sm:$0xff] %v6481_v48  ;;  %v1360_v52 = vmul.f32 %v6481_v48, %v6481_v48 }
 0x3ed   :  { %10343 = vst [vmem:[#allocation16_spill] sm:$0xff] %v6483_v20 }
 0x3f3   :  { %v6485_v57 = vpop.f32.mrf.mxu2  ;;  %v6487_v0 = vpop.f32.mrf.mxu3 }
 0x3f4   :  { %10344 = vst [vmem:[#allocation17_spill] sm:$0xff] %v6485_v57  ;;  %v1418_v57 = vadd.f32 %v1417_v27, %v1321_v47  ;;  %v1327_v47 = vmul.f32 %v6394_v22, %v6394_v22 }
 0x3f5   :  { %10345 = vst [vmem:[#allocation18_spill] sm:$0xff] %v6487_v0  ;;  %v1381_v0 = vadd.f32 %v1380_v30, %v1320_v41  ;;  %v1326_v41 = vmul.f32 %v6392_v11, %v6392_v11  ;;  %v1282_v30 = vadd.f32 %v1281_v18, %v6390_v21  ;;  %v1352_v21 = vmul.f32 %v6453_v6, %v6453_v6 }
 0x3f6   :  { %v1419_v45 = vadd.f32 %v1418_v57, %v1323_v8  ;;  %v1246_v57 = vadd.f32 %v1245_v59, %v6392_v11  ;;  %v1333_v59 = vmul.f32 %v6406_v34, %v6406_v34 }
 0x3f7   :  { %v1382_v2 = vadd.f32 %v1381_v0, %v1322_v1  ;;  %v1283_v0 = vadd.f32 %v1282_v30, %v6394_v22 }
 0x3f8   :  { %v1420_v49 = vadd.f32 %v1419_v45, %v1325_v16  ;;  %v1332_v45 = vmul.f32 %v6404_v42, %v6404_v42 }
 0x3f9   :  { %v1383_v27 = vadd.f32 %v1382_v2, %v1324_v53  ;;  %v1247_v53 = vadd.f32 %v1246_v57, %v6396_v32  ;;  %v1284_v16 = vadd.f32 %v1283_v0, %v6398_v3  ;;  %v1338_v3 = vmul.f32 %v6418_v35, %v6418_v35 }
 0x3fa   :  { %v1421_v8 = vadd.f32 %v1420_v49, %v1327_v47  ;;  %v1344_v32 = vmul.f32 %v6434_v55, %v6434_v55 }
 0x3fb   :  { %v6521_v4 = vpop.f32.mrf.mxu2  ;;  %v6523_v12 = vpop.f32.mrf.mxu3  ;;  %v1384_v1 = vadd.f32 %v1383_v27, %v1326_v41  ;;  %v1248_v47 = vadd.f32 %v1247_v53, %v6400_v60  ;;  %v1285_v30 = vadd.f32 %v1284_v16, %v6402_v13  ;;  %v5077_v53 = vld [vmem:[%s10234_s10 + $0x18] sm:$0xff]  ;;  %v1336_v16 = vmul.f32 %v6414_v61, %v6414_v61 }
 0x3fc   :  { %v1422_v2 = vadd.f32 %v1421_v8, %v1329_v10  ;;  %v1335_v10 = vmul.f32 %v6410_v51, %v6410_v51  ;;  %v5086_v8 = vld [vmem:[%s10234_s10 + $0x60] sm:$0xff]  ;;  %1871 = vmatpush.bf16.msrb.mxu0 %v5077_v53 }
 0x3fd   :  { %v1385_v18 = vadd.f32 %v1384_v1, %v1328_v39  ;;  %v1334_v39 = vmul.f32 %v6408_v15, %v6408_v15  ;;  %v1249_v0 = vadd.f32 %v1248_v47, %v6404_v42  ;;  %v1286_v1 = vadd.f32 %v1285_v30, %v6406_v34  ;;  %1959 = vmatpush.bf16.msrb.mxu1 %v5086_v8 }
 0x3fe   :  { %v1423_v57 = vadd.f32 %v1422_v2, %v1331_v28 }
 0x3ff   :  { %v1386_v27 = vadd.f32 %v1385_v18, %v1330_v33  ;;  %v1337_v18 = vmul.f32 %v6416_v40, %v6416_v40  ;;  %v1250_v2 = vadd.f32 %v1249_v0, %v6408_v15  ;;  %v1287_v47 = vadd.f32 %v1286_v1, %v6410_v51 }
 0x400   :  { %v1424_v28 = vadd.f32 %v1423_v57, %v1333_v59  ;;  %v1340_v0 = vmul.f32 %v6424_v17, %v6424_v17  ;;  %v1341_v1 = vmul.f32 %v6426_v25, %v6426_v25 }
 0x401   :  { %v1387_v33 = vadd.f32 %v1386_v27, %v1332_v45  ;;  %v1339_v45 = vmul.f32 %v6420_v36, %v6420_v36  ;;  %v1251_v59 = vadd.f32 %v1250_v2, %v6414_v61  ;;  %v1288_v27 = vadd.f32 %v1287_v47, %v6416_v40 }
 0x402   :  { %v1425_v13 = vadd.f32 %v1424_v28, %v1335_v10 }
 0x403   :  { %v6549_v41 = vpop.f32.mrf.mxu2  ;;  %v6551_v49 = vpop.f32.mrf.mxu3  ;;  %v1388_v30 = vadd.f32 %v1387_v33, %v1334_v39  ;;  %v1252_v8 = vadd.f32 %v1251_v59, %v6418_v35  ;;  %v1289_v53 = vadd.f32 %v1288_v27, %v6420_v36  ;;  %v1345_v59 = vmul.f32 %v6436_v37, %v6436_v37 }
 0x404   :  { %10346 = vst [vmem:[#allocation19_spill] sm:$0xff] %v6551_v49  ;;  %v1426_v60 = vadd.f32 %v1425_v13, %v1337_v18  ;;  %v1343_v13 = vmul.f32 %v6430_v54, %v6430_v54 }
 0x405   :  { %v1389_v57 = vadd.f32 %v1388_v30, %v1336_v16  ;;  %v1342_v16 = vmul.f32 %v6428_v44, %v6428_v44  ;;  %v1253_v18 = vadd.f32 %v1252_v8, %v6424_v17  ;;  %v1290_v2 = vadd.f32 %v1289_v53, %v6426_v25 }
 0x406   :  { %v1427_v28 = vadd.f32 %v1426_v60, %v1339_v45  ;;  %v1347_v8 = vmul.f32 %v6440_v31, %v6440_v31 }
 0x407   :  { %v1390_v33 = vadd.f32 %v1389_v57, %v1338_v3  ;;  %v1254_v3 = vadd.f32 %v1253_v18, %v6428_v44  ;;  %v1291_v60 = vadd.f32 %v1290_v2, %v6430_v54  ;;  %v1346_v57 = vmul.f32 %v6438_v5, %v6438_v5 }
 0x408   :  { %v1428_v30 = vadd.f32 %v1427_v28, %v1341_v1  ;;  %v1348_v28 = vmul.f32 %v6442_v38, %v6442_v38  ;;  %v1349_v18 = vmul.f32 %v6444_v56, %v6444_v56 }
 0x409   :  { %v1391_v47 = vadd.f32 %v1390_v33, %v1340_v0  ;;  %v1255_v0 = vadd.f32 %v1254_v3, %v6434_v55  ;;  %v1292_v1 = vadd.f32 %v1291_v60, %v6436_v37 }
 0x40a   :  { %v1429_v27 = vadd.f32 %v1428_v30, %v1343_v13 }
 0x40b   :  { %v6583_v39 = vpop.f32.mrf.mxu2  ;;  %v6585_v10 = vpop.f32.mrf.mxu3  ;;  %v1392_v45 = vadd.f32 %v1391_v47, %v1342_v16  ;;  %v1256_v2 = vadd.f32 %v1255_v0, %v6438_v5  ;;  %v1293_v47 = vadd.f32 %v1292_v1, %v6440_v31  ;;  %v1353_v0 = vmul.f32 %v6455_v24, %v6455_v24 }
 0x40c   :  { %10347 = vst [vmem:[#allocation20_spill] sm:$0xff] %v6583_v39  ;;  %v1430_v33 = vadd.f32 %v1429_v27, %v1345_v59  ;;  %v1351_v59 = vmul.f32 %v6451_v29, %v6451_v29 }
 0x40d   :  { %10348 = vst [vmem:[#allocation21_spill] sm:$0xff] %v6585_v10  ;;  %v1393_v53 = vadd.f32 %v1392_v45, %v1344_v32  ;;  %v1350_v32 = vmul.f32 %v6449_v26, %v6449_v26  ;;  %v1257_v60 = vadd.f32 %v1256_v2, %v6442_v38  ;;  %v1294_v45 = vadd.f32 %v1293_v47, %v6444_v56 }
 0x40e   :  { %v1431_v3 = vadd.f32 %v1430_v33, %v1347_v8  ;;  %v1354_v33 = vmul.f32 %v6457_v9, %v6457_v9  ;;  %v1355_v2 = vmul.f32 %v6459_v7, %v6459_v7 }
 0x40f   :  { %v1394_v30 = vadd.f32 %v1393_v53, %v1346_v57  ;;  %v1258_v57 = vadd.f32 %v1257_v60, %v6449_v26  ;;  %v1295_v8 = vadd.f32 %v1294_v45, %v6451_v29  ;;  %v1357_v60 = vmul.f32 %v6469_v43, %v6469_v43 }
 0x410   :  { %v1432_v22 = vadd.f32 %v1431_v3, %v1349_v18  ;;  %v1356_v3 = vmul.f32 %v6467_v14, %v6467_v14 }
 0x411   :  { %v1395_v27 = vadd.f32 %v1394_v30, %v1348_v28  ;;  %v1259_v28 = vadd.f32 %v1258_v57, %v6453_v6  ;;  %v1296_v18 = vadd.f32 %v1295_v8, %v6455_v24 }
 0x412   :  { %v1433_v53 = vadd.f32 %v1432_v22, %v1351_v59 }
 0x413   :  { %v6611_v16 = vpop.f32.mrf.mxu2  ;;  %v6613_v13 = vpop.f32.mrf.mxu3  ;;  %v1396_v1 = vadd.f32 %v1395_v27, %v1350_v32  ;;  %v1260_v59 = vadd.f32 %v1259_v28, %v6457_v9  ;;  %v1297_v45 = vadd.f32 %v1296_v18, %v6459_v7  ;;  %v1361_v28 = vmul.f32 %v6483_v20, %v6483_v20 }
 0x414   :  { %10349 = vst [vmem:[#allocation22_spill] sm:$0xff] %v6611_v16  ;;  %v1434_v30 = vadd.f32 %v1433_v53, %v1353_v0  ;;  %v1359_v0 = vmul.f32 %v6473_v62, %v6473_v62 }
 0x415   :  { %10350 = vst [vmem:[#allocation23_spill] sm:$0xff] %v6613_v13  ;;  %v1397_v47 = vadd.f32 %v1396_v1, %v1352_v21  ;;  %v1358_v21 = vmul.f32 %v6471_v23, %v6471_v23  ;;  %v1261_v8 = vadd.f32 %v1260_v59, %v6467_v14  ;;  %v1298_v1 = vadd.f32 %v1297_v45, %v6469_v43  ;;  %v10354_v59 = vld [vmem:[#allocation18_spill] sm:$0xff] }
 0x416   :  { %v1435_v57 = vadd.f32 %v1434_v30, %v1355_v2  ;;  %v10353_v30 = vld [vmem:[#allocation17_spill] sm:$0xff]  ;;  %v1363_v45 = vmul.f32 %v10354_v59, %v10354_v59  ;;  %v1364_v43 = vmul.f32 %v6521_v4, %v6521_v4 }
 0x417   :  { %v1398_v27 = vadd.f32 %v1397_v47, %v1354_v33  ;;  %v1262_v33 = vadd.f32 %v1261_v8, %v6471_v23  ;;  %v1299_v2 = vadd.f32 %v1298_v1, %v6473_v62  ;;  %v1362_v50 = vmul.f32 %v10353_v30, %v10353_v30 }
 0x418   :  { %v1436_v11 = vadd.f32 %v1435_v57, %v1357_v60  ;;  %v1365_v8 = vmul.f32 %v6523_v12, %v6523_v12 }
 0x419   :  { %v1399_v53 = vadd.f32 %v1398_v27, %v1356_v3  ;;  %v1263_v3 = vadd.f32 %v1262_v33, %v6481_v48  ;;  %v1300_v60 = vadd.f32 %v1299_v2, %v6483_v20  ;;  %v1368_v48 = vmul.f32 %v6583_v39, %v6583_v39 }
 0x41a   :  { %v1437_v47 = vadd.f32 %v1436_v11, %v1359_v0 }
 0x41b   :  { %v6639_v32 = vpop.f32.mrf.mxu2  ;;  %v6641_v22 = vpop.f32.mrf.mxu3  ;;  %v1400_v18 = vadd.f32 %v1399_v53, %v1358_v21  ;;  %v1264_v0 = vadd.f32 %v1263_v3, %v10353_v30  ;;  %v1301_v1 = vadd.f32 %v1300_v60, %v10354_v59  ;;  %v1369_v3 = vmul.f32 %v6585_v10, %v6585_v10 }
 0x41c   :  { %10351 = vst [vmem:[#allocation24_spill] sm:$0xff] %v6639_v32  ;;  %v1438_v57 = vadd.f32 %v1437_v47, %v1361_v28  ;;  %v1367_v28 = vmul.f32 %v6551_v49, %v6551_v49 }
 0x41d   :  { %10352 = vst [vmem:[#allocation25_spill] sm:$0xff] %v6641_v22  ;;  %v1401_v27 = vadd.f32 %v1400_v18, %v1360_v52  ;;  %v1366_v52 = vmul.f32 %v6549_v41, %v6549_v41  ;;  %v1265_v2 = vadd.f32 %v1264_v0, %v6521_v4  ;;  %v1302_v18 = vadd.f32 %v1301_v1, %v6523_v12 }
 0x41e   :  { %v1439_v33 = vadd.f32 %v1438_v57, %v1363_v45  ;;  %v1370_v57 = vmul.f32 %v6611_v16, %v6611_v16  ;;  %v1371_v0 = vmul.f32 %v6613_v13, %v6613_v13 }
 0x41f   :  { %v1402_v53 = vadd.f32 %v1401_v27, %v1362_v50  ;;  %v1266_v50 = vadd.f32 %v1265_v2, %v6549_v41  ;;  %v1303_v45 = vadd.f32 %v1302_v18, %v6551_v49  ;;  %v1373_v2 = vmul.f32 %v6641_v22, %v6641_v22 }
 0x420   :  { %v1440_v20 = vadd.f32 %v1439_v33, %v1365_v8  ;;  %v1372_v33 = vmul.f32 %v6639_v32, %v6639_v32 }
 0x421   :  { %v1403_v47 = vadd.f32 %v1402_v53, %v1364_v43  ;;  %v1267_v43 = vadd.f32 %v1266_v50, %v6583_v39  ;;  %v1304_v8 = vadd.f32 %v1303_v45, %v6585_v10 }
 0x422   :  { %v1441_v27 = vadd.f32 %v1440_v20, %v1367_v28 }
 0x423   :  { %v6667_v21 = vpop.f32.mrf.mxu2  ;;  %v6669_v11 = vpop.f32.mrf.mxu3  ;;  %v1404_v60 = vadd.f32 %v1403_v47, %v1366_v52  ;;  %v1268_v28 = vadd.f32 %v1267_v43, %v6611_v16  ;;  %v1305_v18 = vadd.f32 %v1304_v8, %v6613_v13 }
 0x424   :  { %10355 = vst [vmem:[#allocation17_spill] sm:$0xff] %v6667_v21  ;;  %v1442_v53 = vadd.f32 %v1441_v27, %v1369_v3  ;;  %v1375_v3 = vmul.f32 %v6669_v11, %v6669_v11 }
 0x425   :  { %10356 = vst [vmem:[#allocation18_spill] sm:$0xff] %v6669_v11  ;;  %v1405_v1 = vadd.f32 %v1404_v60, %v1368_v48  ;;  %v1374_v48 = vmul.f32 %v6667_v21, %v6667_v21  ;;  %v1269_v45 = vadd.f32 %v1268_v28, %v6639_v32  ;;  %v1306_v60 = vadd.f32 %v1305_v18, %v6641_v22 }
 0x426   :  { %v1443_v50 = vadd.f32 %v1442_v53, %v1371_v0 }
 0x427   :  { %v1406_v47 = vadd.f32 %v1405_v1, %v1370_v57  ;;  %v1270_v57 = vadd.f32 %v1269_v45, %v6667_v21  ;;  %v1307_v0 = vadd.f32 %v1306_v60, %v6669_v11 }
 0x428   :  { %v1444_v10 = vadd.f32 %v1443_v50, %v1373_v2 }
 0x429   :  { %v1407_v27 = vadd.f32 %v1406_v47, %v1372_v33 }
 0x42a   :  { %v1445_v1 = vadd.f32 %v1444_v10, %v1375_v3 }
 0x42b   :  { %v6695_v52 = vpop.f32.mrf.mxu2  ;;  %v6697_v20 = vpop.f32.mrf.mxu3  ;;  %v1408_v8 = vadd.f32 %v1407_v27, %v1374_v48 }
 0x42c   :  { %10357 = vst [vmem:[#allocation26_spill] sm:$0xff] %v6695_v52  ;;  %v1376_v39 = vmul.f32 %v6695_v52, %v6695_v52  ;;  %v1377_v43 = vmul.f32 %v6697_v20, %v6697_v20  ;;  %v1271_v53 = vadd.f32 %v1270_v57, %v6695_v52  ;;  %v1308_v28 = vadd.f32 %v1307_v0, %v6697_v20 }
 0x42d   :  { %10358 = vst [vmem:[#allocation27_spill] sm:$0xff] %v6697_v20 }
 0x42e   :  { %v1409_v32 = vadd.f32 %v1408_v8, %v1376_v39  ;;  %v1446_v18 = vadd.f32 %v1445_v1, %v1377_v43 }
 0x433   :  { %v6715_v33 = vpop.f32.mrf.mxu2  ;;  %v6717_v2 = vpop.f32.mrf.mxu3 }
 0x434   :  { %10359 = vst [vmem:[#allocation28_spill] sm:$0xff] %v6715_v33  ;;  %v1272_v47 = vadd.f32 %v1271_v53, %v6715_v33  ;;  %v1378_v50 = vmul.f32 %v6715_v33, %v6715_v33  ;;  %v1309_v45 = vadd.f32 %v1308_v28, %v6717_v2  ;;  %v1379_v10 = vmul.f32 %v6717_v2, %v6717_v2 }
 0x436   :  { %v1273_v48 = vrot.slane %v1272_v47, 4  ;;  %v1410_v3 = vadd.f32 %v1409_v32, %v1378_v50  ;;  %v1310_v60 = vrot.slane %v1309_v45, 4  ;;  %v1447_v27 = vadd.f32 %v1446_v18, %v1379_v10 }
 0x438   :  { %v1274_v39 = vadd.f32 %v1273_v48, %v1272_v47  ;;  %v1411_v43 = vrot.slane %v1410_v3, 4  ;;  %v1311_v57 = vadd.f32 %v1310_v60, %v1309_v45  ;;  %v1448_v0 = vrot.slane %v1447_v27, 4 }
 0x43a   :  { %v1275_v8 = vrot.slane %v1274_v39, 2  ;;  %v1412_v1 = vadd.f32 %v1411_v43, %v1410_v3  ;;  %v1312_v20 = vrot.slane %v1311_v57, 2  ;;  %v1449_v53 = vadd.f32 %v1448_v0, %v1447_v27 }
 0x43c   :  { %v1276_v52 = vadd.f32 %v1275_v8, %v1274_v39  ;;  %v1413_v11 = vrot.slane %v1412_v1, 2  ;;  %v1313_v33 = vadd.f32 %v1312_v20, %v1311_v57  ;;  %v1450_v21 = vrot.slane %v1449_v53, 2 }
 0x43e   :  { %v1277_v28 = vrot.slane %v1276_v52, 1  ;;  %v1414_v22 = vadd.f32 %v1413_v11, %v1412_v1  ;;  %v1314_v13 = vrot.slane %v1313_v33, 1  ;;  %v1451_v16 = vadd.f32 %v1450_v21, %v1449_v53 }
 0x440   :  { %v1278_v49 = vadd.f32 %v1277_v28, %v1276_v52  ;;  %v1415_v32 = vrot.slane %v1414_v22, 1  ;;  %v1315_v50 = vadd.f32 %v1314_v13, %v1313_v33  ;;  %v1452_v18 = vrot.slane %v1451_v16, 1 }
 0x442   :  { %v1416_v47 = vadd.f32 %v1415_v32, %v1414_v22  ;;  %v1454_v10 = vmul.f32 0.00390625, %v1278_v49  ;;  %v1453_v45 = vadd.f32 %v1452_v18, %v1451_v16  ;;  %v1455_v48 = vmul.f32 0.00390625, %v1315_v50  ;;  %v5085_v49 = vld [vmem:[%s10234_s10 + $0x58] sm:$0xff]  ;;  %v5076_v50 = vld [vmem:[%s10234_s10 + $0x10] sm:$0xff] }
 0x443   :  { %1960 = vmatpush.bf16.msrb.mxu1 %v5085_v49  ;;  %v5084_v18 = vld [vmem:[%s10234_s10 + $0x50] sm:$0xff]  ;;  %1872 = vmatpush.bf16.msrb.mxu0 %v5076_v50 }
 0x444   :  { %v1456_v60 = vmul.f32 0.00390625, %v1416_v47  ;;  %v1458_v3 = vmul.f32 %v1454_v10, %v1454_v10  ;;  %v1457_v43 = vmul.f32 0.00390625, %v1453_v45  ;;  %v1459_v27 = vmul.f32 %v1455_v48, %v1455_v48  ;;  %v1462_v45 = vld [vmem:[%s10235_s8] sm:$0x3] }
 0x446   :  { %v1460_v39 = vsub.f32 %v1456_v60, %v1458_v3  ;;  %v1461_v0 = vsub.f32 %v1457_v43, %v1459_v27  ;;  %v5075_v27 = vld [vmem:[%s10234_s10 + $0x8] sm:$0xff] }
 0x447   :  { %1961 = vmatpush.bf16.msrb.mxu1 %v5084_v18  ;;  %1873 = vmatpush.bf16.msrb.mxu0 %v5075_v27  ;;  %v10365_v27 = vld [vmem:[#allocation14_spill] sm:$0xff] }
 0x448   :  { %v1463_v20 = vadd.f32 1e-05, %v1460_v39  ;;  %v1464_v57 = vadd.f32 1e-05, %v1461_v0  ;;  %v5083_v39 = vld [vmem:[%s10234_s10 + $0x48] sm:$0xff] }
 0x44a   :  { %5114 = vrsqrt.f32 %v1463_v20  ;;  %vm1481_vm9 = vweird.f32 %v1464_v57  ;;  %vm1471_vm11 = vweird.f32 %v1463_v20 }
 0x44b   :  { %5116 = vrsqrt.f32 %v1464_v57  ;;  %1962 = vmatpush.bf16.msrb.mxu1 %v5083_v39  ;;  %v10366_v39 = vld [vmem:[#allocation15_spill] sm:$0xff] }
 0x450   :  { %v5115_v11 = vpop.eup %5114 }
 0x451   :  { %v5117_v21 = vpop.eup %5116  ;;  %v1466_v52 = vmul.f32 %v5115_v11, %v1463_v20  ;;  %vm1472_vm8 = vweird.f32 %v5115_v11 }
 0x452   :  { %v1476_v8 = vmul.f32 %v5117_v21, %v1464_v57  ;;  %vm1482_vm7 = vweird.f32 %v5117_v21  ;;  %vm1473_vm13 = vmor %vm1471_vm11, %vm1472_vm8 }
 0x453   :  { %v1467_v13 = vmul.f32 %v5115_v11, %v1466_v52  ;;  %vm1483_vm10 = vmor %vm1481_vm9, %vm1482_vm7 }
 0x454   :  { %v1477_v33 = vmul.f32 %v5117_v21, %v1476_v8 }
 0x455   :  { %v1468_v16 = vmul.f32 0.5, %v1467_v13  ;;  %v1492_v13 = vld [vmem:[%s10236_s9] sm:$0x3] }
 0x456   :  { %v1478_v22 = vmul.f32 0.5, %v1477_v33 }
 0x457   :  { %v1469_v1 = vsub.f32 1.5, %v1468_v16 }
 0x458   :  { %v1479_v53 = vsub.f32 1.5, %v1478_v22 }
 0x459   :  { %v1470_v28 = vmul.f32 %v5115_v11, %v1469_v1  ;;  %v10361_v1 = vld [vmem:[#allocation2_spill] sm:$0xff] }
 0x45a   :  { %v1480_v32 = vmul.f32 %v5117_v21, %v1479_v53 }
 0x45b   :  { %v1474_v3 = vsel %vm1473_vm13, %v5115_v11, %v1470_v28  ;;  %v5074_v11 = vld [vmem:[%s10234_s10] sm:$0xff] }
 0x45c   :  { %v1484_v47 = vsel %vm1483_vm10, %v5117_v21, %v1480_v32  ;;  %v5082_v21 = vld [vmem:[%s10234_s10 + $0x40] sm:$0xff]  ;;  %1874 = vmatpush.bf16.msrb.mxu0 %v5074_v11 }
 0x45d   :  { %v1487_v60 = vrot.slane %v1484_v47, 7  ;;  %1963 = vmatpush.bf16.msrb.mxu1 %v5082_v21  ;;  %v10368_v21 = vld [vmem:[#allocation19_spill] sm:$0xff] }
 0x45f   :  { %v1489_v43 = vsel %vm1488_vm12, %v1474_v3, %v1487_v60 }
 0x460   :  { %v1491_v0 = vmul.f32 %v1489_v43, %v1462_v45 }
 0x462   :  { %v6744_v20 = vperm.slane %v1491_v0, 0  ;;  %v6746_v57 = vperm.slane %v1491_v0, 1  ;;  %v10367_v0 = vld [vmem:[#allocation16_spill] sm:$0xff] }
 0x464   :  { %10360 = vst [vmem:[#allocation29_spill] sm:$0xff] %v6746_v57  ;;  %v1499_v52 = vmul.f32 %v6746_v57, %v1455_v48  ;;  %v1569_v8 = vmul.f32 %v6746_v57, %v6717_v2  ;;  %v1498_v33 = vmul.f32 %v6744_v20, %v1454_v10  ;;  %v1506_v22 = vmul.f32 %v6744_v20, %v6372_v46  ;;  %v10362_v10 = vld [vmem:[#allocation3_spill] sm:$0xff] }
 0x465   :  { %v1507_v48 = vmul.f32 %v6746_v57, %v6374_v19  ;;  %v6768_v2 = vmul.f32 %v6744_v20, %v10361_v1  ;;  %v6772_v28 = vmul.f32 %v6746_v57, %v6378_v63  ;;  %v6776_v32 = vmul.f32 %v6744_v20, %v10362_v10  ;;  %v10373_v1 = vld [vmem:[#allocation24_spill] sm:$0xff]  ;;  %v10375_v10 = vld [vmem:[#allocation17_spill] sm:$0xff] }
 0x466   :  { %v1502_v49 = vrot.slane %v1499_v52, 7  ;;  %v6780_v50 = vmul.f32 %v6744_v20, %v6384_v58  ;;  %v1522_v46 = vmul.f32 %v6744_v20, %v6404_v42  ;;  %v1523_v19 = vmul.f32 %v6746_v57, %v6406_v34 }
 0x467   :  { %v1524_v18 = vmul.f32 %v6744_v20, %v6408_v15  ;;  %v1525_v63 = vmul.f32 %v6746_v57, %v6410_v51  ;;  %v1526_v58 = vmul.f32 %v6744_v20, %v6414_v61  ;;  %v1527_v60 = vmul.f32 %v6746_v57, %v6416_v40 }
 0x468   :  { %v1503_v16 = vsel %vm1488_vm12, %v1498_v33, %v1502_v49  ;;  %10363 = vst [vmem:[#allocation2_spill] sm:$0xff] %v6780_v50  ;;  %v1528_v42 = vmul.f32 %v6744_v20, %v6418_v35  ;;  %v1529_v34 = vmul.f32 %v6746_v57, %v6420_v36  ;;  %v1530_v15 = vmul.f32 %v6744_v20, %v6424_v17  ;;  %v10370_v33 = vld [vmem:[#allocation21_spill] sm:$0xff]  ;;  %v10371_v49 = vld [vmem:[#allocation22_spill] sm:$0xff] }
 0x469   :  { %v1505_v53 = vsub.f32 %v1492_v13, %v1503_v16  ;;  %v1531_v51 = vmul.f32 %v6746_v57, %v6426_v25  ;;  %v1532_v61 = vmul.f32 %v6744_v20, %v6428_v44  ;;  %v1533_v40 = vmul.f32 %v6746_v57, %v6430_v54  ;;  %v10372_v16 = vld [vmem:[#allocation23_spill] sm:$0xff] }
 0x46a   :  { %v1534_v35 = vmul.f32 %v6744_v20, %v6434_v55  ;;  %v1535_v36 = vmul.f32 %v6746_v57, %v6436_v37  ;;  %v1536_v17 = vmul.f32 %v6744_v20, %v6438_v5  ;;  %v1537_v25 = vmul.f32 %v6746_v57, %v6440_v31 }
 0x46b   :  { %v6790_v47 = vperm.slane %v1505_v53, 0  ;;  %v6792_v45 = vperm.slane %v1505_v53, 1  ;;  %v1538_v43 = vmul.f32 %v6744_v20, %v6442_v38  ;;  %v1539_v44 = vmul.f32 %v6746_v57, %v6444_v56  ;;  %v10374_v53 = vld [vmem:[#allocation25_spill] sm:$0xff] }
 0x46c   :  { %v1540_v54 = vmul.f32 %v6744_v20, %v6449_v26  ;;  %v1541_v55 = vmul.f32 %v6746_v57, %v6451_v29  ;;  %v1542_v37 = vmul.f32 %v6744_v20, %v6453_v6  ;;  %v1543_v5 = vmul.f32 %v6746_v57, %v6455_v24 }
 0x46d   :  { %v6807_v3 = vadd.f32 %v6792_v45, %v1569_v8  ;;  %v1544_v31 = vmul.f32 %v6744_v20, %v6457_v9  ;;  %v1545_v38 = vmul.f32 %v6746_v57, %v6459_v7  ;;  %v1546_v56 = vmul.f32 %v6744_v20, %v6467_v14  ;;  %v10369_v8 = vld [vmem:[#allocation20_spill] sm:$0xff] }
 0x46e   :  { %v1547_v26 = vmul.f32 %v6746_v57, %v10365_v27  ;;  %v1548_v29 = vmul.f32 %v6744_v20, %v6471_v23  ;;  %v1549_v6 = vmul.f32 %v6746_v57, %v6473_v62  ;;  %v1550_v24 = vmul.f32 %v6744_v20, %v10366_v39  ;;  %v10376_v39 = vld [vmem:[#allocation18_spill] sm:$0xff] }
 0x46f   :  { %10364 = vst [vmem:[#allocation3_spill] sm:$0xff] %v6807_v3  ;;  %v1551_v9 = vmul.f32 %v6746_v57, %v10367_v0  ;;  %v1552_v7 = vmul.f32 %v6744_v20, %v10353_v30  ;;  %v1553_v14 = vmul.f32 %v6746_v57, %v10354_v59  ;;  %v1554_v11 = vmul.f32 %v6744_v20, %v6521_v4  ;;  %v10379_v3 = vld [vmem:[#allocation28_spill] sm:$0xff] }
 0x470   :  { %v1555_v23 = vmul.f32 %v6746_v57, %v6523_v12  ;;  %v1556_v62 = vmul.f32 %v6744_v20, %v6549_v41  ;;  %v1557_v52 = vmul.f32 %v6746_v57, %v10368_v21  ;;  %v1558_v13 = vmul.f32 %v6744_v20, %v10369_v8  ;;  %v10377_v21 = vld [vmem:[#allocation26_spill] sm:$0xff] }
 0x471   :  { %v1559_v30 = vmul.f32 %v6746_v57, %v10370_v33  ;;  %v1560_v59 = vmul.f32 %v6744_v20, %v10371_v49  ;;  %v1561_v4 = vmul.f32 %v6746_v57, %v10372_v16  ;;  %v1562_v12 = vmul.f32 %v6744_v20, %v10373_v1  ;;  %v10378_v33 = vld [vmem:[#allocation27_spill] sm:$0xff] }
 0x472   :  { %v1563_v41 = vmul.f32 %v6746_v57, %v10374_v53  ;;  %v1564_v27 = vmul.f32 %v6744_v20, %v10375_v10  ;;  %v1565_v0 = vmul.f32 %v6746_v57, %v10376_v39  ;;  %v1566_v8 = vmul.f32 %v6744_v20, %v10377_v21 }
 0x473   :  { %v1567_v49 = vmul.f32 %v6746_v57, %v10378_v33  ;;  %v1568_v16 = vmul.f32 %v6744_v20, %v10379_v3  ;;  %v1575_v1 = vadd.f32 %v6790_v47, %v1506_v22  ;;  %v6885_v50 = vadd.f32 %v6792_v45, %v1507_v48 }
 0x474   :  { %v6888_v53 = vadd.f32 %v6790_v47, %v1522_v46  ;;  %v6891_v10 = vadd.f32 %v6792_v45, %v1523_v19  ;;  %v6894_v39 = vadd.f32 %v6790_v47, %v1524_v18  ;;  %v6897_v21 = vadd.f32 %v6792_v45, %v1525_v63 }
 0x475   :  { %v6900_v33 = vadd.f32 %v6790_v47, %v1526_v58  ;;  %v6903_v22 = vadd.f32 %v6792_v45, %v1527_v60  ;;  %v6906_v48 = vadd.f32 %v6790_v47, %v1528_v42  ;;  %v6909_v46 = vadd.f32 %v6792_v45, %v1529_v34 }
 0x476   :  { %v6912_v19 = vadd.f32 %v6790_v47, %v1530_v15  ;;  %v6915_v18 = vadd.f32 %v6792_v45, %v1531_v51  ;;  %v6918_v63 = vadd.f32 %v6790_v47, %v1532_v61  ;;  %v6921_v58 = vadd.f32 %v6792_v45, %v1533_v40 }
 0x477   :  { %v6924_v60 = vadd.f32 %v6790_v47, %v1534_v35  ;;  %v6927_v42 = vadd.f32 %v6792_v45, %v1535_v36  ;;  %v6930_v34 = vadd.f32 %v6790_v47, %v1536_v17  ;;  %v6933_v15 = vadd.f32 %v6792_v45, %v1537_v25 }
 0x478   :  { %v6936_v51 = vadd.f32 %v6790_v47, %v1538_v43  ;;  %v6939_v3 = vadd.f32 %v6792_v45, %v1539_v44  ;;  %v6942_v61 = vadd.f32 %v6790_v47, %v1540_v54  ;;  %v6945_v40 = vadd.f32 %v6792_v45, %v1541_v55 }
 0x479   :  { %v6948_v35 = vadd.f32 %v6790_v47, %v1542_v37  ;;  %v6951_v36 = vadd.f32 %v6792_v45, %v1543_v5  ;;  %v6954_v17 = vadd.f32 %v6790_v47, %v1544_v31  ;;  %v6957_v25 = vadd.f32 %v6792_v45, %v1545_v38 }
 0x47a   :  { %v6960_v43 = vadd.f32 %v6790_v47, %v1546_v56  ;;  %v6963_v44 = vadd.f32 %v6792_v45, %v1547_v26  ;;  %v6966_v54 = vadd.f32 %v6790_v47, %v1548_v29  ;;  %v6969_v55 = vadd.f32 %v6792_v45, %v1549_v6 }
 0x47b   :  { %v6972_v37 = vadd.f32 %v6790_v47, %v1550_v24  ;;  %v6975_v5 = vadd.f32 %v6792_v45, %v1551_v9  ;;  %v6978_v31 = vadd.f32 %v6790_v47, %v1552_v7  ;;  %v6981_v38 = vadd.f32 %v6792_v45, %v1553_v14 }
 0x47c   :  { %v6984_v56 = vadd.f32 %v6790_v47, %v1554_v11  ;;  %v6987_v26 = vadd.f32 %v6792_v45, %v1555_v23  ;;  %v6990_v29 = vadd.f32 %v6790_v47, %v1556_v62  ;;  %v6993_v6 = vadd.f32 %v6792_v45, %v1557_v52 }
 0x47d   :  { %v6996_v24 = vadd.f32 %v6790_v47, %v1558_v13  ;;  %v6999_v9 = vadd.f32 %v6792_v45, %v1559_v30  ;;  %v7002_v7 = vadd.f32 %v6790_v47, %v1560_v59  ;;  %v7005_v14 = vadd.f32 %v6792_v45, %v1561_v4 }
 0x47e   :  { %v7008_v11 = vadd.f32 %v6790_v47, %v1562_v12  ;;  %v7011_v23 = vadd.f32 %v6792_v45, %v1563_v41  ;;  %v7014_v62 = vadd.f32 %v6790_v47, %v1564_v27  ;;  %v7017_v52 = vadd.f32 %v6792_v45, %v1565_v0  ;;  %v10387_v12 = vld [vmem:[#allocation4_spill] sm:$0xff] }
 0x47f   :  { %10380 = vst [vmem:[#allocation14_spill] sm:$0xff] %v7005_v14  ;;  %v7020_v13 = vadd.f32 %v6790_v47, %v1566_v8  ;;  %v7023_v30 = vadd.f32 %v6792_v45, %v1567_v49  ;;  %v7026_v59 = vadd.f32 %v6790_v47, %v1568_v16  ;;  %v1577_v4 = vadd.f32 %v6790_v47, %v6768_v2  ;;  %v10388_v8 = vld [vmem:[#allocation5_spill] sm:$0xff] }
 0x480   :  { %10381 = vst [vmem:[#allocation15_spill] sm:$0xff] %v7008_v11  ;;  %v1511_v41 = vmul.f32 %v6746_v57, %v10387_v12  ;;  %v1639_v27 = vmax.f32 %v1575_v1, 0.0  ;;  %v1578_v0 = vadd.f32 %v6792_v45, %v6772_v28  ;;  %v1579_v16 = vadd.f32 %v6790_v47, %v6776_v32 }
 0x481   :  { %10382 = vst [vmem:[#allocation16_spill] sm:$0xff] %v7011_v23  ;;  %v1641_v49 = vmax.f32 %v1577_v4, 0.0  ;;  %v10390_v4 = vld [vmem:[#allocation6_spill] sm:$0xff]  ;;  %v1655_v32 = vmax.f32 %v6888_v53, 0.0 }
 0x482   :  { %10383 = vst [vmem:[#allocation19_spill] sm:$0xff] %v7014_v62  ;;  %v1642_v2 = vmax.f32 %v1578_v0, 0.0  ;;  %v1580_v12 = vadd.f32 %v6792_v45, %v1511_v41  ;;  %v1643_v28 = vmax.f32 %v1579_v16, 0.0  ;;  %v10391_v41 = vld [vmem:[#allocation3_spill] sm:$0xff]  ;;  %v1660_v16 = vmax.f32 %v6903_v22, 0.0 }
 0x483   :  { %10384 = vst [vmem:[#allocation20_spill] sm:$0xff] %v7017_v52  ;;  %v1640_v52 = vmax.f32 %v6885_v50, 0.0  ;;  %v1703_v62 = vpack.c.bf16 %v1641_v49, %v1639_v27  ;;  %v1656_v27 = vmax.f32 %v6891_v10, 0.0  ;;  %v1702_v0 = vmax.f32 %v10391_v41, 0.0 }
 0x484   :  { %10385 = vst [vmem:[#allocation21_spill] sm:$0xff] %v7020_v13  ;;  %v1513_v13 = vmul.f32 %v6746_v57, %v10388_v8  ;;  %v1644_v14 = vmax.f32 %v1580_v12, 0.0  ;;  %v7045_v57 = vmul.f32 %v6744_v20, %v10390_v4  ;;  %v1661_v49 = vmax.f32 %v6906_v48, 0.0 }
 0x485   :  { %10386 = vst [vmem:[#allocation22_spill] sm:$0xff] %v7023_v30  ;;  %v10389_v30 = vld [vmem:[#allocation2_spill] sm:$0xff]  ;;  %v1704_v11 = vpack.c.bf16 %v1642_v2, %v1640_v52  ;;  %1875 = vmatmul.bf16.vlgmr.msrb.gmra.mxu0 %v1703_v62  ;;  %v1701_v52 = vmax.f32 %v7026_v59, 0.0  ;;  %v1662_v10 = vmax.f32 %v6909_v46, 0.0  ;;  %v1667_v48 = vmax.f32 %v6924_v60, 0.0 }
 0x486   :  { %v1581_v23 = vadd.f32 %v6790_v47, %v10389_v30  ;;  %v1582_v1 = vadd.f32 %v6792_v45, %v1513_v13  ;;  %v1657_v30 = vmax.f32 %v6894_v39, 0.0  ;;  %v1659_v13 = vmax.f32 %v6900_v33, 0.0 }
 0x487   :  { %1964 = vmatmul.bf16.vlgmr.msrb.gmra.mxu1 %v1704_v11  ;;  %v1663_v39 = vmax.f32 %v6912_v19, 0.0  ;;  %v7067_v33 = vpack.c.bf16 %v1662_v10, %v1660_v16  ;;  %v1669_v22 = vmax.f32 %v6930_v34, 0.0  ;;  %v1670_v19 = vmax.f32 %v6933_v15, 0.0  ;;  %v10392_v10 = vld [vmem:[#allocation14_spill] sm:$0xff] }
 0x488   :  { %v1645_v50 = vmax.f32 %v1581_v23, 0.0  ;;  %v1646_v8 = vmax.f32 %v1582_v1, 0.0  ;;  %v1658_v23 = vmax.f32 %v6897_v21, 0.0  ;;  %v7053_v11 = vpack.c.bf16 %v1657_v30, %v1655_v32 }
 0x489   :  { %v7062_v12 = vpack.c.bf16 %v1661_v49, %v1659_v13  ;;  %v1665_v1 = vmax.f32 %v6918_v63, 0.0  ;;  %v1664_v21 = vmax.f32 %v6915_v18, 0.0  ;;  %v1671_v63 = vmax.f32 %v6936_v51, 0.0 }
 0x48a   :  { %v1705_v62 = vpack.c.bf16 %v1645_v50, %v1643_v28  ;;  %v1706_v53 = vpack.c.bf16 %v1646_v8, %v1644_v14  ;;  %v7058_v2 = vpack.c.bf16 %v1658_v23, %v1656_v27  ;;  %v1666_v28 = vmax.f32 %v6921_v58, 0.0 }
 0x48b   :  { %v1668_v14 = vmax.f32 %v6927_v42, 0.0  ;;  %v7072_v50 = vpack.c.bf16 %v1665_v1, %v1663_v39  ;;  %v7078_v8 = vpack.c.bf16 %v1669_v22, %v1667_v48  ;;  %v1673_v18 = vmax.f32 %v6942_v61, 0.0  ;;  %v10393_v1 = vld [vmem:[#allocation15_spill] sm:$0xff]  ;;  %v10396_v22 = vld [vmem:[#allocation20_spill] sm:$0xff] }
 0x48c   :  { %v7074_v46 = vpack.c.bf16 %v1666_v28, %v1664_v21  ;;  %v1672_v58 = vmax.f32 %v6939_v3, 0.0  ;;  %v1674_v60 = vmax.f32 %v6945_v40, 0.0  ;;  %v1675_v42 = vmax.f32 %v6948_v35, 0.0 }
 0x48d   :  { %v7083_v4 = vpack.c.bf16 %v1670_v19, %v1668_v14  ;;  %v1677_v34 = vmax.f32 %v6954_v17, 0.0  ;;  %v1676_v32 = vmax.f32 %v6951_v36, 0.0  ;;  %v7088_v30 = vpack.c.bf16 %v1673_v18, %v1671_v63  ;;  %v10397_v19 = vld [vmem:[#allocation8_spill] sm:$0xff] }
 0x48e   :  { %v7090_v15 = vpack.c.bf16 %v1674_v60, %v1672_v58  ;;  %v1678_v51 = vmax.f32 %v6957_v25, 0.0  ;;  %v1679_v61 = vmax.f32 %v6960_v43, 0.0  ;;  %v1681_v3 = vmax.f32 %v6966_v54, 0.0  ;;  %v10398_v58 = vld [vmem:[#allocation21_spill] sm:$0xff] }
 0x48f   :  { %v7094_v27 = vpack.c.bf16 %v1677_v34, %v1675_v42  ;;  %v1680_v40 = vmax.f32 %v6963_v44, 0.0  ;;  %v1682_v35 = vmax.f32 %v6969_v55, 0.0  ;;  %v1683_v36 = vmax.f32 %v6972_v37, 0.0  ;;  %v10399_v42 = vld [vmem:[#allocation22_spill] sm:$0xff] }
 0x490   :  { %v7099_v23 = vpack.c.bf16 %v1678_v51, %v1676_v32  ;;  %v1685_v17 = vmax.f32 %v6978_v31, 0.0  ;;  %v1684_v13 = vmax.f32 %v6975_v5, 0.0  ;;  %v7104_v49 = vpack.c.bf16 %v1681_v3, %v1679_v61  ;;  %v2049_v5 = vld [vmem:[%s10238_s12 + $0x20] sm:$0xff]  ;;  %v10400_v32 = vld [vmem:[#allocation7_spill] sm:$0xff]  ;;  %v10401_v51 = vld [vmem:[#allocation29_spill] sm:$0xff] }
 0x491   :  { %v7106_v25 = vpack.c.bf16 %v1682_v35, %v1680_v40  ;;  %v1686_v43 = vmax.f32 %v6981_v38, 0.0  ;;  %v1687_v54 = vmax.f32 %v6984_v56, 0.0  ;;  %v1689_v55 = vmax.f32 %v6990_v29, 0.0  ;;  %v2045_v31 = vld [vmem:[%s10238_s12] sm:$0xff]  ;;  %v2047_v38 = vld [vmem:[%s10238_s12 + $0x10] sm:$0xff]  ;;  %2085 = vrot.lane.b32.xlu2 %v2049_v5, %s5536_s1  ;;  %v10402_v3 = vld [vmem:[#allocation9_spill] sm:$0xff] }
 0x492   :  { %v7110_v44 = vpack.c.bf16 %v1685_v17, %v1683_v36  ;;  %v1688_v16 = vmax.f32 %v6987_v26, 0.0  ;;  %v1690_v37 = vmax.f32 %v6993_v6, 0.0  ;;  %v1691_v29 = vmax.f32 %v6996_v24, 0.0  ;;  %2077 = vrot.lane.b32.xlu0 %v2045_v31, %s5536_s1  ;;  %2081 = vrot.lane.b32.xlu1 %v2047_v38, %s5536_s1  ;;  %v2048_v38 = vld [vmem:[%s10238_s12 + $0x18] sm:$0xff] }
 0x493   :  { %v7124_v56 = vpack.c.bf16 %v1686_v43, %v1684_v13  ;;  %v1693_v26 = vmax.f32 %v7002_v7, 0.0  ;;  %v1692_v6 = vmax.f32 %v6999_v9, 0.0  ;;  %v1694_v39 = vmax.f32 %v10392_v10, 0.0  ;;  %v10394_v7 = vld [vmem:[#allocation19_spill] sm:$0xff]  ;;  %v10395_v9 = vld [vmem:[#allocation16_spill] sm:$0xff] }
 0x494   :  { %v1695_v21 = vmax.f32 %v10393_v1, 0.0  ;;  %v1697_v28 = vmax.f32 %v10394_v7, 0.0  ;;  %v1696_v48 = vmax.f32 %v10395_v9, 0.0  ;;  %v1698_v14 = vmax.f32 %v10396_v22, 0.0 }
 0x495   :  { %1880 = vmatmul.bf16.gmra.mxu0 %v1705_v62  ;;  %v7131_v62 = vpack.c.bf16 %v1689_v55, %v1687_v54  ;;  %v7138_v24 = vpack.c.bf16 %v1693_v26, %v1691_v29  ;;  %v1516_v63 = vmul.f32 %v6744_v20, %v10397_v19  ;;  %v7145_v18 = vpack.c.bf16 %v1694_v39, %v1692_v6  ;;  %v2053_v29 = vld [vmem:[%s10238_s12 + $0x40] sm:$0xff]  ;;  %v2051_v26 = vld [vmem:[%s10238_s12 + $0x30] sm:$0xff] }
 0x496   :  { %v1699_v60 = vmax.f32 %v10398_v58, 0.0  ;;  %v1700_v34 = vmax.f32 %v10399_v42, 0.0  ;;  %v1515_v61 = vmul.f32 %v10401_v51, %v10400_v32  ;;  %v1517_v40 = vmul.f32 %v10401_v51, %v10402_v3  ;;  %v10403_v6 = vld [vmem:[#allocation10_spill] sm:$0xff]  ;;  %v10404_v39 = vld [vmem:[#allocation12_spill] sm:$0xff]  ;;  %v2054_v58 = vld [vmem:[%s10238_s12 + $0x48] sm:$0xff] }
 0x497   :  { %1969 = vmatmul.bf16.gmra.mxu1 %v1706_v53  ;;  %v7133_v53 = vpack.c.bf16 %v1690_v37, %v1688_v16  ;;  %v7153_v35 = vpack.c.bf16 %v1697_v28, %v1695_v21  ;;  %v7155_v36 = vpack.c.bf16 %v1698_v14, %v1696_v48  ;;  %v1583_v17 = vadd.f32 %v6790_v47, %v7045_v57  ;;  %v2050_v37 = vld [vmem:[%s10238_s12 + $0x28] sm:$0xff]  ;;  %v10406_v28 = vld [vmem:[#allocation13_spill] sm:$0xff]  ;;  %v2057_v3 = vld [vmem:[%s10238_s12 + $0x60] sm:$0xff] }
 0x498   :  { %v1585_v13 = vadd.f32 %v6790_v47, %v1516_v63  ;;  %v7162_v43 = vpack.c.bf16 %v1701_v52, %v1699_v60  ;;  %v7166_v54 = vpack.c.bf16 %v1702_v0, %v1700_v34  ;;  %v1584_v55 = vadd.f32 %v6792_v45, %v1515_v61  ;;  %v2046_v57 = vld [vmem:[%s10238_s12 + $0x8] sm:$0xff]  ;;  %v2052_v63 = vld [vmem:[%s10238_s12 + $0x38] sm:$0xff]  ;;  %v2059_v61 = vld [vmem:[%s10238_s12 + $0x70] sm:$0xff] }
 0x499   :  { %v1586_v16 = vadd.f32 %v6792_v45, %v1517_v40  ;;  %v1647_v5 = vmax.f32 %v1583_v17, 0.0  ;;  %2087 = vrot.lane.b32.xlu2 %v2050_v37, %s5536_s1  ;;  %v1518_v10 = vmul.f32 %v6744_v20, %v10403_v6  ;;  %v1520_v1 = vmul.f32 %v6744_v20, %v10404_v39  ;;  %v10405_v21 = vld [vmem:[#allocation11_spill] sm:$0xff]  ;;  %v2056_v20 = vld [vmem:[%s10238_s12 + $0x58] sm:$0xff]  ;;  %v2063_v37 = vld [vmem:[%s10238_s12 + $0x90] sm:$0xff] }
 0x49a   :  { %v1649_v59 = vmax.f32 %v1585_v13, 0.0  ;;  %2079 = vrot.lane.b32.xlu0 %v2046_v57, %s5536_s1  ;;  %v1648_v41 = vmax.f32 %v1584_v55, 0.0  ;;  %2083 = vrot.lane.b32.xlu1 %v2048_v38, %s5536_s1  ;;  %v1519_v7 = vmul.f32 %v10401_v51, %v10405_v21  ;;  %v1521_v9 = vmul.f32 %v10401_v51, %v10406_v28  ;;  %v2055_v51 = vld [vmem:[%s10238_s12 + $0x50] sm:$0xff]  ;;  %v2058_v40 = vld [vmem:[%s10238_s12 + $0x68] sm:$0xff] }
 0x49b   :  { %v1650_v0 = vmax.f32 %v1586_v16, 0.0  ;;  %v1587_v48 = vadd.f32 %v6790_v47, %v1518_v10  ;;  %v1589_v22 = vadd.f32 %v6790_v47, %v1520_v1  ;;  %v2062_v17 = vld [vmem:[%s10238_s12 + $0x88] sm:$0xff]  ;;  %v2060_v13 = vld [vmem:[%s10238_s12 + $0x78] sm:$0xff]  ;;  %v2061_v55 = vld [vmem:[%s10238_s12 + $0x80] sm:$0xff]  ;;  %v5537_v38 = vmov 32  }
 0x49c   :  { %v1707_v52 = vpack.c.bf16 %v1649_v59, %v1647_v5  ;;  %v1588_v14 = vadd.f32 %v6792_v45, %v1519_v7  ;;  %v1590_v19 = vadd.f32 %v6792_v45, %v1521_v9  ;;  %v2065_v16 = vld [vmem:[%s10238_s12 + $0xa0] sm:$0xff]  ;;  %v2066_v57 = vld [vmem:[%s10238_s12 + $0xa8] sm:$0xff]  ;;  %v2067_v5 = vld [vmem:[%s10238_s12 + $0xb0] sm:$0xff]  ;;  %5106 = vset.pattern.permute.xlu1 %v5537_v38  ;;  %5107 = vset.pattern.permute.xlu2 %v5537_v38 }
 0x49d   :  { %v1708_v31 = vpack.c.bf16 %v1650_v0, %v1648_v41  ;;  %v1651_v60 = vmax.f32 %v1587_v48, 0.0  ;;  %v1653_v42 = vmax.f32 %v1589_v22, 0.0  ;;  %v2071_v59 = vld [vmem:[%s10238_s12 + $0xd0] sm:$0xff]  ;;  %v2069_v41 = vld [vmem:[%s10238_s12 + $0xc0] sm:$0xff]  ;;  %v2072_v0 = vld [vmem:[%s10238_s12 + $0xd8] sm:$0xff]  ;;  %5108 = vset.pattern.permute.xlu0 %v5537_v38 }
 0x49e   :  { %v1652_v47 = vmax.f32 %v1588_v14, 0.0  ;;  %v1654_v45 = vmax.f32 %v1590_v19, 0.0 }
 0x49f   :  { %v1709_v34 = vpack.c.bf16 %v1653_v42, %v1651_v60 }
 0x4a0   :  { %v1710_v32 = vpack.c.bf16 %v1654_v45, %v1652_v47 }
 0x4a1   :  { %2093 = vrot.lane.b32.xlu2 %v2053_v29, %s5536_s1 }
 0x4a2   :  { %2089 = vrot.lane.b32.xlu0 %v2051_v26, %s5536_s1  ;;  %2091 = vrot.lane.b32.xlu1 %v2052_v63, %s5536_s1 }
 0x4a5   :  { %1885 = vmatmul.bf16.gmra.mxu0 %v1707_v52  ;;  %v2073_v52 = vld [vmem:[%s10238_s12 + $0xe0] sm:$0xff] }
 0x4a7   :  { %1974 = vmatmul.bf16.gmra.mxu1 %v1708_v31  ;;  %v2075_v31 = vld [vmem:[%s10238_s12 + $0xf0] sm:$0xff] }
 0x4a9   :  { %2099 = vrot.lane.b32.xlu2 %v2056_v20, %s5536_s1 }
 0x4aa   :  { %2095 = vrot.lane.b32.xlu0 %v2054_v58, %s5536_s1  ;;  %2097 = vrot.lane.b32.xlu1 %v2055_v51, %s5536_s1 }
 0x4b1   :  { %2105 = vrot.lane.b32.xlu2 %v2059_v61, %s5536_s1 }
 0x4b2   :  { %2101 = vrot.lane.b32.xlu0 %v2057_v3, %s5536_s1  ;;  %2103 = vrot.lane.b32.xlu1 %v2058_v40, %s5536_s1 }
 0x4b5   :  { %1890 = vmatmul.bf16.gmra.mxu0 %v1709_v34 }
 0x4b7   :  { %1979 = vmatmul.bf16.gmra.mxu1 %v1710_v32 }
 0x4b9   :  { %2111 = vrot.lane.b32.xlu2 %v2062_v17, %s5536_s1 }
 0x4ba   :  { %2107 = vrot.lane.b32.xlu0 %v2060_v13, %s5536_s1  ;;  %2109 = vrot.lane.b32.xlu1 %v2061_v55, %s5536_s1 }
 0x4c1   :  { %2117 = vrot.lane.b32.xlu2 %v2065_v16, %s5536_s1 }
 0x4c2   :  { %2113 = vrot.lane.b32.xlu0 %v2063_v37, %s5536_s1 }
 0x4c5   :  { %1895 = vmatmul.bf16.gmra.mxu0 %v7053_v11  ;;  %v2064_v11 = vld [vmem:[%s10238_s12 + $0x98] sm:$0xff] }
 0x4c6   :  { %2115 = vrot.lane.b32.xlu1 %v2064_v11, %s5536_s1 }
 0x4c7   :  { %1984 = vmatmul.bf16.gmra.mxu1 %v7058_v2  ;;  %v2068_v2 = vld [vmem:[%s10238_s12 + $0xb8] sm:$0xff] }
 0x4c9   :  { %2123 = vrot.lane.b32.xlu2 %v2068_v2, %s5536_s1 }
 0x4ca   :  { %2119 = vrot.lane.b32.xlu0 %v2066_v57, %s5536_s1 }
 0x4ce   :  { %2121 = vrot.lane.b32.xlu1 %v2067_v5, %s5536_s1 }
 0x4d1   :  { %2129 = vrot.lane.b32.xlu2 %v2071_v59, %s5536_s1 }
 0x4d2   :  { %2125 = vrot.lane.b32.xlu0 %v2069_v41, %s5536_s1 }
 0x4d5   :  { %1900 = vmatmul.bf16.gmra.mxu0 %v7062_v12  ;;  %v2070_v12 = vld [vmem:[%s10238_s12 + $0xc8] sm:$0xff] }
 0x4d6   :  { %2127 = vrot.lane.b32.xlu1 %v2070_v12, %s5536_s1 }
 0x4d7   :  { %1989 = vmatmul.bf16.gmra.mxu1 %v7067_v33  ;;  %v2074_v33 = vld [vmem:[%s10238_s12 + $0xe8] sm:$0xff] }
 0x4d9   :  { %2135 = vrot.lane.b32.xlu2 %v2074_v33, %s5536_s1 }
 0x4da   :  { %2131 = vrot.lane.b32.xlu0 %v2072_v0, %s5536_s1 }
 0x4de   :  { %2133 = vrot.lane.b32.xlu1 %v2073_v52, %s5536_s1 }
 0x4e2   :  { %2137 = vrot.lane.b32.xlu0 %v2075_v31, %s5536_s1 }
 0x4e5   :  { %1905 = vmatmul.bf16.gmra.mxu0 %v7072_v50  ;;  %v2076_v50 = vld [vmem:[%s10238_s12 + $0xf8] sm:$0xff] }
 0x4e6   :  { %2139 = vrot.lane.b32.xlu1 %v2076_v50, %s5536_s1 }
 0x4e7   :  { %1994 = vmatmul.bf16.gmra.mxu1 %v7074_v46  ;;  %v7309_v46 = vld [vmem:[%s10237_s11] ss:$0 sm:$0xff] }
 0x4eb   :  { %v7311_v26 = vpop.permute.xlu2 %2085 }
 0x4f3   :  { %v7322_v7 = vpop.permute.xlu2 %2087 }
 0x4f5   :  { %1910 = vmatmul.bf16.gmra.mxu0 %v7078_v8 }
 0x4f7   :  { %1999 = vmatmul.bf16.gmra.mxu1 %v7083_v4 }
 0x4fb   :  { %v7343_v42 = vpop.permute.xlu2 %2093 }
 0x4fc   :  { %10410 = vst [vmem:[#allocation17_spill] sm:$0xff] %v7343_v42 }
 0x502   :  { %v1876_v29 = vpop.f32.mrf.mxu0 }
 0x503   :  { %v1877_v8 = vadd.f32 %v7309_v46, %v1876_v29  ;;  %v7374_v33 = vpop.permute.xlu2 %2099 }
 0x504   :  { %v1965_v4 = vpop.f32.mrf.mxu1  ;;  %v7351_v51 = vpop.permute.xlu0 %2077 }
 0x505   :  { %v7314_v6 = vadd.f32 %v1965_v4, %v1877_v8  ;;  %1915 = vmatmul.bf16.gmra.mxu0 %v7088_v30  ;;  %v7355_v3 = vpop.permute.xlu1 %2081 }
 0x507   :  { %10407 = vst [vmem:[#allocation23_spill] sm:$0xff] %v7314_v6  ;;  %2004 = vmatmul.bf16.gmra.mxu1 %v7090_v15  ;;  %v2205_v10 = vmul.f32 1.442695, %v7314_v6  ;;  %2141 = vrot.lane.b32.xlu2 %v7314_v6, %s5536_s1 }
 0x509   :  { %5118 = vpow2.f32 %v2205_v10 }
 0x50a   :  { %v1878_v39 = vpop.f32.mrf.mxu0 }
 0x50b   :  { %v1879_v1 = vadd.f32 %v7309_v46, %v1878_v39 }
 0x50c   :  { %v1967_v21 = vpop.f32.mrf.mxu1  ;;  %v7377_v38 = vpop.permute.xlu0 %2079 }
 0x50d   :  { %v7324_v28 = vadd.f32 %v1967_v21, %v1879_v1  ;;  %v7384_v1 = vpop.permute.xlu1 %2083 }
 0x50f   :  { %10408 = vst [vmem:[#allocation24_spill] sm:$0xff] %v7324_v28  ;;  %v5119_v9 = vpop.eup %5118  ;;  %v2207_v48 = vmul.f32 1.442695, %v7324_v28  ;;  %2143 = vrot.lane.b32.xlu0 %v7324_v28, %s5536_s1  ;;  %4447 = vrot.lane.b32.xlu2 %v7314_v6, %s5538_s28 }
 0x510   :  { %v7331_v30 = vadd.f32 9.0, %v5119_v9 }
 0x511   :  { %5120 = vpow2.f32 %v2207_v48 }
 0x512   :  { %v1881_v15 = vpop.f32.mrf.mxu0  ;;  %v3005_v22 = vmul.f32 0.5, %v7331_v30  ;;  %v2397_v14 = vmul.f32 4.5, %v7331_v30  ;;  %5122 = vrsqrt.f32 %v7331_v30  ;;  %vm3332_vm1 = vcmp.eq.f32.partialorder %v7331_v30, inf }
 0x513   :  { %v1882_v19 = vadd.f32 %v7309_v46, %v1881_v15  ;;  %vm3334_vm3 = vcmp.eq.f32.partialorder %v7331_v30, 0.0 }
 0x514   :  { %v1970_v63 = vpop.f32.mrf.mxu1  ;;  %v4998_v20 = vadd.f32 -0.33333334, %v3005_v22  ;;  %v7337_v58 = vadd.f32 -3.0, %v2397_v14 }
 0x515   :  { %v7339_v60 = vadd.f32 %v1970_v63, %v1882_v19  ;;  %1920 = vmatmul.bf16.gmra.mxu0 %v7094_v27 }
 0x516   :  { %3135 = vperm.xlu1 %5106, %v4998_v20   ;;  %5124 = vrsqrt.f32 %v7337_v58  ;;  %vm2467_vm15 = vweird.f32 %v7337_v58 }
 0x517   :  { %10409 = vst [vmem:[#allocation25_spill] sm:$0xff] %v7339_v60  ;;  %2009 = vmatmul.bf16.gmra.mxu1 %v7099_v23  ;;  %v5121_v47 = vpop.eup %5120  ;;  %v2209_v45 = vmul.f32 1.442695, %v7339_v60  ;;  %4449 = vrot.lane.b32.xlu0 %v7324_v28, %s5538_s28 }
 0x518   :  { %v5123_v34 = vpop.eup %5122  ;;  %v7349_v32 = vadd.f32 9.0, %v5121_v47  ;;  %v7405_v47 = vpop.permute.xlu2 %2105 }
 0x519   :  { %5126 = vpow2.f32 %v2209_v45  ;;  %v3326_v27 = vmul.f32 %v5123_v34, %v7331_v30  ;;  %10413 = vst [vmem:[#allocation27_spill] sm:$0xff] %v7405_v47 }
 0x51a   :  { %v1883_v23 = vpop.f32.mrf.mxu0  ;;  %v3006_v61 = vmul.f32 0.5, %v7349_v32  ;;  %v2398_v40 = vmul.f32 4.5, %v7349_v32  ;;  %vm3344_vm7 = vcmp.eq.f32.partialorder %v7349_v32, inf  ;;  %vm3346_vm10 = vcmp.eq.f32.partialorder %v7349_v32, 0.0 }
 0x51b   :  { %v1884_v17 = vadd.f32 %v7309_v46, %v1883_v23  ;;  %v3327_v57 = vmul.f32 %v5123_v34, %v3326_v27 }
 0x51c   :  { %v1972_v13 = vpop.f32.mrf.mxu1  ;;  %v7359_v55 = vpop.eup %5124  ;;  %v4999_v16 = vadd.f32 -0.33333334, %v3006_v61  ;;  %v7361_v37 = vadd.f32 -3.0, %v2398_v40 }
 0x51d   :  { %v7363_v11 = vadd.f32 %v1972_v13, %v1884_v17  ;;  %v2462_v2 = vmul.f32 %v7359_v55, %v7337_v58  ;;  %v3328_v0 = vmul.f32 0.5, %v3327_v57  ;;  %vm2468_vm14 = vweird.f32 %v7359_v55  ;;  %v7411_v61 = vpop.permute.xlu0 %2089 }
 0x51e   :  { %3140 = vperm.xlu2 %5107, %v4999_v16   ;;  %2145 = vrot.lane.b32.xlu1 %v7339_v60, %s5536_s1  ;;  %5128 = vrsqrt.f32 %v7361_v37  ;;  %10414 = vst [vmem:[#allocation28_spill] sm:$0xff] %v7411_v61  ;;  %vm2469_vm0 = vmor %vm2467_vm15, %vm2468_vm14  ;;  %vm2477_vm4 = vweird.f32 %v7361_v37 }
 0x51f   :  { %10411 = vst [vmem:[#allocation18_spill] sm:$0xff] %v7363_v11  ;;  %v5127_v5 = vpop.eup %5126  ;;  %v2463_v59 = vmul.f32 %v7359_v55, %v2462_v2  ;;  %v2211_v12 = vmul.f32 1.442695, %v7363_v11  ;;  %5130 = vrsqrt.f32 %v7349_v32  ;;  %v3329_v15 = vsub.f32 1.5, %v3328_v0  ;;  %v7421_v2 = vpop.permute.xlu1 %2091 }
 0x520   :  { %v7371_v41 = vadd.f32 9.0, %v5127_v5 }
 0x521   :  { %v2464_v50 = vmul.f32 0.5, %v2463_v59  ;;  %5132 = vpow2.f32 %v2211_v12  ;;  %v3330_v63 = vmul.f32 %v5123_v34, %v3329_v15  ;;  %v7444_v15 = vpop.permute.xlu2 %2111 }
 0x522   :  { %v1886_v52 = vpop.f32.mrf.mxu0  ;;  %v3007_v31 = vmul.f32 0.5, %v7371_v41  ;;  %v2399_v29 = vmul.f32 4.5, %v7371_v41  ;;  %10416 = vst [vmem:[#allocation5_spill] sm:$0xff] %v7444_v15  ;;  %vm3356_vm11 = vcmp.eq.f32.partialorder %v7371_v41, inf  ;;  %vm3358_vm12 = vcmp.eq.f32.partialorder %v7371_v41, 0.0 }
 0x523   :  { %v1887_v8 = vadd.f32 %v7309_v46, %v1886_v52  ;;  %v2465_v22 = vsub.f32 1.5, %v2464_v50  ;;  %v3331_v40 = vmul.f32 %v3330_v63, %v7331_v30 }
 0x524   :  { %v7382_v4 = vpop.eup %5128  ;;  %v1975_v10 = vpop.f32.mrf.mxu1  ;;  %v5000_v39 = vadd.f32 -0.33333334, %v3007_v31  ;;  %v7386_v21 = vadd.f32 -3.0, %v2399_v29  ;;  %v3335_v29 = vand.u32 2147483648, %v7331_v30 }
 0x525   :  { %v7388_v9 = vadd.f32 %v1975_v10, %v1887_v8  ;;  %1925 = vmatmul.bf16.gmra.mxu0 %v7104_v49  ;;  %v2472_v48 = vmul.f32 %v7382_v4, %v7361_v37  ;;  %v7399_v19 = vpop.eup %5130  ;;  %v3333_v59 = vsel %vm3332_vm1, %v7331_v30, %v3331_v40  ;;  %vm2478_vm2 = vweird.f32 %v7382_v4 }
 0x526   :  { %3145 = vperm.xlu0 %5108, %v5000_v39   ;;  %2147 = vrot.lane.b32.xlu2 %v7363_v11, %s5536_s1  ;;  %5134 = vrsqrt.f32 %v7386_v21  ;;  %v3338_v27 = vmul.f32 %v7399_v19, %v7349_v32  ;;  %vm2479_vm5 = vmor %vm2477_vm4, %vm2478_vm2  ;;  %vm2487_vm8 = vweird.f32 %v7386_v21 }
 0x527   :  { %10412 = vst [vmem:[#allocation26_spill] sm:$0xff] %v7388_v9  ;;  %2014 = vmatmul.bf16.gmra.mxu1 %v7106_v25  ;;  %4451 = vrot.lane.b32.xlu1 %v7339_v60, %s5538_s28  ;;  %v2473_v14 = vmul.f32 %v7382_v4, %v2472_v48  ;;  %v2213_v49 = vmul.f32 1.442695, %v7388_v9  ;;  %v5133_v20 = vpop.eup %5132  ;;  %v2466_v25 = vmul.f32 %v7359_v55, %v2465_v22  ;;  %5136 = vrsqrt.f32 %v7371_v41 }
 0x528   :  { %v7413_v34 = vadd.f32 9.0, %v5133_v20  ;;  %v3339_v58 = vmul.f32 %v7399_v19, %v3338_v27  ;;  %v3336_v48 = vsel %vm3334_vm3, %v3335_v29, %v3333_v59  ;;  %v7454_v20 = vpop.permute.xlu0 %2095  ;;  %v7458_v27 = vpop.permute.xlu1 %2097 }
 0x529   :  { %v2474_v45 = vmul.f32 0.5, %v2473_v14  ;;  %5138 = vpow2.f32 %v2213_v49  ;;  %v2470_v13 = vsel %vm2469_vm0, %v7359_v55, %v2466_v25 }
 0x52a   :  { %v1888_v23 = vpop.f32.mrf.mxu0  ;;  %v3008_v12 = vmul.f32 0.5, %v7413_v34  ;;  %v2400_v0 = vmul.f32 4.5, %v7413_v34  ;;  %v3340_v10 = vmul.f32 0.5, %v3339_v58  ;;  %5140 = vrsqrt.f32 %v7413_v34 }
 0x52b   :  { %v2475_v16 = vsub.f32 1.5, %v2474_v45  ;;  %v1889_v57 = vadd.f32 %v7309_v46, %v1888_v23  ;;  %vm3368_vm0 = vcmp.eq.f32.partialorder %v7413_v34, inf  ;;  %vm3370_vm3 = vcmp.eq.f32.partialorder %v7413_v34, 0.0 }
 0x52c   :  { %v7416_v17 = vpop.eup %5134  ;;  %v1977_v31 = vpop.f32.mrf.mxu1  ;;  %v5001_v14 = vadd.f32 -0.33333334, %v3008_v12  ;;  %v7450_v63 = vadd.f32 -3.0, %v2400_v0  ;;  %v3341_v25 = vsub.f32 1.5, %v3340_v10 }
 0x52d   :  { %v7427_v5 = vpop.eup %5136  ;;  %v2482_v55 = vmul.f32 %v7416_v17, %v7386_v21  ;;  %v2476_v50 = vmul.f32 %v7382_v4, %v2475_v16  ;;  %v7438_v8 = vadd.f32 %v1977_v31, %v1889_v57  ;;  %vm2488_vm6 = vweird.f32 %v7416_v17 }
 0x52e   :  { %2149 = vrot.lane.b32.xlu0 %v7388_v9, %s5536_s1  ;;  %4453 = vrot.lane.b32.xlu2 %v7363_v11, %s5538_s28  ;;  %v3350_v39 = vmul.f32 %v7427_v5, %v7371_v41  ;;  %5142 = vrsqrt.f32 %v7450_v63  ;;  %v3342_v40 = vmul.f32 %v7399_v19, %v3341_v25  ;;  %vm2489_vm9 = vmor %vm2487_vm8, %vm2488_vm6  ;;  %vm2497_vm14 = vweird.f32 %v7450_v63 }
 0x52f   :  { %2783 = vperm.xlu1 %5106, %v2470_v13   ;;  %v5139_v52 = vpop.eup %5138  ;;  %10415 = vst [vmem:[#allocation4_spill] sm:$0xff] %v7438_v8  ;;  %v2483_v49 = vmul.f32 %v7416_v17, %v2482_v55  ;;  %v2480_v30 = vsel %vm2479_vm5, %v7382_v4, %v2476_v50  ;;  %v2215_v37 = vmul.f32 1.442695, %v7438_v8  ;;  %v7471_v55 = vpop.permute.xlu2 %2117 }
 0x530   :  { %v7446_v22 = vadd.f32 9.0, %v5139_v52  ;;  %v7467_v59 = vpop.eup %5140  ;;  %10417 = vst [vmem:[#allocation2_spill] sm:$0xff] %v7471_v55  ;;  %v3343_v19 = vmul.f32 %v3342_v40, %v7349_v32  ;;  %v7479_v50 = vpop.permute.xlu0 %2101 }
 0x531   :  { %5144 = vpow2.f32 %v2215_v37 }
 0x532   :  { %v1891_v45 = vpop.f32.mrf.mxu0  ;;  %v3009_v23 = vmul.f32 0.5, %v7446_v22  ;;  %v2401_v4 = vmul.f32 4.5, %v7446_v22  ;;  %vm3380_vm5 = vcmp.eq.f32.partialorder %v7446_v22, inf  ;;  %vm3382_vm6 = vcmp.eq.f32.partialorder %v7446_v22, 0.0 }
 0x533   :  { %v1892_v31 = vadd.f32 %v7309_v46, %v1891_v45  ;;  %v3347_v45 = vand.u32 2147483648, %v7349_v32 }
 0x534   :  { %v5002_v16 = vadd.f32 -0.33333334, %v3009_v23  ;;  %v7465_v58 = vadd.f32 -3.0, %v2401_v4  ;;  %v1980_v12 = vpop.f32.mrf.mxu1  ;;  %v7473_v0 = vpop.eup %5142 }
 0x535   :  { %1930 = vmatmul.bf16.gmra.mxu0 %v7110_v44  ;;  %v3351_v44 = vmul.f32 %v7427_v5, %v3350_v39  ;;  %vm2498_vm13 = vweird.f32 %v7473_v0 }
 0x536   :  { %4063 = vperm.xlu0 %5108, %v3336_v48   ;;  %2788 = vperm.xlu2 %5107, %v2480_v30   ;;  %5146 = vrsqrt.f32 %v7465_v58  ;;  %v7485_v48 = vpop.permute.xlu1 %2103  ;;  %v3345_v30 = vsel %vm3344_vm7, %v7349_v32, %v3343_v19  ;;  %vm2499_vm15 = vmor %vm2497_vm14, %vm2498_vm13  ;;  %vm2507_vm2 = vweird.f32 %v7465_v58 }
 0x537   :  { %2019 = vmatmul.bf16.gmra.mxu1 %v7124_v56  ;;  %3150 = vperm.xlu1 %5106, %v5001_v14   ;;  %v2484_v56 = vmul.f32 0.5, %v2483_v49  ;;  %v3352_v13 = vmul.f32 0.5, %v3351_v44  ;;  %v5145_v29 = vpop.eup %5144  ;;  %v2492_v14 = vmul.f32 %v7473_v0, %v7450_v63  ;;  %v3362_v49 = vmul.f32 %v7467_v59, %v7413_v34 }
 0x538   :  { %v7494_v25 = vadd.f32 9.0, %v5145_v29  ;;  %v7496_v44 = vadd.f32 %v1980_v12, %v1892_v31  ;;  %v3348_v21 = vsel %vm3346_vm10, %v3347_v45, %v3345_v30  ;;  %5148 = vrsqrt.f32 %v7446_v22 }
 0x539   :  { %v2485_v57 = vsub.f32 1.5, %v2484_v56  ;;  %v3353_v52 = vsub.f32 1.5, %v3352_v13  ;;  %v2493_v56 = vmul.f32 %v7473_v0, %v2492_v14 }
 0x53a   :  { %v1893_v39 = vpop.f32.mrf.mxu0  ;;  %10418 = vst [vmem:[#allocation6_spill] sm:$0xff] %v7496_v44  ;;  %v3010_v13 = vmul.f32 0.5, %v7494_v25  ;;  %vm3392_vm7 = vcmp.eq.f32.partialorder %v7494_v25, inf  ;;  %vm3394_vm8 = vcmp.eq.f32.partialorder %v7494_v25, 0.0 }
 0x53b   :  { %v2486_v10 = vmul.f32 %v7416_v17, %v2485_v57  ;;  %v3354_v37 = vmul.f32 %v7427_v5, %v3353_v52  ;;  %v3363_v5 = vmul.f32 %v7467_v59, %v3362_v49  ;;  %v1894_v32 = vadd.f32 %v7309_v46, %v1893_v39 }
 0x53c   :  { %v7505_v4 = vpop.eup %5146  ;;  %v1982_v40 = vpop.f32.mrf.mxu1  ;;  %v2494_v57 = vmul.f32 0.5, %v2493_v56  ;;  %v5003_v39 = vadd.f32 -0.33333334, %v3010_v13 }
 0x53d   :  { %v2490_v23 = vsel %vm2489_vm9, %v7416_v17, %v2486_v10  ;;  %v2217_v17 = vmul.f32 1.442695, %v7496_v44  ;;  %v2502_v12 = vmul.f32 %v7505_v4, %v7465_v58  ;;  %v3364_v19 = vmul.f32 0.5, %v3363_v5 }
 0x53e   :  { %4455 = vrot.lane.b32.xlu0 %v7388_v9, %s5538_s28  ;;  %3155 = vperm.xlu2 %5107, %v5002_v16   ;;  %v7516_v16 = vpop.permute.xlu0 %2107  ;;  %v7522_v31 = vadd.f32 %v1982_v40, %v1894_v32  ;;  %v3359_v10 = vand.u32 2147483648, %v7371_v41  ;;  %v7525_v14 = vpop.permute.xlu1 %2109  ;;  %v2495_v30 = vsub.f32 1.5, %v2494_v57  ;;  %vm2508_vm1 = vweird.f32 %v7505_v4 }
 0x53f   :  { %2151 = vrot.lane.b32.xlu1 %v7438_v8, %s5536_s1  ;;  %10420 = vst [vmem:[#allocation14_spill] sm:$0xff] %v7516_v16  ;;  %5150 = vpow2.f32 %v2217_v17  ;;  %v3365_v45 = vsub.f32 1.5, %v3364_v19  ;;  %vm2509_vm4 = vmor %vm2507_vm2, %vm2508_vm1 }
 0x540   :  { %10421 = vst [vmem:[#allocation15_spill] sm:$0xff] %v7522_v31  ;;  %v2219_v56 = vmul.f32 1.442695, %v7522_v31  ;;  %v2496_v17 = vmul.f32 %v7473_v0, %v2495_v30  ;;  %5152 = vrsqrt.f32 %v7494_v25 }
 0x541   :  { %10422 = vst [vmem:[#allocation19_spill] sm:$0xff] %v7525_v14  ;;  %v3366_v40 = vmul.f32 %v7467_v59, %v3365_v45  ;;  %v3371_v45 = vand.u32 2147483648, %v7413_v34 }
 0x542   :  { %v1896_v29 = vpop.f32.mrf.mxu0  ;;  %5154 = vpow2.f32 %v2219_v56  ;;  %v2500_v59 = vsel %vm2499_vm15, %v7473_v0, %v2496_v17  ;;  %v2402_v0 = vmul.f32 4.5, %v7494_v25 }
 0x545   :  { %1935 = vmatmul.bf16.gmra.mxu0 %v7131_v62  ;;  %v3355_v62 = vmul.f32 %v3354_v37, %v7371_v41  ;;  %v2503_v37 = vmul.f32 %v7505_v4, %v2502_v12 }
 0x546   :  { %2793 = vperm.xlu0 %5108, %v2490_v23   ;;  %2153 = vrot.lane.b32.xlu2 %v7496_v44, %s5536_s1  ;;  %v1897_v23 = vadd.f32 %v7309_v46, %v1896_v29  ;;  %v7546_v12 = vpop.permute.xlu0 %2113  ;;  %v3367_v29 = vmul.f32 %v3366_v40, %v7413_v34  ;;  %v7558_v63 = vpop.permute.xlu1 %2115  ;;  %v7582_v40 = vadd.f32 -3.0, %v2402_v0 }
 0x547   :  { %2024 = vmatmul.bf16.gmra.mxu1 %v7133_v53  ;;  %4068 = vperm.xlu1 %5106, %v3348_v21   ;;  %v7512_v53 = vpop.permute.xlu2 %2123  ;;  %v3357_v52 = vsel %vm3356_vm11, %v7371_v41, %v3355_v62  ;;  %v7532_v21 = vpop.eup %5148  ;;  %v2504_v32 = vmul.f32 0.5, %v2503_v37  ;;  %10425 = vst [vmem:[#allocation8_spill] sm:$0xff] %v7546_v12 }
 0x548   :  { %10419 = vst [vmem:[#allocation3_spill] sm:$0xff] %v7512_v53  ;;  %v3360_v49 = vsel %vm3358_vm12, %v3359_v10, %v3357_v52  ;;  %v5151_v5 = vpop.eup %5150  ;;  %v1985_v41 = vpop.f32.mrf.mxu1  ;;  %v3374_v57 = vmul.f32 %v7532_v21, %v7446_v22  ;;  %v3369_v37 = vsel %vm3368_vm0, %v7413_v34, %v3367_v29  ;;  %vm2517_vm12 = vweird.f32 %v7582_v40 }
 0x549   :  { %v7541_v13 = vadd.f32 %v1985_v41, %v1897_v23  ;;  %v7548_v19 = vadd.f32 9.0, %v5151_v5  ;;  %v2505_v52 = vsub.f32 1.5, %v2504_v32  ;;  %10426 = vst [vmem:[#allocation21_spill] sm:$0xff] %v7558_v63  ;;  %v3372_v17 = vsel %vm3370_vm3, %v3371_v45, %v3369_v37 }
 0x54b   :  { %10424 = vst [vmem:[#allocation20_spill] sm:$0xff] %v7541_v13  ;;  %v2221_v10 = vmul.f32 1.442695, %v7541_v13  ;;  %5156 = vrsqrt.f32 %v7548_v19  ;;  %v2506_v30 = vmul.f32 %v7505_v4, %v2505_v52  ;;  %vm3404_vm9 = vcmp.eq.f32.partialorder %v7548_v19, inf }
 0x54c   :  { %vm3406_vm11 = vcmp.eq.f32.partialorder %v7548_v19, 0.0 }
 0x54d   :  { %5158 = vpow2.f32 %v2221_v10  ;;  %v1898_v10 = vpop.f32.mrf.mxu0 }
 0x54e   :  { %3160 = vperm.xlu0 %5108, %v5003_v39   ;;  %4073 = vperm.xlu2 %5107, %v3360_v49   ;;  %v7564_v39 = vpop.eup %5152  ;;  %v7588_v34 = vpop.permute.xlu1 %2121  ;;  %5160 = vrsqrt.f32 %v7582_v40 }
 0x54f   :  { %4457 = vrot.lane.b32.xlu1 %v7438_v8, %s5538_s28  ;;  %v7536_v62 = vpop.permute.xlu2 %2129  ;;  %v5155_v49 = vpop.eup %5154  ;;  %v3386_v56 = vmul.f32 %v7564_v39, %v7494_v25  ;;  %10429 = vst [vmem:[#allocation29_spill] sm:$0xff] %v7588_v34 }
 0x550   :  { %10423 = vst [vmem:[#allocation16_spill] sm:$0xff] %v7536_v62  ;;  %v7580_v41 = vadd.f32 9.0, %v5155_v49  ;;  %v3383_v62 = vand.u32 2147483648, %v7446_v22 }
 0x551   :  { %v5157_v52 = vpop.eup %5156  ;;  %v3387_v58 = vmul.f32 %v7564_v39, %v3386_v56  ;;  %v1987_v56 = vpop.f32.mrf.mxu1 }
 0x552   :  { %v3012_v49 = vmul.f32 0.5, %v7580_v41  ;;  %v3419_v34 = vand.u32 2147483648, %v7580_v41 }
 0x554   :  { %v5005_v45 = vadd.f32 -0.33333334, %v3012_v49 }
 0x555   :  { %1940 = vmatmul.bf16.gmra.mxu0 %v7138_v24  ;;  %v3375_v24 = vmul.f32 %v7532_v21, %v3374_v57  ;;  %v2510_v57 = vsel %vm2509_vm4, %v7505_v4, %v2506_v30  ;;  %v3398_v4 = vmul.f32 %v5157_v52, %v7548_v19  ;;  %v3388_v30 = vmul.f32 0.5, %v3387_v58  ;;  %v1901_v49 = vpop.f32.mrf.mxu0 }
 0x556   :  { %2155 = vrot.lane.b32.xlu0 %v7522_v31, %s5536_s1  ;;  %4459 = vrot.lane.b32.xlu2 %v7496_v44, %s5538_s28  ;;  %vm3416_vm4 = vcmp.eq.f32.partialorder %v7580_v41, inf }
 0x557   :  { %2029 = vmatmul.bf16.gmra.mxu1 %v7145_v18  ;;  %2798 = vperm.xlu1 %5106, %v2500_v59   ;;  %v3011_v18 = vmul.f32 0.5, %v7548_v19  ;;  %v3376_v23 = vmul.f32 0.5, %v3375_v24  ;;  %v7576_v5 = vpop.permute.xlu2 %2135  ;;  %v7585_v59 = vpop.permute.xlu0 %2119 }
 0x558   :  { %10427 = vst [vmem:[#allocation22_spill] sm:$0xff] %v7576_v5  ;;  %v5159_v24 = vpop.eup %5158 }
 0x559   :  { %v5004_v32 = vadd.f32 -0.33333334, %v3011_v18  ;;  %10428 = vst [vmem:[#allocation7_spill] sm:$0xff] %v7585_v59  ;;  %v3377_v29 = vsub.f32 1.5, %v3376_v23  ;;  %v2403_v18 = vmul.f32 4.5, %v7548_v19  ;;  %v7595_v37 = vadd.f32 9.0, %v5159_v24 }
 0x55b   :  { %v3378_v0 = vmul.f32 %v7532_v21, %v3377_v29  ;;  %v7598_v23 = vadd.f32 -3.0, %v2403_v18  ;;  %v3389_v21 = vsub.f32 1.5, %v3388_v30  ;;  %v1899_v29 = vadd.f32 %v7309_v46, %v1898_v10  ;;  %v7617_v18 = vpop.permute.xlu1 %2127 }
 0x55c   :  { %v3013_v24 = vmul.f32 0.5, %v7595_v37  ;;  %10431 = vst [vmem:[#allocation10_spill] sm:$0xff] %v7617_v18 }
 0x55d   :  { %5162 = vrsqrt.f32 %v7598_v23  ;;  %v3390_v10 = vmul.f32 %v7564_v39, %v3389_v21  ;;  %v1990_v21 = vpop.f32.mrf.mxu1  ;;  %vm2527_vm15 = vweird.f32 %v7598_v23 }
 0x55e   :  { %4078 = vperm.xlu0 %5108, %v3372_v17   ;;  %2803 = vperm.xlu2 %5107, %v2510_v57   ;;  %v7605_v57 = vpop.eup %5160  ;;  %v5006_v5 = vadd.f32 -0.33333334, %v3013_v24 }
 0x55f   :  { %3165 = vperm.xlu1 %5106, %v5004_v32   ;;  %v3399_v32 = vmul.f32 %v5157_v52, %v3398_v4  ;;  %v7611_v58 = vpop.permute.xlu0 %2125  ;;  %v3391_v39 = vmul.f32 %v3390_v10, %v7494_v25  ;;  %vm2518_vm10 = vweird.f32 %v7605_v57 }
 0x560   :  { %10430 = vst [vmem:[#allocation9_spill] sm:$0xff] %v7611_v58  ;;  %vm2519_vm13 = vmor %vm2517_vm12, %vm2518_vm10 }
 0x561   :  { %v7600_v17 = vpop.permute.xlu2 %2141  ;;  %v3400_v4 = vmul.f32 0.5, %v3399_v32  ;;  %v3393_v24 = vsel %vm3392_vm7, %v7494_v25, %v3391_v39  ;;  %vm3430_vm7 = vcmp.eq.f32.partialorder %v7595_v37, 0.0 }
 0x563   :  { %v3401_v18 = vsub.f32 1.5, %v3400_v4  ;;  %v3395_v4 = vand.u32 2147483648, %v7494_v25 }
 0x565   :  { %1945 = vmatmul.bf16.gmra.mxu0 %v7153_v35  ;;  %v3379_v35 = vmul.f32 %v3378_v0, %v7446_v22  ;;  %v2512_v0 = vmul.f32 %v7605_v57, %v7582_v40 }
 0x566   :  { %4461 = vrot.lane.b32.xlu0 %v7522_v31, %s5538_s28  ;;  %3170 = vperm.xlu2 %5107, %v5005_v45   ;;  %v7623_v45 = vadd.f32 %v1987_v56, %v1899_v29  ;;  %v7630_v31 = vpop.eup %5162 }
 0x567   :  { %2034 = vmatmul.bf16.gmra.mxu1 %v7155_v36  ;;  %2157 = vrot.lane.b32.xlu1 %v7541_v13, %s5536_s1  ;;  %v2404_v36 = vmul.f32 4.5, %v7580_v41  ;;  %v3381_v30 = vsel %vm3380_vm5, %v7446_v22, %v3379_v35  ;;  %v2513_v32 = vmul.f32 %v7605_v57, %v2512_v0  ;;  %v1902_v35 = vadd.f32 %v7309_v46, %v1901_v49  ;;  %v7641_v22 = vpop.permute.xlu0 %2131  ;;  %v1903_v49 = vpop.f32.mrf.mxu0 }
 0x568   :  { %10432 = vst [vmem:[#allocation12_spill] sm:$0xff] %v7623_v45  ;;  %v3384_v53 = vsel %vm3382_vm6, %v3383_v62, %v3381_v30  ;;  %v2223_v56 = vmul.f32 1.442695, %v7623_v45  ;;  %v3402_v62 = vmul.f32 %v5157_v52, %v3401_v18  ;;  %v7650_v0 = vpop.permute.xlu1 %2133  ;;  %v3396_v18 = vsel %vm3394_vm8, %v3395_v4, %v3393_v24 }
 0x569   :  { %v7626_v44 = vadd.f32 -3.0, %v2404_v36  ;;  %v7637_v29 = vpop.permute.xlu2 %4447  ;;  %10434 = vst [vmem:[#allocation13_spill] sm:$0xff] %v7641_v22  ;;  %v7647_v36 = vadd.f32 %v1990_v21, %v1902_v35  ;;  %v1904_v39 = vadd.f32 %v7309_v46, %v1903_v49  ;;  %v1992_v21 = vpop.f32.mrf.mxu1  ;;  %v3407_v49 = vand.u32 2147483648, %v7548_v19 }
 0x56a   :  { %10433 = vst [vmem:[#allocation11_spill] sm:$0xff] %v7637_v29  ;;  %v3403_v30 = vmul.f32 %v3402_v62, %v7548_v19  ;;  %vm2528_vm14 = vweird.f32 %v7630_v31  ;;  %vm3418_vm5 = vcmp.eq.f32.partialorder %v7580_v41, 0.0  ;;  %vm3428_vm6 = vcmp.eq.f32.partialorder %v7595_v37, inf }
 0x56b   :  { %5164 = vrsqrt.f32 %v7626_v44  ;;  %10435 = vst [vmem:[#allocation30_spill] sm:$0xff] %v7647_v36  ;;  %v2225_v25 = vmul.f32 1.442695, %v7647_v36  ;;  %v7676_v24 = vadd.f32 %v1992_v21, %v1904_v39  ;;  %vm2529_vm0 = vmor %vm2527_vm15, %vm2528_vm14  ;;  %vm2537_vm2 = vweird.f32 %v7626_v44 }
 0x56c   :  { %5166 = vrsqrt.f32 %v7580_v41  ;;  %10436 = vst [vmem:[#allocation31_spill] sm:$0xff] %v7650_v0  ;;  %v3405_v62 = vsel %vm3404_vm9, %v7548_v19, %v3403_v30 }
 0x56d   :  { %5168 = vpow2.f32 %v2223_v56  ;;  %10437 = vst [vmem:[#allocation32_spill] sm:$0xff] %v7676_v24  ;;  %v2227_v0 = vmul.f32 1.442695, %v7676_v24 }
 0x56e   :  { %3175 = vperm.xlu0 %5108, %v5006_v5   ;;  %2159 = vrot.lane.b32.xlu2 %v7623_v45, %s5536_s1  ;;  %v2514_v5 = vmul.f32 0.5, %v2513_v32  ;;  %5170 = vrsqrt.f32 %v7595_v37 }
 0x56f   :  { %4083 = vperm.xlu1 %5106, %v3384_v53   ;;  %v2522_v53 = vmul.f32 %v7630_v31, %v7598_v23  ;;  %5172 = vpow2.f32 %v2225_v25 }
 0x570   :  { %v2515_v10 = vsub.f32 1.5, %v2514_v5  ;;  %v7691_v21 = vpop.permute.xlu1 %2139 }
 0x571   :  { %v7654_v52 = vpop.eup %5164  ;;  %v2523_v32 = vmul.f32 %v7630_v31, %v2522_v53  ;;  %10439 = vst [vmem:[#allocation34_spill] sm:$0xff] %v7691_v21 }
 0x572   :  { %v2532_v56 = vmul.f32 %v7654_v52, %v7626_v44  ;;  %v2516_v5 = vmul.f32 %v7605_v57, %v2515_v10  ;;  %v3408_v10 = vsel %vm3406_vm11, %v3407_v49, %v3405_v62  ;;  %vm2538_vm1 = vweird.f32 %v7654_v52 }
 0x573   :  { %v2524_v53 = vmul.f32 0.5, %v2523_v32  ;;  %vm2539_vm3 = vmor %vm2537_vm2, %vm2538_vm1 }
 0x574   :  { %v2533_v32 = vmul.f32 %v7654_v52, %v2532_v56  ;;  %v2520_v39 = vsel %vm2519_vm13, %v7605_v57, %v2516_v5  ;;  %v2405_v57 = vmul.f32 4.5, %v7595_v37 }
 0x575   :  { %1950 = vmatmul.bf16.gmra.mxu0 %v7162_v43  ;;  %v7664_v43 = vpop.eup %5166  ;;  %v2525_v25 = vsub.f32 1.5, %v2524_v53 }
 0x576   :  { %2161 = vrot.lane.b32.xlu0 %v7647_v36, %s5536_s1  ;;  %4088 = vperm.xlu2 %5107, %v3396_v18   ;;  %v5169_v35 = vpop.eup %5168  ;;  %v3410_v4 = vmul.f32 %v7664_v43, %v7580_v41  ;;  %v7681_v18 = vpop.permute.xlu0 %2137  ;;  %v2534_v62 = vmul.f32 0.5, %v2533_v32  ;;  %v7711_v21 = vadd.f32 -3.0, %v2405_v57 }
 0x577   :  { %2039 = vmatmul.bf16.gmra.mxu1 %v7166_v54  ;;  %4463 = vrot.lane.b32.xlu1 %v7541_v13, %s5538_s28  ;;  %10438 = vst [vmem:[#allocation33_spill] sm:$0xff] %v7681_v18  ;;  %v7685_v30 = vadd.f32 9.0, %v5169_v35  ;;  %v7697_v40 = vpop.eup %5170  ;;  %v2526_v53 = vmul.f32 %v7630_v31, %v2525_v25 }
 0x578   :  { %v7667_v54 = vpop.permute.xlu2 %3140  ;;  %v3411_v19 = vmul.f32 %v7664_v43, %v3410_v4  ;;  %v5173_v5 = vpop.eup %5172  ;;  %v3422_v4 = vmul.f32 %v7697_v40, %v7595_v37  ;;  %vm2547_vm11 = vweird.f32 %v7711_v21 }
 0x579   :  { %v3014_v56 = vmul.f32 0.5, %v7685_v30  ;;  %5174 = vrsqrt.f32 %v7685_v30  ;;  %v2530_v25 = vsel %vm2529_vm0, %v7630_v31, %v2526_v53  ;;  %v2406_v53 = vmul.f32 4.5, %v7685_v30 }
 0x57a   :  { %5176 = vpow2.f32 %v2227_v0  ;;  %v3412_v49 = vmul.f32 0.5, %v3411_v19  ;;  %v3423_v23 = vmul.f32 %v7697_v40, %v3422_v4  ;;  %vm3440_vm8 = vcmp.eq.f32.partialorder %v7685_v30, inf }
 0x57b   :  { %v5007_v32 = vadd.f32 -0.33333334, %v3014_v56  ;;  %5178 = vrsqrt.f32 %v7711_v21  ;;  %v7737_v13 = vadd.f32 -3.0, %v2406_v53  ;;  %vm3442_vm10 = vcmp.eq.f32.partialorder %v7685_v30, 0.0 }
 0x57c   :  { %v3413_v19 = vsub.f32 1.5, %v3412_v49 }
 0x57d   :  { %5180 = vrsqrt.f32 %v7737_v13  ;;  %vm2557_vm14 = vweird.f32 %v7737_v13 }
 0x57e   :  { %4093 = vperm.xlu0 %5108, %v3408_v10   ;;  %4465 = vrot.lane.b32.xlu2 %v7623_v45, %s5538_s28  ;;  %v7709_v10 = vadd.f32 9.0, %v5173_v5  ;;  %v1906_v5 = vpop.f32.mrf.mxu0  ;;  %v3414_v4 = vmul.f32 %v7664_v43, %v3413_v19 }
 0x57f   :  { %2808 = vperm.xlu1 %5106, %v2520_v39   ;;  %v2535_v39 = vsub.f32 1.5, %v2534_v62  ;;  %v7718_v0 = vpop.eup %5174  ;;  %v1907_v19 = vadd.f32 %v7309_v46, %v1906_v5 }
 0x580   :  { %v7699_v35 = vpop.permute.xlu2 %2147  ;;  %v5177_v56 = vpop.eup %5176  ;;  %v3015_v31 = vmul.f32 0.5, %v7709_v10  ;;  %v3434_v49 = vmul.f32 %v7718_v0, %v7685_v30  ;;  %v3415_v44 = vmul.f32 %v3414_v4, %v7580_v41 }
 0x581   :  { %v7713_v18 = vpop.permute.xlu0 %2143  ;;  %v2536_v57 = vmul.f32 %v7654_v52, %v2535_v39  ;;  %v1995_v39 = vpop.f32.mrf.mxu1 }
 0x582   :  { %v3435_v58 = vmul.f32 %v7718_v0, %v3434_v49  ;;  %v7740_v8 = vpop.eup %5178  ;;  %v3417_v5 = vsel %vm3416_vm4, %v7580_v41, %v3415_v44  ;;  %v7760_v4 = vadd.f32 %v1995_v39, %v1907_v19  ;;  %vm3454_vm4 = vcmp.eq.f32.partialorder %v7709_v10, 0.0 }
 0x583   :  { %v2540_v22 = vsel %vm2539_vm3, %v7654_v52, %v2536_v57  ;;  %v2542_v53 = vmul.f32 %v7740_v8, %v7711_v21  ;;  %v3420_v55 = vsel %vm3418_vm5, %v3419_v34, %v3417_v5  ;;  %v7767_v11 = vpop.eup %5180  ;;  %v3431_v5 = vand.u32 2147483648, %v7595_v37 }
 0x584   :  { %v3436_v57 = vmul.f32 0.5, %v3435_v58  ;;  %10442 = vst [vmem:[#allocation37_spill] sm:$0xff] %v7760_v4  ;;  %v2229_v39 = vmul.f32 1.442695, %v7760_v4  ;;  %vm2548_vm9 = vweird.f32 %v7740_v8  ;;  %vm2558_vm13 = vweird.f32 %v7767_v11 }
 0x585   :  { %v2543_v58 = vmul.f32 %v7740_v8, %v2542_v53  ;;  %vm2549_vm12 = vmor %vm2547_vm11, %vm2548_vm9  ;;  %vm3452_vm3 = vcmp.eq.f32.partialorder %v7709_v10, inf }
 0x586   :  { %4467 = vrot.lane.b32.xlu0 %v7647_v36, %s5538_s28  ;;  %2813 = vperm.xlu2 %5107, %v2530_v25   ;;  %v7734_v25 = vadd.f32 9.0, %v5177_v56  ;;  %v5008_v36 = vadd.f32 -0.33333334, %v3015_v31  ;;  %v3437_v15 = vsub.f32 1.5, %v3436_v57  ;;  %vm2559_vm15 = vmor %vm2557_vm14, %vm2558_vm13 }
 0x587   :  { %3180 = vperm.xlu1 %5106, %v5007_v32   ;;  %v3424_v32 = vmul.f32 0.5, %v3423_v23 }
 0x588   :  { %v7721_v45 = vpop.permute.xlu1 %3135  ;;  %v7724_v62 = vpop.permute.xlu2 %4453  ;;  %v3016_v56 = vmul.f32 0.5, %v7734_v25  ;;  %vm3464_vm5 = vcmp.eq.f32.partialorder %v7734_v25, inf }
 0x589   :  { %10440 = vst [vmem:[#allocation35_spill] sm:$0xff] %v7724_v62  ;;  %v3425_v43 = vsub.f32 1.5, %v3424_v32  ;;  %v7746_v23 = vpop.permute.xlu0 %4449 }
 0x58a   :  { %10441 = vst [vmem:[#allocation36_spill] sm:$0xff] %v7746_v23  ;;  %v5009_v32 = vadd.f32 -0.33333334, %v3016_v56  ;;  %v3438_v56 = vmul.f32 %v7718_v0, %v3437_v15 }
 0x58b   :  { %v3426_v49 = vmul.f32 %v7697_v40, %v3425_v43  ;;  %v1997_v43 = vpop.f32.mrf.mxu1 }
 0x58c   :  { %v3439_v15 = vmul.f32 %v3438_v56, %v7685_v30 }
 0x58d   :  { %v3427_v40 = vmul.f32 %v3426_v49, %v7595_v37 }
 0x58e   :  { %2818 = vperm.xlu0 %5108, %v2540_v22   ;;  %3185 = vperm.xlu2 %5107, %v5008_v36   ;;  %v2407_v22 = vmul.f32 4.5, %v7709_v10  ;;  %v1908_v36 = vpop.f32.mrf.mxu0 }
 0x58f   :  { %2163 = vrot.lane.b32.xlu1 %v7676_v24, %s5536_s1  ;;  %v1909_v44 = vadd.f32 %v7309_v46, %v1908_v36  ;;  %v3429_v36 = vsel %vm3428_vm6, %v7595_v37, %v3427_v40  ;;  %vm3466_vm6 = vcmp.eq.f32.partialorder %v7734_v25, 0.0 }
 0x590   :  { %v7748_v52 = vpop.permute.xlu1 %2145  ;;  %v7752_v31 = vpop.permute.xlu2 %2788  ;;  %v7763_v62 = vadd.f32 -3.0, %v2407_v22  ;;  %v2552_v22 = vmul.f32 %v7767_v11, %v7737_v13 }
 0x591   :  { %v7787_v57 = vadd.f32 %v1997_v43, %v1909_v44 }
 0x592   :  { %5182 = vrsqrt.f32 %v7763_v62  ;;  %vm2567_vm1 = vweird.f32 %v7763_v62 }
 0x593   :  { %5184 = vrsqrt.f32 %v7709_v10  ;;  %10444 = vst [vmem:[#allocation39_spill] sm:$0xff] %v7787_v57  ;;  %v2231_v37 = vmul.f32 1.442695, %v7787_v57 }
 0x594   :  { %5186 = vpow2.f32 %v2229_v39 }
 0x595   :  { %5188 = vrsqrt.f32 %v7734_v25 }
 0x596   :  { %3190 = vperm.xlu0 %5108, %v5009_v32   ;;  %2165 = vrot.lane.b32.xlu2 %v7760_v4, %s5536_s1  ;;  %v1911_v53 = vpop.f32.mrf.mxu0  ;;  %v3432_v32 = vsel %vm3430_vm7, %v3431_v5, %v3429_v36  ;;  %5190 = vpow2.f32 %v2231_v37 }
 0x597   :  { %4098 = vperm.xlu1 %5106, %v3420_v55   ;;  %v2544_v55 = vmul.f32 0.5, %v2543_v58  ;;  %v2553_v58 = vmul.f32 %v7767_v11, %v2552_v22  ;;  %v1912_v40 = vadd.f32 %v7309_v46, %v1911_v53  ;;  %v3441_v22 = vsel %vm3440_vm8, %v7685_v30, %v3439_v15 }
 0x598   :  { %v7774_v19 = vpop.permute.xlu0 %3145  ;;  %v7777_v41 = vpop.permute.xlu2 %3155 }
 0x599   :  { %v7779_v34 = vpop.permute.xlu1 %4451  ;;  %v7791_v49 = vpop.eup %5182  ;;  %v2545_v0 = vsub.f32 1.5, %v2544_v55  ;;  %v2554_v5 = vmul.f32 0.5, %v2553_v58 }
 0x59a   :  { %10443 = vst [vmem:[#allocation38_spill] sm:$0xff] %v7779_v34  ;;  %v7800_v39 = vpop.eup %5184  ;;  %v2562_v46 = vmul.f32 %v7791_v49, %v7763_v62  ;;  %v2000_v55 = vpop.f32.mrf.mxu1  ;;  %vm2568_vm0 = vweird.f32 %v7791_v49 }
 0x59b   :  { %v5187_v56 = vpop.eup %5186  ;;  %v2546_v53 = vmul.f32 %v7740_v8, %v2545_v0  ;;  %v3446_v59 = vmul.f32 %v7800_v39, %v7709_v10  ;;  %vm2569_vm2 = vmor %vm2567_vm1, %vm2568_vm0 }
 0x59c   :  { %v7823_v9 = vadd.f32 9.0, %v5187_v56  ;;  %v2563_v0 = vmul.f32 %v7791_v49, %v2562_v46  ;;  %v7833_v21 = vpop.eup %5188 }
 0x59d   :  { %v2550_v58 = vsel %vm2549_vm12, %v7740_v8, %v2546_v53  ;;  %v5191_v53 = vpop.eup %5190 }
 0x59e   :  { %2167 = vrot.lane.b32.xlu0 %v7787_v57, %s5536_s1  ;;  %4103 = vperm.xlu2 %5107, %v3432_v32   ;;  %v7816_v32 = vadd.f32 %v2000_v55, %v1912_v40  ;;  %v2555_v40 = vsub.f32 1.5, %v2554_v5  ;;  %v3017_v46 = vmul.f32 0.5, %v7823_v9  ;;  %v2564_v8 = vmul.f32 0.5, %v2563_v0  ;;  %v1913_v13 = vpop.f32.mrf.mxu0 }
 0x59f   :  { %4469 = vrot.lane.b32.xlu1 %v7676_v24, %s5538_s28  ;;  %v3443_v24 = vand.u32 2147483648, %v7685_v30  ;;  %v3447_v30 = vmul.f32 %v7800_v39, %v3446_v59  ;;  %5192 = vrsqrt.f32 %v7823_v9  ;;  %vm3476_vm7 = vcmp.eq.f32.partialorder %v7823_v9, inf }
 0x5a0   :  { %v7803_v44 = vpop.permute.xlu0 %2149  ;;  %v7805_v43 = vpop.permute.xlu2 %2153  ;;  %10446 = vst [vmem:[#allocation41_spill] sm:$0xff] %v7816_v32  ;;  %v2233_v55 = vmul.f32 1.442695, %v7816_v32  ;;  %v2556_v5 = vmul.f32 %v7767_v11, %v2555_v40  ;;  %v5010_v0 = vadd.f32 -0.33333334, %v3017_v46  ;;  %vm3478_vm9 = vcmp.eq.f32.partialorder %v7823_v9, 0.0 }
 0x5a1   :  { %10445 = vst [vmem:[#allocation40_spill] sm:$0xff] %v7805_v43  ;;  %v7807_v36 = vpop.permute.xlu1 %2783  ;;  %v3444_v15 = vsel %vm3442_vm10, %v3443_v24, %v3441_v22  ;;  %v2408_v22 = vmul.f32 4.5, %v7734_v25  ;;  %v3448_v59 = vmul.f32 0.5, %v3447_v30  ;;  %v3455_v43 = vand.u32 2147483648, %v7709_v10 }
 0x5a2   :  { %5194 = vpow2.f32 %v2233_v55  ;;  %v2560_v60 = vsel %vm2559_vm15, %v7767_v11, %v2556_v5 }
 0x5a3   :  { %v7851_v34 = vadd.f32 -3.0, %v2408_v22  ;;  %v3449_v55 = vsub.f32 1.5, %v3448_v59 }
 0x5a5   :  { %v7856_v40 = vpop.eup %5192  ;;  %5196 = vrsqrt.f32 %v7851_v34  ;;  %vm2577_vm10 = vweird.f32 %v7851_v34 }
 0x5a6   :  { %4108 = vperm.xlu0 %5108, %v3444_v15   ;;  %4471 = vrot.lane.b32.xlu2 %v7760_v4, %s5538_s28  ;;  %v3458_v15 = vmul.f32 %v7833_v21, %v7734_v25  ;;  %v2565_v4 = vsub.f32 1.5, %v2564_v8  ;;  %v3470_v59 = vmul.f32 %v7856_v40, %v7823_v9 }
 0x5a7   :  { %2823 = vperm.xlu1 %5106, %v2550_v58   ;;  %v7849_v58 = vadd.f32 9.0, %v5191_v53 }
 0x5a8   :  { %v7835_v24 = vpop.permute.xlu0 %4063  ;;  %v7837_v37 = vpop.permute.xlu2 %4073  ;;  %v3459_v30 = vmul.f32 %v7833_v21, %v3458_v15  ;;  %v2566_v5 = vmul.f32 %v7791_v49, %v2565_v4  ;;  %v3450_v15 = vmul.f32 %v7800_v39, %v3449_v55  ;;  %v3471_v29 = vmul.f32 %v7856_v40, %v3470_v59  ;;  %v7888_v55 = vld [vmem:[%s10237_s11] ss:$0 sm:$0xff] }
 0x5a9   :  { %10447 = vst [vmem:[#allocation42_spill] sm:$0xff] %v7835_v24  ;;  %v7839_v56 = vpop.permute.xlu1 %3150  ;;  %v5195_v46 = vpop.eup %5194  ;;  %v3018_v11 = vmul.f32 0.5, %v7849_v58 }
 0x5aa   :  { %10448 = vst [vmem:[#allocation43_spill] sm:$0xff] %v7837_v37  ;;  %v2002_v4 = vpop.f32.mrf.mxu1  ;;  %v3451_v62 = vmul.f32 %v3450_v15, %v7709_v10 }
 0x5ab   :  { %v7880_v37 = vpop.eup %5196 }
 0x5ac   :  { %v2572_v59 = vmul.f32 %v7880_v37, %v7851_v34  ;;  %vm2578_vm8 = vweird.f32 %v7880_v37 }
 0x5ad   :  { %vm2579_vm11 = vmor %vm2577_vm10, %vm2578_vm8 }
 0x5ae   :  { %4473 = vrot.lane.b32.xlu0 %v7787_v57, %s5538_s28  ;;  %2828 = vperm.xlu2 %5107, %v2560_v60   ;;  %v2409_v60 = vmul.f32 4.5, %v7823_v9  ;;  %v7874_v57 = vadd.f32 9.0, %v5195_v46  ;;  %v2410_v46 = vmul.f32 4.5, %v7849_v58 }
 0x5af   :  { %3195 = vperm.xlu1 %5106, %v5010_v0   ;;  %v3460_v0 = vmul.f32 0.5, %v3459_v30 }
 0x5b0   :  { %v7859_v53 = vpop.permute.xlu0 %4455  ;;  %v7862_v8 = vpop.permute.xlu2 %4459  ;;  %v7877_v63 = vadd.f32 -3.0, %v2409_v60  ;;  %v3472_v60 = vmul.f32 0.5, %v3471_v29  ;;  %v7908_v12 = vadd.f32 -3.0, %v2410_v46  ;;  %v2573_v29 = vmul.f32 %v7880_v37, %v2572_v59 }
 0x5b1   :  { %10449 = vst [vmem:[#allocation44_spill] sm:$0xff] %v7859_v53  ;;  %v7864_v22 = vpop.permute.xlu1 %2151  ;;  %v2570_v53 = vsel %vm2569_vm2, %v7791_v49, %v2566_v5  ;;  %v3461_v39 = vsub.f32 1.5, %v3460_v0  ;;  %v1914_v49 = vadd.f32 %v7888_v55, %v1913_v13  ;;  %v1916_v5 = vpop.f32.mrf.mxu0  ;;  %v3453_v13 = vsel %vm3452_vm3, %v7709_v10, %v3451_v62 }
 0x5b2   :  { %10450 = vst [vmem:[#allocation45_spill] sm:$0xff] %v7862_v8  ;;  %v5011_v8 = vadd.f32 -0.33333334, %v3018_v11  ;;  %5198 = vrsqrt.f32 %v7877_v63  ;;  %v3456_v28 = vsel %vm3454_vm4, %v3455_v43, %v3453_v13  ;;  %v3473_v6 = vsub.f32 1.5, %v3472_v60 }
 0x5b3   :  { %10451 = vst [vmem:[#allocation46_spill] sm:$0xff] %v7864_v22  ;;  %v3462_v15 = vmul.f32 %v7833_v21, %v3461_v39  ;;  %v7905_v0 = vadd.f32 %v2002_v4, %v1914_v49  ;;  %v1917_v62 = vadd.f32 %v7888_v55, %v1916_v5  ;;  %v2005_v39 = vpop.f32.mrf.mxu1  ;;  %5200 = vrsqrt.f32 %v7908_v12 }
 0x5b4   :  { %v3474_v43 = vmul.f32 %v7856_v40, %v3473_v6  ;;  %5202 = vrsqrt.f32 %v7849_v58  ;;  %v3467_v59 = vand.u32 2147483648, %v7734_v25  ;;  %vm2587_vm13 = vweird.f32 %v7877_v63 }
 0x5b5   :  { %10452 = vst [vmem:[#allocation47_spill] sm:$0xff] %v7905_v0  ;;  %v3463_v21 = vmul.f32 %v3462_v15, %v7734_v25  ;;  %v2235_v4 = vmul.f32 1.442695, %v7905_v0  ;;  %v7932_v5 = vadd.f32 %v2005_v39, %v1917_v62  ;;  %vm2597_vm0 = vweird.f32 %v7908_v12 }
 0x5b6   :  { %2833 = vperm.xlu0 %5108, %v2570_v53   ;;  %3200 = vperm.xlu2 %5107, %v5011_v8   ;;  %v3019_v53 = vmul.f32 0.5, %v7874_v57  ;;  %v3475_v6 = vmul.f32 %v3474_v43, %v7823_v9  ;;  %vm3488_vm2 = vcmp.eq.f32.partialorder %v7849_v58, inf  ;;  %vm3490_vm3 = vcmp.eq.f32.partialorder %v7849_v58, 0.0 }
 0x5b7   :  { %2169 = vrot.lane.b32.xlu1 %v7816_v32, %s5536_s1  ;;  %v3465_v46 = vsel %vm3464_vm5, %v7734_v25, %v3463_v21  ;;  %5204 = vpow2.f32 %v2235_v4  ;;  %10454 = vst [vmem:[#allocation49_spill] sm:$0xff] %v7932_v5  ;;  %v2237_v25 = vmul.f32 1.442695, %v7932_v5  ;;  %vm3500_vm4 = vcmp.eq.f32.partialorder %v7874_v57, inf }
 0x5b8   :  { %v7891_v30 = vpop.permute.xlu0 %2793  ;;  %v7895_v8 = vpop.permute.xlu2 %2803  ;;  %v5012_v23 = vadd.f32 -0.33333334, %v3019_v53  ;;  %v3468_v15 = vsel %vm3466_vm6, %v3467_v59, %v3465_v46  ;;  %5206 = vrsqrt.f32 %v7874_v57  ;;  %vm3502_vm5 = vcmp.eq.f32.partialorder %v7874_v57, 0.0 }
 0x5b9   :  { %v7897_v11 = vpop.permute.xlu1 %4068  ;;  %v7912_v14 = vpop.eup %5198  ;;  %5208 = vpow2.f32 %v2237_v25 }
 0x5ba   :  { %v2582_v53 = vmul.f32 %v7912_v14, %v7877_v63  ;;  %v1918_v60 = vpop.f32.mrf.mxu0  ;;  %v7936_v13 = vpop.eup %5200  ;;  %vm2588_vm12 = vweird.f32 %v7912_v14 }
 0x5bb   :  { %v1919_v21 = vadd.f32 %v7888_v55, %v1918_v60  ;;  %v7945_v4 = vpop.eup %5202  ;;  %v2592_v43 = vmul.f32 %v7936_v13, %v7908_v12  ;;  %v3477_v60 = vsel %vm3476_vm7, %v7823_v9, %v3475_v6  ;;  %vm2589_vm14 = vmor %vm2587_vm13, %vm2588_vm12  ;;  %vm2598_vm15 = vweird.f32 %v7936_v13 }
 0x5bc   :  { %vm2599_vm1 = vmor %vm2597_vm0, %vm2598_vm15 }
 0x5be   :  { %3205 = vperm.xlu0 %5108, %v5012_v23   ;;  %2171 = vrot.lane.b32.xlu2 %v7905_v0, %s5536_s1 }
 0x5bf   :  { %4113 = vperm.xlu1 %5106, %v3456_v28   ;;  %v2574_v28 = vmul.f32 0.5, %v2573_v29  ;;  %v2583_v29 = vmul.f32 %v7912_v14, %v2582_v53  ;;  %v2007_v53 = vpop.f32.mrf.mxu1 }
 0x5c0   :  { %v7919_v49 = vpop.permute.xlu0 %3160  ;;  %v7922_v10 = vpop.permute.xlu2 %3170 }
 0x5c1   :  { %v7924_v23 = vpop.permute.xlu1 %4457  ;;  %v2575_v40 = vsub.f32 1.5, %v2574_v28  ;;  %v5205_v28 = vpop.eup %5204 }
 0x5c2   :  { %10453 = vst [vmem:[#allocation48_spill] sm:$0xff] %v7924_v23  ;;  %v3479_v23 = vand.u32 2147483648, %v7823_v9  ;;  %v7978_v34 = vpop.eup %5206  ;;  %v1921_v63 = vpop.f32.mrf.mxu0 }
 0x5c3   :  { %v2576_v59 = vmul.f32 %v7880_v37, %v2575_v40  ;;  %v2593_v40 = vmul.f32 %v7936_v13, %v2592_v43  ;;  %v1922_v47 = vadd.f32 %v7888_v55, %v1921_v63 }
 0x5c4   :  { %v3480_v6 = vsel %vm3478_vm9, %v3479_v23, %v3477_v60  ;;  %v2411_v60 = vmul.f32 4.5, %v7874_v57 }
 0x5c6   :  { %2173 = vrot.lane.b32.xlu0 %v7932_v5, %s5536_s1  ;;  %4118 = vperm.xlu2 %5107, %v3468_v15   ;;  %v2584_v15 = vmul.f32 0.5, %v2583_v29  ;;  %v2580_v29 = vsel %vm2579_vm11, %v7880_v37, %v2576_v59  ;;  %v2594_v37 = vmul.f32 0.5, %v2593_v40  ;;  %v5209_v59 = vpop.eup %5208 }
 0x5c7   :  { %4475 = vrot.lane.b32.xlu1 %v7816_v32, %s5538_s28  ;;  %v7961_v32 = vadd.f32 %v2007_v53, %v1919_v21 }
 0x5c8   :  { %v7948_v62 = vpop.permute.xlu0 %2155  ;;  %v7950_v39 = vpop.permute.xlu2 %2159  ;;  %v2585_v21 = vsub.f32 1.5, %v2584_v15 }
 0x5c9   :  { %10455 = vst [vmem:[#allocation50_spill] sm:$0xff] %v7948_v62  ;;  %v7952_v46 = vpop.permute.xlu1 %2798  ;;  %v7968_v62 = vadd.f32 9.0, %v5205_v28  ;;  %v2239_v53 = vmul.f32 1.442695, %v7961_v32 }
 0x5ca   :  { %10456 = vst [vmem:[#allocation51_spill] sm:$0xff] %v7950_v39  ;;  %v3482_v39 = vmul.f32 %v7945_v4, %v7849_v58  ;;  %v2586_v15 = vmul.f32 %v7912_v14, %v2585_v21  ;;  %v1923_v63 = vpop.f32.mrf.mxu0 }
 0x5cb   :  { %10457 = vst [vmem:[#allocation52_spill] sm:$0xff] %v7961_v32  ;;  %v3020_v43 = vmul.f32 0.5, %v7968_v62  ;;  %5210 = vrsqrt.f32 %v7968_v62  ;;  %vm3512_vm6 = vcmp.eq.f32.partialorder %v7968_v62, inf  ;;  %vm3514_vm8 = vcmp.eq.f32.partialorder %v7968_v62, 0.0 }
 0x5cc   :  { %v3483_v9 = vmul.f32 %v7945_v4, %v3482_v39  ;;  %5212 = vpow2.f32 %v2239_v53 }
 0x5cd   :  { %v5013_v40 = vadd.f32 -0.33333334, %v3020_v43 }
 0x5ce   :  { %4123 = vperm.xlu0 %5108, %v3480_v6   ;;  %4477 = vrot.lane.b32.xlu2 %v7905_v0, %s5538_s28  ;;  %v3484_v39 = vmul.f32 0.5, %v3483_v9  ;;  %v3494_v6 = vmul.f32 %v7978_v34, %v7874_v57  ;;  %v2595_v0 = vsub.f32 1.5, %v2594_v37 }
 0x5cf   :  { %2838 = vperm.xlu1 %5106, %v2580_v29   ;;  %v7994_v29 = vadd.f32 9.0, %v5209_v59 }
 0x5d0   :  { %v7980_v23 = vpop.permute.xlu0 %4078  ;;  %v7982_v25 = vpop.permute.xlu2 %4088  ;;  %v3485_v53 = vsub.f32 1.5, %v3484_v39  ;;  %v3495_v9 = vmul.f32 %v7978_v34, %v3494_v6 }
 0x5d1   :  { %10458 = vst [vmem:[#allocation53_spill] sm:$0xff] %v7980_v23  ;;  %v7984_v28 = vpop.permute.xlu1 %3165  ;;  %v2590_v23 = vsel %vm2589_vm14, %v7912_v14, %v2586_v15  ;;  %v8001_v21 = vpop.eup %5210  ;;  %v3021_v14 = vmul.f32 0.5, %v7994_v29  ;;  %v2596_v15 = vmul.f32 %v7936_v13, %v2595_v0 }
 0x5d2   :  { %10459 = vst [vmem:[#allocation54_spill] sm:$0xff] %v7982_v25  ;;  %v7996_v25 = vadd.f32 -3.0, %v2411_v60  ;;  %v5213_v43 = vpop.eup %5212  ;;  %v3506_v39 = vmul.f32 %v8001_v21, %v7968_v62  ;;  %v3486_v6 = vmul.f32 %v7945_v4, %v3485_v53  ;;  %v2010_v0 = vpop.f32.mrf.mxu1 }
 0x5d3   :  { %10460 = vst [vmem:[#allocation55_spill] sm:$0xff] %v7984_v28 }
 0x5d4   :  { %5214 = vrsqrt.f32 %v7996_v25  ;;  %v3507_v28 = vmul.f32 %v8001_v21, %v3506_v39  ;;  %v3487_v12 = vmul.f32 %v3486_v6, %v7849_v58  ;;  %vm2607_vm9 = vweird.f32 %v7996_v25 }
 0x5d6   :  { %4479 = vrot.lane.b32.xlu0 %v7932_v5, %s5538_s28  ;;  %2843 = vperm.xlu2 %5107, %v2590_v23   ;;  %v2412_v23 = vmul.f32 4.5, %v7968_v62  ;;  %v8019_v5 = vadd.f32 9.0, %v5213_v43 }
 0x5d7   :  { %3210 = vperm.xlu1 %5106, %v5013_v40   ;;  %v3496_v40 = vmul.f32 0.5, %v3495_v9  ;;  %v2413_v9 = vmul.f32 4.5, %v7994_v29 }
 0x5d8   :  { %v8004_v59 = vpop.permute.xlu0 %4461  ;;  %v8007_v37 = vpop.permute.xlu2 %4465 }
 0x5d9   :  { %10461 = vst [vmem:[#allocation56_spill] sm:$0xff] %v8004_v59  ;;  %v8009_v60 = vpop.permute.xlu1 %2157  ;;  %v2600_v59 = vsel %vm2599_vm1, %v7936_v13, %v2596_v15  ;;  %v3497_v4 = vsub.f32 1.5, %v3496_v40  ;;  %v3022_v13 = vmul.f32 0.5, %v8019_v5  ;;  %v8043_v15 = vadd.f32 %v2010_v0, %v1922_v47 }
 0x5da   :  { %10462 = vst [vmem:[#allocation57_spill] sm:$0xff] %v8007_v37  ;;  %v5014_v37 = vadd.f32 -0.33333334, %v3021_v14  ;;  %v8025_v42 = vpop.eup %5214  ;;  %v3491_v40 = vand.u32 2147483648, %v7849_v58  ;;  %v1924_v0 = vadd.f32 %v7888_v55, %v1923_v63  ;;  %vm3524_vm1 = vcmp.eq.f32.partialorder %v7994_v29, inf }
 0x5db   :  { %10463 = vst [vmem:[#allocation58_spill] sm:$0xff] %v8009_v60  ;;  %v8022_v60 = vadd.f32 -3.0, %v2412_v23  ;;  %v2602_v14 = vmul.f32 %v8025_v42, %v7996_v25  ;;  %v3489_v23 = vsel %vm3488_vm2, %v7849_v58, %v3487_v12  ;;  %v3498_v39 = vmul.f32 %v7978_v34, %v3497_v4  ;;  %v2012_v12 = vpop.f32.mrf.mxu1 }
 0x5dc   :  { %10467 = vst [vmem:[#allocation62_spill] sm:$0xff] %v8043_v15  ;;  %v5015_v6 = vadd.f32 -0.33333334, %v3022_v13  ;;  %v2241_v47 = vmul.f32 1.442695, %v8043_v15  ;;  %vm2608_vm7 = vweird.f32 %v8025_v42  ;;  %vm3526_vm2 = vcmp.eq.f32.partialorder %v7994_v29, 0.0 }
 0x5dd   :  { %5216 = vrsqrt.f32 %v8022_v60  ;;  %v3499_v34 = vmul.f32 %v3498_v39, %v7874_v57  ;;  %v3503_v39 = vand.u32 2147483648, %v7874_v57  ;;  %vm2609_vm10 = vmor %vm2607_vm9, %vm2608_vm7  ;;  %vm2617_vm12 = vweird.f32 %v8022_v60 }
 0x5de   :  { %2848 = vperm.xlu0 %5108, %v2600_v59   ;;  %3215 = vperm.xlu2 %5107, %v5014_v37   ;;  %v3508_v37 = vmul.f32 0.5, %v3507_v28  ;;  %v2603_v28 = vmul.f32 %v8025_v42, %v2602_v14 }
 0x5df   :  { %2175 = vrot.lane.b32.xlu1 %v7961_v32, %s5536_s1  ;;  %v3501_v14 = vsel %vm3500_vm4, %v7874_v57, %v3499_v34  ;;  %vm3538_vm4 = vcmp.eq.f32.partialorder %v8019_v5, 0.0 }
 0x5e0   :  { %v8031_v53 = vpop.permute.xlu0 %3175  ;;  %v8035_v59 = vpop.permute.xlu2 %2813  ;;  %v3509_v22 = vsub.f32 1.5, %v3508_v37  ;;  %v2604_v63 = vmul.f32 0.5, %v2603_v28 }
 0x5e1   :  { %10464 = vst [vmem:[#allocation59_spill] sm:$0xff] %v8031_v53  ;;  %v8037_v43 = vpop.permute.xlu1 %4083  ;;  %v8048_v53 = vadd.f32 -3.0, %v2413_v9 }
 0x5e2   :  { %10465 = vst [vmem:[#allocation60_spill] sm:$0xff] %v8035_v59  ;;  %v3510_v9 = vmul.f32 %v8001_v21, %v3509_v22  ;;  %v2605_v21 = vsub.f32 1.5, %v2604_v63 }
 0x5e3   :  { %10466 = vst [vmem:[#allocation61_spill] sm:$0xff] %v8037_v43  ;;  %v3492_v43 = vsel %vm3490_vm3, %v3491_v40, %v3489_v23  ;;  %v8052_v59 = vpop.eup %5216  ;;  %5218 = vrsqrt.f32 %v8048_v53  ;;  %v1926_v23 = vpop.f32.mrf.mxu0  ;;  %v3504_v40 = vsel %vm3502_vm5, %v3503_v39, %v3501_v14  ;;  %vm2627_vm15 = vweird.f32 %v8048_v53 }
 0x5e4   :  { %v2612_v37 = vmul.f32 %v8052_v59, %v8022_v60  ;;  %5220 = vrsqrt.f32 %v7994_v29  ;;  %v3511_v22 = vmul.f32 %v3510_v9, %v7968_v62  ;;  %v2015_v63 = vpop.f32.mrf.mxu1  ;;  %vm2618_vm11 = vweird.f32 %v8052_v59 }
 0x5e5   :  { %5222 = vpow2.f32 %v2241_v47  ;;  %vm2619_vm13 = vmor %vm2617_vm12, %vm2618_vm11  ;;  %vm3536_vm3 = vcmp.eq.f32.partialorder %v8019_v5, inf }
 0x5e6   :  { %3220 = vperm.xlu0 %5108, %v5015_v6   ;;  %2177 = vrot.lane.b32.xlu2 %v8043_v15, %s5536_s1  ;;  %v2613_v28 = vmul.f32 %v8052_v59, %v2612_v37  ;;  %v3513_v37 = vsel %vm3512_vm6, %v7968_v62, %v3511_v22  ;;  %5224 = vrsqrt.f32 %v8019_v5 }
 0x5e7   :  { %4128 = vperm.xlu1 %5106, %v3492_v43   ;;  %v8071_v43 = vadd.f32 %v2012_v12, %v1924_v0  ;;  %v1927_v0 = vadd.f32 %v7888_v55, %v1926_v23  ;;  %v2606_v23 = vmul.f32 %v8025_v42, %v2605_v21 }
 0x5e8   :  { %v8059_v4 = vpop.permute.xlu0 %2161  ;;  %v8062_v58 = vpop.permute.xlu2 %3185 }
 0x5e9   :  { %10468 = vst [vmem:[#allocation63_spill] sm:$0xff] %v8059_v4  ;;  %v8064_v13 = vpop.permute.xlu1 %4463  ;;  %v8076_v6 = vpop.eup %5218  ;;  %v2243_v47 = vmul.f32 1.442695, %v8071_v43 }
 0x5ea   :  { %10469 = vst [vmem:[#allocation64_spill] sm:$0xff] %v8064_v13  ;;  %v8086_v57 = vpop.eup %5220  ;;  %v2622_v9 = vmul.f32 %v8076_v6, %v8048_v53  ;;  %v3515_v13 = vand.u32 2147483648, %v7968_v62  ;;  %vm2628_vm14 = vweird.f32 %v8076_v6 }
 0x5eb   :  { %10470 = vst [vmem:[#allocation65_spill] sm:$0xff] %v8071_v43  ;;  %v5223_v12 = vpop.eup %5222  ;;  %5226 = vpow2.f32 %v2243_v47  ;;  %vm2629_vm0 = vmor %vm2627_vm15, %vm2628_vm14 }
 0x5ec   :  { %v3516_v22 = vsel %vm3514_vm8, %v3515_v13, %v3513_v37  ;;  %v2623_v21 = vmul.f32 %v8076_v6, %v2622_v9  ;;  %v2414_v13 = vmul.f32 4.5, %v8019_v5 }
 0x5ee   :  { %2179 = vrot.lane.b32.xlu0 %v8071_v43, %s5536_s1  ;;  %4133 = vperm.xlu2 %5107, %v3504_v40   ;;  %v2614_v40 = vmul.f32 0.5, %v2613_v28  ;;  %v2610_v28 = vsel %vm2609_vm10, %v8025_v42, %v2606_v23  ;;  %v2624_v23 = vmul.f32 0.5, %v2623_v21 }
 0x5ef   :  { %4481 = vrot.lane.b32.xlu1 %v7961_v32, %s5538_s28  ;;  %v8101_v32 = vadd.f32 %v2015_v63, %v1927_v0 }
 0x5f0   :  { %v8088_v34 = vpop.permute.xlu0 %4093  ;;  %v8090_v14 = vpop.permute.xlu2 %2165  ;;  %v2615_v47 = vsub.f32 1.5, %v2614_v40 }
 0x5f1   :  { %10471 = vst [vmem:[#allocation66_spill] sm:$0xff] %v8088_v34  ;;  %v8092_v39 = vpop.permute.xlu1 %2808  ;;  %v3518_v34 = vmul.f32 %v8086_v57, %v7994_v29  ;;  %v2245_v0 = vmul.f32 1.442695, %v8101_v32 }
 0x5f2   :  { %10472 = vst [vmem:[#allocation67_spill] sm:$0xff] %v8090_v14  ;;  %v8106_v14 = vadd.f32 9.0, %v5223_v12  ;;  %v8118_v12 = vpop.eup %5224  ;;  %v2616_v40 = vmul.f32 %v8052_v59, %v2615_v47 }
 0x5f3   :  { %10473 = vst [vmem:[#allocation68_spill] sm:$0xff] %v8101_v32  ;;  %v3519_v62 = vmul.f32 %v8086_v57, %v3518_v34  ;;  %v5227_v9 = vpop.eup %5226 }
 0x5f4   :  { %5228 = vrsqrt.f32 %v8106_v14  ;;  %v3023_v37 = vmul.f32 0.5, %v8106_v14  ;;  %v2620_v21 = vsel %vm2619_vm13, %v8052_v59, %v2616_v40  ;;  %v2415_v40 = vmul.f32 4.5, %v8106_v14 }
 0x5f5   :  { %5230 = vpow2.f32 %v2245_v0  ;;  %v3520_v34 = vmul.f32 0.5, %v3519_v62  ;;  %vm3548_vm5 = vcmp.eq.f32.partialorder %v8106_v14, inf  ;;  %vm3550_vm10 = vcmp.eq.f32.partialorder %v8106_v14, 0.0 }
 0x5f6   :  { %4138 = vperm.xlu0 %5108, %v3516_v22   ;;  %4483 = vrot.lane.b32.xlu2 %v8043_v15, %s5538_s28  ;;  %v3530_v22 = vmul.f32 %v8118_v12, %v8019_v5  ;;  %v8136_v15 = vadd.f32 -3.0, %v2414_v13  ;;  %v8166_v53 = vadd.f32 -3.0, %v2415_v40 }
 0x5f7   :  { %2853 = vperm.xlu1 %5106, %v2610_v28   ;;  %v8133_v28 = vadd.f32 9.0, %v5227_v9  ;;  %v3521_v47 = vsub.f32 1.5, %v3520_v34  ;;  %v2941_v34 = vmul.f32 %v7807_v36, %v7351_v51  ;;  %v2942_v51 = vmul.f32 %v7752_v31, %v7377_v38 }
 0x5f8   :  { %v8120_v25 = vpop.permute.xlu0 %4467  ;;  %v8124_v63 = vpop.permute.xlu2 %4103  ;;  %v3531_v0 = vmul.f32 %v8118_v12, %v3530_v22  ;;  %5232 = vrsqrt.f32 %v8136_v15  ;;  %vm2637_vm8 = vweird.f32 %v8136_v15  ;;  %vm2647_vm15 = vweird.f32 %v8166_v53 }
 0x5f9   :  { %10474 = vst [vmem:[#allocation69_spill] sm:$0xff] %v8120_v25  ;;  %v8126_v42 = vpop.permute.xlu1 %3180  ;;  %v5016_v25 = vadd.f32 -0.33333334, %v3023_v37  ;;  %v3024_v60 = vmul.f32 0.5, %v8133_v28  ;;  %v1928_v22 = vpop.f32.mrf.mxu0  ;;  %v2973_v36 = vadd.f32 1.0, %v2941_v34  ;;  %5234 = vrsqrt.f32 %v8166_v53 }
 0x5fa   :  { %10475 = vst [vmem:[#allocation70_spill] sm:$0xff] %v8124_v63  ;;  %v2625_v63 = vsub.f32 1.5, %v2624_v23  ;;  %v8138_v4 = vpop.eup %5228 }
 0x5fb   :  { %v5231_v13 = vpop.eup %5230  ;;  %v3069_v34 = vmul.f32 %v2973_v36, %v2973_v36 }
 0x5fc   :  { %v2626_v23 = vmul.f32 %v8076_v6, %v2625_v63 }
 0x5fe   :  { %4485 = vrot.lane.b32.xlu0 %v8071_v43, %s5538_s28  ;;  %2858 = vperm.xlu2 %5107, %v2620_v21   ;;  %v3532_v43 = vmul.f32 0.5, %v3531_v0  ;;  %v8168_v24 = vpop.eup %5232 }
 0x5ff   :  { %3225 = vperm.xlu1 %5106, %v5016_v25   ;;  %v3542_v25 = vmul.f32 %v8138_v4, %v8106_v14  ;;  %vm2638_vm6 = vweird.f32 %v8168_v24 }
 0x600   :  { %v2819_v62 = vpop.permute.xlu0 %2818  ;;  %v8147_v9 = vpop.permute.xlu2 %4471  ;;  %v3533_v0 = vsub.f32 1.5, %v3532_v43  ;;  %v2974_v43 = vadd.f32 1.0, %v2942_v51  ;;  %vm8274_vm11 = vmor %vm2637_vm8, %vm2638_vm6  ;;  %vm3560_vm6 = vcmp.eq.f32.partialorder %v8133_v28, inf }
 0x601   :  { %10476 = vst [vmem:[#allocation71_spill] sm:$0xff] %v8147_v9  ;;  %v2948_v59 = vmul.f32 %v2819_v62, %v7421_v2  ;;  %v8150_v37 = vpop.permute.xlu1 %2163  ;;  %v3522_v9 = vmul.f32 %v8086_v57, %v3521_v47  ;;  %v8160_v2 = vadd.f32 9.0, %v5231_v13  ;;  %v5017_v62 = vadd.f32 -0.33333334, %v3024_v60  ;;  %v2017_v60 = vpop.f32.mrf.mxu1 }
 0x602   :  { %10477 = vst [vmem:[#allocation72_spill] sm:$0xff] %v8150_v37  ;;  %v2630_v37 = vsel %vm2629_vm0, %v8076_v6, %v2626_v23  ;;  %v3543_v61 = vmul.f32 %v8138_v4, %v3542_v25  ;;  %v1929_v6 = vadd.f32 %v7888_v55, %v1928_v22  ;;  %v2416_v23 = vmul.f32 4.5, %v8133_v28 }
 0x603   :  { %v2980_v21 = vadd.f32 1.0, %v2948_v59  ;;  %v3523_v47 = vmul.f32 %v3522_v9, %v7994_v29  ;;  %v3025_v59 = vmul.f32 0.5, %v8160_v2  ;;  %v2632_v9 = vmul.f32 %v8168_v24, %v8136_v15 }
 0x604   :  { %v3544_v25 = vmul.f32 0.5, %v3543_v61  ;;  %v3534_v61 = vmul.f32 %v8118_v12, %v3533_v0  ;;  %v8199_v51 = vadd.f32 %v2017_v60, %v1929_v6  ;;  %v8205_v12 = vpop.eup %5234  ;;  %v3070_v0 = vmul.f32 %v2974_v43, %v2974_v43 }
 0x605   :  { %v3076_v63 = vmul.f32 %v2980_v21, %v2980_v21  ;;  %v3525_v22 = vsel %vm3524_vm1, %v7994_v29, %v3523_v47  ;;  %v2633_v16 = vmul.f32 %v8168_v24, %v2632_v9  ;;  %vm2648_vm13 = vweird.f32 %v8205_v12 }
 0x606   :  { %2863 = vperm.xlu0 %5108, %v2630_v37   ;;  %3230 = vperm.xlu2 %5107, %v5017_v62   ;;  %v5018_v62 = vadd.f32 -0.33333334, %v3025_v59  ;;  %10479 = vst [vmem:[#allocation74_spill] sm:$0xff] %v8199_v51  ;;  %v3101_v59 = vmul.f32 %v3069_v34, %v2973_v36  ;;  %v3535_v6 = vmul.f32 %v3534_v61, %v8019_v5  ;;  %vm2649_vm1 = vmor %vm2647_vm15, %vm2648_vm13  ;;  %vm3572_vm8 = vcmp.eq.f32.partialorder %v8160_v2, inf }
 0x607   :  { %v3108_v57 = vmul.f32 %v3076_v63, %v2980_v21  ;;  %2181 = vrot.lane.b32.xlu1 %v8101_v32, %s5536_s1  ;;  %v3527_v63 = vand.u32 2147483648, %v7994_v29  ;;  %v2634_v36 = vmul.f32 0.5, %v2633_v16  ;;  %v3102_v61 = vmul.f32 %v3070_v0, %v2974_v43 }
 0x608   :  { %v8176_v13 = vpop.permute.xlu0 %3190  ;;  %v2829_v31 = vpop.permute.xlu2 %2828 }
 0x609   :  { %v8181_v38 = vmul.f32 %v7922_v10, %v3108_v57  ;;  %v8183_v37 = vpop.permute.xlu1 %4098  ;;  %v2950_v40 = vmul.f32 %v2829_v31, %v7454_v20  ;;  %v8197_v57 = vadd.f32 -3.0, %v2416_v23  ;;  %v1931_v20 = vpop.f32.mrf.mxu0  ;;  %v3545_v31 = vsub.f32 1.5, %v3544_v25 }
 0x60a   :  { %v3528_v47 = vsel %vm3526_vm2, %v3527_v63, %v3525_v22  ;;  %v1932_v60 = vadd.f32 %v7888_v55, %v1931_v20  ;;  %v2642_v22 = vmul.f32 %v8205_v12, %v8166_v53  ;;  %v2943_v63 = vmul.f32 %v7891_v30, %v7355_v3 }
 0x60b   :  { %10478 = vst [vmem:[#allocation73_spill] sm:$0xff] %v8181_v38  ;;  %v8192_v10 = vmul.f32 2.0, %v8181_v38  ;;  %v2982_v21 = vadd.f32 1.0, %v2950_v40  ;;  %v3546_v40 = vmul.f32 %v8138_v4, %v3545_v31  ;;  %v3537_v4 = vsel %vm3536_vm3, %v8019_v5, %v3535_v6 }
 0x60c   :  { %v3539_v31 = vand.u32 2147483648, %v8019_v5  ;;  %v2635_v43 = vsub.f32 1.5, %v2634_v36  ;;  %v2643_v0 = vmul.f32 %v8205_v12, %v2642_v22  ;;  %v2975_v6 = vadd.f32 1.0, %v2943_v63 }
 0x60d   :  { %5236 = vrsqrt.f32 %v8192_v10  ;;  %v3078_v38 = vmul.f32 %v2982_v21, %v2982_v21  ;;  %v8250_v5 = vmul.f32 %v7667_v54, %v3102_v61  ;;  %vm3817_vm9 = vweird.f32 %v8192_v10 }
 0x60e   :  { %3235 = vperm.xlu0 %5108, %v5018_v62   ;;  %2183 = vrot.lane.b32.xlu2 %v8199_v51, %s5536_s1  ;;  %5238 = vrsqrt.f32 %v8197_v57  ;;  %v2020_v62 = vpop.f32.mrf.mxu1  ;;  %v3540_v30 = vsel %vm3538_vm4, %v3539_v31, %v3537_v4  ;;  %v2644_v63 = vmul.f32 0.5, %v2643_v0  ;;  %v3071_v4 = vmul.f32 %v2975_v6, %v2975_v6 }
 0x60f   :  { %4143 = vperm.xlu1 %5106, %v3528_v47   ;;  %v3110_v23 = vmul.f32 %v3078_v38, %v2982_v21  ;;  %v8226_v21 = vmul.f32 %v7721_v45, %v3101_v59  ;;  %v8231_v16 = vadd.f32 %v2020_v62, %v1932_v60  ;;  %v3547_v45 = vmul.f32 %v3546_v40, %v8106_v14 }
 0x610   :  { %v8211_v25 = vpop.permute.xlu0 %2167  ;;  %v8214_v9 = vpop.permute.xlu2 %3200  ;;  %v2247_v59 = vmul.f32 1.442695, %v8199_v51  ;;  %v2636_v62 = vmul.f32 %v8168_v24, %v2635_v43  ;;  %v3551_v31 = vand.u32 2147483648, %v8106_v14  ;;  %vm2657_vm4 = vweird.f32 %v8197_v57 }
 0x611   :  { %10480 = vst [vmem:[#allocation75_spill] sm:$0xff] %v8211_v25  ;;  %v8216_v29 = vpop.permute.xlu1 %4469  ;;  %v8220_v34 = vmul.f32 %v8126_v42, %v3110_v23  ;;  %v3549_v22 = vsel %vm3548_vm5, %v8106_v14, %v3547_v45 }
 0x612   :  { %10481 = vst [vmem:[#allocation76_spill] sm:$0xff] %v8216_v29  ;;  %v3552_v0 = vsel %vm3550_vm10, %v3551_v31, %v3549_v22  ;;  %v3103_v29 = vmul.f32 %v3071_v4, %v2975_v6 }
 0x613   :  { %10482 = vst [vmem:[#allocation77_spill] sm:$0xff] %v8220_v34  ;;  %v5237_v38 = vpop.eup %5236  ;;  %v8234_v42 = vmul.f32 2.0, %v8220_v34 }
 0x614   :  { %10483 = vst [vmem:[#allocation78_spill] sm:$0xff] %v8231_v16  ;;  %v3812_v20 = vmul.f32 %v5237_v38, %v8192_v10  ;;  %v8240_v47 = vpop.eup %5238  ;;  %vm3818_vm7 = vweird.f32 %v5237_v38 }
 0x615   :  { %5240 = vrsqrt.f32 %v8234_v42  ;;  %v2652_v54 = vmul.f32 %v8240_v47, %v8197_v57  ;;  %vm3819_vm12 = vmor %vm3817_vm9, %vm3818_vm7  ;;  %vm3837_vm0 = vweird.f32 %v8234_v42  ;;  %vm2658_vm3 = vweird.f32 %v8240_v47 }
 0x616   :  { %v3813_v3 = vmul.f32 %v5237_v38, %v3812_v20  ;;  %2185 = vrot.lane.b32.xlu0 %v8231_v16, %s5536_s1  ;;  %4148 = vperm.xlu2 %5107, %v3540_v30   ;;  %5242 = vlog2.f32 %v8226_v21  ;;  %v1933_v20 = vpop.f32.mrf.mxu0  ;;  %v2249_v30 = vmul.f32 1.442695, %v8231_v16  ;;  %vm2659_vm5 = vmor %vm2657_vm4, %vm2658_vm3  ;;  %vm3562_vm7 = vcmp.eq.f32.partialorder %v8133_v28, 0.0 }
 0x617   :  { %4487 = vrot.lane.b32.xlu1 %v8101_v32, %s5538_s28  ;;  %5244 = vrsqrt.f32 %v8133_v28  ;;  %v2653_v10 = vmul.f32 %v8240_v47, %v2652_v54  ;;  %v1934_v14 = vadd.f32 %v7888_v55, %v1933_v20  ;;  %v2645_v32 = vsub.f32 1.5, %v2644_v63  ;;  %v2022_v55 = vpop.f32.mrf.mxu1 }
 0x618   :  { %v3814_v60 = vmul.f32 0.5, %v3813_v3  ;;  %v8252_v23 = vpop.permute.xlu0 %4108  ;;  %v8256_v40 = vpop.permute.xlu2 %2171  ;;  %5246 = vpow2.f32 %v2247_v59 }
 0x619   :  { %10484 = vst [vmem:[#allocation79_spill] sm:$0xff] %v8256_v40  ;;  %v8258_v36 = vpop.permute.xlu1 %2823  ;;  %5248 = vlog2.f32 %v8250_v5  ;;  %v2654_v63 = vmul.f32 0.5, %v2653_v10  ;;  %v8303_v20 = vadd.f32 %v2022_v55, %v1934_v14  ;;  %v2646_v31 = vmul.f32 %v8205_v12, %v2645_v32 }
 0x61a   :  { %v3815_v61 = vsub.f32 1.5, %v3814_v60  ;;  %5250 = vrsqrt.f32 %v8160_v2  ;;  %v2304_v10 = vmul.f32 0.5, %v7699_v35 }
 0x61b   :  { %v8268_v45 = vpop.eup %5240  ;;  %5252 = vpow2.f32 %v2249_v30  ;;  %10490 = vst [vmem:[#allocation83_spill] sm:$0xff] %v8303_v20  ;;  %v2655_v32 = vsub.f32 1.5, %v2654_v63  ;;  %v2251_v14 = vmul.f32 1.442695, %v8303_v20  ;;  %v2650_v53 = vsel %vm2649_vm1, %v8205_v12, %v2646_v31 }
 0x61c   :  { %v3816_v43 = vmul.f32 %v5237_v38, %v3815_v61  ;;  %v3832_v15 = vmul.f32 %v8268_v45, %v8234_v42  ;;  %v5243_v59 = vpop.eup %5242  ;;  %v2640_v61 = vsel %vm8274_vm11, %v8168_v24, %v2636_v62  ;;  %vm3838_vm14 = vweird.f32 %v8268_v45 }
 0x61d   :  { %v8294_v22 = vpop.eup %5244  ;;  %vm3839_vm2 = vmor %vm3837_vm0, %vm3838_vm14  ;;  %v2302_v31 = vmul.f32 0.5, %v7713_v18  ;;  %vm3574_vm11 = vcmp.eq.f32.partialorder %v8160_v2, 0.0 }
 0x61e   :  { %v3820_v60 = vsel %vm3819_vm12, %v5237_v38, %v3816_v43  ;;  %4153 = vperm.xlu0 %5108, %v3552_v0   ;;  %v3833_v25 = vmul.f32 %v8268_v45, %v3832_v15  ;;  %4489 = vrot.lane.b32.xlu2 %v8199_v51, %s5538_s28  ;;  %v5247_v54 = vpop.eup %5246  ;;  %v8308_v43 = vmul.f32 %v7774_v19, %v3103_v29  ;;  %v2301_v15 = vmul.f32 0.5, %v7600_v17 }
 0x61f   :  { %v8289_v40 = vmul.f32 %v8183_v37, %v3820_v60  ;;  %2868 = vperm.xlu1 %5106, %v2640_v61   ;;  %v4350_v37 = vmul.f32 0.6931472, %v5243_v59  ;;  %v5249_v4 = vpop.eup %5248  ;;  %v8314_v0 = vadd.f32 9.0, %v5247_v54  ;;  %v8324_v59 = vmul.f32 2.0, %v8250_v5 }
 0x620   :  { %v8296_v38 = vpop.permute.xlu0 %4473  ;;  %v3834_v24 = vmul.f32 0.5, %v3833_v25  ;;  %v8299_v62 = vpop.permute.xlu2 %4118  ;;  %v3554_v25 = vmul.f32 %v8294_v22, %v8133_v28  ;;  %5254 = vlog2.f32 %v8308_v43 }
 0x621   :  { %10487 = vst [vmem:[#allocation80_spill] sm:$0xff] %v8289_v40  ;;  %v8301_v6 = vpop.permute.xlu1 %3195  ;;  %v4413_v19 = vsub.f32 %v7600_v17, %v4350_v37  ;;  %v8320_v29 = vpop.eup %5250  ;;  %v4352_v17 = vmul.f32 0.6931472, %v5249_v4  ;;  %v3026_v12 = vmul.f32 0.5, %v8314_v0  ;;  %5256 = vrsqrt.f32 %v8314_v0 }
 0x622   :  { %10488 = vst [vmem:[#allocation81_spill] sm:$0xff] %v8296_v38  ;;  %v3835_v3 = vsub.f32 1.5, %v3834_v24  ;;  %v3555_v5 = vmul.f32 %v8294_v22, %v3554_v25  ;;  %v5253_v60 = vpop.eup %5252  ;;  %v2656_v37 = vmul.f32 %v8240_v47, %v2655_v32  ;;  %v3566_v63 = vmul.f32 %v8320_v29, %v8160_v2 }
 0x623   :  { %10489 = vst [vmem:[#allocation82_spill] sm:$0xff] %v8299_v62  ;;  %v2333_v4 = vmul.f32 1.442695, %v2301_v15  ;;  %5258 = vpow2.f32 %v2251_v14  ;;  %v5019_v32 = vadd.f32 -0.33333334, %v3026_v12  ;;  %vm3584_vm13 = vcmp.eq.f32.partialorder %v8314_v0, inf }
 0x624   :  { %v3836_v30 = vmul.f32 %v8268_v45, %v3835_v3  ;;  %v2339_v3 = vmul.f32 1.442695, %v2304_v10  ;;  %5260 = vrsqrt.f32 %v8324_v59  ;;  %v3567_v10 = vmul.f32 %v8320_v29, %v3566_v63 }
 0x625   :  { %5262 = vpow2.f32 %v2333_v4  ;;  %vm3757_vm15 = vweird.f32 %v8324_v59 }
 0x626   :  { %4491 = vrot.lane.b32.xlu0 %v8231_v16, %s5538_s28  ;;  %v3840_v42 = vsel %vm3839_vm2, %v8268_v45, %v3836_v30  ;;  %2873 = vperm.xlu2 %5107, %v2650_v53   ;;  %v3556_v30 = vmul.f32 0.5, %v3555_v5  ;;  %v5255_v53 = vpop.eup %5254  ;;  %v2335_v5 = vmul.f32 1.442695, %v2302_v31  ;;  %5264 = vpow2.f32 %v2339_v3 }
 0x627   :  { %4511 = vrot.lane.b32.xlu1 %v4413_v19, %s5539_s7  ;;  %v8335_v61 = vmul.f32 %v8252_v23, %v3840_v42  ;;  %v2417_v23 = vmul.f32 4.5, %v8160_v2  ;;  %v4414_v19 = vsub.f32 %v7713_v18, %v4352_v17  ;;  %v2660_v42 = vsel %vm2659_vm5, %v8240_v47, %v2656_v37  ;;  %v8361_v57 = vpop.eup %5256 }
 0x628   :  { %v2834_v55 = vpop.permute.xlu0 %2833  ;;  %v8340_v45 = vpop.permute.xlu2 %4477  ;;  %v3557_v18 = vsub.f32 1.5, %v3556_v30  ;;  %v4354_v12 = vmul.f32 0.6931472, %v5255_v53  ;;  %v3568_v4 = vmul.f32 0.5, %v3567_v10  ;;  %v3578_v31 = vmul.f32 %v8361_v57, %v8314_v0 }
 0x629   :  { %10491 = vst [vmem:[#allocation84_spill] sm:$0xff] %v8335_v61  ;;  %v2951_v54 = vmul.f32 %v2834_v55, %v7458_v27  ;;  %v8343_v24 = vpop.permute.xlu1 %2169  ;;  %v8352_v27 = vadd.f32 9.0, %v5253_v60  ;;  %v8359_v14 = vadd.f32 -3.0, %v2417_v23  ;;  %v5259_v17 = vpop.eup %5258  ;;  %v2945_v30 = vmul.f32 %v7895_v8, %v7311_v26 }
 0x62a   :  { %10492 = vst [vmem:[#allocation85_spill] sm:$0xff] %v8340_v45  ;;  %v8376_v3 = vpop.eup %5260  ;;  %v2944_v53 = vmul.f32 %v7952_v46, %v7384_v1  ;;  %v2303_v10 = vmul.f32 0.5, %v7748_v52  ;;  %v3569_v8 = vsub.f32 1.5, %v3568_v4  ;;  %v3579_v1 = vmul.f32 %v8361_v57, %v3578_v31  ;;  %v2025_v31 = vpop.f32.mrf.mxu1 }
 0x62b   :  { %10493 = vst [vmem:[#allocation86_spill] sm:$0xff] %v8343_v24  ;;  %v2983_v25 = vadd.f32 1.0, %v2951_v54  ;;  %v3027_v47 = vmul.f32 0.5, %v8352_v27  ;;  %v2418_v54 = vmul.f32 4.5, %v8314_v0  ;;  %5266 = vrsqrt.f32 %v8359_v14  ;;  %v8396_v26 = vpop.eup %5262 }
 0x62c   :  { %5268 = vpow2.f32 %v2335_v5  ;;  %v4415_v5 = vsub.f32 %v7748_v52, %v4354_v12  ;;  %v8400_v46 = vpop.eup %5264  ;;  %v2976_v12 = vadd.f32 1.0, %v2944_v53  ;;  %v8414_v4 = vmul.f32 1.442695, %v2303_v10 }
 0x62d   :  { %v3079_v15 = vmul.f32 %v2983_v25, %v2983_v25  ;;  %10495 = vst [vmem:[#allocation88_spill] sm:$0xff] %v8400_v46  ;;  %v8421_v53 = vmul.f32 0.5, %v7803_v44  ;;  %vm3758_vm1 = vweird.f32 %v8376_v3  ;;  %vm3586_vm2 = vcmp.eq.f32.partialorder %v8314_v0, 0.0 }
 0x62e   :  { %2878 = vperm.xlu0 %5108, %v2660_v42   ;;  %4513 = vrot.lane.b32.xlu2 %v4414_v19, %s5539_s7  ;;  %v3558_v42 = vmul.f32 %v8294_v22, %v3557_v18  ;;  %v3752_v22 = vmul.f32 %v8376_v3, %v8324_v59  ;;  %v3072_v61 = vmul.f32 %v2976_v12, %v2976_v12  ;;  %vm2667_vm3 = vweird.f32 %v8359_v14 }
 0x62f   :  { %v3111_v60 = vmul.f32 %v3079_v15, %v2983_v25  ;;  %3240 = vperm.xlu1 %5106, %v5019_v32   ;;  %v8379_v25 = vmul.f32 2.0, %v8226_v21  ;;  %v8384_v32 = vadd.f32 9.0, %v5259_v17  ;;  %v2977_v17 = vadd.f32 1.0, %v2945_v30 }
 0x630   :  { %v8364_v55 = vpop.permute.xlu0 %3205  ;;  %v2844_v63 = vpop.permute.xlu2 %2843  ;;  %v2419_v30 = vmul.f32 4.5, %v8352_v27  ;;  %v3753_v45 = vmul.f32 %v8376_v3, %v3752_v22 }
 0x631   :  { %v8369_v37 = vmul.f32 %v8062_v58, %v3111_v60  ;;  %v8371_v23 = vpop.permute.xlu1 %4113  ;;  %v1936_v58 = vpop.f32.mrf.mxu0  ;;  %v2953_v19 = vmul.f32 %v2844_v63, %v7479_v50  ;;  %v8394_v60 = vadd.f32 -3.0, %v2418_v54  ;;  %v5020_v50 = vadd.f32 -0.33333334, %v3027_v47 }
 0x632   :  { %v8406_v52 = vpop.eup %5266  ;;  %v3028_v47 = vmul.f32 0.5, %v8384_v32  ;;  %v3559_v54 = vmul.f32 %v3558_v42, %v8133_v28  ;;  %v8452_v22 = vadd.f32 -3.0, %v2419_v30 }
 0x633   :  { %10494 = vst [vmem:[#allocation87_spill] sm:$0xff] %v8369_v37  ;;  %v8389_v15 = vmul.f32 2.0, %v8369_v37  ;;  %v2985_v21 = vadd.f32 1.0, %v2953_v19  ;;  %v8412_v63 = vpop.eup %5268  ;;  %v2662_v38 = vmul.f32 %v8406_v52, %v8359_v14  ;;  %vm2668_vm14 = vweird.f32 %v8406_v52 }
 0x634   :  { %vm2669_vm5 = vmor %vm2667_vm3, %vm2668_vm14  ;;  %vm3598_vm3 = vcmp.eq.f32.partialorder %v8352_v27, 0.0 }
 0x635   :  { %5270 = vrsqrt.f32 %v8389_v15  ;;  %v3081_v18 = vmul.f32 %v2985_v21, %v2985_v21  ;;  %v2663_v46 = vmul.f32 %v8406_v52, %v2662_v38  ;;  %vm3847_vm10 = vweird.f32 %v8389_v15 }
 0x636   :  { %5272 = vrsqrt.f32 %v8379_v25  ;;  %4515 = vrot.lane.b32.xlu0 %v4415_v5, %s5539_s7  ;;  %3245 = vperm.xlu2 %5107, %v5020_v50   ;;  %v8426_v5 = vld [vmem:[%s10237_s11] ss:$0 sm:$0xff] }
 0x637   :  { %2187 = vrot.lane.b32.xlu1 %v8303_v20, %s5536_s1  ;;  %v3113_v19 = vmul.f32 %v3081_v18, %v2985_v21  ;;  %5274 = vrsqrt.f32 %v8394_v60  ;;  %v1937_v42 = vadd.f32 %v8426_v5, %v1936_v58  ;;  %v3570_v21 = vmul.f32 %v8320_v29, %v3569_v8 }
 0x638   :  { %v8416_v51 = vpop.permute.xlu0 %2173  ;;  %v8429_v10 = vpop.permute.xlu2 %3215  ;;  %v3580_v18 = vmul.f32 0.5, %v3579_v1  ;;  %v3073_v58 = vmul.f32 %v2977_v17, %v2977_v17  ;;  %v3563_v1 = vand.u32 2147483648, %v8133_v28 }
 0x639   :  { %10496 = vst [vmem:[#allocation89_spill] sm:$0xff] %v8416_v51  ;;  %v8431_v50 = vpop.permute.xlu1 %4475  ;;  %v8436_v16 = vmul.f32 %v8301_v6, %v3113_v19  ;;  %v5021_v51 = vadd.f32 -0.33333334, %v3028_v47  ;;  %v1938_v29 = vpop.f32.mrf.mxu0  ;;  %v8454_v19 = vadd.f32 %v2025_v31, %v1937_v42  ;;  %v3571_v47 = vmul.f32 %v3570_v21, %v8160_v2 }
 0x63a   :  { %10497 = vst [vmem:[#allocation90_spill] sm:$0xff] %v8431_v50  ;;  %v3561_v50 = vsel %vm3560_vm6, %v8133_v28, %v3559_v54  ;;  %v3581_v54 = vsub.f32 1.5, %v3580_v18  ;;  %v8465_v31 = vmul.f32 0.5, %v3753_v45  ;;  %v3104_v42 = vmul.f32 %v3072_v61, %v2976_v12 }
 0x63b   :  { %10498 = vst [vmem:[#allocation91_spill] sm:$0xff] %v8436_v16  ;;  %v8441_v62 = vpop.eup %5270  ;;  %v8447_v8 = vmul.f32 2.0, %v8436_v16  ;;  %v3564_v37 = vsel %vm3562_vm7, %v3563_v1, %v3561_v50  ;;  %v1939_v28 = vadd.f32 %v8426_v5, %v1938_v29  ;;  %v3105_v21 = vmul.f32 %v3073_v58, %v2977_v17  ;;  %v2027_v17 = vpop.f32.mrf.mxu1 }
 0x63c   :  { %v8444_v40 = vpop.eup %5272  ;;  %v3842_v6 = vmul.f32 %v8441_v62, %v8389_v15  ;;  %10499 = vst [vmem:[#allocation92_spill] sm:$0xff] %v8454_v19  ;;  %v3573_v61 = vsel %vm3572_vm8, %v8160_v2, %v3571_v47  ;;  %v3582_v12 = vmul.f32 %v8361_v57, %v3581_v54  ;;  %vm3848_vm9 = vweird.f32 %v8441_v62 }
 0x63d   :  { %v8458_v24 = vpop.eup %5274  ;;  %5276 = vrsqrt.f32 %v8447_v8  ;;  %v3742_v30 = vmul.f32 %v8444_v40, %v8379_v25  ;;  %v2664_v58 = vmul.f32 0.5, %v2663_v46  ;;  %v8484_v29 = vmul.f32 %v7839_v56, %v3104_v42  ;;  %vm3849_vm12 = vmor %vm3847_vm10, %vm3848_vm9 }
 0x63e   :  { %v3843_v16 = vmul.f32 %v8441_v62, %v3842_v6  ;;  %3250 = vperm.xlu0 %5108, %v5021_v51   ;;  %2189 = vrot.lane.b32.xlu2 %v8454_v19, %s5536_s1  ;;  %5278 = vrsqrt.f32 %v8452_v22  ;;  %v2253_v51 = vmul.f32 1.442695, %v8454_v19  ;;  %v8486_v6 = vadd.f32 %v2027_v17, %v1939_v28  ;;  %vm8582_vm9 = vmor %vm3757_vm15, %vm3758_vm1 }
 0x63f   :  { %4158 = vperm.xlu1 %5106, %v3564_v37   ;;  %v2672_v37 = vmul.f32 %v8458_v24, %v8394_v60  ;;  %v2946_v1 = vmul.f32 %v8092_v39, %v7322_v7  ;;  %v3575_v57 = vand.u32 2147483648, %v8160_v2  ;;  %v3583_v46 = vmul.f32 %v3582_v12, %v8314_v0 }
 0x640   :  { %v3844_v18 = vmul.f32 0.5, %v3843_v16  ;;  %v8470_v34 = vpop.permute.xlu0 %4123  ;;  %v8475_v38 = vpop.permute.xlu2 %2177  ;;  %10501 = vst [vmem:[#allocation94_spill] sm:$0xff] %v8486_v6  ;;  %5280 = vpow2.f32 %v2253_v51  ;;  %v2665_v15 = vsub.f32 1.5, %v2664_v58  ;;  %vm3867_vm4 = vweird.f32 %v8447_v8 }
 0x641   :  { %10500 = vst [vmem:[#allocation93_spill] sm:$0xff] %v8475_v38  ;;  %v2839_v45 = vpop.permute.xlu1 %2838  ;;  %v3576_v56 = vsel %vm3574_vm11, %v3575_v57, %v3573_v61  ;;  %v2673_v28 = vmul.f32 %v8458_v24, %v2672_v37  ;;  %5282 = vlog2.f32 %v8484_v29  ;;  %v2978_v2 = vadd.f32 1.0, %v2946_v1  ;;  %v1941_v57 = vpop.f32.mrf.mxu0 }
 0x642   :  { %v3845_v16 = vsub.f32 1.5, %v3844_v18  ;;  %v2952_v50 = vmul.f32 %v2839_v45, %v7374_v33  ;;  %v3297_v61 = vmul.f32 %v7777_v41, %v3105_v21  ;;  %5284 = vrsqrt.f32 %v8352_v27 }
 0x643   :  { %v8491_v47 = vpop.eup %5276  ;;  %v3585_v41 = vsel %vm3584_vm13, %v8314_v0, %v3583_v46  ;;  %v2666_v21 = vmul.f32 %v8406_v52, %v2665_v15  ;;  %v2674_v58 = vmul.f32 0.5, %v2673_v28  ;;  %v1942_v28 = vadd.f32 %v8426_v5, %v1941_v57 }
 0x644   :  { %v3846_v54 = vmul.f32 %v8441_v62, %v3845_v16  ;;  %v2984_v18 = vadd.f32 1.0, %v2952_v50  ;;  %v3862_v33 = vmul.f32 %v8491_v47, %v8447_v8  ;;  %v8499_v7 = vpop.eup %5278  ;;  %vm3868_vm0 = vweird.f32 %v8491_v47 }
 0x645   :  { %v2682_v50 = vmul.f32 %v8499_v7, %v8452_v22  ;;  %vm3869_vm6 = vmor %vm3867_vm4, %vm3868_vm0  ;;  %v2675_v14 = vsub.f32 1.5, %v2674_v58  ;;  %5286 = vlog2.f32 %v3297_v61  ;;  %v2255_v8 = vmul.f32 1.442695, %v8486_v6 }
 0x646   :  { %v3850_v39 = vsel %vm3849_vm12, %v8441_v62, %v3846_v54  ;;  %v3080_v42 = vmul.f32 %v2984_v18, %v2984_v18  ;;  %2191 = vrot.lane.b32.xlu0 %v8486_v6, %s5536_s1  ;;  %v3863_v45 = vmul.f32 %v8491_v47, %v3862_v33  ;;  %4163 = vperm.xlu2 %5107, %v3576_v56   ;;  %v5281_v1 = vpop.eup %5280  ;;  %v3587_v33 = vand.u32 2147483648, %v8314_v0 }
 0x647   :  { %v8507_v51 = vmul.f32 %v8371_v23, %v3850_v39  ;;  %4493 = vrot.lane.b32.xlu1 %v8303_v20, %s5538_s28  ;;  %v3743_v62 = vmul.f32 %v8444_v40, %v3742_v30  ;;  %v3074_v54 = vmul.f32 %v2978_v2, %v2978_v2  ;;  %v3755_v56 = vsub.f32 1.5, %v8465_v31 }
 0x648   :  { %v3112_v12 = vmul.f32 %v3080_v42, %v2984_v18  ;;  %v8514_v17 = vpop.permute.xlu0 %4479  ;;  %v3864_v37 = vmul.f32 0.5, %v3863_v45  ;;  %v8517_v16 = vpop.permute.xlu2 %4133  ;;  %v3588_v39 = vsel %vm3586_vm2, %v3587_v33, %v3585_v41  ;;  %v2683_v42 = vmul.f32 %v8499_v7, %v2682_v50 }
 0x649   :  { %10502 = vst [vmem:[#allocation95_spill] sm:$0xff] %v8507_v51  ;;  %v8519_v23 = vpop.permute.xlu1 %3210  ;;  %v3744_v31 = vmul.f32 0.5, %v3743_v62  ;;  %v2670_v0 = vsel %vm2669_vm5, %v8406_v52, %v2666_v21  ;;  %v3106_v45 = vmul.f32 %v3074_v54, %v2978_v2  ;;  %v8552_v62 = vmul.f32 2.0, %v3297_v61  ;;  %v2030_v41 = vpop.f32.mrf.mxu1 }
 0x64a   :  { %10503 = vst [vmem:[#allocation96_spill] sm:$0xff] %v8514_v17  ;;  %v8526_v30 = vmul.f32 %v8176_v13, %v3112_v12  ;;  %v3865_v18 = vsub.f32 1.5, %v3864_v37  ;;  %v5283_v13 = vpop.eup %5282  ;;  %v8555_v37 = vmul.f32 2.0, %v8308_v43  ;;  %v3756_v50 = vmul.f32 %v8376_v3, %v3755_v56 }
 0x64b   :  { %10504 = vst [vmem:[#allocation97_spill] sm:$0xff] %v8517_v16  ;;  %v8542_v15 = vpop.eup %5284  ;;  %v4356_v57 = vmul.f32 0.6931472, %v5283_v13  ;;  %v2684_v54 = vmul.f32 0.5, %v2683_v42  ;;  %v8568_v43 = vadd.f32 %v2030_v41, %v1942_v28  ;;  %vm2678_vm7 = vweird.f32 %v8458_v24 }
 0x64c   :  { %v3866_v46 = vmul.f32 %v8491_v47, %v3865_v18  ;;  %v3590_v61 = vmul.f32 %v8542_v15, %v8352_v27  ;;  %v2676_v18 = vmul.f32 %v8458_v24, %v2675_v14  ;;  %5288 = vrsqrt.f32 %v8384_v32 }
 0x64d   :  { %10508 = vst [vmem:[#allocation101_spill] sm:$0xff] %v8568_v43  ;;  %5290 = vpow2.f32 %v2255_v8  ;;  %v8574_v33 = vmul.f32 %v7919_v49, %v3106_v45  ;;  %vm3747_vm8 = vweird.f32 %v8379_v25  ;;  %v8586_v13 = vadd.f32 9.0, %v5281_v1 }
 0x64e   :  { %4168 = vperm.xlu0 %5108, %v3588_v39   ;;  %v3870_v12 = vsel %vm3869_vm6, %v8491_v47, %v3866_v46  ;;  %4495 = vrot.lane.b32.xlu2 %v8454_v19, %s5538_s28  ;;  %5292 = vrsqrt.f32 %v8555_v37  ;;  %vm2677_vm10 = vweird.f32 %v8394_v60  ;;  %v5287_v46 = vpop.eup %5286  ;;  %v4416_v39 = vsub.f32 %v7699_v35, %v4356_v57 }
 0x64f   :  { %2883 = vperm.xlu1 %5106, %v2670_v0   ;;  %v8559_v52 = vmul.f32 %v8470_v34, %v3870_v12  ;;  %v3745_v34 = vsub.f32 1.5, %v3744_v31  ;;  %vm2679_vm11 = vmor %vm2677_vm10, %vm2678_vm7  ;;  %v2685_v42 = vsub.f32 1.5, %v2684_v54  ;;  %v3591_v31 = vmul.f32 %v8542_v15, %v3590_v61 }
 0x650   :  { %v2849_v21 = vpop.permute.xlu0 %2848  ;;  %v8561_v58 = vpop.permute.xlu2 %4483  ;;  %5294 = vrsqrt.f32 %v8552_v62  ;;  %v3760_v59 = vsel %vm8582_vm9, %v8376_v3, %v3756_v50  ;;  %v2257_v28 = vmul.f32 1.442695, %v8568_v43  ;;  %v2680_v1 = vsel %vm2679_vm11, %v8458_v24, %v2676_v18  ;;  %v10513_v18 = vld [vmem:[#allocation14_spill] sm:$0xff] }
 0x651   :  { %10505 = vst [vmem:[#allocation98_spill] sm:$0xff] %v8559_v52  ;;  %v2954_v47 = vmul.f32 %v2849_v21, %v7485_v48  ;;  %v8564_v2 = vpop.permute.xlu1 %2175  ;;  %v3746_v60 = vmul.f32 %v8444_v40, %v3745_v34  ;;  %vm3748_vm12 = vweird.f32 %v8444_v40  ;;  %5296 = vlog2.f32 %v8574_v33 }
 0x652   :  { %10506 = vst [vmem:[#allocation99_spill] sm:$0xff] %v8561_v58  ;;  %v8603_v0 = vpop.eup %5288  ;;  %v4358_v14 = vmul.f32 0.6931472, %v5287_v46  ;;  %vm2688_vm13 = vweird.f32 %v8499_v7  ;;  %v3029_v24 = vmul.f32 0.5, %v8586_v13  ;;  %v2420_v8 = vmul.f32 4.5, %v8384_v32  ;;  %vm8624_vm14 = vmor %vm3747_vm8, %vm3748_vm12 }
 0x653   :  { %10507 = vst [vmem:[#allocation100_spill] sm:$0xff] %v8564_v2  ;;  %v2986_v48 = vadd.f32 1.0, %v2954_v47  ;;  %v5291_v45 = vpop.eup %5290  ;;  %v2686_v21 = vmul.f32 %v8499_v7, %v2685_v42  ;;  %v3592_v47 = vmul.f32 0.5, %v3591_v31  ;;  %5298 = vrsqrt.f32 %v8586_v13 }
 0x654   :  { %v8617_v57 = vpop.eup %5292  ;;  %v2341_v54 = vmul.f32 1.442695, %v8421_v53  ;;  %5300 = vpow2.f32 %v2257_v28  ;;  %vm2687_vm15 = vweird.f32 %v8452_v22  ;;  %v3602_v25 = vmul.f32 %v8603_v0, %v8384_v32 }
 0x655   :  { %v3082_v49 = vmul.f32 %v2986_v48, %v2986_v48  ;;  %v8641_v46 = vadd.f32 9.0, %v5291_v45  ;;  %vm2689_vm0 = vmor %vm2687_vm15, %vm2688_vm13  ;;  %v5022_v42 = vadd.f32 -0.33333334, %v3029_v24  ;;  %v3593_v31 = vsub.f32 1.5, %v3592_v47  ;;  %v10516_v45 = vld [vmem:[#allocation28_spill] sm:$0xff] }
 0x656   :  { %4497 = vrot.lane.b32.xlu0 %v8486_v6, %s5538_s28  ;;  %2888 = vperm.xlu2 %5107, %v2680_v1   ;;  %v8639_v53 = vpop.eup %5294  ;;  %v2690_v22 = vsel %vm2689_vm0, %v8499_v7, %v2686_v21  ;;  %v3603_v1 = vmul.f32 %v8603_v0, %v3602_v25  ;;  %v1943_v7 = vpop.f32.mrf.mxu0  ;;  %vm3596_vm1 = vcmp.eq.f32.partialorder %v8352_v27, inf  ;;  %v3599_v17 = vand.u32 2147483648, %v8352_v27 }
 0x657   :  { %v3114_v35 = vmul.f32 %v3082_v49, %v2986_v48  ;;  %4517 = vrot.lane.b32.xlu1 %v4416_v39, %s5539_s7  ;;  %v3750_v48 = vsel %vm8624_vm14, %v8444_v40, %v3746_v60  ;;  %v4417_v49 = vsub.f32 %v7803_v44, %v4358_v14  ;;  %v8646_v39 = vadd.f32 -3.0, %v2420_v8  ;;  %v5297_v40 = vpop.eup %5296 }
 0x658   :  { %v8605_v3 = vpop.permute.xlu0 %3220  ;;  %v2859_v50 = vpop.permute.xlu2 %2858  ;;  %v3594_v61 = vmul.f32 %v8542_v15, %v3593_v31  ;;  %v5504_v15 = vld [vmem:[%s10238_s12 + $0x8] sm:$0xff]  ;;  %v3604_v31 = vmul.f32 0.5, %v3603_v1  ;;  %vm3608_vm6 = vcmp.eq.f32.partialorder %v8384_v32, inf  ;;  %vm3610_vm9 = vcmp.eq.f32.partialorder %v8384_v32, 0.0 }
 0x659   :  { %v8611_v12 = vmul.f32 %v8214_v9, %v3114_v35  ;;  %v8613_v41 = vpop.permute.xlu1 %4128  ;;  %v4222_v9 = vmul.f32 %v7897_v11, %v3760_v59  ;;  %v2956_v34 = vmul.f32 %v2859_v50, %v10513_v18  ;;  %v8651_v28 = vpop.eup %5298  ;;  %v10514_v35 = vld [vmem:[#allocation42_spill] sm:$0xff]  ;;  %v10517_v50 = vld [vmem:[#allocation60_spill] sm:$0xff]  ;;  %vm3620_vm12 = vcmp.eq.f32.partialorder %v8586_v13, inf }
 0x65a   :  { %v5301_v60 = vpop.eup %5300  ;;  %v4221_v14 = vmul.f32 %v10514_v35, %v3750_v48  ;;  %v2947_v21 = vmul.f32 %v10517_v50, %v10516_v45  ;;  %v10519_v18 = vld [vmem:[#allocation46_spill] sm:$0xff]  ;;  %v3762_v48 = vmul.f32 %v8617_v57, %v8555_v37  ;;  %vm2697_vm13 = vweird.f32 %v8646_v39 }
 0x65b   :  { %v8634_v56 = vmul.f32 2.0, %v8611_v12  ;;  %v2988_v11 = vadd.f32 1.0, %v2956_v34  ;;  %v4254_v44 = vmul.f32 %v8412_v63, %v4222_v9  ;;  %v2421_v9 = vmul.f32 4.5, %v8586_v13 }
 0x65c   :  { %v8670_v34 = vmul.f32 0.5, %v10519_v18  ;;  %vm3622_vm14 = vcmp.eq.f32.partialorder %v8586_v13, 0.0  ;;  %vm3768_vm0 = vweird.f32 %v8617_v57 }
 0x65d   :  { %5302 = vrsqrt.f32 %v8634_v56  ;;  %v3084_v59 = vmul.f32 %v2988_v11, %v2988_v11  ;;  %v8704_v1 = vadd.f32 -3.0, %v2421_v9  ;;  %v3605_v9 = vsub.f32 1.5, %v3604_v31 }
 0x65e   :  { %5304 = vpow2.f32 %v8414_v4  ;;  %2893 = vperm.xlu0 %5108, %v2690_v22   ;;  %4519 = vrot.lane.b32.xlu2 %v4417_v49, %s5539_s7  ;;  %v4360_v4 = vmul.f32 0.6931472, %v5297_v40  ;;  %v8684_v40 = vmul.f32 %v5504_v15, %v4254_v44  ;;  %v8686_v22 = vadd.f32 9.0, %v5301_v60  ;;  %v1946_v31 = vpop.f32.mrf.mxu0 }
 0x65f   :  { %5306 = vpow2.f32 %v2341_v54  ;;  %3255 = vperm.xlu1 %5106, %v5022_v42   ;;  %v3116_v24 = vmul.f32 %v3084_v59, %v2988_v11  ;;  %v3030_v54 = vmul.f32 0.5, %v8641_v46  ;;  %v3614_v11 = vmul.f32 %v8651_v28, %v8586_v13 }
 0x660   :  { %v8657_v8 = vpop.permute.xlu0 %2179  ;;  %5308 = vrsqrt.f32 %v8646_v39  ;;  %v8662_v47 = vpop.permute.xlu2 %3230  ;;  %v3782_v42 = vmul.f32 %v8639_v53, %v8552_v62  ;;  %v4418_v44 = vsub.f32 %v10519_v18, %v4360_v4  ;;  %v2979_v60 = vadd.f32 1.0, %v2947_v21 }
 0x661   :  { %10515 = vst [vmem:[#allocation14_spill] sm:$0xff] %v8657_v8  ;;  %v8664_v63 = vpop.permute.xlu1 %4481  ;;  %v8675_v25 = vmul.f32 %v8519_v23, %v3116_v24  ;;  %v8693_v23 = vmul.f32 %v8396_v26, %v4221_v14  ;;  %v5023_v50 = vadd.f32 -0.33333334, %v3030_v54  ;;  %v3595_v15 = vmul.f32 %v3594_v61, %v8352_v27  ;;  %v2032_v14 = vpop.f32.mrf.mxu1  ;;  %v10575_v8 = vld [vmem:[#allocation51_spill] sm:$0xff] }
 0x662   :  { %10518 = vst [vmem:[#allocation42_spill] sm:$0xff] %v8664_v63  ;;  %v3763_v26 = vmul.f32 %v8617_v57, %v3762_v48  ;;  %v3615_v4 = vmul.f32 %v8651_v28, %v3614_v11  ;;  %v8714_v21 = vmul.f32 2.0, %v8484_v29  ;;  %v8717_v54 = vmul.f32 %v8639_v53, %v3782_v42 }
 0x663   :  { %v8679_v49 = vpop.eup %5302  ;;  %v8696_v35 = vmul.f32 2.0, %v8675_v25  ;;  %v3031_v61 = vmul.f32 0.5, %v8686_v22  ;;  %v1944_v18 = vadd.f32 %v8426_v5, %v1943_v7  ;;  %v2422_v29 = vmul.f32 4.5, %v8641_v46 }
 0x664   :  { %v8690_v59 = vpop.eup %5304  ;;  %v3872_v24 = vmul.f32 %v8679_v49, %v8634_v56  ;;  %v3075_v11 = vmul.f32 %v2979_v60, %v2979_v60  ;;  %vm3878_vm2 = vweird.f32 %v8679_v49  ;;  %v3616_v63 = vmul.f32 0.5, %v3615_v4 }
 0x665   :  { %v8701_v45 = vpop.eup %5306  ;;  %5310 = vrsqrt.f32 %v8696_v35  ;;  %v5024_v16 = vadd.f32 -0.33333334, %v3031_v61  ;;  %v3606_v52 = vmul.f32 %v8603_v0, %v3605_v9  ;;  %vm3877_vm4 = vweird.f32 %v8634_v56 }
 0x666   :  { %v8706_v20 = vpop.eup %5308  ;;  %v3873_v19 = vmul.f32 %v8679_v49, %v3872_v24  ;;  %4521 = vrot.lane.b32.xlu0 %v4418_v44, %s5539_s7  ;;  %3260 = vperm.xlu2 %5107, %v5023_v50   ;;  %v3597_v50 = vsel %vm3596_vm1, %v8352_v27, %v3595_v15  ;;  %5312 = vrsqrt.f32 %v8704_v1  ;;  %vm3879_vm5 = vmor %vm3877_vm4, %vm3878_vm2  ;;  %vm3897_vm8 = vweird.f32 %v8696_v35 }
 0x667   :  { %2193 = vrot.lane.b32.xlu1 %v8568_v43, %s5536_s1  ;;  %v2692_v6 = vmul.f32 %v8706_v20, %v8646_v39  ;;  %5314 = vrsqrt.f32 %v8714_v21  ;;  %v3600_v4 = vsel %vm3598_vm3, %v3599_v17, %v3597_v50  ;;  %v3107_v17 = vmul.f32 %v3075_v11, %v2979_v60 }
 0x668   :  { %v3874_v48 = vmul.f32 0.5, %v3873_v19  ;;  %v8723_v24 = vpop.permute.xlu0 %4138  ;;  %v8727_v44 = vpop.permute.xlu2 %2183  ;;  %v10521_v19 = vld [vmem:[#allocation27_spill] sm:$0xff]  ;;  %vm2698_vm11 = vweird.f32 %v8706_v20  ;;  %vm3788_vm2 = vweird.f32 %v8639_v53  ;;  %vm3767_vm3 = vweird.f32 %v8555_v37 }
 0x669   :  { %10520 = vst [vmem:[#allocation28_spill] sm:$0xff] %v8727_v44  ;;  %v2854_v42 = vpop.permute.xlu1 %2853  ;;  %v2693_v9 = vmul.f32 %v8706_v20, %v2692_v6  ;;  %v1947_v6 = vadd.f32 %v8426_v5, %v1946_v31  ;;  %vm2699_vm15 = vmor %vm2697_vm13, %vm2698_vm11  ;;  %vm2707_vm4 = vweird.f32 %v8704_v1 }
 0x66a   :  { %v3875_v7 = vsub.f32 1.5, %v3874_v48  ;;  %v2955_v58 = vmul.f32 %v2854_v42, %v10521_v19  ;;  %v8742_v48 = vadd.f32 -3.0, %v2422_v29  ;;  %v8745_v42 = vadd.f32 %v2032_v14, %v1944_v18  ;;  %vm8954_vm13 = vmor %vm3767_vm3, %vm3768_vm0 }
 0x66b   :  { %v8738_v15 = vpop.eup %5310  ;;  %v8773_v29 = vmul.f32 0.5, %v3763_v26  ;;  %v10526_v26 = vld [vmem:[#allocation17_spill] sm:$0xff] }
 0x66c   :  { %v3876_v51 = vmul.f32 %v8679_v49, %v3875_v7  ;;  %v2987_v44 = vadd.f32 1.0, %v2955_v58  ;;  %10522 = vst [vmem:[#allocation60_spill] sm:$0xff] %v8745_v42  ;;  %v3892_v27 = vmul.f32 %v8738_v15, %v8696_v35  ;;  %v3617_v7 = vsub.f32 1.5, %v3616_v63  ;;  %v8751_v56 = vpop.eup %5312 }
 0x66d   :  { %v8754_v58 = vmul.f32 1.442695, %v8670_v34  ;;  %5316 = vrsqrt.f32 %v8742_v48  ;;  %v2702_v19 = vmul.f32 %v8751_v56, %v8704_v1  ;;  %vm3898_vm7 = vweird.f32 %v8738_v15 }
 0x66e   :  { %v3880_v0 = vsel %vm3879_vm5, %v8679_v49, %v3876_v51  ;;  %v3083_v61 = vmul.f32 %v2987_v44, %v2987_v44  ;;  %3265 = vperm.xlu0 %5108, %v5024_v16   ;;  %v3893_v18 = vmul.f32 %v8738_v15, %v3892_v27  ;;  %2195 = vrot.lane.b32.xlu2 %v8745_v42, %s5536_s1  ;;  %v2035_v16 = vpop.f32.mrf.mxu1  ;;  %vm3899_vm10 = vmor %vm3897_vm8, %vm3898_vm7  ;;  %vm2708_vm1 = vweird.f32 %v8751_v56 }
 0x66f   :  { %v8757_v14 = vmul.f32 %v8613_v41, %v3880_v0  ;;  %4173 = vperm.xlu1 %5106, %v3600_v4   ;;  %v3607_v51 = vmul.f32 %v3606_v52, %v8384_v32  ;;  %v5505_v41 = vld [vmem:[%s10238_s12] sm:$0xff]  ;;  %v3618_v31 = vmul.f32 %v8651_v28, %v3617_v7  ;;  %v2949_v27 = vmul.f32 %v8258_v36, %v10526_v26 }
 0x670   :  { %v3115_v63 = vmul.f32 %v3083_v61, %v2987_v44  ;;  %v8764_v49 = vpop.permute.xlu0 %4485  ;;  %v8771_v34 = vmul.f32 %v5505_v41, %v8693_v23  ;;  %v3894_v50 = vmul.f32 0.5, %v3893_v18  ;;  %v8775_v52 = vpop.permute.xlu2 %4148  ;;  %v2694_v44 = vmul.f32 0.5, %v2693_v9  ;;  %v10527_v61 = vld [vmem:[#allocation55_spill] sm:$0xff] }
 0x671   :  { %10523 = vst [vmem:[#allocation46_spill] sm:$0xff] %v8757_v14  ;;  %v8777_v60 = vpop.permute.xlu1 %3225  ;;  %v8786_v23 = vpop.eup %5314  ;;  %v3609_v0 = vsel %vm3608_vm6, %v8384_v32, %v3607_v51  ;;  %v8793_v18 = vmul.f32 %v10527_v61, %v3107_v17  ;;  %v8798_v28 = vadd.f32 %v2035_v16, %v1947_v6  ;;  %v3611_v7 = vand.u32 2147483648, %v8384_v32  ;;  %vm2709_vm6 = vmor %vm2707_vm4, %vm2708_vm1 }
 0x672   :  { %10524 = vst [vmem:[#allocation27_spill] sm:$0xff] %v8764_v49  ;;  %v8781_v11 = vmul.f32 %v8364_v55, %v3115_v63  ;;  %v3895_v4 = vsub.f32 1.5, %v3894_v50  ;;  %v8796_v55 = vmul.f32 0.5, %v8717_v54  ;;  %v1948_v9 = vpop.f32.mrf.mxu0  ;;  %v3765_v63 = vsub.f32 1.5, %v8773_v29 }
 0x673   :  { %10525 = vst [vmem:[#allocation102_spill] sm:$0xff] %v8775_v52  ;;  %v8805_v51 = vpop.eup %5316  ;;  %v3612_v17 = vsel %vm3610_vm9, %v3611_v7, %v3609_v0  ;;  %v2695_v54 = vsub.f32 1.5, %v2694_v44  ;;  %v3619_v6 = vmul.f32 %v3618_v31, %v8586_v13  ;;  %v2703_v16 = vmul.f32 %v8751_v56, %v2702_v19 }
 0x674   :  { %10528 = vst [vmem:[#allocation17_spill] sm:$0xff] %v8798_v28  ;;  %v3896_v36 = vmul.f32 %v8738_v15, %v3895_v4  ;;  %v3772_v41 = vmul.f32 %v8786_v23, %v8714_v21  ;;  %v2259_v29 = vmul.f32 1.442695, %v8745_v42  ;;  %v2981_v35 = vadd.f32 1.0, %v2949_v27  ;;  %v10531_v4 = vld [vmem:[#allocation19_spill] sm:$0xff] }
 0x675   :  { %5318 = vlog2.f32 %v8793_v18  ;;  %v2261_v50 = vmul.f32 1.442695, %v8798_v28  ;;  %v1949_v44 = vadd.f32 %v8426_v5, %v1948_v9  ;;  %v2696_v61 = vmul.f32 %v8706_v20, %v2695_v54 }
 0x676   :  { %2197 = vrot.lane.b32.xlu0 %v8798_v28, %s5536_s1  ;;  %v3900_v32 = vsel %vm3899_vm10, %v8738_v15, %v3896_v36  ;;  %4178 = vperm.xlu2 %5107, %v3612_v17   ;;  %v2712_v15 = vmul.f32 %v8805_v51, %v8742_v48  ;;  %v3621_v9 = vsel %vm3620_vm12, %v8586_v13, %v3619_v6  ;;  %5320 = vrsqrt.f32 %v8641_v46  ;;  %v2037_v7 = vpop.f32.mrf.mxu1 }
 0x677   :  { %4499 = vrot.lane.b32.xlu1 %v8568_v43, %s5538_s28  ;;  %v8821_v31 = vmul.f32 %v8723_v24, %v3900_v32  ;;  %v2704_v24 = vmul.f32 0.5, %v2703_v16  ;;  %5322 = vpow2.f32 %v2259_v29  ;;  %v3077_v36 = vmul.f32 %v2981_v35, %v2981_v35 }
 0x678   :  { %v2864_v19 = vpop.permute.xlu0 %2863  ;;  %v8823_v26 = vpop.permute.xlu2 %4489  ;;  %v3623_v32 = vand.u32 2147483648, %v8586_v13  ;;  %5324 = vpow2.f32 %v2261_v50  ;;  %v2713_v16 = vmul.f32 %v8805_v51, %v2712_v15  ;;  %v2700_v13 = vsel %vm2699_vm15, %v8706_v20, %v2696_v61  ;;  %v10536_v61 = vld [vmem:[#allocation73_spill] sm:$0xff] }
 0x679   :  { %10529 = vst [vmem:[#allocation55_spill] sm:$0xff] %v8821_v31  ;;  %v2957_v27 = vmul.f32 %v2864_v19, %v10531_v4  ;;  %v8826_v0 = vpop.permute.xlu1 %2181  ;;  %v3773_v19 = vmul.f32 %v8786_v23, %v3772_v41  ;;  %v8837_v4 = vadd.f32 %v2037_v7, %v1949_v44  ;;  %v10535_v41 = vld [vmem:[#allocation24_spill] sm:$0xff]  ;;  %v2705_v50 = vsub.f32 1.5, %v2704_v24 }
 0x67a   :  { %10530 = vst [vmem:[#allocation103_spill] sm:$0xff] %v8823_v26  ;;  %v3624_v6 = vsel %vm3622_vm14, %v3623_v32, %v3621_v9  ;;  %v8850_v44 = vadd.f32 %v8684_v40, %v10535_v41  ;;  %v1951_v39 = vpop.f32.mrf.mxu0  ;;  %v3785_v7 = vsub.f32 1.5, %v8796_v55  ;;  %v3109_v26 = vmul.f32 %v3077_v36, %v2981_v35 }
 0x67b   :  { %10532 = vst [vmem:[#allocation19_spill] sm:$0xff] %v8826_v0  ;;  %v2989_v17 = vadd.f32 1.0, %v2957_v27  ;;  %v5319_v29 = vpop.eup %5318  ;;  %v10534_v27 = vld [vmem:[#allocation23_spill] sm:$0xff]  ;;  %v4445_v15 = vlaneseq  ;;  %v8859_v32 = vmul.f32 %v8617_v57, %v3765_v63  ;;  %v8861_v40 = vmul.f32 0.5, %v3773_v19  ;;  %v10537_v19 = vld [vmem:[#allocation8_spill] sm:$0xff] }
 0x67c   :  { %10533 = vst [vmem:[#allocation104_spill] sm:$0xff] %v8837_v4  ;;  %v8846_v43 = vadd.f32 %v8771_v34, %v10534_v27  ;;  %v8856_v34 = vpop.eup %5320  ;;  %v2263_v20 = vmul.f32 1.442695, %v8837_v4  ;;  %5326 = vlog2.f32 %v10536_v61  ;;  %v1952_v63 = vadd.f32 %v8426_v5, %v1951_v39 }
 0x67d   :  { %v3085_v54 = vmul.f32 %v2989_v17, %v2989_v17  ;;  %v5323_v55 = vpop.eup %5322  ;;  %5328 = vrsqrt.f32 %v8686_v22  ;;  %v2706_v41 = vmul.f32 %v8751_v56, %v2705_v50  ;;  %v3626_v39 = vmul.f32 %v8856_v34, %v8641_v46 }
 0x67e   :  { %4183 = vperm.xlu0 %5108, %v3624_v6   ;;  %4501 = vrot.lane.b32.xlu2 %v8745_v42, %s5538_s28  ;;  %v2714_v6 = vmul.f32 0.5, %v2713_v16  ;;  %v8890_v61 = vadd.f32 9.0, %v5323_v55  ;;  %v8893_v50 = vmul.f32 %v8639_v53, %v3785_v7  ;;  %vm3787_vm5 = vweird.f32 %v8552_v62 }
 0x67f   :  { %v3117_v9 = vmul.f32 %v3085_v54, %v2989_v17  ;;  %2898 = vperm.xlu1 %5106, %v2700_v13   ;;  %v4362_v54 = vmul.f32 0.6931472, %v5319_v29  ;;  %v5325_v13 = vpop.eup %5324  ;;  %v8885_v29 = vand.u32 127, %v4445_v15  ;;  %v10539_v15 = vld [vmem:[#allocation40_spill] sm:$0xff]  ;;  %v2710_v1 = vsel %vm2709_vm6, %v8751_v56, %v2706_v41  ;;  %vm8971_vm14 = vmor %vm3787_vm5, %vm3788_vm2 }
 0x680   :  { %v8865_v24 = vpop.permute.xlu0 %3235  ;;  %v2874_v36 = vpop.permute.xlu2 %2873  ;;  %v2715_v55 = vsub.f32 1.5, %v2714_v6  ;;  %v8902_v31 = vadd.f32 9.0, %v5325_v13  ;;  %v3032_v41 = vmul.f32 0.5, %v8890_v61  ;;  %vm2718_vm9 = vweird.f32 %v8805_v51 }
 0x681   :  { %v8868_v35 = vmul.f32 %v8429_v10, %v3117_v9  ;;  %v8870_v17 = vpop.permute.xlu1 %4143  ;;  %v2959_v27 = vmul.f32 %v2874_v36, %v10537_v19  ;;  %v10538_v10 = vld [vmem:[#allocation59_spill] sm:$0xff]  ;;  %v2040_v19 = vpop.f32.mrf.mxu1  ;;  %vm4577_vm7 = vcmp.lt.s32.totalorder %v8885_v29, 48  ;;  %vm4576_vm8 = vcmp.lt.s32.totalorder %v8885_v29, 32 }
 0x682   :  { %v8880_v9 = vmul.f32 %v10538_v10, %v3109_v26  ;;  %v4419_v10 = vsub.f32 %v10539_v15, %v4362_v54  ;;  %v5327_v42 = vpop.eup %5326  ;;  %v8909_v26 = vadd.f32 %v2040_v19, %v1952_v63  ;;  %v3627_v54 = vmul.f32 %v8856_v34, %v3626_v39 }
 0x683   :  { %v8883_v16 = vmul.f32 2.0, %v8868_v35  ;;  %v2991_v36 = vadd.f32 1.0, %v2959_v27  ;;  %v8907_v27 = vpop.eup %5328  ;;  %v2423_v63 = vmul.f32 4.5, %v8686_v22  ;;  %v4364_v13 = vmul.f32 0.6931472, %v5327_v42 }
 0x684   :  { %10540 = vst [vmem:[#allocation23_spill] sm:$0xff] %v8909_v26  ;;  %vm4575_vm10 = vcmp.lt.s32.totalorder %v8885_v29, 16  ;;  %v3638_v42 = vmul.f32 %v8907_v27, %v8686_v22  ;;  %vm2717_vm11 = vweird.f32 %v8742_v48  ;;  %vm3777_vm15 = vweird.f32 %v8714_v21  ;;  %v10560_v48 = vld [vmem:[#allocation11_spill] sm:$0xff] }
 0x685   :  { %5330 = vrsqrt.f32 %v8883_v16  ;;  %v3087_v7 = vmul.f32 %v2991_v36, %v2991_v36  ;;  %vm2719_vm12 = vmor %vm2717_vm11, %vm2718_vm9  ;;  %v8948_v14 = vadd.f32 -3.0, %v2423_v63  ;;  %v3790_v62 = vsel %vm8971_vm14, %v8639_v53, %v8893_v50 }
 0x686   :  { %5332 = vpow2.f32 %v2263_v20  ;;  %4503 = vrot.lane.b32.xlu0 %v8798_v28, %s5538_s28  ;;  %2903 = vperm.xlu2 %5107, %v2710_v1   ;;  %v1953_v20 = vpop.f32.mrf.mxu0  ;;  %v2265_v1 = vmul.f32 1.442695, %v8909_v26  ;;  %vm3778_vm0 = vweird.f32 %v8786_v23  ;;  %vm3907_vm3 = vweird.f32 %v8883_v16 }
 0x687   :  { %5334 = vlog2.f32 %v8880_v9  ;;  %4523 = vrot.lane.b32.xlu1 %v4419_v10, %s5539_s7  ;;  %v3119_v6 = vmul.f32 %v3087_v7, %v2991_v36  ;;  %v2716_v10 = vmul.f32 %v8805_v51, %v2715_v55  ;;  %v10543_v55 = vld [vmem:[#allocation36_spill] sm:$0xff]  ;;  %v1954_v52 = vadd.f32 %v8426_v5, %v1953_v20  ;;  %vm9022_vm2 = vmor %vm3777_vm15, %vm3778_vm0 }
 0x688   :  { %v8916_v56 = vpop.permute.xlu0 %2185  ;;  %v4514_v19 = vpop.permute.xlu2 %4513  ;;  %5336 = vrsqrt.f32 %v8890_v61  ;;  %vm3632_vm5 = vcmp.eq.f32.partialorder %v8641_v46, inf  ;;  %vm3634_vm9 = vcmp.eq.f32.partialorder %v8641_v46, 0.0  ;;  %vm3646_vm14 = vcmp.eq.f32.partialorder %v8686_v22, 0.0 }
 0x689   :  { %10541 = vst [vmem:[#allocation24_spill] sm:$0xff] %v8916_v56  ;;  %v8920_v28 = vpop.permute.xlu1 %4487  ;;  %v8926_v39 = vmul.f32 %v8777_v60, %v3119_v6  ;;  %v4579_v36 = vsel %vm4577_vm7, %v4514_v19, 0.0  ;;  %v3628_v60 = vmul.f32 0.5, %v3627_v54  ;;  %v10546_v54 = vld [vmem:[#allocation50_spill] sm:$0xff]  ;;  %vm2727_vm15 = vweird.f32 %v8948_v14 }
 0x68a   :  { %10542 = vst [vmem:[#allocation73_spill] sm:$0xff] %v8920_v28  ;;  %v4611_v28 = vsel %vm4576_vm8, %v10543_v55, %v4579_v36  ;;  %v4420_v20 = vsub.f32 %v10546_v54, %v4364_v13  ;;  %v5025_v36 = vadd.f32 -0.33333334, %v3032_v41  ;;  %v2720_v55 = vsel %vm2719_vm12, %v8805_v51, %v2716_v10  ;;  %v2042_v41 = vpop.f32.mrf.mxu1 }
 0x68b   :  { %v8933_v7 = vpop.eup %5330  ;;  %v8942_v49 = vmul.f32 2.0, %v8926_v39  ;;  %v4643_v5 = vsel %vm4575_vm10, %v8850_v44, %v4611_v28  ;;  %v3639_v51 = vmul.f32 %v8907_v27, %v3638_v42  ;;  %v3629_v13 = vsub.f32 1.5, %v3628_v60 }
 0x68c   :  { %v5333_v6 = vpop.eup %5332  ;;  %v3902_v19 = vmul.f32 %v8933_v7, %v8883_v16  ;;  %4675 = vst [vmem:[%s10239_s13 + $0x8] sm:$0xff] %v4643_v5  ;;  %v8989_v10 = vadd.f32 %v2042_v41, %v1954_v52  ;;  %v3033_v52 = vmul.f32 0.5, %v8902_v31  ;;  %vm3908_vm1 = vweird.f32 %v8933_v7 }
 0x68d   :  { %v5335_v56 = vpop.eup %5334  ;;  %5338 = vrsqrt.f32 %v8942_v49  ;;  %v3640_v60 = vmul.f32 0.5, %v3639_v51  ;;  %v9012_v37 = vadd.f32 9.0, %v5333_v6  ;;  %v3630_v41 = vmul.f32 %v8856_v34, %v3629_v13  ;;  %v10554_v6 = vld [vmem:[#allocation58_spill] sm:$0xff]  ;;  %vm3909_vm4 = vmor %vm3907_vm3, %vm3908_vm1 }
 0x68e   :  { %v3903_v28 = vmul.f32 %v8933_v7, %v3902_v19  ;;  %2908 = vperm.xlu0 %5108, %v2720_v55   ;;  %v8981_v44 = vpop.eup %5336  ;;  %5340 = vpow2.f32 %v2265_v1  ;;  %4525 = vrot.lane.b32.xlu2 %v4420_v20, %s5539_s7  ;;  %10549 = vst [vmem:[#allocation8_spill] sm:$0xff] %v8989_v10  ;;  %v4366_v19 = vmul.f32 0.6931472, %v5335_v56  ;;  %v10550_v55 = vsub.f32 1.5, %v8861_v40  ;;  %v10551_v20 = vld [vmem:[#allocation61_spill] sm:$0xff] }
 0x68f   :  { %3270 = vperm.xlu1 %5106, %v5025_v36   ;;  %5342 = vrsqrt.f32 %v8948_v14  ;;  %v2424_v56 = vmul.f32 4.5, %v8890_v61  ;;  %v3650_v40 = vmul.f32 %v8981_v44, %v8890_v61  ;;  %v9010_v36 = vmul.f32 %v10551_v20, %v3790_v62 }
 0x690   :  { %v3904_v5 = vmul.f32 0.5, %v3903_v28  ;;  %v8991_v42 = vpop.permute.xlu0 %4153  ;;  %v8997_v63 = vmul.f32 %v8786_v23, %v10550_v55  ;;  %v9000_v53 = vpop.permute.xlu2 %3245  ;;  %v9015_v28 = vmul.f32 2.0, %v8574_v33  ;;  %v2267_v51 = vmul.f32 1.442695, %v8989_v10 }
 0x691   :  { %v9002_v50 = vpop.permute.xlu1 %2868  ;;  %v4421_v20 = vsub.f32 %v10554_v6, %v4366_v19  ;;  %v5026_v13 = vadd.f32 -0.33333334, %v3033_v52  ;;  %v9038_v38 = vadd.f32 -3.0, %v2424_v56  ;;  %v3641_v19 = vsub.f32 1.5, %v3640_v60 }
 0x692   :  { %v3905_v1 = vsub.f32 1.5, %v3904_v5  ;;  %v3780_v34 = vsel %vm9022_vm2, %v8786_v23, %v8997_v63  ;;  %v3651_v6 = vmul.f32 %v8981_v44, %v3650_v40  ;;  %v2425_v23 = vmul.f32 4.5, %v8902_v31 }
 0x693   :  { %v9018_v55 = vpop.eup %5338  ;;  %5344 = vrsqrt.f32 %v9015_v28  ;;  %v3034_v40 = vmul.f32 0.5, %v9012_v37  ;;  %vm3927_vm11 = vweird.f32 %v8942_v49  ;;  %vm3656_vm0 = vcmp.eq.f32.partialorder %v8890_v61, inf }
 0x694   :  { %v3906_v62 = vmul.f32 %v8933_v7, %v3905_v1  ;;  %v5341_v33 = vpop.eup %5340  ;;  %v3922_v21 = vmul.f32 %v9018_v55, %v8942_v49  ;;  %5346 = vpow2.f32 %v2267_v51  ;;  %vm3928_vm6 = vweird.f32 %v9018_v55 }
 0x695   :  { %v9040_v1 = vpop.eup %5342  ;;  %v9054_v56 = vadd.f32 9.0, %v5341_v33  ;;  %5348 = vrsqrt.f32 %v9038_v38  ;;  %vm3929_vm12 = vmor %vm3927_vm11, %vm3928_vm6  ;;  %vm3658_vm1 = vcmp.eq.f32.partialorder %v8890_v61, 0.0 }
 0x696   :  { %v3910_v16 = vsel %vm3909_vm4, %v8933_v7, %v3906_v62  ;;  %4527 = vrot.lane.b32.xlu0 %v4421_v20, %s5539_s7  ;;  %v3923_v52 = vmul.f32 %v9018_v55, %v3922_v21  ;;  %3275 = vperm.xlu2 %5107, %v5026_v13   ;;  %v3631_v7 = vmul.f32 %v3630_v41, %v8641_v46  ;;  %v10559_v21 = vld [vmem:[#allocation43_spill] sm:$0xff]  ;;  %vm2728_vm2 = vweird.f32 %v9040_v1 }
 0x697   :  { %v9048_v63 = vmul.f32 %v8870_v17, %v3910_v16  ;;  %2199 = vrot.lane.b32.xlu1 %v8837_v4, %s5536_s1  ;;  %v10558_v20 = vsel %vm8954_vm13, %v8617_v57, %v8859_v32  ;;  %v2722_v51 = vmul.f32 %v9040_v1, %v8948_v14  ;;  %v3642_v13 = vmul.f32 %v8907_v27, %v3641_v19  ;;  %vm2729_vm3 = vmor %vm2727_vm15, %vm2728_vm2 }
 0x698   :  { %v9056_v60 = vpop.permute.xlu0 %4491  ;;  %v3924_v5 = vmul.f32 0.5, %v3923_v52  ;;  %v9060_v17 = vpop.permute.xlu2 %2189  ;;  %v4223_v41 = vmul.f32 %v10559_v21, %v10558_v20  ;;  %v3652_v16 = vmul.f32 0.5, %v3651_v6  ;;  %v9074_v52 = vadd.f32 -3.0, %v2425_v23 }
 0x699   :  { %10555 = vst [vmem:[#allocation59_spill] sm:$0xff] %v9048_v63  ;;  %v4512_v62 = vpop.permute.xlu1 %4511  ;;  %v3633_v32 = vsel %vm3632_vm5, %v8641_v46, %v3631_v7  ;;  %v3635_v27 = vand.u32 2147483648, %v8641_v46  ;;  %v5027_v6 = vadd.f32 -0.33333334, %v3034_v40  ;;  %v9086_v19 = vpop.eup %5344  ;;  %v3643_v49 = vmul.f32 %v3642_v13, %v8686_v22 }
 0x69a   :  { %10556 = vst [vmem:[#allocation40_spill] sm:$0xff] %v9056_v60  ;;  %v4578_v33 = vsel %vm4577_vm7, %v4512_v62, 0.0  ;;  %v3925_v60 = vsub.f32 1.5, %v3924_v5  ;;  %v4255_v7 = vmul.f32 %v8690_v59, %v4223_v41  ;;  %v2723_v5 = vmul.f32 %v9040_v1, %v2722_v51  ;;  %v10561_v59 = vld [vmem:[#allocation53_spill] sm:$0xff] }
 0x69b   :  { %10557 = vst [vmem:[#allocation36_spill] sm:$0xff] %v9060_v17  ;;  %v4610_v57 = vsel %vm4576_vm8, %v10560_v48, %v4578_v33  ;;  %v3636_v62 = vsel %vm3634_vm9, %v3635_v27, %v3633_v32  ;;  %v3653_v46 = vsub.f32 1.5, %v3652_v16  ;;  %5350 = vrsqrt.f32 %v9074_v52  ;;  %v10564_v16 = vld [vmem:[#allocation21_spill] sm:$0xff] }
 0x69c   :  { %v4642_v20 = vsel %vm4575_vm10, %v8846_v43, %v4610_v57  ;;  %v3926_v23 = vmul.f32 %v9018_v55, %v3925_v60  ;;  %v5347_v43 = vpop.eup %5346  ;;  %5352 = vrsqrt.f32 %v9054_v56  ;;  %v9105_v21 = vmul.f32 %v10561_v59, %v3780_v34 }
 0x69d   :  { %4674 = vst [vmem:[%s10239_s13] sm:$0xff] %v4642_v20  ;;  %v9096_v40 = vpop.eup %5348  ;;  %5354 = vpow2.f32 %v8754_v58  ;;  %v9109_v41 = vmul.f32 %v8701_v45, %v9010_v36  ;;  %v5506_v58 = vld [vmem:[%s10238_s12 + $0x10] sm:$0xff]  ;;  %v2724_v57 = vmul.f32 0.5, %v2723_v5  ;;  %vm3644_vm13 = vcmp.eq.f32.partialorder %v8686_v22, inf }
 0x69e   :  { %3280 = vperm.xlu0 %5108, %v5027_v6   ;;  %v3930_v60 = vsel %vm3929_vm12, %v9018_v55, %v3926_v23  ;;  %2201 = vrot.lane.b32.xlu2 %v8909_v26, %s5536_s1  ;;  %v4287_v34 = vmul.f32 %v5506_v58, %v4255_v7  ;;  %5356 = vrsqrt.f32 %v9012_v37  ;;  %v3654_v45 = vmul.f32 %v8981_v44, %v3653_v46  ;;  %v10565_v23 = vld [vmem:[#allocation77_spill] sm:$0xff] }
 0x69f   :  { %4188 = vperm.xlu1 %5106, %v3636_v62   ;;  %v9112_v51 = vmul.f32 %v8991_v42, %v3930_v60  ;;  %v2732_v42 = vmul.f32 %v9096_v40, %v9038_v38  ;;  %5358 = vrsqrt.f32 %v8902_v31  ;;  %v3792_v36 = vmul.f32 %v9086_v19, %v9015_v28  ;;  %v10566_v46 = vld [vmem:[#allocation25_spill] sm:$0xff] }
 0x6a0   :  { %v2879_v55 = vpop.permute.xlu0 %2878  ;;  %v9114_v33 = vpop.permute.xlu2 %4163  ;;  %v9130_v32 = vadd.f32 9.0, %v5347_v43  ;;  %v3645_v27 = vsel %vm3644_vm13, %v8686_v22, %v3643_v49  ;;  %5360 = vlog2.f32 %v10565_v23  ;;  %v3647_v44 = vand.u32 2147483648, %v8686_v22 }
 0x6a1   :  { %10562 = vst [vmem:[#allocation50_spill] sm:$0xff] %v9112_v51  ;;  %v2960_v48 = vmul.f32 %v2879_v55, %v10564_v16  ;;  %v9117_v13 = vpop.permute.xlu1 %3240  ;;  %v9133_v6 = vpop.eup %5350  ;;  %v2427_v7 = vmul.f32 4.5, %v9054_v56  ;;  %v4319_v60 = vadd.f32 %v4287_v34, %v10566_v46  ;;  %v2725_v43 = vsub.f32 1.5, %v2724_v57 }
 0x6a2   :  { %10563 = vst [vmem:[#allocation61_spill] sm:$0xff] %v9114_v33  ;;  %v9139_v5 = vpop.eup %5352  ;;  %v3648_v49 = vsel %vm3646_vm14, %v3647_v44, %v3645_v27  ;;  %v3655_v55 = vmul.f32 %v3654_v45, %v8890_v61  ;;  %v2733_v22 = vmul.f32 %v9096_v40, %v2732_v42  ;;  %v2426_v16 = vmul.f32 4.5, %v9012_v37  ;;  %v10569_v33 = vld [vmem:[#allocation38_spill] sm:$0xff] }
 0x6a3   :  { %v2992_v20 = vadd.f32 1.0, %v2960_v48  ;;  %v9143_v59 = vpop.eup %5354  ;;  %v3659_v34 = vand.u32 2147483648, %v8890_v61  ;;  %v2742_v42 = vmul.f32 %v9133_v6, %v9074_v52  ;;  %v3686_v27 = vmul.f32 %v9139_v5, %v9054_v56 }
 0x6a4   :  { %v9150_v48 = vpop.eup %5356  ;;  %v2428_v23 = vmul.f32 4.5, %v9130_v32  ;;  %vm2738_vm4 = vweird.f32 %v9096_v40  ;;  %vm2737_vm5 = vweird.f32 %v9038_v38  ;;  %vm2747_vm9 = vweird.f32 %v9074_v52 }
 0x6a5   :  { %v3088_v62 = vmul.f32 %v2992_v20, %v2992_v20  ;;  %v9157_v57 = vpop.eup %5358  ;;  %v3674_v63 = vmul.f32 %v9150_v48, %v9012_v37  ;;  %vm2739_vm6 = vmor %vm2737_vm5, %vm2738_vm4  ;;  %vm2748_vm11 = vweird.f32 %v9133_v6  ;;  %vm3680_vm2 = vcmp.eq.f32.partialorder %v9012_v37, inf }
 0x6a6   :  { %2203 = vrot.lane.b32.xlu0 %v8989_v10, %s5536_s1  ;;  %4193 = vperm.xlu2 %5107, %v3648_v49   ;;  %v5361_v51 = vpop.eup %5360  ;;  %vm2749_vm14 = vmor %vm2747_vm9, %vm2748_vm11  ;;  %vm3692_vm4 = vcmp.eq.f32.partialorder %v9054_v56, inf  ;;  %vm3668_vm5 = vcmp.eq.f32.partialorder %v8902_v31, inf  ;;  %vm3694_vm9 = vcmp.eq.f32.partialorder %v9054_v56, 0.0 }
 0x6a7   :  { %v3120_v58 = vmul.f32 %v3088_v62, %v2992_v20  ;;  %4505 = vrot.lane.b32.xlu1 %v8837_v4, %s5538_s28  ;;  %v9163_v20 = vadd.f32 -3.0, %v2427_v7  ;;  %v2726_v4 = vmul.f32 %v9040_v1, %v2725_v43  ;;  %v3675_v14 = vmul.f32 %v9150_v48, %v3674_v63 }
 0x6a8   :  { %v4516_v45 = vpop.permute.xlu0 %4515  ;;  %v9169_v62 = vpop.permute.xlu2 %4495 }
 0x6a9   :  { %v9167_v44 = vmul.f32 %v8662_v47, %v3120_v58  ;;  %10567 = vst [vmem:[#allocation43_spill] sm:$0xff] %v9169_v62  ;;  %v4580_v46 = vsel %vm4577_vm7, %v4516_v45, 0.0  ;;  %v9173_v49 = vpop.permute.xlu1 %2187  ;;  %v3657_v47 = vsel %vm3656_vm0, %v8890_v61, %v3655_v55  ;;  %v2734_v58 = vmul.f32 0.5, %v2733_v22 }
 0x6aa   :  { %10568 = vst [vmem:[#allocation11_spill] sm:$0xff] %v9173_v49  ;;  %v4612_v7 = vsel %vm4576_vm8, %v10569_v33, %v4580_v46  ;;  %v9183_v62 = vadd.f32 -3.0, %v2426_v16  ;;  %v3662_v49 = vmul.f32 %v9157_v57, %v8902_v31  ;;  %v2743_v33 = vmul.f32 %v9133_v6, %v2742_v42 }
 0x6ab   :  { %v9186_v45 = vmul.f32 2.0, %v9167_v44  ;;  %v4644_v43 = vsel %vm4575_vm10, %v4319_v60, %v4612_v7  ;;  %v3687_v55 = vmul.f32 %v9139_v5, %v3686_v27  ;;  %5362 = vrsqrt.f32 %v9163_v20  ;;  %v10570_v60 = vld [vmem:[#allocation88_spill] sm:$0xff]  ;;  %v5507_v27 = vld [vmem:[%s10238_s12 + $0x20] sm:$0xff] }
 0x6ac   :  { %4676 = vst [vmem:[%s10239_s13 + $0x10] sm:$0xff] %v4644_v43  ;;  %v9200_v22 = vadd.f32 -3.0, %v2428_v23  ;;  %v4256_v16 = vmul.f32 %v10570_v60, %v9105_v21  ;;  %v3793_v46 = vmul.f32 %v9086_v19, %v3792_v36  ;;  %v3660_v42 = vsel %vm3658_vm1, %v3659_v34, %v3657_v47 }
 0x6ad   :  { %5364 = vrsqrt.f32 %v9186_v45  ;;  %v4289_v23 = vmul.f32 %v5507_v27, %v9109_v41  ;;  %v2730_v21 = vsel %vm2729_vm3, %v9040_v1, %v2726_v4  ;;  %v2735_v36 = vsub.f32 1.5, %v2734_v58  ;;  %v5508_v4 = vld [vmem:[%s10238_s12 + $0x18] sm:$0xff] }
 0x6ae   :  { %4198 = vperm.xlu0 %5108, %v3660_v42   ;;  %5366 = vrsqrt.f32 %v9183_v62  ;;  %4507 = vrot.lane.b32.xlu2 %v8909_v26, %s5538_s28  ;;  %v3663_v61 = vmul.f32 %v9157_v57, %v3662_v49  ;;  %v2744_v7 = vmul.f32 0.5, %v2743_v33  ;;  %v3688_v41 = vmul.f32 0.5, %v3687_v55  ;;  %v10572_v42 = vld [vmem:[#allocation26_spill] sm:$0xff]  ;;  %v10573_v55 = vld [vmem:[#allocation7_spill] sm:$0xff] }
 0x6af   :  { %2913 = vperm.xlu1 %5106, %v2730_v21   ;;  %5368 = vrsqrt.f32 %v9130_v32  ;;  %v4288_v1 = vmul.f32 %v5508_v4, %v4256_v16  ;;  %v9229_v47 = vmul.f32 0.5, %v3793_v46  ;;  %v4368_v58 = vmul.f32 0.6931472, %v5361_v51 }
 0x6b0   :  { %v9223_v34 = vpop.permute.xlu0 %3250  ;;  %5370 = vrsqrt.f32 %v9200_v22  ;;  %v2889_v43 = vpop.permute.xlu2 %2888  ;;  %v3035_v49 = vmul.f32 0.5, %v9054_v56  ;;  %v4321_v33 = vadd.f32 %v4289_v23, %v10572_v42  ;;  %v2736_v21 = vmul.f32 %v9096_v40, %v2735_v36 }
 0x6b1   :  { %10571 = vst [vmem:[#allocation53_spill] sm:$0xff] %v9223_v34  ;;  %v9231_v63 = vpop.permute.xlu1 %4158  ;;  %v9234_v60 = vpop.eup %5362  ;;  %v2962_v27 = vmul.f32 %v2889_v43, %v10573_v55  ;;  %v9243_v16 = vmul.f32 2.0, %v8793_v18  ;;  %v3676_v51 = vmul.f32 0.5, %v3675_v14  ;;  %v3664_v46 = vmul.f32 0.5, %v3663_v61  ;;  %v10574_v55 = vld [vmem:[#allocation18_spill] sm:$0xff] }
 0x6b2   :  { %v2745_v43 = vsub.f32 1.5, %v2744_v7  ;;  %v3689_v42 = vsub.f32 1.5, %v3688_v41  ;;  %v9253_v34 = vadd.f32 %v4288_v1, %v10574_v55  ;;  %v3795_v18 = vsub.f32 1.5, %v9229_v47 }
 0x6b3   :  { %v9240_v26 = vpop.eup %5364  ;;  %v2994_v17 = vadd.f32 1.0, %v2962_v27  ;;  %v4422_v38 = vsub.f32 %v10575_v8, %v4368_v58  ;;  %v5028_v14 = vadd.f32 -0.33333334, %v3035_v49  ;;  %v2740_v2 = vsel %vm2739_vm6, %v9096_v40, %v2736_v21 }
 0x6b4   :  { %v9246_v4 = vpop.eup %5366  ;;  %v3932_v23 = vmul.f32 %v9240_v26, %v9186_v45  ;;  %v3036_v7 = vmul.f32 0.5, %v9130_v32  ;;  %v3677_v41 = vsub.f32 1.5, %v3676_v51  ;;  %v3665_v1 = vsub.f32 1.5, %v3664_v46 }
 0x6b5   :  { %v9250_v36 = vpop.eup %5368  ;;  %v3090_v0 = vmul.f32 %v2994_v17, %v2994_v17  ;;  %v2746_v40 = vmul.f32 %v9133_v6, %v2745_v43  ;;  %v3690_v21 = vmul.f32 %v9139_v5, %v3689_v42  ;;  %vm3938_vm12 = vweird.f32 %v9240_v26  ;;  %v10578_v43 = vld [vmem:[#allocation44_spill] sm:$0xff] }
 0x6b6   :  { %v9257_v61 = vpop.eup %5370  ;;  %v3933_v27 = vmul.f32 %v9240_v26, %v3932_v23  ;;  %4509 = vrot.lane.b32.xlu0 %v8989_v10, %s5538_s28  ;;  %2918 = vperm.xlu2 %5107, %v2740_v2   ;;  %v2762_v2 = vmul.f32 %v9234_v60, %v9163_v20  ;;  %v3678_v10 = vmul.f32 %v9150_v48, %v3677_v41  ;;  %vm3937_vm13 = vweird.f32 %v9186_v45 }
 0x6b7   :  { %4529 = vrot.lane.b32.xlu1 %v4422_v38, %s5539_s7  ;;  %v3122_v47 = vmul.f32 %v3090_v0, %v2994_v17  ;;  %v2752_v38 = vmul.f32 %v9246_v4, %v9183_v62  ;;  %v2772_v51 = vmul.f32 %v9257_v61, %v9200_v22  ;;  %v3698_v0 = vmul.f32 %v9250_v36, %v9130_v32  ;;  %vm3939_vm15 = vmor %vm3937_vm13, %vm3938_vm12 }
 0x6b8   :  { %v3934_v58 = vmul.f32 0.5, %v3933_v27  ;;  %v9267_v49 = vpop.permute.xlu0 %2191  ;;  %v4520_v23 = vpop.permute.xlu2 %4519  ;;  %v5029_v27 = vadd.f32 -0.33333334, %v3036_v7  ;;  %v2750_v48 = vsel %vm2749_vm14, %v9133_v6, %v2746_v40  ;;  %v2763_v7 = vmul.f32 %v9234_v60, %v2762_v2 }
 0x6b9   :  { %10576 = vst [vmem:[#allocation21_spill] sm:$0xff] %v9267_v49  ;;  %v9271_v55 = vpop.permute.xlu1 %4493  ;;  %v9282_v17 = vmul.f32 %v9117_v13, %v3122_v47  ;;  %v4582_v5 = vsel %vm4577_vm7, %v4520_v23, 0.0  ;;  %v2773_v45 = vmul.f32 %v9257_v61, %v2772_v51  ;;  %v2753_v52 = vmul.f32 %v9246_v4, %v2752_v38  ;;  %v10580_v38 = vld [vmem:[#allocation5_spill] sm:$0xff] }
 0x6ba   :  { %10577 = vst [vmem:[#allocation77_spill] sm:$0xff] %v9271_v55  ;;  %v3935_v46 = vsub.f32 1.5, %v3934_v58  ;;  %v4614_v42 = vsel %vm4576_vm8, %v10578_v43, %v4582_v5  ;;  %v3666_v55 = vmul.f32 %v9157_v57, %v3665_v1  ;;  %v3691_v57 = vmul.f32 %v3690_v21, %v9054_v56 }
 0x6bb   :  { %v9293_v49 = vmul.f32 2.0, %v9282_v17  ;;  %v4646_v47 = vsel %vm4575_vm10, %v4321_v33, %v4614_v42  ;;  %v3699_v41 = vmul.f32 %v9250_v36, %v3698_v0  ;;  %vm3797_vm0 = vweird.f32 %v9015_v28 }
 0x6bc   :  { %v3936_v13 = vmul.f32 %v9240_v26, %v3935_v46  ;;  %4678 = vst [vmem:[%s10239_s13 + $0x20] sm:$0xff] %v4646_v47  ;;  %v3679_v6 = vmul.f32 %v3678_v10, %v9012_v37  ;;  %v3667_v58 = vmul.f32 %v3666_v55, %v8902_v31  ;;  %v9321_v40 = vmul.f32 %v9086_v19, %v3795_v18 }
 0x6bd   :  { %5372 = vrsqrt.f32 %v9293_v49  ;;  %vm3798_vm1 = vweird.f32 %v9086_v19  ;;  %vm3682_vm3 = vcmp.eq.f32.partialorder %v9012_v37, 0.0  ;;  %v2764_v10 = vmul.f32 0.5, %v2763_v7 }
 0x6be   :  { %v3940_v33 = vsel %vm3939_vm15, %v9240_v26, %v3936_v13  ;;  %2923 = vperm.xlu0 %5108, %v2750_v48   ;;  %3290 = vperm.xlu2 %5107, %v5029_v27   ;;  %v10579_v26 = vld [vmem:[#allocation87_spill] sm:$0xff]  ;;  %v3693_v18 = vsel %vm3692_vm4, %v9054_v56, %v3691_v57  ;;  %v2754_v55 = vmul.f32 0.5, %v2753_v52  ;;  %v3700_v2 = vmul.f32 0.5, %v3699_v41  ;;  %vm9351_vm11 = vmor %vm3797_vm0, %vm3798_vm1 }
 0x6bf   :  { %v9316_v1 = vmul.f32 %v9231_v63, %v3940_v33  ;;  %3285 = vperm.xlu1 %5106, %v5028_v14   ;;  %5374 = vlog2.f32 %v10579_v26  ;;  %v2774_v14 = vmul.f32 0.5, %v2773_v45  ;;  %v2958_v51 = vmul.f32 %v9002_v50, %v10580_v38 }
 0x6c0   :  { %v9325_v21 = vpop.permute.xlu0 %4168  ;;  %v9328_v23 = vpop.permute.xlu2 %3260  ;;  %v3681_v0 = vsel %vm3680_vm2, %v9012_v37, %v3679_v6  ;;  %v3669_v46 = vsel %vm3668_vm5, %v8902_v31, %v3667_v58  ;;  %v3695_v5 = vand.u32 2147483648, %v9054_v56  ;;  %v3683_v42 = vand.u32 2147483648, %v9012_v37 }
 0x6c1   :  { %v2884_v63 = vpop.permute.xlu1 %2883  ;;  %vm3670_vm6 = vcmp.eq.f32.partialorder %v8902_v31, 0.0  ;;  %v3671_v27 = vand.u32 2147483648, %v8902_v31  ;;  %v2765_v47 = vsub.f32 1.5, %v2764_v10  ;;  %v2775_v48 = vsub.f32 1.5, %v2774_v14  ;;  %v10583_v10 = vld [vmem:[#allocation2_spill] sm:$0xff] }
 0x6c2   :  { %v3696_v50 = vsel %vm3694_vm9, %v3695_v5, %v3693_v18  ;;  %v3684_v31 = vsel %vm3682_vm3, %v3683_v42, %v3681_v0  ;;  %v2755_v56 = vsub.f32 1.5, %v2754_v55  ;;  %v3701_v33 = vsub.f32 1.5, %v3700_v2  ;;  %v10584_v0 = vld [vmem:[#allocation35_spill] sm:$0xff] }
 0x6c3   :  { %v9339_v43 = vpop.eup %5372  ;;  %v3672_v45 = vsel %vm3670_vm6, %v3671_v27, %v3669_v46  ;;  %v3800_v52 = vsel %vm9351_vm11, %v9086_v19, %v9321_v40  ;;  %5376 = vlog2.f32 %v8526_v30  ;;  %v2990_v41 = vadd.f32 1.0, %v2958_v51 }
 0x6c4   :  { %v3952_v13 = vmul.f32 %v9339_v43, %v9293_v49  ;;  %vm2767_vm12 = vweird.f32 %v9163_v20  ;;  %vm2768_vm13 = vweird.f32 %v9234_v60  ;;  %vm2758_vm14 = vweird.f32 %v9246_v4 }
 0x6c5   :  { %v5375_v57 = vpop.eup %5374  ;;  %vm2777_vm15 = vweird.f32 %v9200_v22  ;;  %v2766_v40 = vmul.f32 %v9234_v60, %v2765_v47  ;;  %v2776_v26 = vmul.f32 %v9257_v61, %v2775_v48  ;;  %vm2778_vm0 = vweird.f32 %v9257_v61  ;;  %vm9387_vm2 = vmor %vm2767_vm12, %vm2768_vm13 }
 0x6c6   :  { %4213 = vperm.xlu0 %5108, %v3696_v50   ;;  %v3953_v28 = vmul.f32 %v9339_v43, %v3952_v13  ;;  %4208 = vperm.xlu2 %5107, %v3684_v31   ;;  %v2961_v14 = vmul.f32 %v2884_v63, %v10583_v10  ;;  %v2756_v55 = vmul.f32 %v9246_v4, %v2755_v56  ;;  %vm3958_vm1 = vweird.f32 %v9339_v43  ;;  %vm2779_vm4 = vmor %vm2777_vm15, %vm2778_vm0 }
 0x6c7   :  { %4203 = vperm.xlu1 %5106, %v3672_v45   ;;  %v3702_v2 = vmul.f32 %v9250_v36, %v3701_v33  ;;  %v3086_v38 = vmul.f32 %v2990_v41, %v2990_v41  ;;  %5378 = vrsqrt.f32 %v9243_v16  ;;  %vm2757_vm3 = vweird.f32 %v9183_v62  ;;  %v10588_v62 = vld [vmem:[#allocation91_spill] sm:$0xff] }
 0x6c8   :  { %v9363_v6 = vpop.permute.xlu0 %4497  ;;  %v3954_v37 = vmul.f32 0.5, %v3953_v28  ;;  %v9369_v58 = vpop.permute.xlu2 %2195  ;;  %vm3957_vm5 = vweird.f32 %v9293_v49  ;;  %vm2759_vm6 = vmor %vm2757_vm3, %vm2758_vm14  ;;  %v2780_v20 = vsel %vm2779_vm4, %v9257_v61, %v2776_v26  ;;  %5380 = vlog2.f32 %v10588_v62 }
 0x6c9   :  { %v4518_v19 = vpop.permute.xlu1 %4517  ;;  %v5377_v5 = vpop.eup %5376  ;;  %vm3959_vm9 = vmor %vm3957_vm5, %vm3958_vm1  ;;  %v2993_v22 = vadd.f32 1.0, %v2961_v14  ;;  %v2770_v49 = vsel %vm9387_vm2, %v9234_v60, %v2766_v40  ;;  %v2760_v13 = vsel %vm2759_vm6, %v9246_v4, %v2756_v55  ;;  %5382 = vlog2.f32 %v8781_v11  ;;  %v10589_v4 = vld [vmem:[#allocation29_spill] sm:$0xff]  ;;  %v10590_v40 = vld [vmem:[#allocation72_spill] sm:$0xff] }
 0x6ca   :  { %v4581_v18 = vsel %vm4577_vm7, %v4518_v19, 0.0  ;;  %v3955_v51 = vsub.f32 1.5, %v3954_v37  ;;  %v3118_v50 = vmul.f32 %v3086_v38, %v2990_v41  ;;  %v3703_v47 = vmul.f32 %v3702_v2, %v9130_v32  ;;  %v10591_v14 = vld [vmem:[#allocation63_spill] sm:$0xff] }
 0x6cb   :  { %v4613_v46 = vsel %vm4576_vm8, %v10584_v0, %v4581_v18  ;;  %v4372_v48 = vmul.f32 0.6931472, %v5377_v5  ;;  %5384 = vlog2.f32 %v8611_v12  ;;  %v4370_v60 = vmul.f32 0.6931472, %v5375_v57 }
 0x6cc   :  { %v4645_v36 = vsel %vm4575_vm10, %v9253_v34, %v4613_v46  ;;  %v3956_v42 = vmul.f32 %v9339_v43, %v3955_v51  ;;  %v10587_v34 = vld [vmem:[#allocation54_spill] sm:$0xff]  ;;  %v2308_v41 = vmul.f32 0.5, %v10546_v54  ;;  %v3089_v28 = vmul.f32 %v2993_v22, %v2993_v22  ;;  %v5509_v54 = vld [vmem:[%s10238_s12 + $0x28] sm:$0xff] }
 0x6cd   :  { %4677 = vst [vmem:[%s10239_s13 + $0x18] sm:$0xff] %v4645_v36  ;;  %v4226_v27 = vmul.f32 %v10587_v34, %v3800_v52  ;;  %v9427_v52 = vpop.eup %5378  ;;  %vm3704_vm11 = vcmp.eq.f32.partialorder %v9130_v32, inf  ;;  %v9432_v12 = vmul.f32 %v8605_v3, %v3118_v50  ;;  %v3707_v19 = vand.u32 2147483648, %v9130_v32  ;;  %v10592_v34 = vld [vmem:[#allocation4_spill] sm:$0xff] }
 0x6ce   :  { %2938 = vperm.xlu0 %5108, %v2780_v20   ;;  %v3960_v61 = vsel %vm3959_vm9, %v9339_v43, %v3956_v42  ;;  %2933 = vperm.xlu2 %5107, %v2770_v49   ;;  %v3705_v57 = vsel %vm3704_vm11, %v9130_v32, %v3703_v47  ;;  %v5381_v37 = vpop.eup %5380  ;;  %v4424_v26 = vsub.f32 %v10590_v40, %v4372_v48  ;;  %vm3706_vm12 = vcmp.eq.f32.partialorder %v9130_v32, 0.0  ;;  %v10593_v49 = vld [vmem:[#allocation48_spill] sm:$0xff] }
 0x6cf   :  { %2928 = vperm.xlu1 %5106, %v2760_v13   ;;  %v9419_v7 = vmul.f32 %v9325_v21, %v3960_v61  ;;  %v4258_v43 = vmul.f32 %v9143_v59, %v4226_v27  ;;  %v5383_v10 = vpop.eup %5382  ;;  %v4423_v18 = vsub.f32 %v10591_v14, %v4370_v60  ;;  %v2347_v2 = vmul.f32 1.442695, %v2308_v41 }
 0x6d0   :  { %v2894_v31 = vpop.permute.xlu0 %2893  ;;  %v9421_v45 = vpop.permute.xlu2 %4178  ;;  %5386 = vlog2.f32 %v8675_v25  ;;  %v3121_v38 = vmul.f32 %v3089_v28, %v2993_v22  ;;  %v3708_v51 = vsel %vm3706_vm12, %v3707_v19, %v3705_v57  ;;  %v3802_v0 = vmul.f32 %v9427_v52, %v9243_v16 }
 0x6d1   :  { %v2963_v56 = vmul.f32 %v2894_v31, %v10589_v4  ;;  %v9424_v33 = vpop.permute.xlu1 %3255  ;;  %v4290_v3 = vmul.f32 %v5509_v54, %v4258_v43  ;;  %v5385_v55 = vpop.eup %5384  ;;  %5388 = vlog2.f32 %v9432_v12  ;;  %v9449_v32 = vmul.f32 2.0, %v8880_v9  ;;  %v10595_v31 = vld [vmem:[#allocation75_spill] sm:$0xff] }
 0x6d2   :  { %v4374_v63 = vmul.f32 0.6931472, %v5381_v37  ;;  %v4378_v36 = vmul.f32 0.6931472, %v5383_v10  ;;  %5390 = vlog2.f32 %v8868_v35  ;;  %v4376_v5 = vmul.f32 0.6931472, %v5385_v55 }
 0x6d3   :  { %v2995_v21 = vadd.f32 1.0, %v2963_v56  ;;  %v4322_v27 = vadd.f32 %v4290_v3, %v10592_v34  ;;  %5392 = vpow2.f32 %v2347_v2  ;;  %v9461_v9 = vmul.f32 %v8865_v24, %v3121_v38  ;;  %v10594_v24 = vld [vmem:[#allocation86_spill] sm:$0xff]  ;;  %v10596_v4 = vld [vmem:[#allocation67_spill] sm:$0xff]  ;;  %v10597_v37 = vld [vmem:[#allocation80_spill] sm:$0xff] }
 0x6d4   :  { %v3803_v13 = vmul.f32 %v9427_v52, %v3802_v0  ;;  %5394 = vrsqrt.f32 %v9449_v32  ;;  %v4427_v47 = vsub.f32 %v10594_v24, %v4378_v36  ;;  %v4426_v60 = vsub.f32 %v10595_v31, %v4376_v5  ;;  %v10598_v3 = vld [vmem:[#allocation9_spill] sm:$0xff] }
 0x6d5   :  { %v3091_v59 = vmul.f32 %v2995_v21, %v2995_v21  ;;  %v4425_v56 = vsub.f32 %v10596_v4, %v4374_v63  ;;  %vm3808_vm13 = vweird.f32 %v9427_v52  ;;  %vm3807_vm14 = vweird.f32 %v9243_v16 }
 0x6d6   :  { %4533 = vrot.lane.b32.xlu0 %v4424_v26, %s5539_s7  ;;  %4531 = vrot.lane.b32.xlu2 %v4423_v18, %s5539_s7  ;;  %v5387_v61 = vpop.eup %5386  ;;  %v3804_v41 = vmul.f32 0.5, %v3803_v13  ;;  %vm9516_vm15 = vmor %vm3807_vm14, %vm3808_vm13  ;;  %vm3827_vm4 = vweird.f32 %v9449_v32 }
 0x6d7   :  { %v3123_v46 = vmul.f32 %v3091_v59, %v2995_v21  ;;  %4218 = vperm.xlu1 %5106, %v3708_v51   ;;  %v5389_v48 = vpop.eup %5388  ;;  %v4380_v26 = vmul.f32 0.6931472, %v5387_v61 }
 0x6d8   :  { %v4522_v25 = vpop.permute.xlu0 %4521  ;;  %v9453_v20 = vpop.permute.xlu2 %4501  ;;  %v4384_v21 = vmul.f32 0.6931472, %v5389_v48  ;;  %v3805_v38 = vsub.f32 1.5, %v3804_v41  ;;  %v10602_v41 = vld [vmem:[#allocation15_spill] sm:$0xff] }
 0x6d9   :  { %v3315_v42 = vmul.f32 %v9000_v53, %v3123_v46  ;;  %v4583_v62 = vsel %vm4577_vm7, %v4522_v25, 0.0  ;;  %v9458_v22 = vpop.permute.xlu1 %2193  ;;  %v5391_v43 = vpop.eup %5390  ;;  %v10599_v46 = vld [vmem:[#allocation100_spill] sm:$0xff]  ;;  %v5510_v25 = vld [vmem:[%s10238_s12 + $0x38] sm:$0xff] }
 0x6da   :  { %v4615_v35 = vsel %vm4576_vm8, %v10593_v49, %v4583_v62  ;;  %v5393_v28 = vpop.eup %5392  ;;  %v4382_v10 = vmul.f32 0.6931472, %v5391_v43  ;;  %v4430_v63 = vsub.f32 %v10599_v46, %v4384_v21  ;;  %v10601_v62 = vld [vmem:[#allocation79_spill] sm:$0xff] }
 0x6db   :  { %v9467_v53 = vmul.f32 2.0, %v3315_v42  ;;  %v4647_v50 = vsel %vm4575_vm10, %v4322_v27, %v4615_v35  ;;  %v4260_v19 = vmul.f32 %v5393_v28, %v10597_v37  ;;  %v9488_v54 = vpop.eup %5394  ;;  %v4428_v49 = vsub.f32 %v10601_v62, %v4380_v26 }
 0x6dc   :  { %4679 = vst [vmem:[%s10239_s13 + $0x28] sm:$0xff] %v4647_v50  ;;  %v3822_v34 = vmul.f32 %v9488_v54, %v9449_v32  ;;  %vm3828_vm3 = vweird.f32 %v9488_v54  ;;  %v10619_v32 = vld [vmem:[#allocation53_spill] sm:$0xff] }
 0x6dd   :  { %5396 = vrsqrt.f32 %v9467_v53  ;;  %v4292_v5 = vmul.f32 %v5510_v25, %v4260_v19  ;;  %vm3967_vm1 = vweird.f32 %v9467_v53  ;;  %v10609_v25 = vld [vmem:[#allocation93_spill] sm:$0xff]  ;;  %vm9564_vm5 = vmor %vm3827_vm4, %vm3828_vm3 }
 0x6de   :  { %5398 = vlog2.f32 %v9461_v9  ;;  %4539 = vrot.lane.b32.xlu0 %v4427_v47, %s5539_s7  ;;  %4537 = vrot.lane.b32.xlu2 %v4426_v60, %s5539_s7  ;;  %v3806_v47 = vmul.f32 %v9427_v52, %v3805_v38  ;;  %v3823_v21 = vmul.f32 %v9488_v54, %v3822_v34  ;;  %v10607_v38 = vld [vmem:[#allocation19_spill] sm:$0xff] }
 0x6df   :  { %5400 = vlog2.f32 %v8926_v39  ;;  %4535 = vrot.lane.b32.xlu1 %v4425_v56, %s5539_s7  ;;  %v2307_v39 = vmul.f32 0.5, %v10539_v15  ;;  %v10600_v15 = vld [vmem:[#allocation89_spill] sm:$0xff]  ;;  %v4324_v28 = vadd.f32 %v4292_v5, %v10602_v41 }
 0x6e0   :  { %5402 = vlog2.f32 %v9167_v44  ;;  %v9485_v57 = vpop.permute.xlu0 %3265  ;;  %v2904_v59 = vpop.permute.xlu2 %2903  ;;  %v4429_v27 = vsub.f32 %v10600_v15, %v4382_v10 }
 0x6e1   :  { %v4174_v18 = vpop.permute.xlu1 %4173  ;;  %v2965_v55 = vmul.f32 %v2904_v59, %v10598_v3  ;;  %v2345_v13 = vmul.f32 1.442695, %v2307_v39  ;;  %5404 = vlog2.f32 %v9282_v17  ;;  %v3810_v39 = vsel %vm9516_vm15, %v9427_v52, %v3806_v47  ;;  %v10606_v3 = vld [vmem:[#allocation56_spill] sm:$0xff]  ;;  %v10608_v52 = vld [vmem:[#allocation14_spill] sm:$0xff] }
 0x6e2   :  { %5406 = vlog2.f32 %v3315_v42  ;;  %v10611_v47 = vld [vmem:[#allocation58_spill] sm:$0xff] }
 0x6e3   :  { %v5397_v2 = vpop.eup %5396  ;;  %v2997_v0 = vadd.f32 1.0, %v2965_v55  ;;  %5408 = vpow2.f32 %v2345_v13 }
 0x6e4   :  { %v5399_v51 = vpop.eup %5398  ;;  %v3962_v44 = vmul.f32 %v5397_v2, %v9467_v53  ;;  %vm3968_vm0 = vweird.f32 %v5397_v2 }
 0x6e5   :  { %v5401_v36 = vpop.eup %5400  ;;  %v3093_v50 = vmul.f32 %v2997_v0, %v2997_v0  ;;  %v4390_v48 = vmul.f32 0.6931472, %v5399_v51  ;;  %vm3969_vm2 = vmor %vm3967_vm1, %vm3968_vm0 }
 0x6e6   :  { %v5403_v35 = vpop.eup %5402  ;;  %v3963_v61 = vmul.f32 %v5397_v2, %v3962_v44  ;;  %4545 = vrot.lane.b32.xlu0 %v4430_v63, %s5539_s7  ;;  %4543 = vrot.lane.b32.xlu2 %v4429_v27, %s5539_s7  ;;  %v4386_v37 = vmul.f32 0.6931472, %v5401_v36  ;;  %v10610_v27 = vld [vmem:[#allocation66_spill] sm:$0xff] }
 0x6e7   :  { %4541 = vrot.lane.b32.xlu1 %v4428_v49, %s5539_s7  ;;  %v3125_v60 = vmul.f32 %v3093_v50, %v2997_v0  ;;  %v4388_v19 = vmul.f32 0.6931472, %v5403_v35  ;;  %v4433_v51 = vsub.f32 %v10607_v38, %v4390_v48  ;;  %v5405_v63 = vpop.eup %5404  ;;  %v4227_v49 = vmul.f32 %v10610_v27, %v3810_v39  ;;  %v10614_v39 = vld [vmem:[#allocation28_spill] sm:$0xff] }
 0x6e8   :  { %v3964_v56 = vmul.f32 0.5, %v3963_v61  ;;  %v9508_v43 = vpop.permute.xlu0 %2197  ;;  %v4526_v26 = vpop.permute.xlu2 %4525  ;;  %v4431_v5 = vsub.f32 %v10609_v25, %v4386_v37  ;;  %v3824_v35 = vmul.f32 0.5, %v3823_v21  ;;  %v2309_v48 = vmul.f32 0.5, %v10611_v47  ;;  %v10612_v37 = vld [vmem:[#allocation3_spill] sm:$0xff]  ;;  %v10618_v47 = vld [vmem:[#allocation6_spill] sm:$0xff] }
 0x6e9   :  { %v9512_v17 = vpop.permute.xlu1 %4499  ;;  %v3317_v16 = vmul.f32 %v9424_v33, %v3125_v60  ;;  %v4585_v59 = vsel %vm4577_vm7, %v4526_v26, 0.0  ;;  %v4432_v36 = vsub.f32 %v10608_v52, %v4388_v19  ;;  %v5407_v34 = vpop.eup %5406  ;;  %v4392_v60 = vmul.f32 0.6931472, %v5405_v63 }
 0x6ea   :  { %10603 = vst [vmem:[#allocation25_spill] sm:$0xff] %v9512_v17  ;;  %v3965_v42 = vsub.f32 1.5, %v3964_v56  ;;  %v4617_v55 = vsel %vm4576_vm8, %v10606_v3, %v4585_v59  ;;  %v5409_v61 = vpop.eup %5408  ;;  %v4394_v56 = vmul.f32 0.6931472, %v5407_v34  ;;  %v2349_v10 = vmul.f32 1.442695, %v2309_v48 }
 0x6eb   :  { %v9530_v0 = vmul.f32 2.0, %v3317_v16  ;;  %v4649_v33 = vsel %vm4575_vm10, %v4324_v28, %v4617_v55  ;;  %v4259_v21 = vmul.f32 %v5409_v61, %v4227_v49  ;;  %v10613_v59 = vld [vmem:[#allocation24_spill] sm:$0xff]  ;;  %v4434_v3 = vsub.f32 %v10614_v39, %v4392_v60 }
 0x6ec   :  { %v3966_v44 = vmul.f32 %v5397_v2, %v3965_v42  ;;  %4681 = vst [vmem:[%s10239_s13 + $0x38] sm:$0xff] %v4649_v33 }
 0x6ed   :  { %5410 = vrsqrt.f32 %v9530_v0  ;;  %vm3987_vm9 = vweird.f32 %v9530_v0 }
 0x6ee   :  { %v3970_v53 = vsel %vm3969_vm2, %v5397_v2, %v3966_v44  ;;  %4551 = vrot.lane.b32.xlu0 %v4433_v51, %s5539_s7  ;;  %4549 = vrot.lane.b32.xlu2 %v4432_v36, %s5539_s7  ;;  %5412 = vlog2.f32 %v3317_v16  ;;  %v3825_v2 = vsub.f32 1.5, %v3824_v35  ;;  %v4435_v16 = vsub.f32 %v10613_v59, %v4394_v56  ;;  %v5511_v51 = vld [vmem:[%s10238_s12 + $0x30] sm:$0xff] }
 0x6ef   :  { %v9543_v13 = vmul.f32 %v4174_v18, %v3970_v53  ;;  %4547 = vrot.lane.b32.xlu1 %v4431_v5, %s5539_s7  ;;  %v4291_v44 = vmul.f32 %v5511_v51, %v4259_v21  ;;  %5414 = vpow2.f32 %v2349_v10 }
 0x6f0   :  { %v4184_v50 = vpop.permute.xlu0 %4183  ;;  %v9548_v41 = vpop.permute.xlu2 %3275  ;;  %v3826_v33 = vmul.f32 %v9488_v54, %v3825_v2  ;;  %v10620_v2 = vld [vmem:[#allocation45_spill] sm:$0xff] }
 0x6f1   :  { %v2899_v28 = vpop.permute.xlu1 %2898  ;;  %v4323_v48 = vadd.f32 %v4291_v44, %v10618_v47  ;;  %v10625_v47 = vld [vmem:[#allocation11_spill] sm:$0xff] }
 0x6f2   :  { %v2964_v19 = vmul.f32 %v2899_v28, %v10612_v37  ;;  %v3830_v60 = vsel %vm9564_vm5, %v9488_v54, %v3826_v33  ;;  %v10621_v54 = vld [vmem:[#allocation36_spill] sm:$0xff] }
 0x6f3   :  { %v5411_v18 = vpop.eup %5410 }
 0x6f4   :  { %v2996_v26 = vadd.f32 1.0, %v2964_v19  ;;  %v3982_v42 = vmul.f32 %v5411_v18, %v9530_v0  ;;  %v5413_v55 = vpop.eup %5412  ;;  %vm3988_vm6 = vweird.f32 %v5411_v18 }
 0x6f5   :  { %v4398_v49 = vmul.f32 0.6931472, %v5413_v55  ;;  %vm3989_vm11 = vmor %vm3987_vm9, %vm3988_vm6 }
 0x6f6   :  { %v3092_v63 = vmul.f32 %v2996_v26, %v2996_v26  ;;  %v3983_v36 = vmul.f32 %v5411_v18, %v3982_v42  ;;  %4555 = vrot.lane.b32.xlu2 %v4435_v16, %s5539_s7  ;;  %v10622_v42 = vld [vmem:[#allocation70_spill] sm:$0xff] }
 0x6f7   :  { %4553 = vrot.lane.b32.xlu1 %v4434_v3, %s5539_s7  ;;  %v4437_v10 = vsub.f32 %v10621_v54, %v4398_v49  ;;  %v4229_v16 = vmul.f32 %v10622_v42, %v3830_v60  ;;  %v5415_v3 = vpop.eup %5414 }
 0x6f8   :  { %v3124_v5 = vmul.f32 %v3092_v63, %v2996_v26  ;;  %v9562_v34 = vpop.permute.xlu0 %4503  ;;  %v3984_v35 = vmul.f32 0.5, %v3983_v36  ;;  %v9568_v53 = vpop.permute.xlu2 %2201  ;;  %v10624_v63 = vld [vmem:[#allocation10_spill] sm:$0xff] }
 0x6f9   :  { %10615 = vst [vmem:[#allocation38_spill] sm:$0xff] %v9562_v34  ;;  %v4524_v61 = vpop.permute.xlu1 %4523 }
 0x6fa   :  { %v9575_v56 = vmul.f32 %v10619_v32, %v3124_v5  ;;  %v4584_v28 = vsel %vm4577_vm7, %v4524_v61, 0.0  ;;  %v3985_v21 = vsub.f32 1.5, %v3984_v35  ;;  %v4261_v5 = vmul.f32 %v5415_v3, %v4229_v16 }
 0x6fb   :  { %v4616_v37 = vsel %vm4576_vm8, %v10620_v2, %v4584_v28  ;;  %v10627_v2 = vld [vmem:[#allocation20_spill] sm:$0xff] }
 0x6fc   :  { %5416 = vlog2.f32 %v9575_v56  ;;  %v4648_v19 = vsel %vm4575_vm10, %v4323_v48, %v4616_v37  ;;  %v3986_v26 = vmul.f32 %v5411_v18, %v3985_v21 }
 0x6fd   :  { %4680 = vst [vmem:[%s10239_s13 + $0x30] sm:$0xff] %v4648_v19 }
 0x6fe   :  { %v3990_v55 = vsel %vm3989_vm11, %v5411_v18, %v3986_v26  ;;  %v5512_v18 = vld [vmem:[%s10238_s12 + $0x40] sm:$0xff] }
 0x6ff   :  { %4559 = vrot.lane.b32.xlu1 %v4437_v10, %s5539_s7  ;;  %v9592_v51 = vmul.f32 %v4184_v50, %v3990_v55  ;;  %v4293_v60 = vmul.f32 %v5512_v18, %v4261_v5  ;;  %v10628_v10 = vld [vmem:[#allocation64_spill] sm:$0xff] }
 0x700   :  { %v2909_v44 = vpop.permute.xlu0 %2908  ;;  %v9594_v33 = vpop.permute.xlu2 %4193 }
 0x701   :  { %10623 = vst [vmem:[#allocation88_spill] sm:$0xff] %v9594_v33  ;;  %v2966_v0 = vmul.f32 %v2909_v44, %v10624_v63  ;;  %v3271_v36 = vpop.permute.xlu1 %3270  ;;  %v4325_v37 = vadd.f32 %v4293_v60, %v10627_v2  ;;  %v2310_v63 = vmul.f32 0.5, %v10575_v8  ;;  %v10630_v60 = vld [vmem:[#allocation21_spill] sm:$0xff] }
 0x702   :  { %v5417_v27 = vpop.eup %5416 }
 0x703   :  { %v4396_v35 = vmul.f32 0.6931472, %v5417_v27  ;;  %v2998_v61 = vadd.f32 1.0, %v2966_v0 }
 0x705   :  { %v3094_v49 = vmul.f32 %v2998_v61, %v2998_v61  ;;  %v4436_v48 = vsub.f32 %v10625_v47, %v4396_v35  ;;  %v10629_v35 = vld [vmem:[#allocation13_spill] sm:$0xff] }
 0x707   :  { %v3126_v50 = vmul.f32 %v3094_v49, %v2998_v61  ;;  %4557 = vrot.lane.b32.xlu0 %v4436_v48, %s5539_s7 }
 0x708   :  { %v4528_v32 = vpop.permute.xlu0 %4527  ;;  %v9603_v21 = vpop.permute.xlu2 %4507 }
 0x709   :  { %v3318_v28 = vmul.f32 %v9328_v23, %v3126_v50  ;;  %10626 = vst [vmem:[#allocation26_spill] sm:$0xff] %v9603_v21  ;;  %v4586_v19 = vsel %vm4577_vm7, %v4528_v32, 0.0  ;;  %v9608_v26 = vpop.permute.xlu1 %2199  ;;  %v9619_v23 = vmul.f32 2.0, %v8526_v30  ;;  %v2351_v32 = vmul.f32 1.442695, %v2310_v63 }
 0x70a   :  { %v4618_v42 = vsel %vm4576_vm8, %v10628_v10, %v4586_v19  ;;  %v2311_v10 = vmul.f32 0.5, %v10591_v14  ;;  %v2313_v63 = vmul.f32 0.5, %v10596_v4 }
 0x70b   :  { %v3734_v16 = vmul.f32 2.0, %v3318_v28  ;;  %5418 = vlog2.f32 %v3318_v28  ;;  %v4650_v3 = vsel %vm4575_vm10, %v4325_v37, %v4618_v42  ;;  %v9634_v42 = vmul.f32 2.0, %v8781_v11 }
 0x70c   :  { %4682 = vst [vmem:[%s10239_s13 + $0x40] sm:$0xff] %v4650_v3  ;;  %v2353_v11 = vmul.f32 1.442695, %v2311_v10  ;;  %v2357_v4 = vmul.f32 1.442695, %v2313_v63  ;;  %vm3857_vm2 = vweird.f32 %v9619_v23 }
 0x70d   :  { %5420 = vrsqrt.f32 %v3734_v16  ;;  %vm3997_vm13 = vweird.f32 %v3734_v16  ;;  %vm3887_vm6 = vweird.f32 %v9634_v42 }
 0x70e   :  { %5422 = vrsqrt.f32 %v9619_v23 }
 0x70f   :  { %5424 = vpow2.f32 %v2351_v32 }
 0x710   :  { %v9621_v55 = vpop.permute.xlu0 %3280  ;;  %v2919_v0 = vpop.permute.xlu2 %2918 }
 0x711   :  { %v5419_v44 = vpop.eup %5418  ;;  %v4189_v5 = vpop.permute.xlu1 %4188  ;;  %v2968_v61 = vmul.f32 %v2919_v0, %v10629_v35  ;;  %v2312_v35 = vmul.f32 0.5, %v10590_v40 }
 0x712   :  { %v4400_v27 = vmul.f32 0.6931472, %v5419_v44 }
 0x713   :  { %v5421_v49 = vpop.eup %5420  ;;  %v3000_v48 = vadd.f32 1.0, %v2968_v61  ;;  %v2355_v32 = vmul.f32 1.442695, %v2312_v35 }
 0x714   :  { %v3992_v18 = vmul.f32 %v5421_v49, %v3734_v16  ;;  %v4438_v50 = vsub.f32 %v10630_v60, %v4400_v27  ;;  %v9628_v2 = vpop.eup %5422  ;;  %vm3998_vm12 = vweird.f32 %v5421_v49  ;;  %v2315_v16 = vmul.f32 0.5, %v10594_v24 }
 0x715   :  { %v3096_v30 = vmul.f32 %v3000_v48, %v3000_v48  ;;  %v3852_v61 = vmul.f32 %v9628_v2, %v9619_v23  ;;  %vm3999_vm14 = vmor %vm3997_vm13, %vm3998_vm12  ;;  %vm3858_vm15 = vweird.f32 %v9628_v2 }
 0x716   :  { %v3993_v28 = vmul.f32 %v5421_v49, %v3992_v18  ;;  %4561 = vrot.lane.b32.xlu2 %v4438_v50, %s5539_s7  ;;  %v2314_v18 = vmul.f32 0.5, %v10595_v31  ;;  %v5425_v50 = vpop.eup %5424  ;;  %vm9726_vm4 = vmor %vm3857_vm2, %vm3858_vm15 }
 0x717   :  { %v3128_v8 = vmul.f32 %v3096_v30, %v3000_v48 }
 0x718   :  { %v3994_v37 = vmul.f32 0.5, %v3993_v28  ;;  %v9630_v19 = vpop.permute.xlu0 %2203  ;;  %v9636_v3 = vpop.permute.xlu2 %3290  ;;  %v10632_v28 = vld [vmem:[#allocation84_spill] sm:$0xff]  ;;  %v2359_v10 = vmul.f32 1.442695, %v2314_v18 }
 0x719   :  { %v9638_v44 = vpop.permute.xlu1 %4505  ;;  %v3320_v0 = vmul.f32 %v3271_v36, %v3128_v8  ;;  %v2316_v36 = vmul.f32 0.5, %v10601_v62  ;;  %v4262_v8 = vmul.f32 %v5425_v50, %v10632_v28 }
 0x71a   :  { %10631 = vst [vmem:[#allocation7_spill] sm:$0xff] %v9638_v44  ;;  %v3995_v27 = vsub.f32 1.5, %v3994_v37  ;;  %v3853_v37 = vmul.f32 %v9628_v2, %v3852_v61 }
 0x71b   :  { %v9644_v48 = vmul.f32 2.0, %v3320_v0  ;;  %5426 = vlog2.f32 %v3320_v0 }
 0x71c   :  { %v3996_v14 = vmul.f32 %v5421_v49, %v3995_v27  ;;  %5428 = vrsqrt.f32 %v9634_v42  ;;  %v10634_v27 = vld [vmem:[#allocation16_spill] sm:$0xff]  ;;  %v3854_v50 = vmul.f32 0.5, %v3853_v37 }
 0x71d   :  { %5430 = vrsqrt.f32 %v9644_v48  ;;  %vm4017_vm1 = vweird.f32 %v9644_v48 }
 0x71e   :  { %v4000_v40 = vsel %vm3999_vm14, %v5421_v49, %v3996_v14  ;;  %5432 = vpow2.f32 %v2353_v11  ;;  %v2363_v49 = vmul.f32 1.442695, %v2316_v36  ;;  %v9663_v14 = vmul.f32 2.0, %v9432_v12  ;;  %v5513_v11 = vld [vmem:[%s10238_s12 + $0x48] sm:$0xff] }
 0x71f   :  { %v9650_v30 = vmul.f32 %v4189_v5, %v4000_v40  ;;  %5434 = vpow2.f32 %v2357_v4  ;;  %v4294_v18 = vmul.f32 %v5513_v11, %v4262_v8  ;;  %v2361_v40 = vmul.f32 1.442695, %v2315_v16 }
 0x720   :  { %v9655_v31 = vpop.permute.xlu0 %4198  ;;  %v9657_v63 = vpop.permute.xlu2 %4208  ;;  %5436 = vpow2.f32 %v2355_v32  ;;  %v2317_v36 = vmul.f32 0.5, %v10600_v15  ;;  %v10635_v15 = vld [vmem:[#allocation12_spill] sm:$0xff]  ;;  %vm3917_vm11 = vweird.f32 %v9663_v14 }
 0x721   :  { %10633 = vst [vmem:[#allocation18_spill] sm:$0xff] %v9657_v63  ;;  %v2914_v62 = vpop.permute.xlu1 %2913  ;;  %v5427_v0 = vpop.eup %5426  ;;  %5438 = vpow2.f32 %v2359_v10  ;;  %v4326_v37 = vadd.f32 %v4294_v18, %v10635_v15  ;;  %v3855_v10 = vsub.f32 1.5, %v3854_v50  ;;  %v10638_v18 = vld [vmem:[#allocation33_spill] sm:$0xff] }
 0x722   :  { %v2967_v35 = vmul.f32 %v2914_v62, %v10634_v27  ;;  %v9660_v5 = vpop.eup %5428  ;;  %v4404_v24 = vmul.f32 0.6931472, %v5427_v0  ;;  %5440 = vpow2.f32 %v2363_v49  ;;  %v2365_v44 = vmul.f32 1.442695, %v2317_v36 }
 0x723   :  { %v9665_v61 = vpop.eup %5430  ;;  %v3882_v28 = vmul.f32 %v9660_v5, %v9634_v42  ;;  %5442 = vrsqrt.f32 %v9663_v14  ;;  %vm3888_vm5 = vweird.f32 %v9660_v5 }
 0x724   :  { %v2999_v4 = vadd.f32 1.0, %v2967_v35  ;;  %v4012_v32 = vmul.f32 %v9665_v61, %v9644_v48  ;;  %v4440_v12 = vsub.f32 %v9369_v58, %v4404_v24  ;;  %v5433_v0 = vpop.eup %5432  ;;  %5444 = vpow2.f32 %v2361_v40  ;;  %v10637_v24 = vld [vmem:[#allocation95_spill] sm:$0xff]  ;;  %vm9784_vm9 = vmor %vm3887_vm6, %vm3888_vm5 }
 0x725   :  { %v9679_v16 = vpop.eup %5434  ;;  %v4263_v11 = vmul.f32 %v5433_v0, %v10637_v24  ;;  %vm4018_vm0 = vweird.f32 %v9665_v61  ;;  %v10639_v0 = vld [vmem:[#allocation57_spill] sm:$0xff] }
 0x726   :  { %v3095_v62 = vmul.f32 %v2999_v4, %v2999_v4  ;;  %v4013_v8 = vmul.f32 %v9665_v61, %v4012_v32  ;;  %4565 = vrot.lane.b32.xlu1 %v4440_v12, %s5539_s7  ;;  %v9684_v49 = vpop.eup %5436  ;;  %v3883_v12 = vmul.f32 %v9660_v5, %v3882_v28  ;;  %vm4019_vm3 = vmor %vm4017_vm1, %vm4018_vm0 }
 0x728   :  { %v3127_v27 = vmul.f32 %v3095_v62, %v2999_v4  ;;  %v9682_v35 = vpop.permute.xlu0 %4509  ;;  %v4014_v63 = vmul.f32 0.5, %v4013_v8  ;;  %v2934_v32 = vpop.permute.xlu2 %2933  ;;  %v9696_v62 = vmul.f32 2.0, %v9461_v9  ;;  %v5514_v9 = vld [vmem:[%s10238_s12 + $0x50] sm:$0xff] }
 0x729   :  { %10636 = vst [vmem:[#allocation51_spill] sm:$0xff] %v9682_v35  ;;  %v4530_v21 = vpop.permute.xlu1 %4529  ;;  %v2971_v40 = vmul.f32 %v2934_v32, %v10638_v18  ;;  %v5439_v4 = vpop.eup %5438  ;;  %v3884_v32 = vmul.f32 0.5, %v3883_v12 }
 0x72a   :  { %v9690_v17 = vmul.f32 %v9485_v57, %v3127_v27  ;;  %v4587_v50 = vsel %vm4577_vm7, %v4530_v21, 0.0  ;;  %v4015_v36 = vsub.f32 1.5, %v4014_v63  ;;  %v9702_v28 = vpop.eup %5440  ;;  %v3856_v57 = vmul.f32 %v9628_v2, %v3855_v10 }
 0x72b   :  { %v4619_v8 = vsel %vm4576_vm8, %v10639_v0, %v4587_v50  ;;  %v3003_v15 = vadd.f32 1.0, %v2971_v40  ;;  %v9708_v27 = vpop.eup %5442  ;;  %v4295_v63 = vmul.f32 %v5514_v9, %v4263_v11  ;;  %v10642_v50 = vld [vmem:[#allocation30_spill] sm:$0xff]  ;;  %v2319_v0 = vmul.f32 0.5, %v10609_v25 }
 0x72c   :  { %5446 = vlog2.f32 %v9690_v17  ;;  %v4651_v21 = vsel %vm4575_vm10, %v4326_v37, %v4619_v8  ;;  %v4016_v24 = vmul.f32 %v9665_v61, %v4015_v36  ;;  %v9718_v10 = vpop.eup %5444  ;;  %v2320_v37 = vmul.f32 0.5, %v10608_v52  ;;  %v10643_v8 = vld [vmem:[#allocation46_spill] sm:$0xff] }
 0x72d   :  { %5448 = vpow2.f32 %v2365_v44  ;;  %4683 = vst [vmem:[%s10239_s13 + $0x48] sm:$0xff] %v4651_v21  ;;  %v3099_v11 = vmul.f32 %v3003_v15, %v3003_v15  ;;  %v3860_v23 = vsel %vm9726_vm4, %v9628_v2, %v3856_v57  ;;  %v3912_v52 = vmul.f32 %v9708_v27, %v9663_v14 }
 0x72e   :  { %5450 = vrsqrt.f32 %v9696_v62  ;;  %v4020_v48 = vsel %vm4019_vm3, %v9665_v61, %v4016_v24  ;;  %v4327_v36 = vadd.f32 %v4295_v63, %v10642_v50  ;;  %v4266_v21 = vmul.f32 %v5439_v4, %v10643_v8  ;;  %v10644_v61 = vld [vmem:[#allocation31_spill] sm:$0xff] }
 0x72f   :  { %v9738_v12 = vmul.f32 %v9655_v31, %v4020_v48  ;;  %v3131_v40 = vmul.f32 %v3099_v11, %v3003_v15  ;;  %v2371_v2 = vmul.f32 1.442695, %v2320_v37  ;;  %v3885_v57 = vsub.f32 1.5, %v3884_v32  ;;  %v10645_v15 = vld [vmem:[#allocation69_spill] sm:$0xff]  ;;  %v10646_v11 = vld [vmem:[#allocation82_spill] sm:$0xff] }
 0x730   :  { %v2924_v18 = vpop.permute.xlu0 %2923  ;;  %v4532_v9 = vpop.permute.xlu2 %4531  ;;  %v4232_v4 = vmul.f32 %v10646_v11, %v3860_v23  ;;  %v3913_v50 = vmul.f32 %v9708_v27, %v3912_v52  ;;  %v2323_v8 = vmul.f32 0.5, %v10613_v59  ;;  %v10648_v59 = vld [vmem:[#allocation98_spill] sm:$0xff]  ;;  %vm3918_vm12 = vweird.f32 %v9708_v27 }
 0x731   :  { %v2969_v24 = vmul.f32 %v2924_v18, %v10644_v61  ;;  %v3286_v35 = vpop.permute.xlu1 %3285  ;;  %v4588_v34 = vsel %vm4577_vm7, %v4532_v9, 0.0  ;;  %v10647_v61 = vld [vmem:[#allocation59_spill] sm:$0xff]  ;;  %vm9862_vm14 = vmor %vm3917_vm11, %vm3918_vm12  ;;  %vm3947_vm5 = vweird.f32 %v9696_v62 }
 0x732   :  { %v5447_v44 = vpop.eup %5446  ;;  %v3323_v31 = vmul.f32 %v3286_v35, %v3131_v40  ;;  %v4620_v63 = vsel %vm4576_vm8, %v10645_v15, %v4588_v34  ;;  %v2318_v35 = vmul.f32 0.5, %v10599_v46  ;;  %v5515_v40 = vld [vmem:[%s10238_s12 + $0x68] sm:$0xff]  ;;  %v9769_v46 = vmul.f32 1.442695, %v2319_v0 }
 0x733   :  { %v5449_v48 = vpop.eup %5448  ;;  %v4402_v33 = vmul.f32 0.6931472, %v5447_v44  ;;  %v3001_v25 = vadd.f32 1.0, %v2969_v24  ;;  %v4652_v18 = vsel %vm4575_vm10, %v4327_v36, %v4620_v63  ;;  %v4298_v34 = vmul.f32 %v5515_v40, %v4266_v21 }
 0x734   :  { %v9753_v37 = vmul.f32 2.0, %v3323_v31  ;;  %5452 = vlog2.f32 %v3323_v31  ;;  %v9755_v32 = vpop.eup %5450  ;;  %4684 = vst [vmem:[%s10239_s13 + $0x50] sm:$0xff] %v4652_v18  ;;  %v3886_v36 = vmul.f32 %v9660_v5, %v3885_v57  ;;  %v4264_v21 = vmul.f32 %v9684_v49, %v4232_v4 }
 0x735   :  { %v3097_v23 = vmul.f32 %v3001_v25, %v3001_v25  ;;  %v4439_v52 = vsub.f32 %v9458_v22, %v4402_v33  ;;  %v4269_v33 = vmul.f32 %v5449_v48, %v10647_v61  ;;  %v3914_v24 = vmul.f32 0.5, %v3913_v50 }
 0x736   :  { %5454 = vrsqrt.f32 %v9753_v37  ;;  %v3942_v44 = vmul.f32 %v9755_v32, %v9696_v62  ;;  %v4265_v0 = vmul.f32 %v9679_v16, %v10648_v59  ;;  %v2367_v31 = vmul.f32 1.442695, %v2318_v35  ;;  %v10653_v59 = vld [vmem:[#allocation97_spill] sm:$0xff] }
 0x737   :  { %5456 = vpow2.f32 %v2371_v2  ;;  %v3129_v9 = vmul.f32 %v3097_v23, %v3001_v25  ;;  %4563 = vrot.lane.b32.xlu0 %v4439_v52, %s5539_s7  ;;  %v10649_v2 = vld [vmem:[#allocation39_spill] sm:$0xff]  ;;  %v3890_v11 = vsel %vm9784_vm9, %v9660_v5, %v3886_v36  ;;  %v2321_v16 = vmul.f32 0.5, %v10607_v38  ;;  %v5517_v5 = vld [vmem:[%s10238_s12 + $0x80] sm:$0xff]  ;;  %v10652_v36 = vld [vmem:[#allocation81_spill] sm:$0xff] }
 0x738   :  { %v9777_v57 = vpop.permute.xlu0 %4213  ;;  %v4330_v15 = vadd.f32 %v4298_v34, %v10649_v2  ;;  %v4538_v48 = vpop.permute.xlu2 %4537  ;;  %v2377_v4 = vmul.f32 1.442695, %v2323_v8  ;;  %v4301_v38 = vmul.f32 %v5517_v5, %v4269_v33  ;;  %v3915_v23 = vsub.f32 1.5, %v3914_v24  ;;  %v5518_v33 = vld [vmem:[%s10238_s12 + $0x60] sm:$0xff] }
 0x739   :  { %v3321_v42 = vmul.f32 %v9548_v41, %v3129_v9  ;;  %v9789_v63 = vpop.permute.xlu1 %4203  ;;  %v4591_v50 = vsel %vm4577_vm7, %v4538_v48, 0.0  ;;  %v5516_v41 = vld [vmem:[%s10238_s12 + $0x58] sm:$0xff]  ;;  %v3943_v52 = vmul.f32 %v9755_v32, %v3942_v44  ;;  %v4235_v2 = vmul.f32 %v10653_v59, %v3890_v11 }
 0x73a   :  { %v5453_v25 = vpop.eup %5452  ;;  %v4296_v40 = vmul.f32 %v5516_v41, %v4264_v21  ;;  %v4623_v8 = vsel %vm4576_vm8, %v10652_v36, %v4591_v50  ;;  %v9819_v24 = vmul.f32 %v5518_v33, %v4265_v0  ;;  %v10656_v41 = vld [vmem:[#allocation34_spill] sm:$0xff]  ;;  %v10658_v33 = vld [vmem:[#allocation96_spill] sm:$0xff]  ;;  %vm4047_vm15 = vweird.f32 %v9753_v37 }
 0x73b   :  { %v9797_v18 = vmul.f32 2.0, %v3321_v42  ;;  %5458 = vlog2.f32 %v3321_v42  ;;  %v4410_v35 = vmul.f32 0.6931472, %v5453_v25  ;;  %v4655_v49 = vsel %vm4575_vm10, %v4330_v15, %v4623_v8  ;;  %v10654_v25 = vld [vmem:[#allocation32_spill] sm:$0xff] }
 0x73c   :  { %v9802_v34 = vpop.eup %5454  ;;  %v9824_v42 = vmul.f32 1.442695, %v2321_v16  ;;  %4687 = vst [vmem:[%s10239_s13 + $0x68] sm:$0xff] %v4655_v49  ;;  %v9832_v0 = vadd.f32 %v4296_v40, %v10654_v25  ;;  %v4267_v8 = vmul.f32 %v9718_v10, %v4235_v2  ;;  %v5519_v40 = vld [vmem:[%s10238_s12 + $0x98] sm:$0xff]  ;;  %vm3948_vm1 = vweird.f32 %v9755_v32 }
 0x73d   :  { %v5457_v9 = vpop.eup %5456  ;;  %5460 = vrsqrt.f32 %v9797_v18  ;;  %v4042_v21 = vmul.f32 %v9802_v34, %v9753_v37  ;;  %v4443_v61 = vsub.f32 %v9568_v53, %v4410_v35  ;;  %vm4048_vm13 = vweird.f32 %v9802_v34  ;;  %v5520_v37 = vld [vmem:[%s10238_s12 + $0x70] sm:$0xff]  ;;  %vm9940_vm6 = vmor %vm3947_vm5, %vm3948_vm1 }
 0x73e   :  { %5462 = vpow2.f32 %v2367_v31  ;;  %v4272_v44 = vmul.f32 %v5457_v9, %v9316_v1  ;;  %v10655_v31 = vld [vmem:[#allocation49_spill] sm:$0xff]  ;;  %v3944_v1 = vmul.f32 0.5, %v3943_v52  ;;  %vm4049_vm0 = vmor %vm4047_vm15, %vm4048_vm13  ;;  %vm4027_vm3 = vweird.f32 %v9797_v18 }
 0x73f   :  { %5464 = vpow2.f32 %v2377_v4  ;;  %v4043_v48 = vmul.f32 %v9802_v34, %v4042_v21  ;;  %4571 = vrot.lane.b32.xlu1 %v4443_v61, %s5539_s7  ;;  %v4333_v11 = vadd.f32 %v4301_v38, %v10655_v31  ;;  %v3916_v4 = vmul.f32 %v9708_v27, %v3915_v23  ;;  %v10657_v21 = vld [vmem:[#allocation22_spill] sm:$0xff] }
 0x740   :  { %v2939_v15 = vpop.permute.xlu0 %2938  ;;  %v4544_v35 = vpop.permute.xlu2 %4543  ;;  %v4304_v38 = vmul.f32 %v5519_v40, %v4272_v44 }
 0x741   :  { %v5459_v16 = vpop.eup %5458  ;;  %v4044_v50 = vmul.f32 0.5, %v4043_v48  ;;  %v2972_v5 = vmul.f32 %v2939_v15, %v10656_v41  ;;  %v2929_v36 = vpop.permute.xlu1 %2928  ;;  %v4594_v52 = vsel %vm4577_vm7, %v4544_v35, 0.0  ;;  %v3945_v48 = vsub.f32 1.5, %v3944_v1 }
 0x742   :  { %v4406_v9 = vmul.f32 0.6931472, %v5459_v16  ;;  %v2970_v61 = vmul.f32 %v2929_v36, %v10657_v21  ;;  %v4626_v10 = vsel %vm4576_vm8, %v10658_v33, %v4594_v52  ;;  %v3920_v35 = vsel %vm9862_vm14, %v9708_v27, %v3916_v4  ;;  %v10661_v36 = vld [vmem:[#allocation65_spill] sm:$0xff] }
 0x743   :  { %v9846_v59 = vpop.eup %5460  ;;  %v4045_v23 = vsub.f32 1.5, %v4044_v50  ;;  %v3004_v2 = vadd.f32 1.0, %v2972_v5  ;;  %v4658_v25 = vsel %vm4575_vm10, %v4333_v11, %v4626_v10  ;;  %v4299_v5 = vmul.f32 %v5520_v37, %v4267_v8  ;;  %v10666_v37 = vld [vmem:[#allocation55_spill] sm:$0xff] }
 0x744   :  { %v9852_v49 = vpop.eup %5462  ;;  %v4022_v44 = vmul.f32 %v9846_v59, %v9797_v18  ;;  %v3002_v31 = vadd.f32 1.0, %v2970_v61  ;;  %4690 = vst [vmem:[%s10239_s13 + $0x80] sm:$0xff] %v4658_v25  ;;  %v4441_v11 = vsub.f32 %v9508_v43, %v4406_v9  ;;  %v4336_v40 = vadd.f32 %v4304_v38, %v10661_v36  ;;  %v10663_v25 = vld [vmem:[#allocation76_spill] sm:$0xff] }
 0x745   :  { %v5465_v15 = vpop.eup %5464  ;;  %v4046_v50 = vmul.f32 %v9802_v34, %v4045_v23  ;;  %v3100_v1 = vmul.f32 %v3004_v2, %v3004_v2  ;;  %v9886_v27 = vmul.f32 %v9755_v32, %v3945_v48  ;;  %v9893_v38 = vmul.f32 2.0, %v9575_v56  ;;  %v10662_v56 = vld [vmem:[#allocation27_spill] sm:$0xff] }
 0x746   :  { %v4023_v14 = vmul.f32 %v9846_v59, %v4022_v44  ;;  %v3098_v41 = vmul.f32 %v3002_v31, %v3002_v31  ;;  %4567 = vrot.lane.b32.xlu2 %v4441_v11, %s5539_s7  ;;  %v4275_v8 = vmul.f32 %v5465_v15, %v9543_v13  ;;  %vm4028_vm2 = vweird.f32 %v9846_v59 }
 0x747   :  { %v4050_v9 = vsel %vm4049_vm0, %v9802_v34, %v4046_v50  ;;  %v3132_v52 = vmul.f32 %v3100_v1, %v3004_v2  ;;  %v5521_v50 = vld [vmem:[%s10238_s12 + $0xb0] sm:$0xff]  ;;  %vm4029_vm4 = vmor %vm4027_vm3, %vm4028_vm2  ;;  %v4268_v36 = vmul.f32 %v9702_v28, %v10666_v37  ;;  %v3950_v28 = vsel %vm9940_vm6, %v9755_v32, %v9886_v27  ;;  %v10671_v27 = vld [vmem:[#allocation90_spill] sm:$0xff] }
 0x748   :  { %v9889_v4 = vmul.f32 %v9777_v57, %v4050_v9  ;;  %v4024_v21 = vmul.f32 0.5, %v4023_v14  ;;  %v3130_v61 = vmul.f32 %v3098_v41, %v3002_v31  ;;  %v4534_v23 = vpop.permute.xlu0 %4533  ;;  %v4550_v34 = vpop.permute.xlu2 %4549  ;;  %v4307_v1 = vmul.f32 %v5521_v50, %v4275_v8  ;;  %v10674_v37 = vld [vmem:[#allocation61_spill] sm:$0xff] }
 0x749   :  { %v3324_v33 = vmul.f32 %v9636_v3, %v3132_v52  ;;  %v4589_v10 = vsel %vm4577_vm7, %v4534_v23, 0.0  ;;  %v9898_v2 = vpop.permute.xlu1 %4218  ;;  %v4597_v13 = vsel %vm4577_vm7, %v4550_v34, 0.0  ;;  %v10670_v52 = vld [vmem:[#allocation78_spill] sm:$0xff]  ;;  %vm3977_vm14 = vweird.f32 %v9893_v38 }
 0x74a   :  { %v4025_v48 = vsub.f32 1.5, %v4024_v21  ;;  %v9902_v57 = vmul.f32 %v9621_v55, %v3130_v61  ;;  %v4629_v3 = vsel %vm4576_vm8, %v10662_v56, %v4597_v13  ;;  %v4621_v31 = vsel %vm4576_vm8, %v10663_v25, %v4589_v10  ;;  %v10664_v55 = vld [vmem:[#allocation102_spill] sm:$0xff] }
 0x74b   :  { %v9906_v44 = vmul.f32 2.0, %v3324_v33  ;;  %5466 = vlog2.f32 %v3324_v33  ;;  %v4238_v16 = vmul.f32 %v10664_v55, %v3920_v35  ;;  %v4661_v11 = vsel %vm4575_vm10, %v4336_v40, %v4629_v3  ;;  %v10665_v35 = vld [vmem:[#allocation37_spill] sm:$0xff] }
 0x74c   :  { %v4026_v15 = vmul.f32 %v9846_v59, %v4025_v48  ;;  %5468 = vlog2.f32 %v9902_v57  ;;  %v4653_v14 = vsel %vm4575_vm10, %v9832_v0, %v4621_v31  ;;  %4693 = vst [vmem:[%s10239_s13 + $0x98] sm:$0xff] %v4661_v11  ;;  %v4329_v41 = vadd.f32 %v9819_v24, %v10665_v35  ;;  %v5522_v48 = vld [vmem:[%s10238_s12 + $0x78] sm:$0xff] }
 0x74d   :  { %5470 = vrsqrt.f32 %v9906_v44  ;;  %4685 = vst [vmem:[%s10239_s13 + $0x58] sm:$0xff] %v4653_v14  ;;  %v2332_v21 = vmul.f32 0.5, %v9630_v19  ;;  %v4300_v13 = vmul.f32 %v5522_v48, %v4268_v36  ;;  %v4241_v36 = vmul.f32 %v10674_v37, %v3950_v28 }
 0x74e   :  { %5472 = vrsqrt.f32 %v9893_v38  ;;  %v4030_v18 = vsel %vm4029_vm4, %v9846_v59, %v4026_v15  ;;  %v10669_v59 = vld [vmem:[#allocation41_spill] sm:$0xff]  ;;  %v2325_v28 = vmul.f32 0.5, %v10621_v54  ;;  %vm4057_vm11 = vweird.f32 %v9906_v44 }
 0x74f   :  { %5474 = vpow2.f32 %v9769_v46  ;;  %v9945_v0 = vmul.f32 %v9789_v63, %v4030_v18  ;;  %v2322_v46 = vmul.f32 0.5, %v10614_v39  ;;  %v4331_v40 = vadd.f32 %v4299_v5, %v10669_v59  ;;  %v5523_v18 = vld [vmem:[%s10238_s12 + $0x88] sm:$0xff] }
 0x750   :  { %5476 = vpow2.f32 %v9824_v42  ;;  %v4540_v24 = vpop.permute.xlu0 %4539  ;;  %v4339_v63 = vadd.f32 %v4307_v1, %v10670_v52  ;;  %v4556_v61 = vpop.permute.xlu2 %4555  ;;  %v4270_v42 = vmul.f32 %v9852_v49, %v4238_v16  ;;  %v10672_v49 = vld [vmem:[#allocation40_spill] sm:$0xff]  ;;  %v10673_v16 = vld [vmem:[#allocation71_spill] sm:$0xff]  ;;  %v2395_v11 = vmul.f32 1.442695, %v2332_v21  ;;  %v10676_v21 = vld [vmem:[#allocation50_spill] sm:$0xff] }
 0x751   :  { %v5467_v9 = vpop.eup %5466  ;;  %v4592_v23 = vsel %vm4577_vm7, %v4540_v24, 0.0  ;;  %v4536_v39 = vpop.permute.xlu1 %4535  ;;  %v4600_v32 = vsel %vm4577_vm7, %v4556_v61, 0.0  ;;  %v10675_v52 = vld [vmem:[#allocation47_spill] sm:$0xff] }
 0x752   :  { %v5469_v8 = vpop.eup %5468  ;;  %v4412_v33 = vmul.f32 0.6931472, %v5467_v9  ;;  %v4624_v5 = vsel %vm4576_vm8, %v10671_v27, %v4592_v23  ;;  %v4590_v34 = vsel %vm4577_vm7, %v4536_v39, 0.0  ;;  %v4632_v3 = vsel %vm4576_vm8, %v10672_v49, %v4600_v32 }
 0x753   :  { %v5471_v10 = vpop.eup %5470  ;;  %v4408_v56 = vmul.f32 0.6931472, %v5469_v8  ;;  %v4656_v25 = vsel %vm4575_vm10, %v4331_v40, %v4624_v5  ;;  %v4664_v55 = vsel %vm4575_vm10, %v4339_v63, %v4632_v3  ;;  %v4622_v50 = vsel %vm4576_vm8, %v10673_v16, %v4590_v34  ;;  %v10678_v5 = vld [vmem:[#allocation42_spill] sm:$0xff] }
 0x754   :  { %v9977_v31 = vpop.eup %5472  ;;  %v4052_v15 = vmul.f32 %v5471_v10, %v9906_v44  ;;  %4688 = vst [vmem:[%s10239_s13 + $0x70] sm:$0xff] %v4656_v25  ;;  %v4654_v14 = vsel %vm4575_vm10, %v4329_v41, %v4622_v50  ;;  %v4302_v35 = vmul.f32 %v5523_v18, %v4270_v42  ;;  %v4444_v59 = vsub.f32 %v9630_v19, %v4412_v33  ;;  %v10677_v42 = vld [vmem:[#allocation52_spill] sm:$0xff]  ;;  %v5525_v44 = vld [vmem:[%s10238_s12 + $0xa0] sm:$0xff] }
 0x755   :  { %v5475_v1 = vpop.eup %5474  ;;  %4696 = vst [vmem:[%s10239_s13 + $0xb0] sm:$0xff] %v4664_v55  ;;  %v4442_v40 = vsub.f32 %v9608_v26, %v4408_v56  ;;  %v2375_v9 = vmul.f32 1.442695, %v2322_v46  ;;  %v4332_v41 = vadd.f32 %v4300_v13, %v10675_v52  ;;  %v3972_v63 = vmul.f32 %v9977_v31, %v9893_v38  ;;  %v10679_v13 = vld [vmem:[#allocation85_spill] sm:$0xff] }
 0x756   :  { %v5477_v62 = vpop.eup %5476  ;;  %v4053_v24 = vmul.f32 %v5471_v10, %v4052_v15  ;;  %4686 = vst [vmem:[%s10239_s13 + $0x60] sm:$0xff] %v4654_v14  ;;  %v4271_v61 = vmul.f32 %v5475_v1, %v10676_v21  ;;  %v2326_v23 = vmul.f32 0.5, %v10630_v60  ;;  %4573 = vrot.lane.b32.xlu2 %v4444_v59, %s5539_s7  ;;  %5478 = vpow2.f32 %v2395_v11  ;;  %v5524_v15 = vld [vmem:[%s10238_s12 + $0x90] sm:$0xff] }
 0x757   :  { %4569 = vrot.lane.b32.xlu0 %v4442_v40, %s5539_s7  ;;  %v4334_v46 = vadd.f32 %v4302_v35, %v10677_v42  ;;  %v4273_v32 = vmul.f32 %v5477_v62, %v4241_v36  ;;  %vm4058_vm9 = vweird.f32 %v5471_v10  ;;  %5480 = vpow2.f32 %v2375_v9  ;;  %v10680_v36 = vld [vmem:[#allocation62_spill] sm:$0xff]  ;;  %v10681_v59 = vld [vmem:[#allocation68_spill] sm:$0xff] }
 0x758   :  { %v4054_v39 = vmul.f32 0.5, %v4053_v24  ;;  %v4546_v19 = vpop.permute.xlu0 %4545  ;;  %v3973_v34 = vmul.f32 %v9977_v31, %v3972_v63  ;;  %v2381_v49 = vmul.f32 1.442695, %v2325_v28  ;;  %v4303_v55 = vmul.f32 %v5524_v15, %v4271_v61  ;;  %vm4059_vm12 = vmor %vm4057_vm11, %vm4058_vm9 }
 0x759   :  { %v4595_v8 = vsel %vm4577_vm7, %v4546_v19, 0.0  ;;  %v4542_v33 = vpop.permute.xlu1 %4541  ;;  %v4305_v16 = vmul.f32 %v5525_v44, %v4273_v32  ;;  %v2383_v50 = vmul.f32 1.442695, %v2326_v23  ;;  %v2324_v21 = vmul.f32 0.5, %v10625_v47  ;;  %v10683_v23 = vld [vmem:[#allocation99_spill] sm:$0xff] }
 0x75a   :  { %v4055_v27 = vsub.f32 1.5, %v4054_v39  ;;  %v4627_v54 = vsel %vm4576_vm8, %v10678_v5, %v4595_v8  ;;  %v4593_v60 = vsel %vm4577_vm7, %v4542_v33, 0.0  ;;  %v3974_v14 = vmul.f32 0.5, %v3973_v34  ;;  %v5526_v19 = vld [vmem:[%s10238_s12 + $0xa8] sm:$0xff]  ;;  %v10684_v5 = vld [vmem:[#allocation74_spill] sm:$0xff] }
 0x75b   :  { %v4659_v48 = vsel %vm4575_vm10, %v4334_v46, %v4627_v54  ;;  %v4625_v56 = vsel %vm4576_vm8, %v10679_v13, %v4593_v60  ;;  %5482 = vpow2.f32 %v2381_v49  ;;  %v4335_v62 = vadd.f32 %v4303_v55, %v10680_v36  ;;  %v10685_v13 = vld [vmem:[#allocation103_spill] sm:$0xff]  ;;  %v10686_v55 = vld [vmem:[#allocation94_spill] sm:$0xff] }
 0x75c   :  { %v4056_v3 = vmul.f32 %v5471_v10, %v4055_v27  ;;  %4691 = vst [vmem:[%s10239_s13 + $0x88] sm:$0xff] %v4659_v48  ;;  %v4657_v25 = vsel %vm4575_vm10, %v4332_v41, %v4625_v56  ;;  %v5479_v11 = vpop.eup %5478  ;;  %v4337_v40 = vadd.f32 %v4305_v16, %v10681_v59  ;;  %5484 = vpow2.f32 %v2383_v50  ;;  %v10682_v41 = vld [vmem:[#allocation73_spill] sm:$0xff] }
 0x75d   :  { %4689 = vst [vmem:[%s10239_s13 + $0x78] sm:$0xff] %v4657_v25  ;;  %v5481_v37 = vpop.eup %5480  ;;  %v3975_v61 = vsub.f32 1.5, %v3974_v14  ;;  %v2379_v46 = vmul.f32 1.442695, %v2324_v21  ;;  %vm3978_vm13 = vweird.f32 %v9977_v31 }
 0x75e   :  { %v4060_v1 = vsel %vm4059_vm12, %v5471_v10, %v4056_v3  ;;  %v4274_v10 = vmul.f32 %v5481_v37, %v9419_v7  ;;  %vm3979_vm15 = vmor %vm3977_vm14, %vm3978_vm13  ;;  %v10688_v37 = vld [vmem:[#allocation43_spill] sm:$0xff] }
 0x75f   :  { %v4252_v18 = vmul.f32 %v9898_v2, %v4060_v1  ;;  %v3976_v8 = vmul.f32 %v9977_v31, %v3975_v61  ;;  %5486 = vpow2.f32 %v2379_v46  ;;  %v10687_v1 = vld [vmem:[#allocation92_spill] sm:$0xff]  ;;  %v2328_v61 = vmul.f32 0.5, %v9369_v58  ;;  %v5530_v58 = vld [vmem:[%s10238_s12 + $0xd8] sm:$0xff] }
 0x760   :  { %v4552_v35 = vpop.permute.xlu0 %4551  ;;  %v4306_v42 = vmul.f32 %v5526_v19, %v4274_v10  ;;  %v2327_v46 = vmul.f32 0.5, %v9458_v22 }
 0x761   :  { %v10041_v24 = vmul.f32 %v5479_v11, %v4252_v18  ;;  %v4598_v9 = vsel %vm4577_vm7, %v4552_v35, 0.0  ;;  %v4548_v52 = vpop.permute.xlu1 %4547  ;;  %v5483_v47 = vpop.eup %5482  ;;  %v3980_v48 = vsel %vm3979_vm15, %v9977_v31, %v3976_v8 }
 0x762   :  { %v4630_v2 = vsel %vm4576_vm8, %v10682_v41, %v4598_v9  ;;  %v4596_v63 = vsel %vm4577_vm7, %v4548_v52, 0.0  ;;  %v5485_v33 = vpop.eup %5484  ;;  %v4338_v54 = vadd.f32 %v4306_v42, %v10684_v5  ;;  %v4277_v60 = vmul.f32 %v5483_v47, %v9592_v51  ;;  %v5528_v51 = vld [vmem:[%s10238_s12 + $0xc0] sm:$0xff]  ;;  %v10689_v52 = vld [vmem:[#allocation83_spill] sm:$0xff] }
 0x763   :  { %v4662_v28 = vsel %vm4575_vm10, %v4337_v40, %v4630_v2  ;;  %v4628_v39 = vsel %vm4576_vm8, %v10683_v23, %v4596_v63  ;;  %v4278_v32 = vmul.f32 %v5485_v33, %v9650_v30  ;;  %v5527_v30 = vld [vmem:[%s10238_s12 + $0xc8] sm:$0xff]  ;;  %v4244_v3 = vmul.f32 %v9421_v45, %v3980_v48  ;;  %v10690_v2 = vld [vmem:[#allocation77_spill] sm:$0xff] }
 0x764   :  { %4694 = vst [vmem:[%s10239_s13 + $0xa0] sm:$0xff] %v4662_v28  ;;  %v4660_v7 = vsel %vm4575_vm10, %v4335_v62, %v4628_v39  ;;  %v4309_v31 = vmul.f32 %v5528_v51, %v4277_v60  ;;  %v3735_v9 = vmul.f32 2.0, %v9690_v17  ;;  %v2387_v28 = vmul.f32 1.442695, %v2328_v61  ;;  %v10691_v60 = vld [vmem:[#allocation60_spill] sm:$0xff]  ;;  %v10697_v61 = vld [vmem:[#allocation23_spill] sm:$0xff] }
 0x765   :  { %4692 = vst [vmem:[%s10239_s13 + $0x90] sm:$0xff] %v4660_v7  ;;  %v4310_v49 = vmul.f32 %v5527_v30, %v4278_v32  ;;  %v5487_v15 = vpop.eup %5486  ;;  %v2329_v39 = vmul.f32 0.5, %v9508_v43  ;;  %v2385_v32 = vmul.f32 1.442695, %v2327_v46  ;;  %v2331_v48 = vmul.f32 0.5, %v9568_v53  ;;  %v10692_v53 = vld [vmem:[#allocation88_spill] sm:$0xff] }
 0x766   :  { %v4341_v11 = vadd.f32 %v4309_v31, %v10687_v1  ;;  %v4276_v35 = vmul.f32 %v5487_v15, %v4244_v3  ;;  %5488 = vrsqrt.f32 %v3735_v9  ;;  %vm4007_vm1 = vweird.f32 %v3735_v9 }
 0x767   :  { %v4342_v44 = vadd.f32 %v4310_v49, %v10686_v55  ;;  %5490 = vpow2.f32 %v2387_v28  ;;  %v2389_v47 = vmul.f32 1.442695, %v2329_v39  ;;  %v2393_v31 = vmul.f32 1.442695, %v2331_v48  ;;  %v10698_v39 = vld [vmem:[#allocation8_spill] sm:$0xff] }
 0x768   :  { %v2330_v46 = vmul.f32 0.5, %v9608_v26 }
 0x769   :  { %v4554_v27 = vpop.permute.xlu1 %4553  ;;  %5492 = vpow2.f32 %v2389_v47 }
 0x76a   :  { %v4599_v34 = vsel %vm4577_vm7, %v4554_v27, 0.0  ;;  %5494 = vpow2.f32 %v2385_v32  ;;  %v2391_v26 = vmul.f32 1.442695, %v2330_v46 }
 0x76b   :  { %v4631_v56 = vsel %vm4576_vm8, %v10685_v13, %v4599_v34 }
 0x76c   :  { %v4663_v38 = vsel %vm4575_vm10, %v4338_v54, %v4631_v56  ;;  %v5489_v17 = vpop.eup %5488  ;;  %v3738_v56 = vmul.f32 2.0, %v9902_v57 }
 0x76d   :  { %4695 = vst [vmem:[%s10239_s13 + $0xa8] sm:$0xff] %v4663_v38  ;;  %v4002_v23 = vmul.f32 %v5489_v17, %v3735_v9  ;;  %v5491_v42 = vpop.eup %5490  ;;  %vm4008_vm0 = vweird.f32 %v5489_v17 }
 0x76e   :  { %v4280_v8 = vmul.f32 %v5491_v42, %v9738_v12  ;;  %vm4009_vm2 = vmor %vm4007_vm1, %vm4008_vm0  ;;  %5496 = vrsqrt.f32 %v3738_v56  ;;  %vm4037_vm4 = vweird.f32 %v3738_v56 }
 0x76f   :  { %v4003_v7 = vmul.f32 %v5489_v17, %v4002_v23  ;;  %v5493_v54 = vpop.eup %5492  ;;  %5498 = vpow2.f32 %v2393_v31 }
 0x770   :  { %v4562_v25 = vpop.permute.xlu2 %4561  ;;  %v4312_v27 = vmul.f32 %v5530_v58, %v4280_v8  ;;  %v4281_v22 = vmul.f32 %v5493_v54, %v9945_v0  ;;  %v5531_v0 = vld [vmem:[%s10238_s12 + $0xe0] sm:$0xff]  ;;  %v5495_v57 = vpop.eup %5494  ;;  %v10700_v8 = vld [vmem:[#allocation51_spill] sm:$0xff]  ;;  %5500 = vpow2.f32 %v2391_v26 }
 0x771   :  { %v4603_v16 = vsel %vm4577_vm7, %v4562_v25, 0.0  ;;  %v4560_v50 = vpop.permute.xlu1 %4559  ;;  %v4004_v19 = vmul.f32 0.5, %v4003_v7  ;;  %v10693_v25 = vld [vmem:[#allocation17_spill] sm:$0xff]  ;;  %v10701_v54 = vld [vmem:[#allocation18_spill] sm:$0xff] }
 0x772   :  { %v4635_v14 = vsel %vm4576_vm8, %v9363_v6, %v4603_v16  ;;  %v4602_v18 = vsel %vm4577_vm7, %v4560_v50, 0.0  ;;  %v5529_v6 = vld [vmem:[%s10238_s12 + $0xb8] sm:$0xff]  ;;  %v4344_v34 = vadd.f32 %v4312_v27, %v10691_v60  ;;  %v4313_v49 = vmul.f32 %v5531_v0, %v4281_v22  ;;  %v5535_v22 = vld [vmem:[%s10238_s12 + $0xe8] sm:$0xff] }
 0x773   :  { %v4667_v45 = vsel %vm4575_vm10, %v4342_v44, %v4635_v14  ;;  %v4634_v36 = vsel %vm4576_vm8, %v10688_v37, %v4602_v18  ;;  %v4308_v59 = vmul.f32 %v5529_v6, %v4276_v35  ;;  %v4005_v33 = vsub.f32 1.5, %v4004_v19  ;;  %v10694_v44 = vld [vmem:[#allocation38_spill] sm:$0xff]  ;;  %v10703_v0 = vld [vmem:[#allocation7_spill] sm:$0xff] }
 0x774   :  { %4699 = vst [vmem:[%s10239_s13 + $0xc8] sm:$0xff] %v4667_v45  ;;  %v4666_v62 = vsel %vm4575_vm10, %v4341_v11, %v4634_v36  ;;  %v5497_v1 = vpop.eup %5496  ;;  %v5532_v11 = vld [vmem:[%s10238_s12 + $0xd0] sm:$0xff]  ;;  %v10695_v36 = vld [vmem:[#allocation101_spill] sm:$0xff]  ;;  %v10699_v19 = vld [vmem:[#allocation26_spill] sm:$0xff] }
 0x775   :  { %4698 = vst [vmem:[%s10239_s13 + $0xc0] sm:$0xff] %v4666_v62  ;;  %v4340_v10 = vadd.f32 %v4308_v59, %v10689_v52  ;;  %v4006_v5 = vmul.f32 %v5489_v17, %v4005_v33  ;;  %v4032_v18 = vmul.f32 %v5497_v1, %v3738_v56  ;;  %v5499_v35 = vpop.eup %5498  ;;  %v10696_v59 = vld [vmem:[#allocation25_spill] sm:$0xff]  ;;  %vm4038_vm3 = vweird.f32 %v5497_v1 }
 0x776   :  { %v4283_v37 = vmul.f32 %v5499_v35, %v9889_v4  ;;  %v5533_v4 = vld [vmem:[%s10238_s12 + $0xf0] sm:$0xff]  ;;  %vm4039_vm5 = vmor %vm4037_vm4, %vm4038_vm3  ;;  %v5501_v60 = vpop.eup %5500 }
 0x777   :  { %v4010_v13 = vsel %vm4009_vm2, %v5489_v17, %v4006_v5  ;;  %v4033_v9 = vmul.f32 %v5497_v1, %v4032_v18 }
 0x778   :  { %v4247_v51 = vmul.f32 %v10692_v53, %v4010_v13  ;;  %v10702_v13 = vld [vmem:[#allocation104_spill] sm:$0xff] }
 0x779   :  { %v4558_v40 = vpop.permute.xlu0 %4557 }
 0x77a   :  { %v4601_v41 = vsel %vm4577_vm7, %v4558_v40, 0.0  ;;  %v4279_v55 = vmul.f32 %v5495_v57, %v4247_v51 }
 0x77b   :  { %v4633_v63 = vsel %vm4576_vm8, %v10690_v2, %v4601_v41  ;;  %v5534_v41 = vld [vmem:[%s10238_s12 + $0xf8] sm:$0xff] }
 0x77c   :  { %v4665_v21 = vsel %vm4575_vm10, %v4340_v10, %v4633_v63  ;;  %v4311_v14 = vmul.f32 %v5532_v11, %v4279_v55  ;;  %v4315_v10 = vmul.f32 %v5533_v4, %v4283_v37  ;;  %v4316_v2 = vmul.f32 %v5534_v41, %v10041_v24 }
 0x77d   :  { %4697 = vst [vmem:[%s10239_s13 + $0xb8] sm:$0xff] %v4665_v21  ;;  %v4034_v63 = vmul.f32 0.5, %v4033_v9 }
 0x77e   :  { %v4343_v62 = vadd.f32 %v4311_v14, %v10695_v36  ;;  %v4347_v17 = vadd.f32 %v4315_v10, %v10697_v61  ;;  %v4348_v7 = vadd.f32 %v4316_v2, %v10698_v39 }
 0x77f   :  { %v4035_v24 = vsub.f32 1.5, %v4034_v63 }
 0x781   :  { %v4036_v27 = vmul.f32 %v5497_v1, %v4035_v24 }
 0x783   :  { %v4040_v5 = vsel %vm4039_vm5, %v5497_v1, %v4036_v27 }
 0x798   :  { %v4566_v43 = vpop.permute.xlu1 %4565 }
 0x799   :  { %v4605_v12 = vsel %vm4577_vm7, %v4566_v43, 0.0  ;;  %v4250_v43 = vmul.f32 %v10701_v54, %v4040_v5 }
 0x79a   :  { %v4637_v38 = vsel %vm4576_vm8, %v9453_v20, %v4605_v12  ;;  %v4345_v20 = vadd.f32 %v4313_v49, %v10693_v25 }
 0x79b   :  { %v4669_v30 = vsel %vm4575_vm10, %v4344_v34, %v4637_v38  ;;  %v4282_v34 = vmul.f32 %v5501_v60, %v4250_v43 }
 0x79c   :  { %4701 = vst [vmem:[%s10239_s13 + $0xd8] sm:$0xff] %v4669_v30 }
 0x79d   :  { %v4314_v12 = vmul.f32 %v5535_v22, %v4282_v34 }
 0x79f   :  { %v4346_v38 = vadd.f32 %v4314_v12, %v10702_v13 }
 0x7a0   :  { %v4568_v3 = vpop.permute.xlu2 %4567 }
 0x7a1   :  { %v4606_v15 = vsel %vm4577_vm7, %v4568_v3, 0.0 }
 0x7a2   :  { %v4638_v16 = vsel %vm4576_vm8, %v10694_v44, %v4606_v15 }
 0x7a3   :  { %v4670_v50 = vsel %vm4575_vm10, %v4345_v20, %v4638_v16 }
 0x7a4   :  { %4702 = vst [vmem:[%s10239_s13 + $0xe0] sm:$0xff] %v4670_v50 }
 0x7a9   :  { %v4564_v45 = vpop.permute.xlu0 %4563 }
 0x7aa   :  { %v4604_v6 = vsel %vm4577_vm7, %v4564_v45, 0.0 }
 0x7ab   :  { %v4636_v40 = vsel %vm4576_vm8, %v10696_v59, %v4604_v6 }
 0x7ac   :  { %v4668_v52 = vsel %vm4575_vm10, %v4343_v62, %v4636_v40 }
 0x7ad   :  { %4700 = vst [vmem:[%s10239_s13 + $0xd0] sm:$0xff] %v4668_v52 }
 0x7b0   :  { %v4574_v28 = vpop.permute.xlu2 %4573 }
 0x7b1   :  { %v4572_v21 = vpop.permute.xlu1 %4571  ;;  %v4609_v47 = vsel %vm4577_vm7, %v4574_v28, 0.0 }
 0x7b2   :  { %v4608_v23 = vsel %vm4577_vm7, %v4572_v21, 0.0  ;;  %v4641_v33 = vsel %vm4576_vm8, %v10700_v8, %v4609_v47 }
 0x7b3   :  { %v4640_v42 = vsel %vm4576_vm8, %v10699_v19, %v4608_v23  ;;  %v4673_v58 = vsel %vm4575_vm10, %v4348_v7, %v4641_v33 }
 0x7b4   :  { %v4672_v32 = vsel %vm4575_vm10, %v4347_v17, %v4640_v42  ;;  %4705 = vst [vmem:[%s10239_s13 + $0xf8] sm:$0xff] %v4673_v58 }
 0x7b5   :  { %4704 = vst [vmem:[%s10239_s13 + $0xf0] sm:$0xff] %v4672_v32 }
 0x7c9   :  { %v4570_v48 = vpop.permute.xlu0 %4569 }
 0x7ca   :  { %v4607_v30 = vsel %vm4577_vm7, %v4570_v48, 0.0 }
 0x7cb   :  { %v4639_v56 = vsel %vm4576_vm8, %v10703_v0, %v4607_v30 }
 0x7cc   :  { %v4671_v49 = vsel %vm4575_vm10, %v4346_v38, %v4639_v56 }
 0x7cd   :  { %4703 = vst [vmem:[%s10239_s13 + $0xe8] sm:$0xff] %v4671_v49 }

</bundles_post_ra>
